<compile_context>
chip_gen: v7x
topology: tpu7x:2x2x1
jax: 0.10.0
libtpu: 0.0.40
codegen_flags: <defaults>
</compile_context>

<pallas_src>
import functools

import jax
import jax.numpy as jnp
import numpy as np
from jax import lax
from jax.experimental import pallas as pl
from jax.experimental.pallas import tpu as pltpu


def _round_up(n, m):
    return ((n + m - 1) // m) * m


def _tpu_generation():
    """Best-effort TPU generation sniff ('v5e' / 'v6e' / 'v7x' / None). Heuristic only."""
    try:
        kind = jax.devices()[0].device_kind.lower()
    except Exception:
        return None
    if "7" in kind:
        return "v7x"
    if "v6" in kind:
        return "v6e"
    if "v5 lite" in kind or "v5e" in kind or "v5lite" in kind:
        return "v5e"
    return None


def _pack_gate_rows(w, H, Hp):
    """w: (4H, K) in PyTorch gate order (i,f,g,o) -> (4Hp, K), each gate zero-padded to Hp rows."""
    parts = []
    for g in range(4):
        blk = w[g * H:(g + 1) * H]
        parts.append(jnp.pad(blk, ((0, Hp - H), (0, 0))))
    return jnp.concatenate(parts, axis=0)


def _const_block_spec(shape, single_buffer):
    """Spec for a weight that is resident for the whole grid (constant index_map)."""
    index_map = lambda b, t: (0,) * len(shape)
    if single_buffer:
        # Constant index_map already skips the re-DMA; Buffered(1) also drops the wasted
        # second VMEM buffer so realistic H fits v7x's 64 MiB VMEM.
        return pl.BlockSpec(shape, index_map, pipeline_mode=pl.Buffered(1))
    return pl.BlockSpec(shape, index_map)


def _pick_batch_block(Bp, n_shards):
    # <=64 rows keeps the per-step (Bb x 4Hp) gate tensor clear of vreg spills while still
    # feeding MXU rows; on v7x prefer >=2 blocks so each TensorCore gets a shard.
    target = min(64, max(8, Bp // n_shards))
    bb = 8
    for cand in range(8, min(target, Bp) + 1, 8):
        if Bp % cand == 0:
            bb = cand
    return bb


def _pick_time_chunk(T, Bb, Hp, scratch_itemsize):
    # Tc must be a multiple of 8 (or == T) because it sits on the sublane dim of the
    # batch-major (Bb, Tc, *) blocks.  Aim: fill ~256-512 MXU rows per hoisted matmul
    # without letting the per-chunk gx+h scratch (~Tc*Bb*5*Hp) blow the VMEM budget.
    budget = 8 * 1024 * 1024
    cands = [c for c in range(1, T + 1) if T % c == 0 and (c == T or c % 8 == 0)]
    ok = [c for c in cands if c * Bb * 5 * Hp * scratch_itemsize <= budget]
    pool = ok if ok else cands
    small = [c for c in pool if c * Bb <= 512]
    return max(small) if small else min(pool)


def _lstm_encoder_kernel(x_ref, wih_ref, whh_ref, b_ref, wfc_ref, bfc_ref,
                         out_ref, hn_ref, cn_ref,
                         h_sc, c_sc, gx_sc, hbuf_sc):
    t_idx = pl.program_id(1)
    Bb, Tc, Ip = x_ref.shape
    Hp = h_sc.shape[-1]
    Op = out_ref.shape[-1]
    mm_dtype = wih_ref.dtype          # f32 or bf16; MXU accumulates in f32 either way

    @pl.when(t_idx == 0)
    def _():
        h_sc[...] = jnp.zeros_like(h_sc)
        c_sc[...] = jnp.zeros_like(c_sc)

    # ---- hoisted input projection for the whole time chunk (one big MXU matmul) ----
    # x arrives batch-major straight from HBM (no wrapper transpose); the matmul is
    # row-order agnostic, and the time-major relayout happens in VMEM via static slices.
    x_flat = x_ref[...].reshape(Bb * Tc, Ip)
    gx = jnp.dot(x_flat.astype(mm_dtype), wih_ref[...],
                 preferred_element_type=jnp.float32) + b_ref[...]
    gx_bm = gx.reshape(Bb, Tc, 4 * Hp)
    for t in range(Tc):                                  # static in-VMEM relayout (t-major)
        gx_sc[t] = gx_bm[:, t, :].astype(gx_sc.dtype)

    whh = whh_ref[...]

    def sigmoid(v):
        # 1 EUP push (tanh) instead of exp + reciprocal on the serial critical path.
        return 0.5 * jnp.tanh(0.5 * v) + 0.5

    # ---- serial recurrence: only h @ W_hh^T + gating remains per timestep ----
    def step(t, carry):
        h, c = carry
        gates = gx_sc[t].astype(jnp.float32) + jnp.dot(
            h.astype(mm_dtype), whh, preferred_element_type=jnp.float32)
        i_g = sigmoid(gates[:, 0 * Hp:1 * Hp])           # 128-aligned gate slices
        f_g = sigmoid(gates[:, 1 * Hp:2 * Hp])
        g_g = jnp.tanh(gates[:, 2 * Hp:3 * Hp])
        o_g = sigmoid(gates[:, 3 * Hp:4 * Hp])
        c = f_g * c + i_g * g_g
        h = o_g * jnp.tanh(c)
        hbuf_sc[t] = h.astype(hbuf_sc.dtype)
        return (h, c)

    h_f, c_f = lax.fori_loop(0, Tc, step, (h_sc[...], c_sc[...]), unroll=True)
    h_sc[...] = h_f
    c_sc[...] = c_f

    # ---- hoisted encoder head over the whole chunk: relu(h @ W_fc^T + b_fc) * -1 ----
    h_flat = hbuf_sc[...].reshape(Tc * Bb, Hp)
    y = jnp.dot(h_flat.astype(mm_dtype), wfc_ref[...],
                preferred_element_type=jnp.float32) + bfc_ref[...]
    y = jnp.maximum(y, 0.0) * -1.0
    y_tm = y.reshape(Tc, Bb, Op).astype(out_ref.dtype)
    for t in range(Tc):                                  # static batch-major, lane-dense store
        out_ref[:, t, :] = y_tm[t]

    # final hidden / cell state, written once at the last time chunk (t innermost+arbitrary)
    @pl.when(t_idx == pl.num_programs(1) - 1)
    def _():
        hn_ref[...] = h_f.astype(hn_ref.dtype)
        cn_ref[...] = c_f.astype(cn_ref.dtype)


def lstm_encoder_forward(x, params, *, time_chunk=None, batch_block=None,
                         weight_dtype=None, scratch_dtype=None,
                         single_buffer_weights=True):
    """x: (B, T, I) float32.  Returns (output (B,T,O), (h_n, c_n)) like the PyTorch module."""
    # TODO(synk): num_layers > 1 would stack this kernel once per layer (module default is 1).
    B, T, I = x.shape
    w_ih, w_hh, b_ih, b_hh, w_fc, b_fc = params
    H = w_hh.shape[1]
    O = w_fc.shape[0]

    gen = _tpu_generation()

    # Padded, TPU-tile-aligned sizes.
    Bp = _round_up(B, 8)          # sublane multiple
    Ip = _round_up(I, 128)        # lane multiple
    Hp = _round_up(H, 128)        # lane multiple -> 128-aligned gate blocks
    Op = _round_up(O, 128)        # lane-dense output stores

    if weight_dtype is None:
        # bf16 weights halve resident VMEM + HBM->VMEM DMA (MXU is natively bf16 with f32
        # accumulation); keep f32 when H is small and VMEM is not a constraint.
        weight_dtype = jnp.bfloat16 if H >= 512 else jnp.float32
    if scratch_dtype is None:
        # v5e has no bf16 VPU/EUP: bf16 scratch there only adds pack/unpack on the serial path.
        scratch_dtype = jnp.float32 if gen == "v5e" else weight_dtype

    n_shards = 2 if gen == "v7x" else 1       # v7x: one batch shard per TensorCore
    Bb = batch_block if batch_block is not None else _pick_batch_block(Bp, n_shards)
    assert Bp % Bb == 0 and Bb % 8 == 0

    s_item = jnp.dtype(scratch_dtype).itemsize
    Tc = time_chunk if time_chunk is not None else _pick_time_chunk(T, Bb, Hp, s_item)
    assert T % Tc == 0 and (Tc == T or Tc % 8 == 0)

    # ---- glue: pad + pack weights so the kernel sees plain (rows, K)@(K, N) matmuls ----
    wih_t = jnp.pad(_pack_gate_rows(w_ih, H, Hp), ((0, 0), (0, Ip - I))).T.astype(weight_dtype)
    whh_t = jnp.pad(_pack_gate_rows(w_hh, H, Hp), ((0, 0), (0, Hp - H))).T.astype(weight_dtype)
    bias = (b_ih + b_hh)[:, None]                                             # (4H, 1)
    bias_p = _pack_gate_rows(bias, H, Hp)[:, 0].reshape(1, 4 * Hp).astype(jnp.float32)
    wfc_t = jnp.pad(w_fc, ((0, Op - O), (0, Hp - H))).T.astype(weight_dtype)  # (Hp, Op)
    bfc_p = jnp.pad(b_fc, (0, Op - O)).reshape(1, Op).astype(jnp.float32)     # (1, Op)

    # x stays batch-major (no wrapper-side HBM transpose); just pad B and I.
    x_p = jnp.pad(x.astype(jnp.float32), ((0, Bp - B), (0, 0), (0, Ip - I)))

    grid = (Bp // Bb, T // Tc)

    # Scoped-VMEM budget from actual buffer sizes (weights counted double-buffered to stay
    # safe even if Buffered(1) is ignored by this jax build), + ~25% and 4 MiB headroom.
    def _nbytes(shape, dt):
        n = 1
        for s in shape:
            n *= s
        return n * jnp.dtype(dt).itemsize

    w_bytes = (_nbytes((Ip, 4 * Hp), weight_dtype) + _nbytes((Hp, 4 * Hp), weight_dtype)
               + _nbytes((Hp, Op), weight_dtype)
               + _nbytes((1, 4 * Hp), jnp.float32) + _nbytes((1, Op), jnp.float32))
    io_bytes = (_nbytes((Bb, Tc, Ip), jnp.float32) + _nbytes((Bb, Tc, Op), jnp.float32)
                + 2 * _nbytes((Bb, Hp), jnp.float32))
    scratch_bytes = (2 * _nbytes((Bb, Hp), jnp.float32)
                     + _nbytes((Tc, Bb, 4 * Hp), scratch_dtype)
                     + _nbytes((Tc, Bb, Hp), scratch_dtype))
    vmem_limit = int(1.25 * (2 * w_bytes + 2 * io_bytes + scratch_bytes)) + (4 << 20)
    vmem_limit = min(vmem_limit, 128 * 1024 * 1024)

    wspec = lambda shape: _const_block_spec(shape, single_buffer_weights)

    out_p, hn_p, cn_p = pl.pallas_call(
        _lstm_encoder_kernel,
        out_shape=(
            jax.ShapeDtypeStruct((Bp, T, Op), jnp.float32),
            jax.ShapeDtypeStruct((Bp, Hp), jnp.float32),
            jax.ShapeDtypeStruct((Bp, Hp), jnp.float32),
        ),
        grid_spec=pltpu.PrefetchScalarGridSpec(
            num_scalar_prefetch=0,
            grid=grid,
            in_specs=[
                pl.BlockSpec((Bb, Tc, Ip), lambda b, t: (b, t, 0)),   # x chunk (batch-major)
                wspec((Ip, 4 * Hp)),                                  # W_ih^T (packed/padded)
                wspec((Hp, 4 * Hp)),                                  # W_hh^T (packed/padded)
                wspec((1, 4 * Hp)),                                   # bias_ih + bias_hh
                wspec((Hp, Op)),                                      # W_fc^T
                wspec((1, Op)),                                       # b_fc
            ],
            out_specs=[
                pl.BlockSpec((Bb, Tc, Op), lambda b, t: (b, t, 0)),   # encoder output chunk
                pl.BlockSpec((Bb, Hp), lambda b, t: (b, 0)),          # h_n (resident over t)
                pl.BlockSpec((Bb, Hp), lambda b, t: (b, 0)),          # c_n (resident over t)
            ],
            scratch_shapes=[
                pltpu.VMEM((Bb, Hp), jnp.float32),                    # h state (persists over t)
                pltpu.VMEM((Bb, Hp), jnp.float32),                    # c state
                pltpu.VMEM((Tc, Bb, 4 * Hp), scratch_dtype),          # per-chunk x-projection gates
                pltpu.VMEM((Tc, Bb, Hp), scratch_dtype),              # per-chunk h buffer for FC head
            ],
        ),
        compiler_params=pltpu.CompilerParams(
            # batch shards independent (megacore on v7x); time is the sequential recurrence.
            dimension_semantics=("parallel", "arbitrary"),
            vmem_limit_bytes=vmem_limit,
        ),
    )(x_p, wih_t, whh_t, bias_p, wfc_t, bfc_p)

    # TODO(synk): for H <= 32, pack all 4 gates into a single 128-lane block (iota mask +
    # pltpu.roll) to cut the per-step MXU-N / EUP work ~4x instead of padding each gate to 128.
    output = out_p[:B, :, :O]                      # already batch-major: (B, T, O), no transpose
    h_n = hn_p[:B, :H][None]                       # (1, B, H) like PyTorch
    c_n = cn_p[:B, :H][None]
    return output, (h_n, c_n)


def _reference_forward(x, params):
    """Pure-JAX reference (PyTorch nn.LSTM semantics) for validation."""
    w_ih, w_hh, b_ih, b_hh, w_fc, b_fc = params
    B, T, I = x.shape
    H = w_hh.shape[1]

    def step(carry, x_t):
        h, c = carry
        gates = x_t @ w_ih.T + h @ w_hh.T + b_ih + b_hh
        i = jax.nn.sigmoid(gates[:, 0 * H:1 * H])
        f = jax.nn.sigmoid(gates[:, 1 * H:2 * H])
        g = jnp.tanh(gates[:, 2 * H:3 * H])
        o = jax.nn.sigmoid(gates[:, 3 * H:4 * H])
        c = f * c + i * g
        h = o * jnp.tanh(c)
        return (h, c), h

    h0 = jnp.zeros((B, H), jnp.float32)
    (h_n, c_n), hs = jax.lax.scan(step, (h0, h0), jnp.transpose(x, (1, 0, 2)))
    lstm_out = jnp.transpose(hs, (1, 0, 2))
    out = jnp.maximum(lstm_out @ w_fc.T + b_fc, 0.0) * -1.0
    return out, (h_n[None], c_n[None])


if __name__ == "__main__":
    # Small shapes consistent with the module's forward.
    B, T = 2, 8
    input_size, hidden_size, output_size = 4, 32, 8

    key = jax.random.PRNGKey(0)
    ks = jax.random.split(key, 7)
    k = 1.0 / np.sqrt(hidden_size)
    params = (
        jax.random.uniform(ks[0], (4 * hidden_size, input_size), jnp.float32, -k, k),   # weight_ih_l0
        jax.random.uniform(ks[1], (4 * hidden_size, hidden_size), jnp.float32, -k, k),  # weight_hh_l0
        jax.random.uniform(ks[2], (4 * hidden_size,), jnp.float32, -k, k),              # bias_ih_l0
        jax.random.uniform(ks[3], (4 * hidden_size,), jnp.float32, -k, k),              # bias_hh_l0
        jax.random.uniform(ks[4], (output_size, hidden_size), jnp.float32, -k, k),      # Enfc.weight
        jax.random.uniform(ks[5], (output_size,), jnp.float32, -k, k),                  # Enfc.bias
    )
    x = jax.random.normal(ks[6], (B, T, input_size), jnp.float32)

    def run(weight_dtype, single_buffer):
        fwd = jax.jit(functools.partial(lstm_encoder_forward,
                                        weight_dtype=weight_dtype,
                                        single_buffer_weights=single_buffer))
        return jax.block_until_ready(fwd(x, params))

    single_buffer = True
    try:
        out, (h_n, c_n) = run(jnp.float32, True)
    except Exception:
        # pl.Buffered(1) single-buffered resident weights not supported on this jax build;
        # fall back to the default double-buffered weight blocks.
        single_buffer = False
        out, (h_n, c_n) = run(jnp.float32, False)

    ref_out, (ref_h, ref_c) = _reference_forward(x, params)
    np.testing.assert_allclose(np.asarray(out), np.asarray(ref_out), atol=2e-5, rtol=2e-5)
    np.testing.assert_allclose(np.asarray(h_n), np.asarray(ref_h), atol=2e-5, rtol=2e-5)
    np.testing.assert_allclose(np.asarray(c_n), np.asarray(ref_c), atol=2e-5, rtol=2e-5)
    assert out.shape == (B, T, output_size)
    assert h_n.shape == (1, B, hidden_size) and c_n.shape == (1, B, hidden_size)

    # Exercise the bf16-weight / bf16-scratch path (the large-H / v7x VMEM configuration).
    out_b, (h_b, c_b) = run(jnp.bfloat16, single_buffer)
    np.testing.assert_allclose(np.asarray(out_b), np.asarray(ref_out), atol=5e-2, rtol=5e-2)
    np.testing.assert_allclose(np.asarray(h_b), np.asarray(ref_h), atol=5e-2, rtol=5e-2)

    print("KERNEL_OK")
</pallas_src>

<mosaic_0001>
module attributes {stable_mosaic.version = 11 : i64} {
  func.func @_lstm_encoder_kernel(%arg0: i32, %arg1: i32, %arg2: memref<8x8x128xf32, #tpu.memory_space<vmem>>, %arg3: memref<128x512xf32, #tpu.memory_space<vmem>>, %arg4: memref<128x512xf32, #tpu.memory_space<vmem>>, %arg5: memref<1x512xf32, #tpu.memory_space<vmem>>, %arg6: memref<128x128xf32, #tpu.memory_space<vmem>>, %arg7: memref<1x128xf32, #tpu.memory_space<vmem>>, %arg8: memref<8x8x128xf32, #tpu.memory_space<vmem>>, %arg9: memref<8x128xf32, #tpu.memory_space<vmem>>, %arg10: memref<8x128xf32, #tpu.memory_space<vmem>>, %arg11: memref<8x128xf32, #tpu.memory_space<vmem>>, %arg12: memref<8x128xf32, #tpu.memory_space<vmem>>, %arg13: memref<8x8x512xf32, #tpu.memory_space<vmem>>, %arg14: memref<8x8x128xf32, #tpu.memory_space<vmem>>) attributes {dimension_semantics = [#tpu.dimension_semantics<parallel>, #tpu.dimension_semantics<arbitrary>], iteration_bounds = array<i64: 1, 1>, scalar_prefetch = 0 : i64, scratch_operands = 4 : i64, tpu.core_type = #tpu.core_type<tc>, window_params = [{transform_indices = @transform_0, window_bounds = array<i64: 8, 8, 128>}, {pipeline_mode = #tpu.pipeline_mode<synchronous>, transform_indices = @transform_1, window_bounds = array<i64: 128, 512>}, {pipeline_mode = #tpu.pipeline_mode<synchronous>, transform_indices = @transform_2, window_bounds = array<i64: 128, 512>}, {pipeline_mode = #tpu.pipeline_mode<synchronous>, transform_indices = @transform_3, window_bounds = array<i64: 1, 512>}, {pipeline_mode = #tpu.pipeline_mode<synchronous>, transform_indices = @transform_4, window_bounds = array<i64: 128, 128>}, {pipeline_mode = #tpu.pipeline_mode<synchronous>, transform_indices = @transform_5, window_bounds = array<i64: 1, 128>}, {transform_indices = @transform_6, window_bounds = array<i64: 8, 8, 128>}, {transform_indices = @transform_7, window_bounds = array<i64: 8, 128>}, {transform_indices = @transform_8, window_bounds = array<i64: 8, 128>}]} {
    %c0_i32 = arith.constant 0 : i32
    %0 = arith.cmpi eq, %arg1, %c0_i32 : i32
    %1 = arith.extui %0 : i1 to i32
    %c0_i32_0 = arith.constant 0 : i32
    %2 = arith.cmpi ne, %1, %c0_i32_0 : i32
    scf.if %2 {
      %cst_183 = arith.constant 0.000000e+00 : f32
      %431 = vector.broadcast %cst_183 : f32 to vector<8x128xf32>
      %c0_184 = arith.constant 0 : index
      %c0_185 = arith.constant 0 : index
      %432 = vector.load %arg11[%c0_184, %c0_185] : memref<8x128xf32, #tpu.memory_space<vmem>>, vector<8x128xf32>
      tpu.vector_store %arg11[%c0_184, %c0_185], %431 {strides = array<i32>} : memref<8x128xf32, #tpu.memory_space<vmem>>, vector<8x128xf32>,
      %cst_186 = arith.constant 0.000000e+00 : f32
      %433 = vector.broadcast %cst_186 : f32 to vector<8x128xf32>
      %c0_187 = arith.constant 0 : index
      %c0_188 = arith.constant 0 : index
      %434 = vector.load %arg12[%c0_187, %c0_188] : memref<8x128xf32, #tpu.memory_space<vmem>>, vector<8x128xf32>
      tpu.vector_store %arg12[%c0_187, %c0_188], %433 {strides = array<i32>} : memref<8x128xf32, #tpu.memory_space<vmem>>, vector<8x128xf32>,
    } else {
    }
    %c0 = arith.constant 0 : index
    %c0_1 = arith.constant 0 : index
    %c0_2 = arith.constant 0 : index
    %3 = vector.load %arg2[%c0, %c0_1, %c0_2] : memref<8x8x128xf32, #tpu.memory_space<vmem>>, vector<8x8x128xf32>
    %4 = vector.shape_cast %3 : vector<8x8x128xf32> to vector<64x128xf32>
    %c0_3 = arith.constant 0 : index
    %c0_4 = arith.constant 0 : index
    %5 = vector.load %arg3[%c0_3, %c0_4] : memref<128x512xf32, #tpu.memory_space<vmem>>, vector<128x512xf32>
    %cst = arith.constant dense<0.000000e+00> : vector<64x512xf32>
    %6 = tpu.matmul %4, %5, %cst {dimension_numbers = #tpu.dot_dimension_numbers<[1], [0], [0], [1], [0, 0, 1, 1], [], []>} : vector<64x128xf32>, vector<128x512xf32>, vector<64x512xf32> -> vector<64x512xf32>
    %c0_5 = arith.constant 0 : index
    %c0_6 = arith.constant 0 : index
    %7 = vector.load %arg5[%c0_5, %c0_6] : memref<1x512xf32, #tpu.memory_space<vmem>>, vector<1x512xf32>
    %8 = vector.broadcast %7 : vector<1x512xf32> to vector<64x512xf32>
    %9 = arith.addf %6, %8 : vector<64x512xf32>
    %10 = vector.shape_cast %9 : vector<64x512xf32> to vector<8x8x512xf32>
    %11 = vector.extract_strided_slice %10 {offsets = [0, 0, 0], sizes = [8, 1, 512], strides = [1, 1, 1]} : vector<8x8x512xf32> to vector<8x1x512xf32>
    %12 = vector.shape_cast %11 : vector<8x1x512xf32> to vector<8x512xf32>
    %c0_7 = arith.constant 0 : index
    %c0_8 = arith.constant 0 : index
    %c0_9 = arith.constant 0 : index
    %13 = vector.load %arg13[%c0_7, %c0_8, %c0_9] : memref<8x8x512xf32, #tpu.memory_space<vmem>>, vector<1x8x512xf32>
    %14 = vector.shape_cast %13 : vector<1x8x512xf32> to vector<8x512xf32>
    %15 = vector.shape_cast %12 : vector<8x512xf32> to vector<1x8x512xf32>
    tpu.vector_store %arg13[%c0_7, %c0_8, %c0_9], %15 {strides = array<i32>} : memref<8x8x512xf32, #tpu.memory_space<vmem>>, vector<1x8x512xf32>,
    %16 = vector.extract_strided_slice %10 {offsets = [0, 1, 0], sizes = [8, 1, 512], strides = [1, 1, 1]} : vector<8x8x512xf32> to vector<8x1x512xf32>
    %17 = vector.shape_cast %16 : vector<8x1x512xf32> to vector<8x512xf32>
    %c1 = arith.constant 1 : index
    %c0_10 = arith.constant 0 : index
    %c0_11 = arith.constant 0 : index
    %18 = vector.load %arg13[%c1, %c0_10, %c0_11] : memref<8x8x512xf32, #tpu.memory_space<vmem>>, vector<1x8x512xf32>
    %19 = vector.shape_cast %18 : vector<1x8x512xf32> to vector<8x512xf32>
    %20 = vector.shape_cast %17 : vector<8x512xf32> to vector<1x8x512xf32>
    tpu.vector_store %arg13[%c1, %c0_10, %c0_11], %20 {strides = array<i32>} : memref<8x8x512xf32, #tpu.memory_space<vmem>>, vector<1x8x512xf32>,
    %21 = vector.extract_strided_slice %10 {offsets = [0, 2, 0], sizes = [8, 1, 512], strides = [1, 1, 1]} : vector<8x8x512xf32> to vector<8x1x512xf32>
    %22 = vector.shape_cast %21 : vector<8x1x512xf32> to vector<8x512xf32>
    %c2 = arith.constant 2 : index
    %c0_12 = arith.constant 0 : index
    %c0_13 = arith.constant 0 : index
    %23 = vector.load %arg13[%c2, %c0_12, %c0_13] : memref<8x8x512xf32, #tpu.memory_space<vmem>>, vector<1x8x512xf32>
    %24 = vector.shape_cast %23 : vector<1x8x512xf32> to vector<8x512xf32>
    %25 = vector.shape_cast %22 : vector<8x512xf32> to vector<1x8x512xf32>
    tpu.vector_store %arg13[%c2, %c0_12, %c0_13], %25 {strides = array<i32>} : memref<8x8x512xf32, #tpu.memory_space<vmem>>, vector<1x8x512xf32>,
    %26 = vector.extract_strided_slice %10 {offsets = [0, 3, 0], sizes = [8, 1, 512], strides = [1, 1, 1]} : vector<8x8x512xf32> to vector<8x1x512xf32>
    %27 = vector.shape_cast %26 : vector<8x1x512xf32> to vector<8x512xf32>
    %c3 = arith.constant 3 : index
    %c0_14 = arith.constant 0 : index
    %c0_15 = arith.constant 0 : index
    %28 = vector.load %arg13[%c3, %c0_14, %c0_15] : memref<8x8x512xf32, #tpu.memory_space<vmem>>, vector<1x8x512xf32>
    %29 = vector.shape_cast %28 : vector<1x8x512xf32> to vector<8x512xf32>
    %30 = vector.shape_cast %27 : vector<8x512xf32> to vector<1x8x512xf32>
    tpu.vector_store %arg13[%c3, %c0_14, %c0_15], %30 {strides = array<i32>} : memref<8x8x512xf32, #tpu.memory_space<vmem>>, vector<1x8x512xf32>,
    %31 = vector.extract_strided_slice %10 {offsets = [0, 4, 0], sizes = [8, 1, 512], strides = [1, 1, 1]} : vector<8x8x512xf32> to vector<8x1x512xf32>
    %32 = vector.shape_cast %31 : vector<8x1x512xf32> to vector<8x512xf32>
    %c4 = arith.constant 4 : index
    %c0_16 = arith.constant 0 : index
    %c0_17 = arith.constant 0 : index
    %33 = vector.load %arg13[%c4, %c0_16, %c0_17] : memref<8x8x512xf32, #tpu.memory_space<vmem>>, vector<1x8x512xf32>
    %34 = vector.shape_cast %33 : vector<1x8x512xf32> to vector<8x512xf32>
    %35 = vector.shape_cast %32 : vector<8x512xf32> to vector<1x8x512xf32>
    tpu.vector_store %arg13[%c4, %c0_16, %c0_17], %35 {strides = array<i32>} : memref<8x8x512xf32, #tpu.memory_space<vmem>>, vector<1x8x512xf32>,
    %36 = vector.extract_strided_slice %10 {offsets = [0, 5, 0], sizes = [8, 1, 512], strides = [1, 1, 1]} : vector<8x8x512xf32> to vector<8x1x512xf32>
    %37 = vector.shape_cast %36 : vector<8x1x512xf32> to vector<8x512xf32>
    %c5 = arith.constant 5 : index
    %c0_18 = arith.constant 0 : index
    %c0_19 = arith.constant 0 : index
    %38 = vector.load %arg13[%c5, %c0_18, %c0_19] : memref<8x8x512xf32, #tpu.memory_space<vmem>>, vector<1x8x512xf32>
    %39 = vector.shape_cast %38 : vector<1x8x512xf32> to vector<8x512xf32>
    %40 = vector.shape_cast %37 : vector<8x512xf32> to vector<1x8x512xf32>
    tpu.vector_store %arg13[%c5, %c0_18, %c0_19], %40 {strides = array<i32>} : memref<8x8x512xf32, #tpu.memory_space<vmem>>, vector<1x8x512xf32>,
    %41 = vector.extract_strided_slice %10 {offsets = [0, 6, 0], sizes = [8, 1, 512], strides = [1, 1, 1]} : vector<8x8x512xf32> to vector<8x1x512xf32>
    %42 = vector.shape_cast %41 : vector<8x1x512xf32> to vector<8x512xf32>
    %c6 = arith.constant 6 : index
    %c0_20 = arith.constant 0 : index
    %c0_21 = arith.constant 0 : index
    %43 = vector.load %arg13[%c6, %c0_20, %c0_21] : memref<8x8x512xf32, #tpu.memory_space<vmem>>, vector<1x8x512xf32>
    %44 = vector.shape_cast %43 : vector<1x8x512xf32> to vector<8x512xf32>
    %45 = vector.shape_cast %42 : vector<8x512xf32> to vector<1x8x512xf32>
    tpu.vector_store %arg13[%c6, %c0_20, %c0_21], %45 {strides = array<i32>} : memref<8x8x512xf32, #tpu.memory_space<vmem>>, vector<1x8x512xf32>,
    %46 = vector.extract_strided_slice %10 {offsets = [0, 7, 0], sizes = [8, 1, 512], strides = [1, 1, 1]} : vector<8x8x512xf32> to vector<8x1x512xf32>
    %47 = vector.shape_cast %46 : vector<8x1x512xf32> to vector<8x512xf32>
    %c7 = arith.constant 7 : index
    %c0_22 = arith.constant 0 : index
    %c0_23 = arith.constant 0 : index
    %48 = vector.load %arg13[%c7, %c0_22, %c0_23] : memref<8x8x512xf32, #tpu.memory_space<vmem>>, vector<1x8x512xf32>
    %49 = vector.shape_cast %48 : vector<1x8x512xf32> to vector<8x512xf32>
    %50 = vector.shape_cast %47 : vector<8x512xf32> to vector<1x8x512xf32>
    tpu.vector_store %arg13[%c7, %c0_22, %c0_23], %50 {strides = array<i32>} : memref<8x8x512xf32, #tpu.memory_space<vmem>>, vector<1x8x512xf32>,
    %c0_24 = arith.constant 0 : index
    %c0_25 = arith.constant 0 : index
    %51 = vector.load %arg4[%c0_24, %c0_25] : memref<128x512xf32, #tpu.memory_space<vmem>>, vector<128x512xf32>
    %c0_26 = arith.constant 0 : index
    %c0_27 = arith.constant 0 : index
    %52 = vector.load %arg11[%c0_26, %c0_27] : memref<8x128xf32, #tpu.memory_space<vmem>>, vector<8x128xf32>
    %c0_28 = arith.constant 0 : index
    %c0_29 = arith.constant 0 : index
    %53 = vector.load %arg12[%c0_28, %c0_29] : memref<8x128xf32, #tpu.memory_space<vmem>>, vector<8x128xf32>
    %c0_i32_30 = arith.constant 0 : i32
    %54 = arith.index_cast %c0_i32_30 : i32 to index
    %c0_31 = arith.constant 0 : index
    %c0_32 = arith.constant 0 : index
    %55 = vector.load %arg13[%54, %c0_31, %c0_32] : memref<8x8x512xf32, #tpu.memory_space<vmem>>, vector<1x8x512xf32>
    %56 = vector.shape_cast %55 : vector<1x8x512xf32> to vector<8x512xf32>
    %cst_33 = arith.constant dense<0.000000e+00> : vector<8x512xf32>
    %57 = tpu.matmul %52, %51, %cst_33 {dimension_numbers = #tpu.dot_dimension_numbers<[1], [0], [0], [1], [0, 0, 1, 1], [], []>} : vector<8x128xf32>, vector<128x512xf32>, vector<8x512xf32> -> vector<8x512xf32>
    %58 = arith.addf %56, %57 : vector<8x512xf32>
    %59 = vector.extract_strided_slice %58 {offsets = [0, 0], sizes = [8, 128], strides = [1, 1]} : vector<8x512xf32> to vector<8x128xf32>
    %cst_34 = arith.constant 5.000000e-01 : f32
    %60 = vector.broadcast %cst_34 : f32 to vector<8x128xf32>
    %61 = arith.mulf %60, %59 : vector<8x128xf32>
    %62 = math.tanh %61 : vector<8x128xf32>
    %cst_35 = arith.constant 5.000000e-01 : f32
    %63 = vector.broadcast %cst_35 : f32 to vector<8x128xf32>
    %64 = arith.mulf %63, %62 : vector<8x128xf32>
    %cst_36 = arith.constant 5.000000e-01 : f32
    %65 = vector.broadcast %cst_36 : f32 to vector<8x128xf32>
    %66 = arith.addf %64, %65 : vector<8x128xf32>
    %67 = vector.extract_strided_slice %58 {offsets = [0, 128], sizes = [8, 128], strides = [1, 1]} : vector<8x512xf32> to vector<8x128xf32>
    %cst_37 = arith.constant 5.000000e-01 : f32
    %68 = vector.broadcast %cst_37 : f32 to vector<8x128xf32>
    %69 = arith.mulf %68, %67 : vector<8x128xf32>
    %70 = math.tanh %69 : vector<8x128xf32>
    %cst_38 = arith.constant 5.000000e-01 : f32
    %71 = vector.broadcast %cst_38 : f32 to vector<8x128xf32>
    %72 = arith.mulf %71, %70 : vector<8x128xf32>
    %cst_39 = arith.constant 5.000000e-01 : f32
    %73 = vector.broadcast %cst_39 : f32 to vector<8x128xf32>
    %74 = arith.addf %72, %73 : vector<8x128xf32>
    %75 = vector.extract_strided_slice %58 {offsets = [0, 256], sizes = [8, 128], strides = [1, 1]} : vector<8x512xf32> to vector<8x128xf32>
    %76 = math.tanh %75 : vector<8x128xf32>
    %77 = vector.extract_strided_slice %58 {offsets = [0, 384], sizes = [8, 128], strides = [1, 1]} : vector<8x512xf32> to vector<8x128xf32>
    %cst_40 = arith.constant 5.000000e-01 : f32
    %78 = vector.broadcast %cst_40 : f32 to vector<8x128xf32>
    %79 = arith.mulf %78, %77 : vector<8x128xf32>
    %80 = math.tanh %79 : vector<8x128xf32>
    %cst_41 = arith.constant 5.000000e-01 : f32
    %81 = vector.broadcast %cst_41 : f32 to vector<8x128xf32>
    %82 = arith.mulf %81, %80 : vector<8x128xf32>
    %cst_42 = arith.constant 5.000000e-01 : f32
    %83 = vector.broadcast %cst_42 : f32 to vector<8x128xf32>
    %84 = arith.addf %82, %83 : vector<8x128xf32>
    %85 = arith.mulf %74, %53 : vector<8x128xf32>
    %86 = arith.mulf %66, %76 : vector<8x128xf32>
    %87 = arith.addf %85, %86 : vector<8x128xf32>
    %88 = math.tanh %87 : vector<8x128xf32>
    %89 = arith.mulf %84, %88 : vector<8x128xf32>
    %90 = arith.index_cast %c0_i32_30 : i32 to index
    %c0_43 = arith.constant 0 : index
    %c0_44 = arith.constant 0 : index
    %91 = vector.load %arg14[%90, %c0_43, %c0_44] : memref<8x8x128xf32, #tpu.memory_space<vmem>>, vector<1x8x128xf32>
    %92 = vector.shape_cast %91 : vector<1x8x128xf32> to vector<8x128xf32>
    %93 = vector.shape_cast %89 : vector<8x128xf32> to vector<1x8x128xf32>
    tpu.vector_store %arg14[%90, %c0_43, %c0_44], %93 {strides = array<i32>} : memref<8x8x128xf32, #tpu.memory_space<vmem>>, vector<1x8x128xf32>,
    %c1_i32 = arith.constant 1 : i32
    %94 = arith.index_cast %c1_i32 : i32 to index
    %c0_45 = arith.constant 0 : index
    %c0_46 = arith.constant 0 : index
    %95 = vector.load %arg13[%94, %c0_45, %c0_46] : memref<8x8x512xf32, #tpu.memory_space<vmem>>, vector<1x8x512xf32>
    %96 = vector.shape_cast %95 : vector<1x8x512xf32> to vector<8x512xf32>
    %cst_47 = arith.constant dense<0.000000e+00> : vector<8x512xf32>
    %97 = tpu.matmul %89, %51, %cst_47 {dimension_numbers = #tpu.dot_dimension_numbers<[1], [0], [0], [1], [0, 0, 1, 1], [], []>} : vector<8x128xf32>, vector<128x512xf32>, vector<8x512xf32> -> vector<8x512xf32>
    %98 = arith.addf %96, %97 : vector<8x512xf32>
    %99 = vector.extract_strided_slice %98 {offsets = [0, 0], sizes = [8, 128], strides = [1, 1]} : vector<8x512xf32> to vector<8x128xf32>
    %cst_48 = arith.constant 5.000000e-01 : f32
    %100 = vector.broadcast %cst_48 : f32 to vector<8x128xf32>
    %101 = arith.mulf %100, %99 : vector<8x128xf32>
    %102 = math.tanh %101 : vector<8x128xf32>
    %cst_49 = arith.constant 5.000000e-01 : f32
    %103 = vector.broadcast %cst_49 : f32 to vector<8x128xf32>
    %104 = arith.mulf %103, %102 : vector<8x128xf32>
    %cst_50 = arith.constant 5.000000e-01 : f32
    %105 = vector.broadcast %cst_50 : f32 to vector<8x128xf32>
    %106 = arith.addf %104, %105 : vector<8x128xf32>
    %107 = vector.extract_strided_slice %98 {offsets = [0, 128], sizes = [8, 128], strides = [1, 1]} : vector<8x512xf32> to vector<8x128xf32>
    %cst_51 = arith.constant 5.000000e-01 : f32
    %108 = vector.broadcast %cst_51 : f32 to vector<8x128xf32>
    %109 = arith.mulf %108, %107 : vector<8x128xf32>
    %110 = math.tanh %109 : vector<8x128xf32>
    %cst_52 = arith.constant 5.000000e-01 : f32
    %111 = vector.broadcast %cst_52 : f32 to vector<8x128xf32>
    %112 = arith.mulf %111, %110 : vector<8x128xf32>
    %cst_53 = arith.constant 5.000000e-01 : f32
    %113 = vector.broadcast %cst_53 : f32 to vector<8x128xf32>
    %114 = arith.addf %112, %113 : vector<8x128xf32>
    %115 = vector.extract_strided_slice %98 {offsets = [0, 256], sizes = [8, 128], strides = [1, 1]} : vector<8x512xf32> to vector<8x128xf32>
    %116 = math.tanh %115 : vector<8x128xf32>
    %117 = vector.extract_strided_slice %98 {offsets = [0, 384], sizes = [8, 128], strides = [1, 1]} : vector<8x512xf32> to vector<8x128xf32>
    %cst_54 = arith.constant 5.000000e-01 : f32
    %118 = vector.broadcast %cst_54 : f32 to vector<8x128xf32>
    %119 = arith.mulf %118, %117 : vector<8x128xf32>
    %120 = math.tanh %119 : vector<8x128xf32>
    %cst_55 = arith.constant 5.000000e-01 : f32
    %121 = vector.broadcast %cst_55 : f32 to vector<8x128xf32>
    %122 = arith.mulf %121, %120 : vector<8x128xf32>
    %cst_56 = arith.constant 5.000000e-01 : f32
    %123 = vector.broadcast %cst_56 : f32 to vector<8x128xf32>
    %124 = arith.addf %122, %123 : vector<8x128xf32>
    %125 = arith.mulf %114, %87 : vector<8x128xf32>
    %126 = arith.mulf %106, %116 : vector<8x128xf32>
    %127 = arith.addf %125, %126 : vector<8x128xf32>
    %128 = math.tanh %127 : vector<8x128xf32>
    %129 = arith.mulf %124, %128 : vector<8x128xf32>
    %130 = arith.index_cast %c1_i32 : i32 to index
    %c0_57 = arith.constant 0 : index
    %c0_58 = arith.constant 0 : index
    %131 = vector.load %arg14[%130, %c0_57, %c0_58] : memref<8x8x128xf32, #tpu.memory_space<vmem>>, vector<1x8x128xf32>
    %132 = vector.shape_cast %131 : vector<1x8x128xf32> to vector<8x128xf32>
    %133 = vector.shape_cast %129 : vector<8x128xf32> to vector<1x8x128xf32>
    tpu.vector_store %arg14[%130, %c0_57, %c0_58], %133 {strides = array<i32>} : memref<8x8x128xf32, #tpu.memory_space<vmem>>, vector<1x8x128xf32>,
    %c2_i32 = arith.constant 2 : i32
    %134 = arith.index_cast %c2_i32 : i32 to index
    %c0_59 = arith.constant 0 : index
    %c0_60 = arith.constant 0 : index
    %135 = vector.load %arg13[%134, %c0_59, %c0_60] : memref<8x8x512xf32, #tpu.memory_space<vmem>>, vector<1x8x512xf32>
    %136 = vector.shape_cast %135 : vector<1x8x512xf32> to vector<8x512xf32>
    %cst_61 = arith.constant dense<0.000000e+00> : vector<8x512xf32>
    %137 = tpu.matmul %129, %51, %cst_61 {dimension_numbers = #tpu.dot_dimension_numbers<[1], [0], [0], [1], [0, 0, 1, 1], [], []>} : vector<8x128xf32>, vector<128x512xf32>, vector<8x512xf32> -> vector<8x512xf32>
    %138 = arith.addf %136, %137 : vector<8x512xf32>
    %139 = vector.extract_strided_slice %138 {offsets = [0, 0], sizes = [8, 128], strides = [1, 1]} : vector<8x512xf32> to vector<8x128xf32>
    %cst_62 = arith.constant 5.000000e-01 : f32
    %140 = vector.broadcast %cst_62 : f32 to vector<8x128xf32>
    %141 = arith.mulf %140, %139 : vector<8x128xf32>
    %142 = math.tanh %141 : vector<8x128xf32>
    %cst_63 = arith.constant 5.000000e-01 : f32
    %143 = vector.broadcast %cst_63 : f32 to vector<8x128xf32>
    %144 = arith.mulf %143, %142 : vector<8x128xf32>
    %cst_64 = arith.constant 5.000000e-01 : f32
    %145 = vector.broadcast %cst_64 : f32 to vector<8x128xf32>
    %146 = arith.addf %144, %145 : vector<8x128xf32>
    %147 = vector.extract_strided_slice %138 {offsets = [0, 128], sizes = [8, 128], strides = [1, 1]} : vector<8x512xf32> to vector<8x128xf32>
    %cst_65 = arith.constant 5.000000e-01 : f32
    %148 = vector.broadcast %cst_65 : f32 to vector<8x128xf32>
    %149 = arith.mulf %148, %147 : vector<8x128xf32>
    %150 = math.tanh %149 : vector<8x128xf32>
    %cst_66 = arith.constant 5.000000e-01 : f32
    %151 = vector.broadcast %cst_66 : f32 to vector<8x128xf32>
    %152 = arith.mulf %151, %150 : vector<8x128xf32>
    %cst_67 = arith.constant 5.000000e-01 : f32
    %153 = vector.broadcast %cst_67 : f32 to vector<8x128xf32>
    %154 = arith.addf %152, %153 : vector<8x128xf32>
    %155 = vector.extract_strided_slice %138 {offsets = [0, 256], sizes = [8, 128], strides = [1, 1]} : vector<8x512xf32> to vector<8x128xf32>
    %156 = math.tanh %155 : vector<8x128xf32>
    %157 = vector.extract_strided_slice %138 {offsets = [0, 384], sizes = [8, 128], strides = [1, 1]} : vector<8x512xf32> to vector<8x128xf32>
    %cst_68 = arith.constant 5.000000e-01 : f32
    %158 = vector.broadcast %cst_68 : f32 to vector<8x128xf32>
    %159 = arith.mulf %158, %157 : vector<8x128xf32>
    %160 = math.tanh %159 : vector<8x128xf32>
    %cst_69 = arith.constant 5.000000e-01 : f32
    %161 = vector.broadcast %cst_69 : f32 to vector<8x128xf32>
    %162 = arith.mulf %161, %160 : vector<8x128xf32>
    %cst_70 = arith.constant 5.000000e-01 : f32
    %163 = vector.broadcast %cst_70 : f32 to vector<8x128xf32>
    %164 = arith.addf %162, %163 : vector<8x128xf32>
    %165 = arith.mulf %154, %127 : vector<8x128xf32>
    %166 = arith.mulf %146, %156 : vector<8x128xf32>
    %167 = arith.addf %165, %166 : vector<8x128xf32>
    %168 = math.tanh %167 : vector<8x128xf32>
    %169 = arith.mulf %164, %168 : vector<8x128xf32>
    %170 = arith.index_cast %c2_i32 : i32 to index
    %c0_71 = arith.constant 0 : index
    %c0_72 = arith.constant 0 : index
    %171 = vector.load %arg14[%170, %c0_71, %c0_72] : memref<8x8x128xf32, #tpu.memory_space<vmem>>, vector<1x8x128xf32>
    %172 = vector.shape_cast %171 : vector<1x8x128xf32> to vector<8x128xf32>
    %173 = vector.shape_cast %169 : vector<8x128xf32> to vector<1x8x128xf32>
    tpu.vector_store %arg14[%170, %c0_71, %c0_72], %173 {strides = array<i32>} : memref<8x8x128xf32, #tpu.memory_space<vmem>>, vector<1x8x128xf32>,
    %c3_i32 = arith.constant 3 : i32
    %174 = arith.index_cast %c3_i32 : i32 to index
    %c0_73 = arith.constant 0 : index
    %c0_74 = arith.constant 0 : index
    %175 = vector.load %arg13[%174, %c0_73, %c0_74] : memref<8x8x512xf32, #tpu.memory_space<vmem>>, vector<1x8x512xf32>
    %176 = vector.shape_cast %175 : vector<1x8x512xf32> to vector<8x512xf32>
    %cst_75 = arith.constant dense<0.000000e+00> : vector<8x512xf32>
    %177 = tpu.matmul %169, %51, %cst_75 {dimension_numbers = #tpu.dot_dimension_numbers<[1], [0], [0], [1], [0, 0, 1, 1], [], []>} : vector<8x128xf32>, vector<128x512xf32>, vector<8x512xf32> -> vector<8x512xf32>
    %178 = arith.addf %176, %177 : vector<8x512xf32>
    %179 = vector.extract_strided_slice %178 {offsets = [0, 0], sizes = [8, 128], strides = [1, 1]} : vector<8x512xf32> to vector<8x128xf32>
    %cst_76 = arith.constant 5.000000e-01 : f32
    %180 = vector.broadcast %cst_76 : f32 to vector<8x128xf32>
    %181 = arith.mulf %180, %179 : vector<8x128xf32>
    %182 = math.tanh %181 : vector<8x128xf32>
    %cst_77 = arith.constant 5.000000e-01 : f32
    %183 = vector.broadcast %cst_77 : f32 to vector<8x128xf32>
    %184 = arith.mulf %183, %182 : vector<8x128xf32>
    %cst_78 = arith.constant 5.000000e-01 : f32
    %185 = vector.broadcast %cst_78 : f32 to vector<8x128xf32>
    %186 = arith.addf %184, %185 : vector<8x128xf32>
    %187 = vector.extract_strided_slice %178 {offsets = [0, 128], sizes = [8, 128], strides = [1, 1]} : vector<8x512xf32> to vector<8x128xf32>
    %cst_79 = arith.constant 5.000000e-01 : f32
    %188 = vector.broadcast %cst_79 : f32 to vector<8x128xf32>
    %189 = arith.mulf %188, %187 : vector<8x128xf32>
    %190 = math.tanh %189 : vector<8x128xf32>
    %cst_80 = arith.constant 5.000000e-01 : f32
    %191 = vector.broadcast %cst_80 : f32 to vector<8x128xf32>
    %192 = arith.mulf %191, %190 : vector<8x128xf32>
    %cst_81 = arith.constant 5.000000e-01 : f32
    %193 = vector.broadcast %cst_81 : f32 to vector<8x128xf32>
    %194 = arith.addf %192, %193 : vector<8x128xf32>
    %195 = vector.extract_strided_slice %178 {offsets = [0, 256], sizes = [8, 128], strides = [1, 1]} : vector<8x512xf32> to vector<8x128xf32>
    %196 = math.tanh %195 : vector<8x128xf32>
    %197 = vector.extract_strided_slice %178 {offsets = [0, 384], sizes = [8, 128], strides = [1, 1]} : vector<8x512xf32> to vector<8x128xf32>
    %cst_82 = arith.constant 5.000000e-01 : f32
    %198 = vector.broadcast %cst_82 : f32 to vector<8x128xf32>
    %199 = arith.mulf %198, %197 : vector<8x128xf32>
    %200 = math.tanh %199 : vector<8x128xf32>
    %cst_83 = arith.constant 5.000000e-01 : f32
    %201 = vector.broadcast %cst_83 : f32 to vector<8x128xf32>
    %202 = arith.mulf %201, %200 : vector<8x128xf32>
    %cst_84 = arith.constant 5.000000e-01 : f32
    %203 = vector.broadcast %cst_84 : f32 to vector<8x128xf32>
    %204 = arith.addf %202, %203 : vector<8x128xf32>
    %205 = arith.mulf %194, %167 : vector<8x128xf32>
    %206 = arith.mulf %186, %196 : vector<8x128xf32>
    %207 = arith.addf %205, %206 : vector<8x128xf32>
    %208 = math.tanh %207 : vector<8x128xf32>
    %209 = arith.mulf %204, %208 : vector<8x128xf32>
    %210 = arith.index_cast %c3_i32 : i32 to index
    %c0_85 = arith.constant 0 : index
    %c0_86 = arith.constant 0 : index
    %211 = vector.load %arg14[%210, %c0_85, %c0_86] : memref<8x8x128xf32, #tpu.memory_space<vmem>>, vector<1x8x128xf32>
    %212 = vector.shape_cast %211 : vector<1x8x128xf32> to vector<8x128xf32>
    %213 = vector.shape_cast %209 : vector<8x128xf32> to vector<1x8x128xf32>
    tpu.vector_store %arg14[%210, %c0_85, %c0_86], %213 {strides = array<i32>} : memref<8x8x128xf32, #tpu.memory_space<vmem>>, vector<1x8x128xf32>,
    %c4_i32 = arith.constant 4 : i32
    %214 = arith.index_cast %c4_i32 : i32 to index
    %c0_87 = arith.constant 0 : index
    %c0_88 = arith.constant 0 : index
    %215 = vector.load %arg13[%214, %c0_87, %c0_88] : memref<8x8x512xf32, #tpu.memory_space<vmem>>, vector<1x8x512xf32>
    %216 = vector.shape_cast %215 : vector<1x8x512xf32> to vector<8x512xf32>
    %cst_89 = arith.constant dense<0.000000e+00> : vector<8x512xf32>
    %217 = tpu.matmul %209, %51, %cst_89 {dimension_numbers = #tpu.dot_dimension_numbers<[1], [0], [0], [1], [0, 0, 1, 1], [], []>} : vector<8x128xf32>, vector<128x512xf32>, vector<8x512xf32> -> vector<8x512xf32>
    %218 = arith.addf %216, %217 : vector<8x512xf32>
    %219 = vector.extract_strided_slice %218 {offsets = [0, 0], sizes = [8, 128], strides = [1, 1]} : vector<8x512xf32> to vector<8x128xf32>
    %cst_90 = arith.constant 5.000000e-01 : f32
    %220 = vector.broadcast %cst_90 : f32 to vector<8x128xf32>
    %221 = arith.mulf %220, %219 : vector<8x128xf32>
    %222 = math.tanh %221 : vector<8x128xf32>
    %cst_91 = arith.constant 5.000000e-01 : f32
    %223 = vector.broadcast %cst_91 : f32 to vector<8x128xf32>
    %224 = arith.mulf %223, %222 : vector<8x128xf32>
    %cst_92 = arith.constant 5.000000e-01 : f32
    %225 = vector.broadcast %cst_92 : f32 to vector<8x128xf32>
    %226 = arith.addf %224, %225 : vector<8x128xf32>
    %227 = vector.extract_strided_slice %218 {offsets = [0, 128], sizes = [8, 128], strides = [1, 1]} : vector<8x512xf32> to vector<8x128xf32>
    %cst_93 = arith.constant 5.000000e-01 : f32
    %228 = vector.broadcast %cst_93 : f32 to vector<8x128xf32>
    %229 = arith.mulf %228, %227 : vector<8x128xf32>
    %230 = math.tanh %229 : vector<8x128xf32>
    %cst_94 = arith.constant 5.000000e-01 : f32
    %231 = vector.broadcast %cst_94 : f32 to vector<8x128xf32>
    %232 = arith.mulf %231, %230 : vector<8x128xf32>
    %cst_95 = arith.constant 5.000000e-01 : f32
    %233 = vector.broadcast %cst_95 : f32 to vector<8x128xf32>
    %234 = arith.addf %232, %233 : vector<8x128xf32>
    %235 = vector.extract_strided_slice %218 {offsets = [0, 256], sizes = [8, 128], strides = [1, 1]} : vector<8x512xf32> to vector<8x128xf32>
    %236 = math.tanh %235 : vector<8x128xf32>
    %237 = vector.extract_strided_slice %218 {offsets = [0, 384], sizes = [8, 128], strides = [1, 1]} : vector<8x512xf32> to vector<8x128xf32>
    %cst_96 = arith.constant 5.000000e-01 : f32
    %238 = vector.broadcast %cst_96 : f32 to vector<8x128xf32>
    %239 = arith.mulf %238, %237 : vector<8x128xf32>
    %240 = math.tanh %239 : vector<8x128xf32>
    %cst_97 = arith.constant 5.000000e-01 : f32
    %241 = vector.broadcast %cst_97 : f32 to vector<8x128xf32>
    %242 = arith.mulf %241, %240 : vector<8x128xf32>
    %cst_98 = arith.constant 5.000000e-01 : f32
    %243 = vector.broadcast %cst_98 : f32 to vector<8x128xf32>
    %244 = arith.addf %242, %243 : vector<8x128xf32>
    %245 = arith.mulf %234, %207 : vector<8x128xf32>
    %246 = arith.mulf %226, %236 : vector<8x128xf32>
    %247 = arith.addf %245, %246 : vector<8x128xf32>
    %248 = math.tanh %247 : vector<8x128xf32>
    %249 = arith.mulf %244, %248 : vector<8x128xf32>
    %250 = arith.index_cast %c4_i32 : i32 to index
    %c0_99 = arith.constant 0 : index
    %c0_100 = arith.constant 0 : index
    %251 = vector.load %arg14[%250, %c0_99, %c0_100] : memref<8x8x128xf32, #tpu.memory_space<vmem>>, vector<1x8x128xf32>
    %252 = vector.shape_cast %251 : vector<1x8x128xf32> to vector<8x128xf32>
    %253 = vector.shape_cast %249 : vector<8x128xf32> to vector<1x8x128xf32>
    tpu.vector_store %arg14[%250, %c0_99, %c0_100], %253 {strides = array<i32>} : memref<8x8x128xf32, #tpu.memory_space<vmem>>, vector<1x8x128xf32>,
    %c5_i32 = arith.constant 5 : i32
    %254 = arith.index_cast %c5_i32 : i32 to index
    %c0_101 = arith.constant 0 : index
    %c0_102 = arith.constant 0 : index
    %255 = vector.load %arg13[%254, %c0_101, %c0_102] : memref<8x8x512xf32, #tpu.memory_space<vmem>>, vector<1x8x512xf32>
    %256 = vector.shape_cast %255 : vector<1x8x512xf32> to vector<8x512xf32>
    %cst_103 = arith.constant dense<0.000000e+00> : vector<8x512xf32>
    %257 = tpu.matmul %249, %51, %cst_103 {dimension_numbers = #tpu.dot_dimension_numbers<[1], [0], [0], [1], [0, 0, 1, 1], [], []>} : vector<8x128xf32>, vector<128x512xf32>, vector<8x512xf32> -> vector<8x512xf32>
    %258 = arith.addf %256, %257 : vector<8x512xf32>
    %259 = vector.extract_strided_slice %258 {offsets = [0, 0], sizes = [8, 128], strides = [1, 1]} : vector<8x512xf32> to vector<8x128xf32>
    %cst_104 = arith.constant 5.000000e-01 : f32
    %260 = vector.broadcast %cst_104 : f32 to vector<8x128xf32>
    %261 = arith.mulf %260, %259 : vector<8x128xf32>
    %262 = math.tanh %261 : vector<8x128xf32>
    %cst_105 = arith.constant 5.000000e-01 : f32
    %263 = vector.broadcast %cst_105 : f32 to vector<8x128xf32>
    %264 = arith.mulf %263, %262 : vector<8x128xf32>
    %cst_106 = arith.constant 5.000000e-01 : f32
    %265 = vector.broadcast %cst_106 : f32 to vector<8x128xf32>
    %266 = arith.addf %264, %265 : vector<8x128xf32>
    %267 = vector.extract_strided_slice %258 {offsets = [0, 128], sizes = [8, 128], strides = [1, 1]} : vector<8x512xf32> to vector<8x128xf32>
    %cst_107 = arith.constant 5.000000e-01 : f32
    %268 = vector.broadcast %cst_107 : f32 to vector<8x128xf32>
    %269 = arith.mulf %268, %267 : vector<8x128xf32>
    %270 = math.tanh %269 : vector<8x128xf32>
    %cst_108 = arith.constant 5.000000e-01 : f32
    %271 = vector.broadcast %cst_108 : f32 to vector<8x128xf32>
    %272 = arith.mulf %271, %270 : vector<8x128xf32>
    %cst_109 = arith.constant 5.000000e-01 : f32
    %273 = vector.broadcast %cst_109 : f32 to vector<8x128xf32>
    %274 = arith.addf %272, %273 : vector<8x128xf32>
    %275 = vector.extract_strided_slice %258 {offsets = [0, 256], sizes = [8, 128], strides = [1, 1]} : vector<8x512xf32> to vector<8x128xf32>
    %276 = math.tanh %275 : vector<8x128xf32>
    %277 = vector.extract_strided_slice %258 {offsets = [0, 384], sizes = [8, 128], strides = [1, 1]} : vector<8x512xf32> to vector<8x128xf32>
    %cst_110 = arith.constant 5.000000e-01 : f32
    %278 = vector.broadcast %cst_110 : f32 to vector<8x128xf32>
    %279 = arith.mulf %278, %277 : vector<8x128xf32>
    %280 = math.tanh %279 : vector<8x128xf32>
    %cst_111 = arith.constant 5.000000e-01 : f32
    %281 = vector.broadcast %cst_111 : f32 to vector<8x128xf32>
    %282 = arith.mulf %281, %280 : vector<8x128xf32>
    %cst_112 = arith.constant 5.000000e-01 : f32
    %283 = vector.broadcast %cst_112 : f32 to vector<8x128xf32>
    %284 = arith.addf %282, %283 : vector<8x128xf32>
    %285 = arith.mulf %274, %247 : vector<8x128xf32>
    %286 = arith.mulf %266, %276 : vector<8x128xf32>
    %287 = arith.addf %285, %286 : vector<8x128xf32>
    %288 = math.tanh %287 : vector<8x128xf32>
    %289 = arith.mulf %284, %288 : vector<8x128xf32>
    %290 = arith.index_cast %c5_i32 : i32 to index
    %c0_113 = arith.constant 0 : index
    %c0_114 = arith.constant 0 : index
    %291 = vector.load %arg14[%290, %c0_113, %c0_114] : memref<8x8x128xf32, #tpu.memory_space<vmem>>, vector<1x8x128xf32>
    %292 = vector.shape_cast %291 : vector<1x8x128xf32> to vector<8x128xf32>
    %293 = vector.shape_cast %289 : vector<8x128xf32> to vector<1x8x128xf32>
    tpu.vector_store %arg14[%290, %c0_113, %c0_114], %293 {strides = array<i32>} : memref<8x8x128xf32, #tpu.memory_space<vmem>>, vector<1x8x128xf32>,
    %c6_i32 = arith.constant 6 : i32
    %294 = arith.index_cast %c6_i32 : i32 to index
    %c0_115 = arith.constant 0 : index
    %c0_116 = arith.constant 0 : index
    %295 = vector.load %arg13[%294, %c0_115, %c0_116] : memref<8x8x512xf32, #tpu.memory_space<vmem>>, vector<1x8x512xf32>
    %296 = vector.shape_cast %295 : vector<1x8x512xf32> to vector<8x512xf32>
    %cst_117 = arith.constant dense<0.000000e+00> : vector<8x512xf32>
    %297 = tpu.matmul %289, %51, %cst_117 {dimension_numbers = #tpu.dot_dimension_numbers<[1], [0], [0], [1], [0, 0, 1, 1], [], []>} : vector<8x128xf32>, vector<128x512xf32>, vector<8x512xf32> -> vector<8x512xf32>
    %298 = arith.addf %296, %297 : vector<8x512xf32>
    %299 = vector.extract_strided_slice %298 {offsets = [0, 0], sizes = [8, 128], strides = [1, 1]} : vector<8x512xf32> to vector<8x128xf32>
    %cst_118 = arith.constant 5.000000e-01 : f32
    %300 = vector.broadcast %cst_118 : f32 to vector<8x128xf32>
    %301 = arith.mulf %300, %299 : vector<8x128xf32>
    %302 = math.tanh %301 : vector<8x128xf32>
    %cst_119 = arith.constant 5.000000e-01 : f32
    %303 = vector.broadcast %cst_119 : f32 to vector<8x128xf32>
    %304 = arith.mulf %303, %302 : vector<8x128xf32>
    %cst_120 = arith.constant 5.000000e-01 : f32
    %305 = vector.broadcast %cst_120 : f32 to vector<8x128xf32>
    %306 = arith.addf %304, %305 : vector<8x128xf32>
    %307 = vector.extract_strided_slice %298 {offsets = [0, 128], sizes = [8, 128], strides = [1, 1]} : vector<8x512xf32> to vector<8x128xf32>
    %cst_121 = arith.constant 5.000000e-01 : f32
    %308 = vector.broadcast %cst_121 : f32 to vector<8x128xf32>
    %309 = arith.mulf %308, %307 : vector<8x128xf32>
    %310 = math.tanh %309 : vector<8x128xf32>
    %cst_122 = arith.constant 5.000000e-01 : f32
    %311 = vector.broadcast %cst_122 : f32 to vector<8x128xf32>
    %312 = arith.mulf %311, %310 : vector<8x128xf32>
    %cst_123 = arith.constant 5.000000e-01 : f32
    %313 = vector.broadcast %cst_123 : f32 to vector<8x128xf32>
    %314 = arith.addf %312, %313 : vector<8x128xf32>
    %315 = vector.extract_strided_slice %298 {offsets = [0, 256], sizes = [8, 128], strides = [1, 1]} : vector<8x512xf32> to vector<8x128xf32>
    %316 = math.tanh %315 : vector<8x128xf32>
    %317 = vector.extract_strided_slice %298 {offsets = [0, 384], sizes = [8, 128], strides = [1, 1]} : vector<8x512xf32> to vector<8x128xf32>
    %cst_124 = arith.constant 5.000000e-01 : f32
    %318 = vector.broadcast %cst_124 : f32 to vector<8x128xf32>
    %319 = arith.mulf %318, %317 : vector<8x128xf32>
    %320 = math.tanh %319 : vector<8x128xf32>
    %cst_125 = arith.constant 5.000000e-01 : f32
    %321 = vector.broadcast %cst_125 : f32 to vector<8x128xf32>
    %322 = arith.mulf %321, %320 : vector<8x128xf32>
    %cst_126 = arith.constant 5.000000e-01 : f32
    %323 = vector.broadcast %cst_126 : f32 to vector<8x128xf32>
    %324 = arith.addf %322, %323 : vector<8x128xf32>
    %325 = arith.mulf %314, %287 : vector<8x128xf32>
    %326 = arith.mulf %306, %316 : vector<8x128xf32>
    %327 = arith.addf %325, %326 : vector<8x128xf32>
    %328 = math.tanh %327 : vector<8x128xf32>
    %329 = arith.mulf %324, %328 : vector<8x128xf32>
    %330 = arith.index_cast %c6_i32 : i32 to index
    %c0_127 = arith.constant 0 : index
    %c0_128 = arith.constant 0 : index
    %331 = vector.load %arg14[%330, %c0_127, %c0_128] : memref<8x8x128xf32, #tpu.memory_space<vmem>>, vector<1x8x128xf32>
    %332 = vector.shape_cast %331 : vector<1x8x128xf32> to vector<8x128xf32>
    %333 = vector.shape_cast %329 : vector<8x128xf32> to vector<1x8x128xf32>
    tpu.vector_store %arg14[%330, %c0_127, %c0_128], %333 {strides = array<i32>} : memref<8x8x128xf32, #tpu.memory_space<vmem>>, vector<1x8x128xf32>,
    %c7_i32 = arith.constant 7 : i32
    %334 = arith.index_cast %c7_i32 : i32 to index
    %c0_129 = arith.constant 0 : index
    %c0_130 = arith.constant 0 : index
    %335 = vector.load %arg13[%334, %c0_129, %c0_130] : memref<8x8x512xf32, #tpu.memory_space<vmem>>, vector<1x8x512xf32>
    %336 = vector.shape_cast %335 : vector<1x8x512xf32> to vector<8x512xf32>
    %cst_131 = arith.constant dense<0.000000e+00> : vector<8x512xf32>
    %337 = tpu.matmul %329, %51, %cst_131 {dimension_numbers = #tpu.dot_dimension_numbers<[1], [0], [0], [1], [0, 0, 1, 1], [], []>} : vector<8x128xf32>, vector<128x512xf32>, vector<8x512xf32> -> vector<8x512xf32>
    %338 = arith.addf %336, %337 : vector<8x512xf32>
    %339 = vector.extract_strided_slice %338 {offsets = [0, 0], sizes = [8, 128], strides = [1, 1]} : vector<8x512xf32> to vector<8x128xf32>
    %cst_132 = arith.constant 5.000000e-01 : f32
    %340 = vector.broadcast %cst_132 : f32 to vector<8x128xf32>
    %341 = arith.mulf %340, %339 : vector<8x128xf32>
    %342 = math.tanh %341 : vector<8x128xf32>
    %cst_133 = arith.constant 5.000000e-01 : f32
    %343 = vector.broadcast %cst_133 : f32 to vector<8x128xf32>
    %344 = arith.mulf %343, %342 : vector<8x128xf32>
    %cst_134 = arith.constant 5.000000e-01 : f32
    %345 = vector.broadcast %cst_134 : f32 to vector<8x128xf32>
    %346 = arith.addf %344, %345 : vector<8x128xf32>
    %347 = vector.extract_strided_slice %338 {offsets = [0, 128], sizes = [8, 128], strides = [1, 1]} : vector<8x512xf32> to vector<8x128xf32>
    %cst_135 = arith.constant 5.000000e-01 : f32
    %348 = vector.broadcast %cst_135 : f32 to vector<8x128xf32>
    %349 = arith.mulf %348, %347 : vector<8x128xf32>
    %350 = math.tanh %349 : vector<8x128xf32>
    %cst_136 = arith.constant 5.000000e-01 : f32
    %351 = vector.broadcast %cst_136 : f32 to vector<8x128xf32>
    %352 = arith.mulf %351, %350 : vector<8x128xf32>
    %cst_137 = arith.constant 5.000000e-01 : f32
    %353 = vector.broadcast %cst_137 : f32 to vector<8x128xf32>
    %354 = arith.addf %352, %353 : vector<8x128xf32>
    %355 = vector.extract_strided_slice %338 {offsets = [0, 256], sizes = [8, 128], strides = [1, 1]} : vector<8x512xf32> to vector<8x128xf32>
    %356 = math.tanh %355 : vector<8x128xf32>
    %357 = vector.extract_strided_slice %338 {offsets = [0, 384], sizes = [8, 128], strides = [1, 1]} : vector<8x512xf32> to vector<8x128xf32>
    %cst_138 = arith.constant 5.000000e-01 : f32
    %358 = vector.broadcast %cst_138 : f32 to vector<8x128xf32>
    %359 = arith.mulf %358, %357 : vector<8x128xf32>
    %360 = math.tanh %359 : vector<8x128xf32>
    %cst_139 = arith.constant 5.000000e-01 : f32
    %361 = vector.broadcast %cst_139 : f32 to vector<8x128xf32>
    %362 = arith.mulf %361, %360 : vector<8x128xf32>
    %cst_140 = arith.constant 5.000000e-01 : f32
    %363 = vector.broadcast %cst_140 : f32 to vector<8x128xf32>
    %364 = arith.addf %362, %363 : vector<8x128xf32>
    %365 = arith.mulf %354, %327 : vector<8x128xf32>
    %366 = arith.mulf %346, %356 : vector<8x128xf32>
    %367 = arith.addf %365, %366 : vector<8x128xf32>
    %368 = math.tanh %367 : vector<8x128xf32>
    %369 = arith.mulf %364, %368 : vector<8x128xf32>
    %370 = arith.index_cast %c7_i32 : i32 to index
    %c0_141 = arith.constant 0 : index
    %c0_142 = arith.constant 0 : index
    %371 = vector.load %arg14[%370, %c0_141, %c0_142] : memref<8x8x128xf32, #tpu.memory_space<vmem>>, vector<1x8x128xf32>
    %372 = vector.shape_cast %371 : vector<1x8x128xf32> to vector<8x128xf32>
    %373 = vector.shape_cast %369 : vector<8x128xf32> to vector<1x8x128xf32>
    tpu.vector_store %arg14[%370, %c0_141, %c0_142], %373 {strides = array<i32>} : memref<8x8x128xf32, #tpu.memory_space<vmem>>, vector<1x8x128xf32>,
    %c8_i32 = arith.constant 8 : i32
    %c0_143 = arith.constant 0 : index
    %c0_144 = arith.constant 0 : index
    %374 = vector.load %arg11[%c0_143, %c0_144] : memref<8x128xf32, #tpu.memory_space<vmem>>, vector<8x128xf32>
    tpu.vector_store %arg11[%c0_143, %c0_144], %369 {strides = array<i32>} : memref<8x128xf32, #tpu.memory_space<vmem>>, vector<8x128xf32>,
    %c0_145 = arith.constant 0 : index
    %c0_146 = arith.constant 0 : index
    %375 = vector.load %arg12[%c0_145, %c0_146] : memref<8x128xf32, #tpu.memory_space<vmem>>, vector<8x128xf32>
    tpu.vector_store %arg12[%c0_145, %c0_146], %367 {strides = array<i32>} : memref<8x128xf32, #tpu.memory_space<vmem>>, vector<8x128xf32>,
    %c0_147 = arith.constant 0 : index
    %c0_148 = arith.constant 0 : index
    %c0_149 = arith.constant 0 : index
    %376 = vector.load %arg14[%c0_147, %c0_148, %c0_149] : memref<8x8x128xf32, #tpu.memory_space<vmem>>, vector<8x8x128xf32>
    %377 = vector.shape_cast %376 : vector<8x8x128xf32> to vector<64x128xf32>
    %c0_150 = arith.constant 0 : index
    %c0_151 = arith.constant 0 : index
    %378 = vector.load %arg6[%c0_150, %c0_151] : memref<128x128xf32, #tpu.memory_space<vmem>>, vector<128x128xf32>
    %cst_152 = arith.constant dense<0.000000e+00> : vector<64x128xf32>
    %379 = tpu.matmul %377, %378, %cst_152 {dimension_numbers = #tpu.dot_dimension_numbers<[1], [0], [0], [1], [0, 0, 1, 1], [], []>} : vector<64x128xf32>, vector<128x128xf32>, vector<64x128xf32> -> vector<64x128xf32>
    %c0_153 = arith.constant 0 : index
    %c0_154 = arith.constant 0 : index
    %380 = vector.load %arg7[%c0_153, %c0_154] : memref<1x128xf32, #tpu.memory_space<vmem>>, vector<1x128xf32>
    %381 = vector.broadcast %380 : vector<1x128xf32> to vector<64x128xf32>
    %382 = arith.addf %379, %381 : vector<64x128xf32>
    %cst_155 = arith.constant 0.000000e+00 : f32
    %383 = vector.broadcast %cst_155 : f32 to vector<64x128xf32>
    %384 = arith.maximumf %382, %383 : vector<64x128xf32>
    %cst_156 = arith.constant -1.000000e+00 : f32
    %385 = vector.broadcast %cst_156 : f32 to vector<64x128xf32>
    %386 = arith.mulf %384, %385 : vector<64x128xf32>
    %387 = vector.shape_cast %386 : vector<64x128xf32> to vector<8x8x128xf32>
    %388 = vector.extract_strided_slice %387 {offsets = [0, 0, 0], sizes = [1, 8, 128], strides = [1, 1, 1]} : vector<8x8x128xf32> to vector<1x8x128xf32>
    %389 = vector.shape_cast %388 : vector<1x8x128xf32> to vector<8x128xf32>
    %c0_157 = arith.constant 0 : index
    %c0_158 = arith.constant 0 : index
    %c0_159 = arith.constant 0 : index
    %390 = vector.load %arg8[%c0_157, %c0_158, %c0_159] : memref<8x8x128xf32, #tpu.memory_space<vmem>>, vector<8x1x128xf32>
    %391 = vector.shape_cast %390 : vector<8x1x128xf32> to vector<8x128xf32>
    %392 = vector.shape_cast %389 : vector<8x128xf32> to vector<8x1x128xf32>
    tpu.vector_store %arg8[%c0_157, %c0_158, %c0_159], %392 {strides = array<i32>} : memref<8x8x128xf32, #tpu.memory_space<vmem>>, vector<8x1x128xf32>,
    %393 = vector.extract_strided_slice %387 {offsets = [1, 0, 0], sizes = [1, 8, 128], strides = [1, 1, 1]} : vector<8x8x128xf32> to vector<1x8x128xf32>
    %394 = vector.shape_cast %393 : vector<1x8x128xf32> to vector<8x128xf32>
    %c0_160 = arith.constant 0 : index
    %c1_161 = arith.constant 1 : index
    %c0_162 = arith.constant 0 : index
    %395 = vector.load %arg8[%c0_160, %c1_161, %c0_162] : memref<8x8x128xf32, #tpu.memory_space<vmem>>, vector<8x1x128xf32>
    %396 = vector.shape_cast %395 : vector<8x1x128xf32> to vector<8x128xf32>
    %397 = vector.shape_cast %394 : vector<8x128xf32> to vector<8x1x128xf32>
    tpu.vector_store %arg8[%c0_160, %c1_161, %c0_162], %397 {strides = array<i32>} : memref<8x8x128xf32, #tpu.memory_space<vmem>>, vector<8x1x128xf32>,
    %398 = vector.extract_strided_slice %387 {offsets = [2, 0, 0], sizes = [1, 8, 128], strides = [1, 1, 1]} : vector<8x8x128xf32> to vector<1x8x128xf32>
    %399 = vector.shape_cast %398 : vector<1x8x128xf32> to vector<8x128xf32>
    %c0_163 = arith.constant 0 : index
    %c2_164 = arith.constant 2 : index
    %c0_165 = arith.constant 0 : index
    %400 = vector.load %arg8[%c0_163, %c2_164, %c0_165] : memref<8x8x128xf32, #tpu.memory_space<vmem>>, vector<8x1x128xf32>
    %401 = vector.shape_cast %400 : vector<8x1x128xf32> to vector<8x128xf32>
    %402 = vector.shape_cast %399 : vector<8x128xf32> to vector<8x1x128xf32>
    tpu.vector_store %arg8[%c0_163, %c2_164, %c0_165], %402 {strides = array<i32>} : memref<8x8x128xf32, #tpu.memory_space<vmem>>, vector<8x1x128xf32>,
    %403 = vector.extract_strided_slice %387 {offsets = [3, 0, 0], sizes = [1, 8, 128], strides = [1, 1, 1]} : vector<8x8x128xf32> to vector<1x8x128xf32>
    %404 = vector.shape_cast %403 : vector<1x8x128xf32> to vector<8x128xf32>
    %c0_166 = arith.constant 0 : index
    %c3_167 = arith.constant 3 : index
    %c0_168 = arith.constant 0 : index
    %405 = vector.load %arg8[%c0_166, %c3_167, %c0_168] : memref<8x8x128xf32, #tpu.memory_space<vmem>>, vector<8x1x128xf32>
    %406 = vector.shape_cast %405 : vector<8x1x128xf32> to vector<8x128xf32>
    %407 = vector.shape_cast %404 : vector<8x128xf32> to vector<8x1x128xf32>
    tpu.vector_store %arg8[%c0_166, %c3_167, %c0_168], %407 {strides = array<i32>} : memref<8x8x128xf32, #tpu.memory_space<vmem>>, vector<8x1x128xf32>,
    %408 = vector.extract_strided_slice %387 {offsets = [4, 0, 0], sizes = [1, 8, 128], strides = [1, 1, 1]} : vector<8x8x128xf32> to vector<1x8x128xf32>
    %409 = vector.shape_cast %408 : vector<1x8x128xf32> to vector<8x128xf32>
    %c0_169 = arith.constant 0 : index
    %c4_170 = arith.constant 4 : index
    %c0_171 = arith.constant 0 : index
    %410 = vector.load %arg8[%c0_169, %c4_170, %c0_171] : memref<8x8x128xf32, #tpu.memory_space<vmem>>, vector<8x1x128xf32>
    %411 = vector.shape_cast %410 : vector<8x1x128xf32> to vector<8x128xf32>
    %412 = vector.shape_cast %409 : vector<8x128xf32> to vector<8x1x128xf32>
    tpu.vector_store %arg8[%c0_169, %c4_170, %c0_171], %412 {strides = array<i32>} : memref<8x8x128xf32, #tpu.memory_space<vmem>>, vector<8x1x128xf32>,
    %413 = vector.extract_strided_slice %387 {offsets = [5, 0, 0], sizes = [1, 8, 128], strides = [1, 1, 1]} : vector<8x8x128xf32> to vector<1x8x128xf32>
    %414 = vector.shape_cast %413 : vector<1x8x128xf32> to vector<8x128xf32>
    %c0_172 = arith.constant 0 : index
    %c5_173 = arith.constant 5 : index
    %c0_174 = arith.constant 0 : index
    %415 = vector.load %arg8[%c0_172, %c5_173, %c0_174] : memref<8x8x128xf32, #tpu.memory_space<vmem>>, vector<8x1x128xf32>
    %416 = vector.shape_cast %415 : vector<8x1x128xf32> to vector<8x128xf32>
    %417 = vector.shape_cast %414 : vector<8x128xf32> to vector<8x1x128xf32>
    tpu.vector_store %arg8[%c0_172, %c5_173, %c0_174], %417 {strides = array<i32>} : memref<8x8x128xf32, #tpu.memory_space<vmem>>, vector<8x1x128xf32>,
    %418 = vector.extract_strided_slice %387 {offsets = [6, 0, 0], sizes = [1, 8, 128], strides = [1, 1, 1]} : vector<8x8x128xf32> to vector<1x8x128xf32>
    %419 = vector.shape_cast %418 : vector<1x8x128xf32> to vector<8x128xf32>
    %c0_175 = arith.constant 0 : index
    %c6_176 = arith.constant 6 : index
    %c0_177 = arith.constant 0 : index
    %420 = vector.load %arg8[%c0_175, %c6_176, %c0_177] : memref<8x8x128xf32, #tpu.memory_space<vmem>>, vector<8x1x128xf32>
    %421 = vector.shape_cast %420 : vector<8x1x128xf32> to vector<8x128xf32>
    %422 = vector.shape_cast %419 : vector<8x128xf32> to vector<8x1x128xf32>
    tpu.vector_store %arg8[%c0_175, %c6_176, %c0_177], %422 {strides = array<i32>} : memref<8x8x128xf32, #tpu.memory_space<vmem>>, vector<8x1x128xf32>,
    %423 = vector.extract_strided_slice %387 {offsets = [7, 0, 0], sizes = [1, 8, 128], strides = [1, 1, 1]} : vector<8x8x128xf32> to vector<1x8x128xf32>
    %424 = vector.shape_cast %423 : vector<1x8x128xf32> to vector<8x128xf32>
    %c0_178 = arith.constant 0 : index
    %c7_179 = arith.constant 7 : index
    %c0_180 = arith.constant 0 : index
    %425 = vector.load %arg8[%c0_178, %c7_179, %c0_180] : memref<8x8x128xf32, #tpu.memory_space<vmem>>, vector<8x1x128xf32>
    %426 = vector.shape_cast %425 : vector<8x1x128xf32> to vector<8x128xf32>
    %427 = vector.shape_cast %424 : vector<8x128xf32> to vector<8x1x128xf32>
    tpu.vector_store %arg8[%c0_178, %c7_179, %c0_180], %427 {strides = array<i32>} : memref<8x8x128xf32, #tpu.memory_space<vmem>>, vector<8x1x128xf32>,
    %c0_i32_181 = arith.constant 0 : i32
    %428 = arith.cmpi eq, %arg1, %c0_i32_181 : i32
    %429 = arith.extui %428 : i1 to i32
    %c0_i32_182 = arith.constant 0 : i32
    %430 = arith.cmpi ne, %429, %c0_i32_182 : i32
    scf.if %430 {
      %c0_183 = arith.constant 0 : index
      %c0_184 = arith.constant 0 : index
      %431 = vector.load %arg9[%c0_183, %c0_184] : memref<8x128xf32, #tpu.memory_space<vmem>>, vector<8x128xf32>
      tpu.vector_store %arg9[%c0_183, %c0_184], %369 {strides = array<i32>} : memref<8x128xf32, #tpu.memory_space<vmem>>, vector<8x128xf32>,
      %c0_185 = arith.constant 0 : index
      %c0_186 = arith.constant 0 : index
      %432 = vector.load %arg10[%c0_185, %c0_186] : memref<8x128xf32, #tpu.memory_space<vmem>>, vector<8x128xf32>
      tpu.vector_store %arg10[%c0_185, %c0_186], %367 {strides = array<i32>} : memref<8x128xf32, #tpu.memory_space<vmem>>, vector<8x128xf32>,
    } else {
    }
    return
  }
  func.func @transform_0(%arg0: i32, %arg1: i32) -> (i32, i32, i32) {
    %c0_i32 = arith.constant 0 : i32
    %c0_i32_0 = arith.constant 0 : i32
    return %arg0, %arg1, %c0_i32 : i32, i32, i32
  }
  func.func @transform_1(%arg0: i32, %arg1: i32) -> (i32, i32) {
    %c0_i32 = arith.constant 0 : i32
    %c0_i32_0 = arith.constant 0 : i32
    %c0_i32_1 = arith.constant 0 : i32
    return %c0_i32, %c0_i32_0 : i32, i32
  }
  func.func @transform_2(%arg0: i32, %arg1: i32) -> (i32, i32) {
    %c0_i32 = arith.constant 0 : i32
    %c0_i32_0 = arith.constant 0 : i32
    %c0_i32_1 = arith.constant 0 : i32
    return %c0_i32, %c0_i32_0 : i32, i32
  }
  func.func @transform_3(%arg0: i32, %arg1: i32) -> (i32, i32) {
    %c0_i32 = arith.constant 0 : i32
    %c0_i32_0 = arith.constant 0 : i32
    %c0_i32_1 = arith.constant 0 : i32
    return %c0_i32, %c0_i32_0 : i32, i32
  }
  func.func @transform_4(%arg0: i32, %arg1: i32) -> (i32, i32) {
    %c0_i32 = arith.constant 0 : i32
    %c0_i32_0 = arith.constant 0 : i32
    %c0_i32_1 = arith.constant 0 : i32
    return %c0_i32, %c0_i32_0 : i32, i32
  }
  func.func @transform_5(%arg0: i32, %arg1: i32) -> (i32, i32) {
    %c0_i32 = arith.constant 0 : i32
    %c0_i32_0 = arith.constant 0 : i32
    %c0_i32_1 = arith.constant 0 : i32
    return %c0_i32, %c0_i32_0 : i32, i32
  }
  func.func @transform_6(%arg0: i32, %arg1: i32) -> (i32, i32, i32) {
    %c0_i32 = arith.constant 0 : i32
    %c0_i32_0 = arith.constant 0 : i32
    return %arg0, %arg1, %c0_i32 : i32, i32, i32
  }
  func.func @transform_7(%arg0: i32, %arg1: i32) -> (i32, i32) {
    %c0_i32 = arith.constant 0 : i32
    %c0_i32_0 = arith.constant 0 : i32
    return %arg0, %c0_i32 : i32, i32
  }
  func.func @transform_8(%arg0: i32, %arg1: i32) -> (i32, i32) {
    %c0_i32 = arith.constant 0 : i32
    %c0_i32_0 = arith.constant 0 : i32
    return %arg0, %c0_i32 : i32, i32
  }
}

module attributes {stable_mosaic.version = 11 : i64} {
  func.func @_lstm_encoder_kernel(%arg0: i32, %arg1: i32, %arg2: memref<8x8x128xf32, #tpu.memory_space<vmem>>, %arg3: memref<128x512xf32, #tpu.memory_space<vmem>>, %arg4: memref<128x512xf32, #tpu.memory_space<vmem>>, %arg5: memref<1x512xf32, #tpu.memory_space<vmem>>, %arg6: memref<128x128xf32, #tpu.memory_space<vmem>>, %arg7: memref<1x128xf32, #tpu.memory_space<vmem>>, %arg8: memref<8x8x128xf32, #tpu.memory_space<vmem>>, %arg9: memref<8x128xf32, #tpu.memory_space<vmem>>, %arg10: memref<8x128xf32, #tpu.memory_space<vmem>>, %arg11: memref<8x128xf32, #tpu.memory_space<vmem>>, %arg12: memref<8x128xf32, #tpu.memory_space<vmem>>, %arg13: memref<8x8x512xf32, #tpu.memory_space<vmem>>, %arg14: memref<8x8x128xf32, #tpu.memory_space<vmem>>) attributes {dimension_semantics = [#tpu.dimension_semantics<parallel>, #tpu.dimension_semantics<arbitrary>], iteration_bounds = array<i64: 1, 1>, scalar_prefetch = 0 : i64, scratch_operands = 4 : i64, tpu.core_type = #tpu.core_type<tc>, window_params = [{transform_indices = @transform_0, window_bounds = array<i64: 8, 8, 128>}, {pipeline_mode = #tpu.pipeline_mode<synchronous>, transform_indices = @transform_1, window_bounds = array<i64: 128, 512>}, {pipeline_mode = #tpu.pipeline_mode<synchronous>, transform_indices = @transform_2, window_bounds = array<i64: 128, 512>}, {pipeline_mode = #tpu.pipeline_mode<synchronous>, transform_indices = @transform_3, window_bounds = array<i64: 1, 512>}, {pipeline_mode = #tpu.pipeline_mode<synchronous>, transform_indices = @transform_4, window_bounds = array<i64: 128, 128>}, {pipeline_mode = #tpu.pipeline_mode<synchronous>, transform_indices = @transform_5, window_bounds = array<i64: 1, 128>}, {transform_indices = @transform_6, window_bounds = array<i64: 8, 8, 128>}, {transform_indices = @transform_7, window_bounds = array<i64: 8, 128>}, {transform_indices = @transform_8, window_bounds = array<i64: 8, 128>}]} {
    %c0_i32 = arith.constant 0 : i32
    %0 = arith.cmpi eq, %arg1, %c0_i32 : i32
    %1 = arith.extui %0 : i1 to i32
    %c0_i32_0 = arith.constant 0 : i32
    %2 = arith.cmpi ne, %1, %c0_i32_0 : i32
    scf.if %2 {
      %cst_183 = arith.constant 0.000000e+00 : f32
      %431 = vector.broadcast %cst_183 : f32 to vector<8x128xf32>
      %c0_184 = arith.constant 0 : index
      %c0_185 = arith.constant 0 : index
      %432 = vector.load %arg11[%c0_184, %c0_185] : memref<8x128xf32, #tpu.memory_space<vmem>>, vector<8x128xf32>
      tpu.vector_store %arg11[%c0_184, %c0_185], %431 {strides = array<i32>} : memref<8x128xf32, #tpu.memory_space<vmem>>, vector<8x128xf32>,
      %cst_186 = arith.constant 0.000000e+00 : f32
      %433 = vector.broadcast %cst_186 : f32 to vector<8x128xf32>
      %c0_187 = arith.constant 0 : index
      %c0_188 = arith.constant 0 : index
      %434 = vector.load %arg12[%c0_187, %c0_188] : memref<8x128xf32, #tpu.memory_space<vmem>>, vector<8x128xf32>
      tpu.vector_store %arg12[%c0_187, %c0_188], %433 {strides = array<i32>} : memref<8x128xf32, #tpu.memory_space<vmem>>, vector<8x128xf32>,
    } else {
    }
    %c0 = arith.constant 0 : index
    %c0_1 = arith.constant 0 : index
    %c0_2 = arith.constant 0 : index
    %3 = vector.load %arg2[%c0, %c0_1, %c0_2] : memref<8x8x128xf32, #tpu.memory_space<vmem>>, vector<8x8x128xf32>
    %4 = vector.shape_cast %3 : vector<8x8x128xf32> to vector<64x128xf32>
    %c0_3 = arith.constant 0 : index
    %c0_4 = arith.constant 0 : index
    %5 = vector.load %arg3[%c0_3, %c0_4] : memref<128x512xf32, #tpu.memory_space<vmem>>, vector<128x512xf32>
    %cst = arith.constant dense<0.000000e+00> : vector<64x512xf32>
    %6 = tpu.matmul %4, %5, %cst {dimension_numbers = #tpu.dot_dimension_numbers<[1], [0], [0], [1], [0, 0, 1, 1], [], []>} : vector<64x128xf32>, vector<128x512xf32>, vector<64x512xf32> -> vector<64x512xf32>
    %c0_5 = arith.constant 0 : index
    %c0_6 = arith.constant 0 : index
    %7 = vector.load %arg5[%c0_5, %c0_6] : memref<1x512xf32, #tpu.memory_space<vmem>>, vector<1x512xf32>
    %8 = vector.broadcast %7 : vector<1x512xf32> to vector<64x512xf32>
    %9 = arith.addf %6, %8 : vector<64x512xf32>
    %10 = vector.shape_cast %9 : vector<64x512xf32> to vector<8x8x512xf32>
    %11 = vector.extract_strided_slice %10 {offsets = [0, 0, 0], sizes = [8, 1, 512], strides = [1, 1, 1]} : vector<8x8x512xf32> to vector<8x1x512xf32>
    %12 = vector.shape_cast %11 : vector<8x1x512xf32> to vector<8x512xf32>
    %c0_7 = arith.constant 0 : index
    %c0_8 = arith.constant 0 : index
    %c0_9 = arith.constant 0 : index
    %13 = vector.load %arg13[%c0_7, %c0_8, %c0_9] : memref<8x8x512xf32, #tpu.memory_space<vmem>>, vector<1x8x512xf32>
    %14 = vector.shape_cast %13 : vector<1x8x512xf32> to vector<8x512xf32>
    %15 = vector.shape_cast %12 : vector<8x512xf32> to vector<1x8x512xf32>
    tpu.vector_store %arg13[%c0_7, %c0_8, %c0_9], %15 {strides = array<i32>} : memref<8x8x512xf32, #tpu.memory_space<vmem>>, vector<1x8x512xf32>,
    %16 = vector.extract_strided_slice %10 {offsets = [0, 1, 0], sizes = [8, 1, 512], strides = [1, 1, 1]} : vector<8x8x512xf32> to vector<8x1x512xf32>
    %17 = vector.shape_cast %16 : vector<8x1x512xf32> to vector<8x512xf32>
    %c1 = arith.constant 1 : index
    %c0_10 = arith.constant 0 : index
    %c0_11 = arith.constant 0 : index
    %18 = vector.load %arg13[%c1, %c0_10, %c0_11] : memref<8x8x512xf32, #tpu.memory_space<vmem>>, vector<1x8x512xf32>
    %19 = vector.shape_cast %18 : vector<1x8x512xf32> to vector<8x512xf32>
    %20 = vector.shape_cast %17 : vector<8x512xf32> to vector<1x8x512xf32>
    tpu.vector_store %arg13[%c1, %c0_10, %c0_11], %20 {strides = array<i32>} : memref<8x8x512xf32, #tpu.memory_space<vmem>>, vector<1x8x512xf32>,
    %21 = vector.extract_strided_slice %10 {offsets = [0, 2, 0], sizes = [8, 1, 512], strides = [1, 1, 1]} : vector<8x8x512xf32> to vector<8x1x512xf32>
    %22 = vector.shape_cast %21 : vector<8x1x512xf32> to vector<8x512xf32>
    %c2 = arith.constant 2 : index
    %c0_12 = arith.constant 0 : index
    %c0_13 = arith.constant 0 : index
    %23 = vector.load %arg13[%c2, %c0_12, %c0_13] : memref<8x8x512xf32, #tpu.memory_space<vmem>>, vector<1x8x512xf32>
    %24 = vector.shape_cast %23 : vector<1x8x512xf32> to vector<8x512xf32>
    %25 = vector.shape_cast %22 : vector<8x512xf32> to vector<1x8x512xf32>
    tpu.vector_store %arg13[%c2, %c0_12, %c0_13], %25 {strides = array<i32>} : memref<8x8x512xf32, #tpu.memory_space<vmem>>, vector<1x8x512xf32>,
    %26 = vector.extract_strided_slice %10 {offsets = [0, 3, 0], sizes = [8, 1, 512], strides = [1, 1, 1]} : vector<8x8x512xf32> to vector<8x1x512xf32>
    %27 = vector.shape_cast %26 : vector<8x1x512xf32> to vector<8x512xf32>
    %c3 = arith.constant 3 : index
    %c0_14 = arith.constant 0 : index
    %c0_15 = arith.constant 0 : index
    %28 = vector.load %arg13[%c3, %c0_14, %c0_15] : memref<8x8x512xf32, #tpu.memory_space<vmem>>, vector<1x8x512xf32>
    %29 = vector.shape_cast %28 : vector<1x8x512xf32> to vector<8x512xf32>
    %30 = vector.shape_cast %27 : vector<8x512xf32> to vector<1x8x512xf32>
    tpu.vector_store %arg13[%c3, %c0_14, %c0_15], %30 {strides = array<i32>} : memref<8x8x512xf32, #tpu.memory_space<vmem>>, vector<1x8x512xf32>,
    %31 = vector.extract_strided_slice %10 {offsets = [0, 4, 0], sizes = [8, 1, 512], strides = [1, 1, 1]} : vector<8x8x512xf32> to vector<8x1x512xf32>
    %32 = vector.shape_cast %31 : vector<8x1x512xf32> to vector<8x512xf32>
    %c4 = arith.constant 4 : index
    %c0_16 = arith.constant 0 : index
    %c0_17 = arith.constant 0 : index
    %33 = vector.load %arg13[%c4, %c0_16, %c0_17] : memref<8x8x512xf32, #tpu.memory_space<vmem>>, vector<1x8x512xf32>
    %34 = vector.shape_cast %33 : vector<1x8x512xf32> to vector<8x512xf32>
    %35 = vector.shape_cast %32 : vector<8x512xf32> to vector<1x8x512xf32>
    tpu.vector_store %arg13[%c4, %c0_16, %c0_17], %35 {strides = array<i32>} : memref<8x8x512xf32, #tpu.memory_space<vmem>>, vector<1x8x512xf32>,
    %36 = vector.extract_strided_slice %10 {offsets = [0, 5, 0], sizes = [8, 1, 512], strides = [1, 1, 1]} : vector<8x8x512xf32> to vector<8x1x512xf32>
    %37 = vector.shape_cast %36 : vector<8x1x512xf32> to vector<8x512xf32>
    %c5 = arith.constant 5 : index
    %c0_18 = arith.constant 0 : index
    %c0_19 = arith.constant 0 : index
    %38 = vector.load %arg13[%c5, %c0_18, %c0_19] : memref<8x8x512xf32, #tpu.memory_space<vmem>>, vector<1x8x512xf32>
    %39 = vector.shape_cast %38 : vector<1x8x512xf32> to vector<8x512xf32>
    %40 = vector.shape_cast %37 : vector<8x512xf32> to vector<1x8x512xf32>
    tpu.vector_store %arg13[%c5, %c0_18, %c0_19], %40 {strides = array<i32>} : memref<8x8x512xf32, #tpu.memory_space<vmem>>, vector<1x8x512xf32>,
    %41 = vector.extract_strided_slice %10 {offsets = [0, 6, 0], sizes = [8, 1, 512], strides = [1, 1, 1]} : vector<8x8x512xf32> to vector<8x1x512xf32>
    %42 = vector.shape_cast %41 : vector<8x1x512xf32> to vector<8x512xf32>
    %c6 = arith.constant 6 : index
    %c0_20 = arith.constant 0 : index
    %c0_21 = arith.constant 0 : index
    %43 = vector.load %arg13[%c6, %c0_20, %c0_21] : memref<8x8x512xf32, #tpu.memory_space<vmem>>, vector<1x8x512xf32>
    %44 = vector.shape_cast %43 : vector<1x8x512xf32> to vector<8x512xf32>
    %45 = vector.shape_cast %42 : vector<8x512xf32> to vector<1x8x512xf32>
    tpu.vector_store %arg13[%c6, %c0_20, %c0_21], %45 {strides = array<i32>} : memref<8x8x512xf32, #tpu.memory_space<vmem>>, vector<1x8x512xf32>,
    %46 = vector.extract_strided_slice %10 {offsets = [0, 7, 0], sizes = [8, 1, 512], strides = [1, 1, 1]} : vector<8x8x512xf32> to vector<8x1x512xf32>
    %47 = vector.shape_cast %46 : vector<8x1x512xf32> to vector<8x512xf32>
    %c7 = arith.constant 7 : index
    %c0_22 = arith.constant 0 : index
    %c0_23 = arith.constant 0 : index
    %48 = vector.load %arg13[%c7, %c0_22, %c0_23] : memref<8x8x512xf32, #tpu.memory_space<vmem>>, vector<1x8x512xf32>
    %49 = vector.shape_cast %48 : vector<1x8x512xf32> to vector<8x512xf32>
    %50 = vector.shape_cast %47 : vector<8x512xf32> to vector<1x8x512xf32>
    tpu.vector_store %arg13[%c7, %c0_22, %c0_23], %50 {strides = array<i32>} : memref<8x8x512xf32, #tpu.memory_space<vmem>>, vector<1x8x512xf32>,
    %c0_24 = arith.constant 0 : index
    %c0_25 = arith.constant 0 : index
    %51 = vector.load %arg4[%c0_24, %c0_25] : memref<128x512xf32, #tpu.memory_space<vmem>>, vector<128x512xf32>
    %c0_26 = arith.constant 0 : index
    %c0_27 = arith.constant 0 : index
    %52 = vector.load %arg11[%c0_26, %c0_27] : memref<8x128xf32, #tpu.memory_space<vmem>>, vector<8x128xf32>
    %c0_28 = arith.constant 0 : index
    %c0_29 = arith.constant 0 : index
    %53 = vector.load %arg12[%c0_28, %c0_29] : memref<8x128xf32, #tpu.memory_space<vmem>>, vector<8x128xf32>
    %c0_i32_30 = arith.constant 0 : i32
    %54 = arith.index_cast %c0_i32_30 : i32 to index
    %c0_31 = arith.constant 0 : index
    %c0_32 = arith.constant 0 : index
    %55 = vector.load %arg13[%54, %c0_31, %c0_32] : memref<8x8x512xf32, #tpu.memory_space<vmem>>, vector<1x8x512xf32>
    %56 = vector.shape_cast %55 : vector<1x8x512xf32> to vector<8x512xf32>
    %cst_33 = arith.constant dense<0.000000e+00> : vector<8x512xf32>
    %57 = tpu.matmul %52, %51, %cst_33 {dimension_numbers = #tpu.dot_dimension_numbers<[1], [0], [0], [1], [0, 0, 1, 1], [], []>} : vector<8x128xf32>, vector<128x512xf32>, vector<8x512xf32> -> vector<8x512xf32>
    %58 = arith.addf %56, %57 : vector<8x512xf32>
    %59 = vector.extract_strided_slice %58 {offsets = [0, 0], sizes = [8, 128], strides = [1, 1]} : vector<8x512xf32> to vector<8x128xf32>
    %cst_34 = arith.constant 5.000000e-01 : f32
    %60 = vector.broadcast %cst_34 : f32 to vector<8x128xf32>
    %61 = arith.mulf %60, %59 : vector<8x128xf32>
    %62 = math.tanh %61 : vector<8x128xf32>
    %cst_35 = arith.constant 5.000000e-01 : f32
    %63 = vector.broadcast %cst_35 : f32 to vector<8x128xf32>
    %64 = arith.mulf %63, %62 : vector<8x128xf32>
    %cst_36 = arith.constant 5.000000e-01 : f32
    %65 = vector.broadcast %cst_36 : f32 to vector<8x128xf32>
    %66 = arith.addf %64, %65 : vector<8x128xf32>
    %67 = vector.extract_strided_slice %58 {offsets = [0, 128], sizes = [8, 128], strides = [1, 1]} : vector<8x512xf32> to vector<8x128xf32>
    %cst_37 = arith.constant 5.000000e-01 : f32
    %68 = vector.broadcast %cst_37 : f32 to vector<8x128xf32>
    %69 = arith.mulf %68, %67 : vector<8x128xf32>
    %70 = math.tanh %69 : vector<8x128xf32>
    %cst_38 = arith.constant 5.000000e-01 : f32
    %71 = vector.broadcast %cst_38 : f32 to vector<8x128xf32>
    %72 = arith.mulf %71, %70 : vector<8x128xf32>
    %cst_39 = arith.constant 5.000000e-01 : f32
    %73 = vector.broadcast %cst_39 : f32 to vector<8x128xf32>
    %74 = arith.addf %72, %73 : vector<8x128xf32>
    %75 = vector.extract_strided_slice %58 {offsets = [0, 256], sizes = [8, 128], strides = [1, 1]} : vector<8x512xf32> to vector<8x128xf32>
    %76 = math.tanh %75 : vector<8x128xf32>
    %77 = vector.extract_strided_slice %58 {offsets = [0, 384], sizes = [8, 128], strides = [1, 1]} : vector<8x512xf32> to vector<8x128xf32>
    %cst_40 = arith.constant 5.000000e-01 : f32
    %78 = vector.broadcast %cst_40 : f32 to vector<8x128xf32>
    %79 = arith.mulf %78, %77 : vector<8x128xf32>
    %80 = math.tanh %79 : vector<8x128xf32>
    %cst_41 = arith.constant 5.000000e-01 : f32
    %81 = vector.broadcast %cst_41 : f32 to vector<8x128xf32>
    %82 = arith.mulf %81, %80 : vector<8x128xf32>
    %cst_42 = arith.constant 5.000000e-01 : f32
    %83 = vector.broadcast %cst_42 : f32 to vector<8x128xf32>
    %84 = arith.addf %82, %83 : vector<8x128xf32>
    %85 = arith.mulf %74, %53 : vector<8x128xf32>
    %86 = arith.mulf %66, %76 : vector<8x128xf32>
    %87 = arith.addf %85, %86 : vector<8x128xf32>
    %88 = math.tanh %87 : vector<8x128xf32>
    %89 = arith.mulf %84, %88 : vector<8x128xf32>
    %90 = arith.index_cast %c0_i32_30 : i32 to index
    %c0_43 = arith.constant 0 : index
    %c0_44 = arith.constant 0 : index
    %91 = vector.load %arg14[%90, %c0_43, %c0_44] : memref<8x8x128xf32, #tpu.memory_space<vmem>>, vector<1x8x128xf32>
    %92 = vector.shape_cast %91 : vector<1x8x128xf32> to vector<8x128xf32>
    %93 = vector.shape_cast %89 : vector<8x128xf32> to vector<1x8x128xf32>
    tpu.vector_store %arg14[%90, %c0_43, %c0_44], %93 {strides = array<i32>} : memref<8x8x128xf32, #tpu.memory_space<vmem>>, vector<1x8x128xf32>,
    %c1_i32 = arith.constant 1 : i32
    %94 = arith.index_cast %c1_i32 : i32 to index
    %c0_45 = arith.constant 0 : index
    %c0_46 = arith.constant 0 : index
    %95 = vector.load %arg13[%94, %c0_45, %c0_46] : memref<8x8x512xf32, #tpu.memory_space<vmem>>, vector<1x8x512xf32>
    %96 = vector.shape_cast %95 : vector<1x8x512xf32> to vector<8x512xf32>
    %cst_47 = arith.constant dense<0.000000e+00> : vector<8x512xf32>
    %97 = tpu.matmul %89, %51, %cst_47 {dimension_numbers = #tpu.dot_dimension_numbers<[1], [0], [0], [1], [0, 0, 1, 1], [], []>} : vector<8x128xf32>, vector<128x512xf32>, vector<8x512xf32> -> vector<8x512xf32>
    %98 = arith.addf %96, %97 : vector<8x512xf32>
    %99 = vector.extract_strided_slice %98 {offsets = [0, 0], sizes = [8, 128], strides = [1, 1]} : vector<8x512xf32> to vector<8x128xf32>
    %cst_48 = arith.constant 5.000000e-01 : f32
    %100 = vector.broadcast %cst_48 : f32 to vector<8x128xf32>
    %101 = arith.mulf %100, %99 : vector<8x128xf32>
    %102 = math.tanh %101 : vector<8x128xf32>
    %cst_49 = arith.constant 5.000000e-01 : f32
    %103 = vector.broadcast %cst_49 : f32 to vector<8x128xf32>
    %104 = arith.mulf %103, %102 : vector<8x128xf32>
    %cst_50 = arith.constant 5.000000e-01 : f32
    %105 = vector.broadcast %cst_50 : f32 to vector<8x128xf32>
    %106 = arith.addf %104, %105 : vector<8x128xf32>
    %107 = vector.extract_strided_slice %98 {offsets = [0, 128], sizes = [8, 128], strides = [1, 1]} : vector<8x512xf32> to vector<8x128xf32>
    %cst_51 = arith.constant 5.000000e-01 : f32
    %108 = vector.broadcast %cst_51 : f32 to vector<8x128xf32>
    %109 = arith.mulf %108, %107 : vector<8x128xf32>
    %110 = math.tanh %109 : vector<8x128xf32>
    %cst_52 = arith.constant 5.000000e-01 : f32
    %111 = vector.broadcast %cst_52 : f32 to vector<8x128xf32>
    %112 = arith.mulf %111, %110 : vector<8x128xf32>
    %cst_53 = arith.constant 5.000000e-01 : f32
    %113 = vector.broadcast %cst_53 : f32 to vector<8x128xf32>
    %114 = arith.addf %112, %113 : vector<8x128xf32>
    %115 = vector.extract_strided_slice %98 {offsets = [0, 256], sizes = [8, 128], strides = [1, 1]} : vector<8x512xf32> to vector<8x128xf32>
    %116 = math.tanh %115 : vector<8x128xf32>
    %117 = vector.extract_strided_slice %98 {offsets = [0, 384], sizes = [8, 128], strides = [1, 1]} : vector<8x512xf32> to vector<8x128xf32>
    %cst_54 = arith.constant 5.000000e-01 : f32
    %118 = vector.broadcast %cst_54 : f32 to vector<8x128xf32>
    %119 = arith.mulf %118, %117 : vector<8x128xf32>
    %120 = math.tanh %119 : vector<8x128xf32>
    %cst_55 = arith.constant 5.000000e-01 : f32
    %121 = vector.broadcast %cst_55 : f32 to vector<8x128xf32>
    %122 = arith.mulf %121, %120 : vector<8x128xf32>
    %cst_56 = arith.constant 5.000000e-01 : f32
    %123 = vector.broadcast %cst_56 : f32 to vector<8x128xf32>
    %124 = arith.addf %122, %123 : vector<8x128xf32>
    %125 = arith.mulf %114, %87 : vector<8x128xf32>
    %126 = arith.mulf %106, %116 : vector<8x128xf32>
    %127 = arith.addf %125, %126 : vector<8x128xf32>
    %128 = math.tanh %127 : vector<8x128xf32>
    %129 = arith.mulf %124, %128 : vector<8x128xf32>
    %130 = arith.index_cast %c1_i32 : i32 to index
    %c0_57 = arith.constant 0 : index
    %c0_58 = arith.constant 0 : index
    %131 = vector.load %arg14[%130, %c0_57, %c0_58] : memref<8x8x128xf32, #tpu.memory_space<vmem>>, vector<1x8x128xf32>
    %132 = vector.shape_cast %131 : vector<1x8x128xf32> to vector<8x128xf32>
    %133 = vector.shape_cast %129 : vector<8x128xf32> to vector<1x8x128xf32>
    tpu.vector_store %arg14[%130, %c0_57, %c0_58], %133 {strides = array<i32>} : memref<8x8x128xf32, #tpu.memory_space<vmem>>, vector<1x8x128xf32>,
    %c2_i32 = arith.constant 2 : i32
    %134 = arith.index_cast %c2_i32 : i32 to index
    %c0_59 = arith.constant 0 : index
    %c0_60 = arith.constant 0 : index
    %135 = vector.load %arg13[%134, %c0_59, %c0_60] : memref<8x8x512xf32, #tpu.memory_space<vmem>>, vector<1x8x512xf32>
    %136 = vector.shape_cast %135 : vector<1x8x512xf32> to vector<8x512xf32>
    %cst_61 = arith.constant dense<0.000000e+00> : vector<8x512xf32>
    %137 = tpu.matmul %129, %51, %cst_61 {dimension_numbers = #tpu.dot_dimension_numbers<[1], [0], [0], [1], [0, 0, 1, 1], [], []>} : vector<8x128xf32>, vector<128x512xf32>, vector<8x512xf32> -> vector<8x512xf32>
    %138 = arith.addf %136, %137 : vector<8x512xf32>
    %139 = vector.extract_strided_slice %138 {offsets = [0, 0], sizes = [8, 128], strides = [1, 1]} : vector<8x512xf32> to vector<8x128xf32>
    %cst_62 = arith.constant 5.000000e-01 : f32
    %140 = vector.broadcast %cst_62 : f32 to vector<8x128xf32>
    %141 = arith.mulf %140, %139 : vector<8x128xf32>
    %142 = math.tanh %141 : vector<8x128xf32>
    %cst_63 = arith.constant 5.000000e-01 : f32
    %143 = vector.broadcast %cst_63 : f32 to vector<8x128xf32>
    %144 = arith.mulf %143, %142 : vector<8x128xf32>
    %cst_64 = arith.constant 5.000000e-01 : f32
    %145 = vector.broadcast %cst_64 : f32 to vector<8x128xf32>
    %146 = arith.addf %144, %145 : vector<8x128xf32>
    %147 = vector.extract_strided_slice %138 {offsets = [0, 128], sizes = [8, 128], strides = [1, 1]} : vector<8x512xf32> to vector<8x128xf32>
    %cst_65 = arith.constant 5.000000e-01 : f32
    %148 = vector.broadcast %cst_65 : f32 to vector<8x128xf32>
    %149 = arith.mulf %148, %147 : vector<8x128xf32>
    %150 = math.tanh %149 : vector<8x128xf32>
    %cst_66 = arith.constant 5.000000e-01 : f32
    %151 = vector.broadcast %cst_66 : f32 to vector<8x128xf32>
    %152 = arith.mulf %151, %150 : vector<8x128xf32>
    %cst_67 = arith.constant 5.000000e-01 : f32
    %153 = vector.broadcast %cst_67 : f32 to vector<8x128xf32>
    %154 = arith.addf %152, %153 : vector<8x128xf32>
    %155 = vector.extract_strided_slice %138 {offsets = [0, 256], sizes = [8, 128], strides = [1, 1]} : vector<8x512xf32> to vector<8x128xf32>
    %156 = math.tanh %155 : vector<8x128xf32>
    %157 = vector.extract_strided_slice %138 {offsets = [0, 384], sizes = [8, 128], strides = [1, 1]} : vector<8x512xf32> to vector<8x128xf32>
    %cst_68 = arith.constant 5.000000e-01 : f32
    %158 = vector.broadcast %cst_68 : f32 to vector<8x128xf32>
    %159 = arith.mulf %158, %157 : vector<8x128xf32>
    %160 = math.tanh %159 : vector<8x128xf32>
    %cst_69 = arith.constant 5.000000e-01 : f32
    %161 = vector.broadcast %cst_69 : f32 to vector<8x128xf32>
    %162 = arith.mulf %161, %160 : vector<8x128xf32>
    %cst_70 = arith.constant 5.000000e-01 : f32
    %163 = vector.broadcast %cst_70 : f32 to vector<8x128xf32>
    %164 = arith.addf %162, %163 : vector<8x128xf32>
    %165 = arith.mulf %154, %127 : vector<8x128xf32>
    %166 = arith.mulf %146, %156 : vector<8x128xf32>
    %167 = arith.addf %165, %166 : vector<8x128xf32>
    %168 = math.tanh %167 : vector<8x128xf32>
    %169 = arith.mulf %164, %168 : vector<8x128xf32>
    %170 = arith.index_cast %c2_i32 : i32 to index
    %c0_71 = arith.constant 0 : index
    %c0_72 = arith.constant 0 : index
    %171 = vector.load %arg14[%170, %c0_71, %c0_72] : memref<8x8x128xf32, #tpu.memory_space<vmem>>, vector<1x8x128xf32>
    %172 = vector.shape_cast %171 : vector<1x8x128xf32> to vector<8x128xf32>
    %173 = vector.shape_cast %169 : vector<8x128xf32> to vector<1x8x128xf32>
    tpu.vector_store %arg14[%170, %c0_71, %c0_72], %173 {strides = array<i32>} : memref<8x8x128xf32, #tpu.memory_space<vmem>>, vector<1x8x128xf32>,
    %c3_i32 = arith.constant 3 : i32
    %174 = arith.index_cast %c3_i32 : i32 to index
    %c0_73 = arith.constant 0 : index
    %c0_74 = arith.constant 0 : index
    %175 = vector.load %arg13[%174, %c0_73, %c0_74] : memref<8x8x512xf32, #tpu.memory_space<vmem>>, vector<1x8x512xf32>
    %176 = vector.shape_cast %175 : vector<1x8x512xf32> to vector<8x512xf32>
    %cst_75 = arith.constant dense<0.000000e+00> : vector<8x512xf32>
    %177 = tpu.matmul %169, %51, %cst_75 {dimension_numbers = #tpu.dot_dimension_numbers<[1], [0], [0], [1], [0, 0, 1, 1], [], []>} : vector<8x128xf32>, vector<128x512xf32>, vector<8x512xf32> -> vector<8x512xf32>
    %178 = arith.addf %176, %177 : vector<8x512xf32>
    %179 = vector.extract_strided_slice %178 {offsets = [0, 0], sizes = [8, 128], strides = [1, 1]} : vector<8x512xf32> to vector<8x128xf32>
    %cst_76 = arith.constant 5.000000e-01 : f32
    %180 = vector.broadcast %cst_76 : f32 to vector<8x128xf32>
    %181 = arith.mulf %180, %179 : vector<8x128xf32>
    %182 = math.tanh %181 : vector<8x128xf32>
    %cst_77 = arith.constant 5.000000e-01 : f32
    %183 = vector.broadcast %cst_77 : f32 to vector<8x128xf32>
    %184 = arith.mulf %183, %182 : vector<8x128xf32>
    %cst_78 = arith.constant 5.000000e-01 : f32
    %185 = vector.broadcast %cst_78 : f32 to vector<8x128xf32>
    %186 = arith.addf %184, %185 : vector<8x128xf32>
    %187 = vector.extract_strided_slice %178 {offsets = [0, 128], sizes = [8, 128], strides = [1, 1]} : vector<8x512xf32> to vector<8x128xf32>
    %cst_79 = arith.constant 5.000000e-01 : f32
    %188 = vector.broadcast %cst_79 : f32 to vector<8x128xf32>
    %189 = arith.mulf %188, %187 : vector<8x128xf32>
    %190 = math.tanh %189 : vector<8x128xf32>
    %cst_80 = arith.constant 5.000000e-01 : f32
    %191 = vector.broadcast %cst_80 : f32 to vector<8x128xf32>
    %192 = arith.mulf %191, %190 : vector<8x128xf32>
    %cst_81 = arith.constant 5.000000e-01 : f32
    %193 = vector.broadcast %cst_81 : f32 to vector<8x128xf32>
    %194 = arith.addf %192, %193 : vector<8x128xf32>
    %195 = vector.extract_strided_slice %178 {offsets = [0, 256], sizes = [8, 128], strides = [1, 1]} : vector<8x512xf32> to vector<8x128xf32>
    %196 = math.tanh %195 : vector<8x128xf32>
    %197 = vector.extract_strided_slice %178 {offsets = [0, 384], sizes = [8, 128], strides = [1, 1]} : vector<8x512xf32> to vector<8x128xf32>
    %cst_82 = arith.constant 5.000000e-01 : f32
    %198 = vector.broadcast %cst_82 : f32 to vector<8x128xf32>
    %199 = arith.mulf %198, %197 : vector<8x128xf32>
    %200 = math.tanh %199 : vector<8x128xf32>
    %cst_83 = arith.constant 5.000000e-01 : f32
    %201 = vector.broadcast %cst_83 : f32 to vector<8x128xf32>
    %202 = arith.mulf %201, %200 : vector<8x128xf32>
    %cst_84 = arith.constant 5.000000e-01 : f32
    %203 = vector.broadcast %cst_84 : f32 to vector<8x128xf32>
    %204 = arith.addf %202, %203 : vector<8x128xf32>
    %205 = arith.mulf %194, %167 : vector<8x128xf32>
    %206 = arith.mulf %186, %196 : vector<8x128xf32>
    %207 = arith.addf %205, %206 : vector<8x128xf32>
    %208 = math.tanh %207 : vector<8x128xf32>
    %209 = arith.mulf %204, %208 : vector<8x128xf32>
    %210 = arith.index_cast %c3_i32 : i32 to index
    %c0_85 = arith.constant 0 : index
    %c0_86 = arith.constant 0 : index
    %211 = vector.load %arg14[%210, %c0_85, %c0_86] : memref<8x8x128xf32, #tpu.memory_space<vmem>>, vector<1x8x128xf32>
    %212 = vector.shape_cast %211 : vector<1x8x128xf32> to vector<8x128xf32>
    %213 = vector.shape_cast %209 : vector<8x128xf32> to vector<1x8x128xf32>
    tpu.vector_store %arg14[%210, %c0_85, %c0_86], %213 {strides = array<i32>} : memref<8x8x128xf32, #tpu.memory_space<vmem>>, vector<1x8x128xf32>,
    %c4_i32 = arith.constant 4 : i32
    %214 = arith.index_cast %c4_i32 : i32 to index
    %c0_87 = arith.constant 0 : index
    %c0_88 = arith.constant 0 : index
    %215 = vector.load %arg13[%214, %c0_87, %c0_88] : memref<8x8x512xf32, #tpu.memory_space<vmem>>, vector<1x8x512xf32>
    %216 = vector.shape_cast %215 : vector<1x8x512xf32> to vector<8x512xf32>
    %cst_89 = arith.constant dense<0.000000e+00> : vector<8x512xf32>
    %217 = tpu.matmul %209, %51, %cst_89 {dimension_numbers = #tpu.dot_dimension_numbers<[1], [0], [0], [1], [0, 0, 1, 1], [], []>} : vector<8x128xf32>, vector<128x512xf32>, vector<8x512xf32> -> vector<8x512xf32>
    %218 = arith.addf %216, %217 : vector<8x512xf32>
    %219 = vector.extract_strided_slice %218 {offsets = [0, 0], sizes = [8, 128], strides = [1, 1]} : vector<8x512xf32> to vector<8x128xf32>
    %cst_90 = arith.constant 5.000000e-01 : f32
    %220 = vector.broadcast %cst_90 : f32 to vector<8x128xf32>
    %221 = arith.mulf %220, %219 : vector<8x128xf32>
    %222 = math.tanh %221 : vector<8x128xf32>
    %cst_91 = arith.constant 5.000000e-01 : f32
    %223 = vector.broadcast %cst_91 : f32 to vector<8x128xf32>
    %224 = arith.mulf %223, %222 : vector<8x128xf32>
    %cst_92 = arith.constant 5.000000e-01 : f32
    %225 = vector.broadcast %cst_92 : f32 to vector<8x128xf32>
    %226 = arith.addf %224, %225 : vector<8x128xf32>
    %227 = vector.extract_strided_slice %218 {offsets = [0, 128], sizes = [8, 128], strides = [1, 1]} : vector<8x512xf32> to vector<8x128xf32>
    %cst_93 = arith.constant 5.000000e-01 : f32
    %228 = vector.broadcast %cst_93 : f32 to vector<8x128xf32>
    %229 = arith.mulf %228, %227 : vector<8x128xf32>
    %230 = math.tanh %229 : vector<8x128xf32>
    %cst_94 = arith.constant 5.000000e-01 : f32
    %231 = vector.broadcast %cst_94 : f32 to vector<8x128xf32>
    %232 = arith.mulf %231, %230 : vector<8x128xf32>
    %cst_95 = arith.constant 5.000000e-01 : f32
    %233 = vector.broadcast %cst_95 : f32 to vector<8x128xf32>
    %234 = arith.addf %232, %233 : vector<8x128xf32>
    %235 = vector.extract_strided_slice %218 {offsets = [0, 256], sizes = [8, 128], strides = [1, 1]} : vector<8x512xf32> to vector<8x128xf32>
    %236 = math.tanh %235 : vector<8x128xf32>
    %237 = vector.extract_strided_slice %218 {offsets = [0, 384], sizes = [8, 128], strides = [1, 1]} : vector<8x512xf32> to vector<8x128xf32>
    %cst_96 = arith.constant 5.000000e-01 : f32
    %238 = vector.broadcast %cst_96 : f32 to vector<8x128xf32>
    %239 = arith.mulf %238, %237 : vector<8x128xf32>
    %240 = math.tanh %239 : vector<8x128xf32>
    %cst_97 = arith.constant 5.000000e-01 : f32
    %241 = vector.broadcast %cst_97 : f32 to vector<8x128xf32>
    %242 = arith.mulf %241, %240 : vector<8x128xf32>
    %cst_98 = arith.constant 5.000000e-01 : f32
    %243 = vector.broadcast %cst_98 : f32 to vector<8x128xf32>
    %244 = arith.addf %242, %243 : vector<8x128xf32>
    %245 = arith.mulf %234, %207 : vector<8x128xf32>
    %246 = arith.mulf %226, %236 : vector<8x128xf32>
    %247 = arith.addf %245, %246 : vector<8x128xf32>
    %248 = math.tanh %247 : vector<8x128xf32>
    %249 = arith.mulf %244, %248 : vector<8x128xf32>
    %250 = arith.index_cast %c4_i32 : i32 to index
    %c0_99 = arith.constant 0 : index
    %c0_100 = arith.constant 0 : index
    %251 = vector.load %arg14[%250, %c0_99, %c0_100] : memref<8x8x128xf32, #tpu.memory_space<vmem>>, vector<1x8x128xf32>
    %252 = vector.shape_cast %251 : vector<1x8x128xf32> to vector<8x128xf32>
    %253 = vector.shape_cast %249 : vector<8x128xf32> to vector<1x8x128xf32>
    tpu.vector_store %arg14[%250, %c0_99, %c0_100], %253 {strides = array<i32>} : memref<8x8x128xf32, #tpu.memory_space<vmem>>, vector<1x8x128xf32>,
    %c5_i32 = arith.constant 5 : i32
    %254 = arith.index_cast %c5_i32 : i32 to index
    %c0_101 = arith.constant 0 : index
    %c0_102 = arith.constant 0 : index
    %255 = vector.load %arg13[%254, %c0_101, %c0_102] : memref<8x8x512xf32, #tpu.memory_space<vmem>>, vector<1x8x512xf32>
    %256 = vector.shape_cast %255 : vector<1x8x512xf32> to vector<8x512xf32>
    %cst_103 = arith.constant dense<0.000000e+00> : vector<8x512xf32>
    %257 = tpu.matmul %249, %51, %cst_103 {dimension_numbers = #tpu.dot_dimension_numbers<[1], [0], [0], [1], [0, 0, 1, 1], [], []>} : vector<8x128xf32>, vector<128x512xf32>, vector<8x512xf32> -> vector<8x512xf32>
    %258 = arith.addf %256, %257 : vector<8x512xf32>
    %259 = vector.extract_strided_slice %258 {offsets = [0, 0], sizes = [8, 128], strides = [1, 1]} : vector<8x512xf32> to vector<8x128xf32>
    %cst_104 = arith.constant 5.000000e-01 : f32
    %260 = vector.broadcast %cst_104 : f32 to vector<8x128xf32>
    %261 = arith.mulf %260, %259 : vector<8x128xf32>
    %262 = math.tanh %261 : vector<8x128xf32>
    %cst_105 = arith.constant 5.000000e-01 : f32
    %263 = vector.broadcast %cst_105 : f32 to vector<8x128xf32>
    %264 = arith.mulf %263, %262 : vector<8x128xf32>
    %cst_106 = arith.constant 5.000000e-01 : f32
    %265 = vector.broadcast %cst_106 : f32 to vector<8x128xf32>
    %266 = arith.addf %264, %265 : vector<8x128xf32>
    %267 = vector.extract_strided_slice %258 {offsets = [0, 128], sizes = [8, 128], strides = [1, 1]} : vector<8x512xf32> to vector<8x128xf32>
    %cst_107 = arith.constant 5.000000e-01 : f32
    %268 = vector.broadcast %cst_107 : f32 to vector<8x128xf32>
    %269 = arith.mulf %268, %267 : vector<8x128xf32>
    %270 = math.tanh %269 : vector<8x128xf32>
    %cst_108 = arith.constant 5.000000e-01 : f32
    %271 = vector.broadcast %cst_108 : f32 to vector<8x128xf32>
    %272 = arith.mulf %271, %270 : vector<8x128xf32>
    %cst_109 = arith.constant 5.000000e-01 : f32
    %273 = vector.broadcast %cst_109 : f32 to vector<8x128xf32>
    %274 = arith.addf %272, %273 : vector<8x128xf32>
    %275 = vector.extract_strided_slice %258 {offsets = [0, 256], sizes = [8, 128], strides = [1, 1]} : vector<8x512xf32> to vector<8x128xf32>
    %276 = math.tanh %275 : vector<8x128xf32>
    %277 = vector.extract_strided_slice %258 {offsets = [0, 384], sizes = [8, 128], strides = [1, 1]} : vector<8x512xf32> to vector<8x128xf32>
    %cst_110 = arith.constant 5.000000e-01 : f32
    %278 = vector.broadcast %cst_110 : f32 to vector<8x128xf32>
    %279 = arith.mulf %278, %277 : vector<8x128xf32>
    %280 = math.tanh %279 : vector<8x128xf32>
    %cst_111 = arith.constant 5.000000e-01 : f32
    %281 = vector.broadcast %cst_111 : f32 to vector<8x128xf32>
    %282 = arith.mulf %281, %280 : vector<8x128xf32>
    %cst_112 = arith.constant 5.000000e-01 : f32
    %283 = vector.broadcast %cst_112 : f32 to vector<8x128xf32>
    %284 = arith.addf %282, %283 : vector<8x128xf32>
    %285 = arith.mulf %274, %247 : vector<8x128xf32>
    %286 = arith.mulf %266, %276 : vector<8x128xf32>
    %287 = arith.addf %285, %286 : vector<8x128xf32>
    %288 = math.tanh %287 : vector<8x128xf32>
    %289 = arith.mulf %284, %288 : vector<8x128xf32>
    %290 = arith.index_cast %c5_i32 : i32 to index
    %c0_113 = arith.constant 0 : index
    %c0_114 = arith.constant 0 : index
    %291 = vector.load %arg14[%290, %c0_113, %c0_114] : memref<8x8x128xf32, #tpu.memory_space<vmem>>, vector<1x8x128xf32>
    %292 = vector.shape_cast %291 : vector<1x8x128xf32> to vector<8x128xf32>
    %293 = vector.shape_cast %289 : vector<8x128xf32> to vector<1x8x128xf32>
    tpu.vector_store %arg14[%290, %c0_113, %c0_114], %293 {strides = array<i32>} : memref<8x8x128xf32, #tpu.memory_space<vmem>>, vector<1x8x128xf32>,
    %c6_i32 = arith.constant 6 : i32
    %294 = arith.index_cast %c6_i32 : i32 to index
    %c0_115 = arith.constant 0 : index
    %c0_116 = arith.constant 0 : index
    %295 = vector.load %arg13[%294, %c0_115, %c0_116] : memref<8x8x512xf32, #tpu.memory_space<vmem>>, vector<1x8x512xf32>
    %296 = vector.shape_cast %295 : vector<1x8x512xf32> to vector<8x512xf32>
    %cst_117 = arith.constant dense<0.000000e+00> : vector<8x512xf32>
    %297 = tpu.matmul %289, %51, %cst_117 {dimension_numbers = #tpu.dot_dimension_numbers<[1], [0], [0], [1], [0, 0, 1, 1], [], []>} : vector<8x128xf32>, vector<128x512xf32>, vector<8x512xf32> -> vector<8x512xf32>
    %298 = arith.addf %296, %297 : vector<8x512xf32>
    %299 = vector.extract_strided_slice %298 {offsets = [0, 0], sizes = [8, 128], strides = [1, 1]} : vector<8x512xf32> to vector<8x128xf32>
    %cst_118 = arith.constant 5.000000e-01 : f32
    %300 = vector.broadcast %cst_118 : f32 to vector<8x128xf32>
    %301 = arith.mulf %300, %299 : vector<8x128xf32>
    %302 = math.tanh %301 : vector<8x128xf32>
    %cst_119 = arith.constant 5.000000e-01 : f32
    %303 = vector.broadcast %cst_119 : f32 to vector<8x128xf32>
    %304 = arith.mulf %303, %302 : vector<8x128xf32>
    %cst_120 = arith.constant 5.000000e-01 : f32
    %305 = vector.broadcast %cst_120 : f32 to vector<8x128xf32>
    %306 = arith.addf %304, %305 : vector<8x128xf32>
    %307 = vector.extract_strided_slice %298 {offsets = [0, 128], sizes = [8, 128], strides = [1, 1]} : vector<8x512xf32> to vector<8x128xf32>
    %cst_121 = arith.constant 5.000000e-01 : f32
    %308 = vector.broadcast %cst_121 : f32 to vector<8x128xf32>
    %309 = arith.mulf %308, %307 : vector<8x128xf32>
    %310 = math.tanh %309 : vector<8x128xf32>
    %cst_122 = arith.constant 5.000000e-01 : f32
    %311 = vector.broadcast %cst_122 : f32 to vector<8x128xf32>
    %312 = arith.mulf %311, %310 : vector<8x128xf32>
    %cst_123 = arith.constant 5.000000e-01 : f32
    %313 = vector.broadcast %cst_123 : f32 to vector<8x128xf32>
    %314 = arith.addf %312, %313 : vector<8x128xf32>
    %315 = vector.extract_strided_slice %298 {offsets = [0, 256], sizes = [8, 128], strides = [1, 1]} : vector<8x512xf32> to vector<8x128xf32>
    %316 = math.tanh %315 : vector<8x128xf32>
    %317 = vector.extract_strided_slice %298 {offsets = [0, 384], sizes = [8, 128], strides = [1, 1]} : vector<8x512xf32> to vector<8x128xf32>
    %cst_124 = arith.constant 5.000000e-01 : f32
    %318 = vector.broadcast %cst_124 : f32 to vector<8x128xf32>
    %319 = arith.mulf %318, %317 : vector<8x128xf32>
    %320 = math.tanh %319 : vector<8x128xf32>
    %cst_125 = arith.constant 5.000000e-01 : f32
    %321 = vector.broadcast %cst_125 : f32 to vector<8x128xf32>
    %322 = arith.mulf %321, %320 : vector<8x128xf32>
    %cst_126 = arith.constant 5.000000e-01 : f32
    %323 = vector.broadcast %cst_126 : f32 to vector<8x128xf32>
    %324 = arith.addf %322, %323 : vector<8x128xf32>
    %325 = arith.mulf %314, %287 : vector<8x128xf32>
    %326 = arith.mulf %306, %316 : vector<8x128xf32>
    %327 = arith.addf %325, %326 : vector<8x128xf32>
    %328 = math.tanh %327 : vector<8x128xf32>
    %329 = arith.mulf %324, %328 : vector<8x128xf32>
    %330 = arith.index_cast %c6_i32 : i32 to index
    %c0_127 = arith.constant 0 : index
    %c0_128 = arith.constant 0 : index
    %331 = vector.load %arg14[%330, %c0_127, %c0_128] : memref<8x8x128xf32, #tpu.memory_space<vmem>>, vector<1x8x128xf32>
    %332 = vector.shape_cast %331 : vector<1x8x128xf32> to vector<8x128xf32>
    %333 = vector.shape_cast %329 : vector<8x128xf32> to vector<1x8x128xf32>
    tpu.vector_store %arg14[%330, %c0_127, %c0_128], %333 {strides = array<i32>} : memref<8x8x128xf32, #tpu.memory_space<vmem>>, vector<1x8x128xf32>,
    %c7_i32 = arith.constant 7 : i32
    %334 = arith.index_cast %c7_i32 : i32 to index
    %c0_129 = arith.constant 0 : index
    %c0_130 = arith.constant 0 : index
    %335 = vector.load %arg13[%334, %c0_129, %c0_130] : memref<8x8x512xf32, #tpu.memory_space<vmem>>, vector<1x8x512xf32>
    %336 = vector.shape_cast %335 : vector<1x8x512xf32> to vector<8x512xf32>
    %cst_131 = arith.constant dense<0.000000e+00> : vector<8x512xf32>
    %337 = tpu.matmul %329, %51, %cst_131 {dimension_numbers = #tpu.dot_dimension_numbers<[1], [0], [0], [1], [0, 0, 1, 1], [], []>} : vector<8x128xf32>, vector<128x512xf32>, vector<8x512xf32> -> vector<8x512xf32>
    %338 = arith.addf %336, %337 : vector<8x512xf32>
    %339 = vector.extract_strided_slice %338 {offsets = [0, 0], sizes = [8, 128], strides = [1, 1]} : vector<8x512xf32> to vector<8x128xf32>
    %cst_132 = arith.constant 5.000000e-01 : f32
    %340 = vector.broadcast %cst_132 : f32 to vector<8x128xf32>
    %341 = arith.mulf %340, %339 : vector<8x128xf32>
    %342 = math.tanh %341 : vector<8x128xf32>
    %cst_133 = arith.constant 5.000000e-01 : f32
    %343 = vector.broadcast %cst_133 : f32 to vector<8x128xf32>
    %344 = arith.mulf %343, %342 : vector<8x128xf32>
    %cst_134 = arith.constant 5.000000e-01 : f32
    %345 = vector.broadcast %cst_134 : f32 to vector<8x128xf32>
    %346 = arith.addf %344, %345 : vector<8x128xf32>
    %347 = vector.extract_strided_slice %338 {offsets = [0, 128], sizes = [8, 128], strides = [1, 1]} : vector<8x512xf32> to vector<8x128xf32>
    %cst_135 = arith.constant 5.000000e-01 : f32
    %348 = vector.broadcast %cst_135 : f32 to vector<8x128xf32>
    %349 = arith.mulf %348, %347 : vector<8x128xf32>
    %350 = math.tanh %349 : vector<8x128xf32>
    %cst_136 = arith.constant 5.000000e-01 : f32
    %351 = vector.broadcast %cst_136 : f32 to vector<8x128xf32>
    %352 = arith.mulf %351, %350 : vector<8x128xf32>
    %cst_137 = arith.constant 5.000000e-01 : f32
    %353 = vector.broadcast %cst_137 : f32 to vector<8x128xf32>
    %354 = arith.addf %352, %353 : vector<8x128xf32>
    %355 = vector.extract_strided_slice %338 {offsets = [0, 256], sizes = [8, 128], strides = [1, 1]} : vector<8x512xf32> to vector<8x128xf32>
    %356 = math.tanh %355 : vector<8x128xf32>
    %357 = vector.extract_strided_slice %338 {offsets = [0, 384], sizes = [8, 128], strides = [1, 1]} : vector<8x512xf32> to vector<8x128xf32>
    %cst_138 = arith.constant 5.000000e-01 : f32
    %358 = vector.broadcast %cst_138 : f32 to vector<8x128xf32>
    %359 = arith.mulf %358, %357 : vector<8x128xf32>
    %360 = math.tanh %359 : vector<8x128xf32>
    %cst_139 = arith.constant 5.000000e-01 : f32
    %361 = vector.broadcast %cst_139 : f32 to vector<8x128xf32>
    %362 = arith.mulf %361, %360 : vector<8x128xf32>
    %cst_140 = arith.constant 5.000000e-01 : f32
    %363 = vector.broadcast %cst_140 : f32 to vector<8x128xf32>
    %364 = arith.addf %362, %363 : vector<8x128xf32>
    %365 = arith.mulf %354, %327 : vector<8x128xf32>
    %366 = arith.mulf %346, %356 : vector<8x128xf32>
    %367 = arith.addf %365, %366 : vector<8x128xf32>
    %368 = math.tanh %367 : vector<8x128xf32>
    %369 = arith.mulf %364, %368 : vector<8x128xf32>
    %370 = arith.index_cast %c7_i32 : i32 to index
    %c0_141 = arith.constant 0 : index
    %c0_142 = arith.constant 0 : index
    %371 = vector.load %arg14[%370, %c0_141, %c0_142] : memref<8x8x128xf32, #tpu.memory_space<vmem>>, vector<1x8x128xf32>
    %372 = vector.shape_cast %371 : vector<1x8x128xf32> to vector<8x128xf32>
    %373 = vector.shape_cast %369 : vector<8x128xf32> to vector<1x8x128xf32>
    tpu.vector_store %arg14[%370, %c0_141, %c0_142], %373 {strides = array<i32>} : memref<8x8x128xf32, #tpu.memory_space<vmem>>, vector<1x8x128xf32>,
    %c8_i32 = arith.constant 8 : i32
    %c0_143 = arith.constant 0 : index
    %c0_144 = arith.constant 0 : index
    %374 = vector.load %arg11[%c0_143, %c0_144] : memref<8x128xf32, #tpu.memory_space<vmem>>, vector<8x128xf32>
    tpu.vector_store %arg11[%c0_143, %c0_144], %369 {strides = array<i32>} : memref<8x128xf32, #tpu.memory_space<vmem>>, vector<8x128xf32>,
    %c0_145 = arith.constant 0 : index
    %c0_146 = arith.constant 0 : index
    %375 = vector.load %arg12[%c0_145, %c0_146] : memref<8x128xf32, #tpu.memory_space<vmem>>, vector<8x128xf32>
    tpu.vector_store %arg12[%c0_145, %c0_146], %367 {strides = array<i32>} : memref<8x128xf32, #tpu.memory_space<vmem>>, vector<8x128xf32>,
    %c0_147 = arith.constant 0 : index
    %c0_148 = arith.constant 0 : index
    %c0_149 = arith.constant 0 : index
    %376 = vector.load %arg14[%c0_147, %c0_148, %c0_149] : memref<8x8x128xf32, #tpu.memory_space<vmem>>, vector<8x8x128xf32>
    %377 = vector.shape_cast %376 : vector<8x8x128xf32> to vector<64x128xf32>
    %c0_150 = arith.constant 0 : index
    %c0_151 = arith.constant 0 : index
    %378 = vector.load %arg6[%c0_150, %c0_151] : memref<128x128xf32, #tpu.memory_space<vmem>>, vector<128x128xf32>
    %cst_152 = arith.constant dense<0.000000e+00> : vector<64x128xf32>
    %379 = tpu.matmul %377, %378, %cst_152 {dimension_numbers = #tpu.dot_dimension_numbers<[1], [0], [0], [1], [0, 0, 1, 1], [], []>} : vector<64x128xf32>, vector<128x128xf32>, vector<64x128xf32> -> vector<64x128xf32>
    %c0_153 = arith.constant 0 : index
    %c0_154 = arith.constant 0 : index
    %380 = vector.load %arg7[%c0_153, %c0_154] : memref<1x128xf32, #tpu.memory_space<vmem>>, vector<1x128xf32>
    %381 = vector.broadcast %380 : vector<1x128xf32> to vector<64x128xf32>
    %382 = arith.addf %379, %381 : vector<64x128xf32>
    %cst_155 = arith.constant 0.000000e+00 : f32
    %383 = vector.broadcast %cst_155 : f32 to vector<64x128xf32>
    %384 = arith.maximumf %382, %383 : vector<64x128xf32>
    %cst_156 = arith.constant -1.000000e+00 : f32
    %385 = vector.broadcast %cst_156 : f32 to vector<64x128xf32>
    %386 = arith.mulf %384, %385 : vector<64x128xf32>
    %387 = vector.shape_cast %386 : vector<64x128xf32> to vector<8x8x128xf32>
    %388 = vector.extract_strided_slice %387 {offsets = [0, 0, 0], sizes = [1, 8, 128], strides = [1, 1, 1]} : vector<8x8x128xf32> to vector<1x8x128xf32>
    %389 = vector.shape_cast %388 : vector<1x8x128xf32> to vector<8x128xf32>
    %c0_157 = arith.constant 0 : index
    %c0_158 = arith.constant 0 : index
    %c0_159 = arith.constant 0 : index
    %390 = vector.load %arg8[%c0_157, %c0_158, %c0_159] : memref<8x8x128xf32, #tpu.memory_space<vmem>>, vector<8x1x128xf32>
    %391 = vector.shape_cast %390 : vector<8x1x128xf32> to vector<8x128xf32>
    %392 = vector.shape_cast %389 : vector<8x128xf32> to vector<8x1x128xf32>
    tpu.vector_store %arg8[%c0_157, %c0_158, %c0_159], %392 {strides = array<i32>} : memref<8x8x128xf32, #tpu.memory_space<vmem>>, vector<8x1x128xf32>,
    %393 = vector.extract_strided_slice %387 {offsets = [1, 0, 0], sizes = [1, 8, 128], strides = [1, 1, 1]} : vector<8x8x128xf32> to vector<1x8x128xf32>
    %394 = vector.shape_cast %393 : vector<1x8x128xf32> to vector<8x128xf32>
    %c0_160 = arith.constant 0 : index
    %c1_161 = arith.constant 1 : index
    %c0_162 = arith.constant 0 : index
    %395 = vector.load %arg8[%c0_160, %c1_161, %c0_162] : memref<8x8x128xf32, #tpu.memory_space<vmem>>, vector<8x1x128xf32>
    %396 = vector.shape_cast %395 : vector<8x1x128xf32> to vector<8x128xf32>
    %397 = vector.shape_cast %394 : vector<8x128xf32> to vector<8x1x128xf32>
    tpu.vector_store %arg8[%c0_160, %c1_161, %c0_162], %397 {strides = array<i32>} : memref<8x8x128xf32, #tpu.memory_space<vmem>>, vector<8x1x128xf32>,
    %398 = vector.extract_strided_slice %387 {offsets = [2, 0, 0], sizes = [1, 8, 128], strides = [1, 1, 1]} : vector<8x8x128xf32> to vector<1x8x128xf32>
    %399 = vector.shape_cast %398 : vector<1x8x128xf32> to vector<8x128xf32>
    %c0_163 = arith.constant 0 : index
    %c2_164 = arith.constant 2 : index
    %c0_165 = arith.constant 0 : index
    %400 = vector.load %arg8[%c0_163, %c2_164, %c0_165] : memref<8x8x128xf32, #tpu.memory_space<vmem>>, vector<8x1x128xf32>
    %401 = vector.shape_cast %400 : vector<8x1x128xf32> to vector<8x128xf32>
    %402 = vector.shape_cast %399 : vector<8x128xf32> to vector<8x1x128xf32>
    tpu.vector_store %arg8[%c0_163, %c2_164, %c0_165], %402 {strides = array<i32>} : memref<8x8x128xf32, #tpu.memory_space<vmem>>, vector<8x1x128xf32>,
    %403 = vector.extract_strided_slice %387 {offsets = [3, 0, 0], sizes = [1, 8, 128], strides = [1, 1, 1]} : vector<8x8x128xf32> to vector<1x8x128xf32>
    %404 = vector.shape_cast %403 : vector<1x8x128xf32> to vector<8x128xf32>
    %c0_166 = arith.constant 0 : index
    %c3_167 = arith.constant 3 : index
    %c0_168 = arith.constant 0 : index
    %405 = vector.load %arg8[%c0_166, %c3_167, %c0_168] : memref<8x8x128xf32, #tpu.memory_space<vmem>>, vector<8x1x128xf32>
    %406 = vector.shape_cast %405 : vector<8x1x128xf32> to vector<8x128xf32>
    %407 = vector.shape_cast %404 : vector<8x128xf32> to vector<8x1x128xf32>
    tpu.vector_store %arg8[%c0_166, %c3_167, %c0_168], %407 {strides = array<i32>} : memref<8x8x128xf32, #tpu.memory_space<vmem>>, vector<8x1x128xf32>,
    %408 = vector.extract_strided_slice %387 {offsets = [4, 0, 0], sizes = [1, 8, 128], strides = [1, 1, 1]} : vector<8x8x128xf32> to vector<1x8x128xf32>
    %409 = vector.shape_cast %408 : vector<1x8x128xf32> to vector<8x128xf32>
    %c0_169 = arith.constant 0 : index
    %c4_170 = arith.constant 4 : index
    %c0_171 = arith.constant 0 : index
    %410 = vector.load %arg8[%c0_169, %c4_170, %c0_171] : memref<8x8x128xf32, #tpu.memory_space<vmem>>, vector<8x1x128xf32>
    %411 = vector.shape_cast %410 : vector<8x1x128xf32> to vector<8x128xf32>
    %412 = vector.shape_cast %409 : vector<8x128xf32> to vector<8x1x128xf32>
    tpu.vector_store %arg8[%c0_169, %c4_170, %c0_171], %412 {strides = array<i32>} : memref<8x8x128xf32, #tpu.memory_space<vmem>>, vector<8x1x128xf32>,
    %413 = vector.extract_strided_slice %387 {offsets = [5, 0, 0], sizes = [1, 8, 128], strides = [1, 1, 1]} : vector<8x8x128xf32> to vector<1x8x128xf32>
    %414 = vector.shape_cast %413 : vector<1x8x128xf32> to vector<8x128xf32>
    %c0_172 = arith.constant 0 : index
    %c5_173 = arith.constant 5 : index
    %c0_174 = arith.constant 0 : index
    %415 = vector.load %arg8[%c0_172, %c5_173, %c0_174] : memref<8x8x128xf32, #tpu.memory_space<vmem>>, vector<8x1x128xf32>
    %416 = vector.shape_cast %415 : vector<8x1x128xf32> to vector<8x128xf32>
    %417 = vector.shape_cast %414 : vector<8x128xf32> to vector<8x1x128xf32>
    tpu.vector_store %arg8[%c0_172, %c5_173, %c0_174], %417 {strides = array<i32>} : memref<8x8x128xf32, #tpu.memory_space<vmem>>, vector<8x1x128xf32>,
    %418 = vector.extract_strided_slice %387 {offsets = [6, 0, 0], sizes = [1, 8, 128], strides = [1, 1, 1]} : vector<8x8x128xf32> to vector<1x8x128xf32>
    %419 = vector.shape_cast %418 : vector<1x8x128xf32> to vector<8x128xf32>
    %c0_175 = arith.constant 0 : index
    %c6_176 = arith.constant 6 : index
    %c0_177 = arith.constant 0 : index
    %420 = vector.load %arg8[%c0_175, %c6_176, %c0_177] : memref<8x8x128xf32, #tpu.memory_space<vmem>>, vector<8x1x128xf32>
    %421 = vector.shape_cast %420 : vector<8x1x128xf32> to vector<8x128xf32>
    %422 = vector.shape_cast %419 : vector<8x128xf32> to vector<8x1x128xf32>
    tpu.vector_store %arg8[%c0_175, %c6_176, %c0_177], %422 {strides = array<i32>} : memref<8x8x128xf32, #tpu.memory_space<vmem>>, vector<8x1x128xf32>,
    %423 = vector.extract_strided_slice %387 {offsets = [7, 0, 0], sizes = [1, 8, 128], strides = [1, 1, 1]} : vector<8x8x128xf32> to vector<1x8x128xf32>
    %424 = vector.shape_cast %423 : vector<1x8x128xf32> to vector<8x128xf32>
    %c0_178 = arith.constant 0 : index
    %c7_179 = arith.constant 7 : index
    %c0_180 = arith.constant 0 : index
    %425 = vector.load %arg8[%c0_178, %c7_179, %c0_180] : memref<8x8x128xf32, #tpu.memory_space<vmem>>, vector<8x1x128xf32>
    %426 = vector.shape_cast %425 : vector<8x1x128xf32> to vector<8x128xf32>
    %427 = vector.shape_cast %424 : vector<8x128xf32> to vector<8x1x128xf32>
    tpu.vector_store %arg8[%c0_178, %c7_179, %c0_180], %427 {strides = array<i32>} : memref<8x8x128xf32, #tpu.memory_space<vmem>>, vector<8x1x128xf32>,
    %c0_i32_181 = arith.constant 0 : i32
    %428 = arith.cmpi eq, %arg1, %c0_i32_181 : i32
    %429 = arith.extui %428 : i1 to i32
    %c0_i32_182 = arith.constant 0 : i32
    %430 = arith.cmpi ne, %429, %c0_i32_182 : i32
    scf.if %430 {
      %c0_183 = arith.constant 0 : index
      %c0_184 = arith.constant 0 : index
      %431 = vector.load %arg9[%c0_183, %c0_184] : memref<8x128xf32, #tpu.memory_space<vmem>>, vector<8x128xf32>
      tpu.vector_store %arg9[%c0_183, %c0_184], %369 {strides = array<i32>} : memref<8x128xf32, #tpu.memory_space<vmem>>, vector<8x128xf32>,
      %c0_185 = arith.constant 0 : index
      %c0_186 = arith.constant 0 : index
      %432 = vector.load %arg10[%c0_185, %c0_186] : memref<8x128xf32, #tpu.memory_space<vmem>>, vector<8x128xf32>
      tpu.vector_store %arg10[%c0_185, %c0_186], %367 {strides = array<i32>} : memref<8x128xf32, #tpu.memory_space<vmem>>, vector<8x128xf32>,
    } else {
    }
    return
  }
  func.func @transform_0(%arg0: i32, %arg1: i32) -> (i32, i32, i32) {
    %c0_i32 = arith.constant 0 : i32
    %c0_i32_0 = arith.constant 0 : i32
    return %arg0, %arg1, %c0_i32 : i32, i32, i32
  }
  func.func @transform_1(%arg0: i32, %arg1: i32) -> (i32, i32) {
    %c0_i32 = arith.constant 0 : i32
    %c0_i32_0 = arith.constant 0 : i32
    %c0_i32_1 = arith.constant 0 : i32
    return %c0_i32, %c0_i32_0 : i32, i32
  }
  func.func @transform_2(%arg0: i32, %arg1: i32) -> (i32, i32) {
    %c0_i32 = arith.constant 0 : i32
    %c0_i32_0 = arith.constant 0 : i32
    %c0_i32_1 = arith.constant 0 : i32
    return %c0_i32, %c0_i32_0 : i32, i32
  }
  func.func @transform_3(%arg0: i32, %arg1: i32) -> (i32, i32) {
    %c0_i32 = arith.constant 0 : i32
    %c0_i32_0 = arith.constant 0 : i32
    %c0_i32_1 = arith.constant 0 : i32
    return %c0_i32, %c0_i32_0 : i32, i32
  }
  func.func @transform_4(%arg0: i32, %arg1: i32) -> (i32, i32) {
    %c0_i32 = arith.constant 0 : i32
    %c0_i32_0 = arith.constant 0 : i32
    %c0_i32_1 = arith.constant 0 : i32
    return %c0_i32, %c0_i32_0 : i32, i32
  }
  func.func @transform_5(%arg0: i32, %arg1: i32) -> (i32, i32) {
    %c0_i32 = arith.constant 0 : i32
    %c0_i32_0 = arith.constant 0 : i32
    %c0_i32_1 = arith.constant 0 : i32
    return %c0_i32, %c0_i32_0 : i32, i32
  }
  func.func @transform_6(%arg0: i32, %arg1: i32) -> (i32, i32, i32) {
    %c0_i32 = arith.constant 0 : i32
    %c0_i32_0 = arith.constant 0 : i32
    return %arg0, %arg1, %c0_i32 : i32, i32, i32
  }
  func.func @transform_7(%arg0: i32, %arg1: i32) -> (i32, i32) {
    %c0_i32 = arith.constant 0 : i32
    %c0_i32_0 = arith.constant 0 : i32
    return %arg0, %c0_i32 : i32, i32
  }
  func.func @transform_8(%arg0: i32, %arg1: i32) -> (i32, i32) {
    %c0_i32 = arith.constant 0 : i32
    %c0_i32_0 = arith.constant 0 : i32
    return %arg0, %c0_i32 : i32, i32
  }
}

</mosaic_0001>

<bundles_post_ra>
// kernel: lstm_encoder_forward.1
= control target key start
LH: loop header
LB: loop body
LE: loop exit
PB: predicated region body
PF: predicated region fallthrough
CT: control target
= control target key end

     0   :  { %v5656_v3 = vmov 0.0   ;;  %vm385_vm0 = vcmask 1041409   ;;  %vm388_vm1 = vcmask 1042434   ;;  %vm391_vm2 = vcmask 1043459   ;;  %s5647_s1 = inlined_call_operand.vmem [shape: f32[128,512], index: 1, kind: input, shape index: {}]   ;;  %s5648_s2 = inlined_call_operand.vmem [shape: f32[128,512], index: 2, kind: input, shape index: {}]   ;;  %s5649_s0 = inlined_call_operand.vmem [shape: f32[8,8,128], index: 0, kind: input, shape index: {}]   ;;  %s5650_s3 = inlined_call_operand.vmem [shape: f32[1,512], index: 3, kind: input, shape index: {}]   ;;  %s5651_s4 = inlined_call_operand.vmem [shape: f32[128,128], index: 4, kind: input, shape index: {}]   ;;  %s5652_s8 = inlined_call_operand.vmem [shape: f32[8,128], index: 8, kind: output, shape index: {2}]   ;;  %s5653_s5 = inlined_call_operand.vmem [shape: f32[1,128], index: 5, kind: input, shape index: {}]   ;;  %s5654_s7 = inlined_call_operand.vmem [shape: f32[8,128], index: 7, kind: output, shape index: {1}]   ;;  %s5655_s6 = inlined_call_operand.vmem [shape: f32[8,8,128], index: 6, kind: output, shape index: {0}]  }
   0x1   :  { %v41_v0 = vld [vmem:[%s5647_s1 + $0x8] sm:$0xff]  ;;  %v40_v2 = vld [vmem:[%s5647_s1] sm:$0xff]  ;;  %190 = vmatprep.mubr.f32.mxu1 %v5656_v3  ;;  %1044 = vmatprep.mubr.f32.mxu0 %v5656_v3  ;;  %vm394_vm3 = vcmask 1044484   ;;  %vm397_vm4 = vcmask 1045509   ;;  %vm400_vm5 = vcmask 1046534   ;;  %vm403_vm6 = vcmask 1047559  }
   0x2   :  { %v45_v1 = vld [vmem:[%s5647_s1 + $0x28] sm:$0xff]  ;;  %v44_v5 = vld [vmem:[%s5647_s1 + $0x20] sm:$0xff] }
   0x3   :  { %v3135_v4 = vpack.c.bf16 %v45_v1, %v41_v0  ;;  %v49_v6 = vld [vmem:[%s5647_s1 + $0x48] sm:$0xff]  ;;  %v3137_v8 = vpack.c.bf16 %v44_v5, %v40_v2  ;;  %v48_v10 = vld [vmem:[%s5647_s1 + $0x40] sm:$0xff] }
   0x4   :  { %v53_v7 = vld [vmem:[%s5647_s1 + $0x68] sm:$0xff]  ;;  %v52_v11 = vld [vmem:[%s5647_s1 + $0x60] sm:$0xff] }
   0x5   :  { %v3139_v9 = vpack.c.bf16 %v53_v7, %v49_v6  ;;  %v57_v12 = vld [vmem:[%s5647_s1 + $0x88] sm:$0xff]  ;;  %3136 = vmatprep.subr.bf16.mxu1 %v3135_v4  ;;  %v3141_v14 = vpack.c.bf16 %v52_v11, %v48_v10  ;;  %v56_v16 = vld [vmem:[%s5647_s1 + $0x80] sm:$0xff] }
   0x6   :  { %v61_v13 = vld [vmem:[%s5647_s1 + $0xa8] sm:$0xff]  ;;  %3138 = vmatpush1.bf16.msra.mxu1 %v3137_v8  ;;  %v60_v17 = vld [vmem:[%s5647_s1 + $0xa0] sm:$0xff] }
   0x7   :  { %3140 = vmatprep.subr.bf16.mxu1 %v3139_v9  ;;  %v3143_v15 = vpack.c.bf16 %v61_v13, %v57_v12  ;;  %v65_v18 = vld [vmem:[%s5647_s1 + $0xc8] sm:$0xff]  ;;  %v3145_v20 = vpack.c.bf16 %v60_v17, %v56_v16  ;;  %v64_v22 = vld [vmem:[%s5647_s1 + $0xc0] sm:$0xff] }
   0x8   :  { %v69_v19 = vld [vmem:[%s5647_s1 + $0xe8] sm:$0xff]  ;;  %v68_v23 = vld [vmem:[%s5647_s1 + $0xe0] sm:$0xff] }
   0x9   :  { %v3147_v21 = vpack.c.bf16 %v69_v19, %v65_v18  ;;  %v73_v24 = vld [vmem:[%s5647_s1 + $0x108] sm:$0xff]  ;;  %v3149_v26 = vpack.c.bf16 %v68_v23, %v64_v22  ;;  %v72_v27 = vld [vmem:[%s5647_s1 + $0x100] sm:$0xff]  ;;  %v46_v22 = vld [vmem:[%s5647_s1 + $0x30] sm:$0xff] }
   0xa   :  { %3142 = vmatpush1.bf16.msra.mxu1 %v3141_v14  ;;  %v77_v25 = vld [vmem:[%s5647_s1 + $0x128] sm:$0xff]  ;;  %v76_v31 = vld [vmem:[%s5647_s1 + $0x120] sm:$0xff]  ;;  %v43_v14 = vld [vmem:[%s5647_s1 + $0x18] sm:$0xff] }
   0xb   :  { %3144 = vmatprep.subr.bf16.mxu1 %v3143_v15  ;;  %v911_v28 = vld [vmem:[%s5648_s2 + $0x8] sm:$0xff]  ;;  %v3151_v30 = vpack.c.bf16 %v77_v25, %v73_v24  ;;  %v910_v33 = vld [vmem:[%s5648_s2] sm:$0xff]  ;;  %v3153_v40 = vpack.c.bf16 %v76_v31, %v72_v27  ;;  %v47_v15 = vld [vmem:[%s5647_s1 + $0x38] sm:$0xff] }
   0xc   :  { %v915_v29 = vld [vmem:[%s5648_s2 + $0x28] sm:$0xff]  ;;  %v914_v34 = vld [vmem:[%s5648_s2 + $0x20] sm:$0xff]  ;;  %v51_v23 = vld [vmem:[%s5647_s1 + $0x58] sm:$0xff] }
   0xd   :  { %v3940_v32 = vpack.c.bf16 %v915_v29, %v911_v28  ;;  %v81_v35 = vld [vmem:[%s5647_s1 + $0x148] sm:$0xff]  ;;  %v3954_v37 = vpack.c.bf16 %v914_v34, %v910_v33  ;;  %v918_v42 = vld [vmem:[%s5648_s2 + $0x40] sm:$0xff]  ;;  %v55_v25 = vld [vmem:[%s5647_s1 + $0x78] sm:$0xff] }
   0xe   :  { %3146 = vmatpush1.bf16.msra.mxu1 %v3145_v20  ;;  %v85_v36 = vld [vmem:[%s5647_s1 + $0x168] sm:$0xff]  ;;  %v922_v43 = vld [vmem:[%s5648_s2 + $0x60] sm:$0xff]  ;;  %v3167_v20 = vpack.c.bf16 %v47_v15, %v43_v14  ;;  %v3171_v33 = vpack.c.bf16 %v55_v25, %v51_v23  ;;  %v50_v34 = vld [vmem:[%s5647_s1 + $0x50] sm:$0xff] }
   0xf   :  { %3148 = vmatprep.subr.bf16.mxu1 %v3147_v21  ;;  %5728 = vst [vmem:[#allocation6_spill] sm:$0xff] %v3940_v32  ;;  %3200 = vmatprep.subr.bf16.mxu0 %v3940_v32  ;;  %v919_v38 = vld [vmem:[%s5648_s2 + $0x48] sm:$0xff]  ;;  %v3155_v44 = vpack.c.bf16 %v85_v36, %v81_v35  ;;  %v80_v45 = vld [vmem:[%s5647_s1 + $0x140] sm:$0xff]  ;;  %v3981_v48 = vpack.c.bf16 %v922_v43, %v918_v42  ;;  %v42_v21 = vld [vmem:[%s5647_s1 + $0x10] sm:$0xff] }
  0x10   :  { %v923_v39 = vld [vmem:[%s5648_s2 + $0x68] sm:$0xff]  ;;  %3202 = vmatpush1.bf16.msra.mxu0 %v3954_v37  ;;  %v84_v46 = vld [vmem:[%s5647_s1 + $0x160] sm:$0xff]  ;;  %v3169_v31 = vpack.c.bf16 %v46_v22, %v42_v21  ;;  %v54_v35 = vld [vmem:[%s5647_s1 + $0x70] sm:$0xff] }
  0x11   :  { %v3964_v41 = vpack.c.bf16 %v923_v39, %v919_v38  ;;  %v89_v47 = vld [vmem:[%s5647_s1 + $0x188] sm:$0xff]  ;;  %v926_v53 = vld [vmem:[%s5648_s2 + $0x80] sm:$0xff]  ;;  %v3157_v55 = vpack.c.bf16 %v84_v46, %v80_v45  ;;  %v59_v36 = vld [vmem:[%s5647_s1 + $0x98] sm:$0xff] }
  0x12   :  { %3150 = vmatpush1.bf16.msra.mxu1 %v3149_v26  ;;  %v93_v49 = vld [vmem:[%s5647_s1 + $0x1a8] sm:$0xff]  ;;  %v930_v54 = vld [vmem:[%s5648_s2 + $0xa0] sm:$0xff]  ;;  %v63_v39 = vld [vmem:[%s5647_s1 + $0xb8] sm:$0xff] }
  0x13   :  { %3152 = vmatprep.subr.bf16.mxu1 %v3151_v30  ;;  %3204 = vmatprep.subr.bf16.mxu0 %v3964_v41  ;;  %v927_v50 = vld [vmem:[%s5648_s2 + $0x88] sm:$0xff]  ;;  %v88_v56 = vld [vmem:[%s5647_s1 + $0x180] sm:$0xff]  ;;  %v4008_v58 = vpack.c.bf16 %v930_v54, %v926_v53  ;;  %v3159_v59 = vpack.c.bf16 %v93_v49, %v89_v47  ;;  %v3173_v47 = vpack.c.bf16 %v54_v35, %v50_v34  ;;  %v67_v53 = vld [vmem:[%s5647_s1 + $0xd8] sm:$0xff] }
  0x14   :  { %v931_v51 = vld [vmem:[%s5648_s2 + $0xa8] sm:$0xff]  ;;  %v92_v57 = vld [vmem:[%s5647_s1 + $0x1a0] sm:$0xff]  ;;  %3206 = vmatpush1.bf16.msra.mxu0 %v3981_v48  ;;  %v3175_v49 = vpack.c.bf16 %v63_v39, %v59_v36  ;;  %v87_v14 = vld [vmem:[%s5647_s1 + $0x178] sm:$0xff] }
  0x15   :  { %v3993_v52 = vpack.c.bf16 %v931_v51, %v927_v50  ;;  %v97_v60 = vld [vmem:[%s5647_s1 + $0x1c8] sm:$0xff]  ;;  %v934_v1 = vld [vmem:[%s5648_s2 + $0xc0] sm:$0xff]  ;;  %v3161_v4 = vpack.c.bf16 %v92_v57, %v88_v56  ;;  %v58_v50 = vld [vmem:[%s5647_s1 + $0x90] sm:$0xff] }
  0x16   :  { %3154 = vmatpush1.bf16.msra.mxu1 %v3153_v40  ;;  %v935_v61 = vld [vmem:[%s5648_s2 + $0xc8] sm:$0xff]  ;;  %v938_v2 = vld [vmem:[%s5648_s2 + $0xe0] sm:$0xff]  ;;  %v62_v51 = vld [vmem:[%s5647_s1 + $0xb0] sm:$0xff] }
  0x17   :  { %3156 = vmatprep.subr.bf16.mxu1 %v3155_v44  ;;  %3208 = vmatprep.subr.bf16.mxu0 %v3993_v52  ;;  %v939_v62 = vld [vmem:[%s5648_s2 + $0xe8] sm:$0xff]  ;;  %v96_v5 = vld [vmem:[%s5647_s1 + $0x1c0] sm:$0xff]  ;;  %v4035_v6 = vpack.c.bf16 %v938_v2, %v934_v1  ;;  %v70_v1 = vld [vmem:[%s5647_s1 + $0xf0] sm:$0xff] }
  0x18   :  { %v101_v63 = vld [vmem:[%s5647_s1 + $0x1e8] sm:$0xff]  ;;  %v4023_v0 = vpack.c.bf16 %v939_v62, %v935_v61  ;;  %3210 = vmatpush1.bf16.msra.mxu0 %v4008_v58  ;;  %v100_v10 = vld [vmem:[%s5647_s1 + $0x1e0] sm:$0xff]  ;;  %v3177_v61 = vpack.c.bf16 %v62_v51, %v58_v50  ;;  %v91_v21 = vld [vmem:[%s5647_s1 + $0x198] sm:$0xff] }
  0x19   :  { %v943_v7 = vld [vmem:[%s5648_s2 + $0x108] sm:$0xff]  ;;  %v3163_v9 = vpack.c.bf16 %v101_v63, %v97_v60  ;;  %v942_v12 = vld [vmem:[%s5648_s2 + $0x100] sm:$0xff]  ;;  %v3165_v18 = vpack.c.bf16 %v100_v10, %v96_v5  ;;  %v4168_v60 = vld [vmem:[%s5649_s0 + $0x10] sm:$0xff] }
  0x1a   :  { %3158 = vmatpush1.bf16.msra.mxu1 %v3157_v55  ;;  %v947_v8 = vld [vmem:[%s5648_s2 + $0x128] sm:$0xff]  ;;  %3212 = vmatprep.subr.bf16.mxu0 %v4023_v0  ;;  %v946_v13 = vld [vmem:[%s5648_s2 + $0x120] sm:$0xff]  ;;  %v71_v55 = vld [vmem:[%s5647_s1 + $0xf8] sm:$0xff] }
  0x1b   :  { %3160 = vmatprep.subr.bf16.mxu1 %v3159_v59  ;;  %v4047_v11 = vpack.c.bf16 %v947_v8, %v943_v7  ;;  %v951_v16 = vld [vmem:[%s5648_s2 + $0x148] sm:$0xff]  ;;  %v4068_v19 = vpack.c.bf16 %v946_v13, %v942_v12  ;;  %v950_v26 = vld [vmem:[%s5648_s2 + $0x140] sm:$0xff]  ;;  %v3179_v62 = vpack.c.bf16 %v71_v55, %v67_v53  ;;  %v66_v63 = vld [vmem:[%s5647_s1 + $0xd0] sm:$0xff] }
  0x1c   :  { %v955_v17 = vld [vmem:[%s5648_s2 + $0x168] sm:$0xff]  ;;  %3214 = vmatpush1.bf16.msra.mxu0 %v4035_v6  ;;  %v954_v27 = vld [vmem:[%s5648_s2 + $0x160] sm:$0xff]  ;;  %v79_v5 = vld [vmem:[%s5647_s1 + $0x138] sm:$0xff]  ;;  %v3181_v8 = vpack.c.bf16 %v70_v1, %v66_v63 }
  0x1d   :  { %3216 = vmatprep.subr.bf16.mxu0 %v4047_v11  ;;  %v4080_v24 = vpack.c.bf16 %v955_v17, %v951_v16  ;;  %v959_v28 = vld [vmem:[%s5648_s2 + $0x188] sm:$0xff]  ;;  %v4100_v30 = vld [vmem:[%s5649_s0] sm:$0xff]  ;;  %v4113_v38 = vpack.c.bf16 %v954_v27, %v950_v26  ;;  %v4191_v7 = vld [vmem:[%s5649_s0 + $0x18] sm:$0xff] }
  0x1e   :  { %3162 = vmatpush1.bf16.msra.mxu1 %v3161_v4  ;;  %v963_v29 = vld [vmem:[%s5648_s2 + $0x1a8] sm:$0xff]  ;;  %v958_v42 = vld [vmem:[%s5648_s2 + $0x180] sm:$0xff]  ;;  %v75_v4 = vld [vmem:[%s5647_s1 + $0x118] sm:$0xff] }
  0x1f   :  { %3164 = vmatprep.subr.bf16.mxu1 %v3163_v9  ;;  %v4118_v40 = vpack.c.bf16 %v963_v29, %v959_v28  ;;  %v962_v43 = vld [vmem:[%s5648_s2 + $0x1a0] sm:$0xff]  ;;  %v967_v44 = vld [vmem:[%s5648_s2 + $0x1c8] sm:$0xff]  ;;  %v3183_v9 = vpack.c.bf16 %v79_v5, %v75_v4  ;;  %v74_v10 = vld [vmem:[%s5647_s1 + $0x110] sm:$0xff] }
  0x20   :  { %3218 = vmatpush1.bf16.msra.mxu0 %v4068_v19  ;;  %v971_v45 = vld [vmem:[%s5648_s2 + $0x1e8] sm:$0xff]  ;;  %v4149_v54 = vpack.c.bf16 %v962_v43, %v958_v42  ;;  %v966_v57 = vld [vmem:[%s5648_s2 + $0x1c0] sm:$0xff]  ;;  %v78_v12 = vld [vmem:[%s5647_s1 + $0x130] sm:$0xff] }
  0x21   :  { %3220 = vmatprep.subr.bf16.mxu0 %v4080_v24  ;;  %v4137_v46 = vld [vmem:[%s5649_s0 + $0x8] sm:$0xff]  ;;  %v4155_v56 = vpack.c.bf16 %v971_v45, %v967_v44  ;;  %v970_v59 = vld [vmem:[%s5648_s2 + $0x1e0] sm:$0xff]  ;;  %v83_v13 = vld [vmem:[%s5647_s1 + $0x158] sm:$0xff]  ;;  %v3185_v16 = vpack.c.bf16 %v78_v12, %v74_v10 }
  0x22   :  { %3166 = vmatpush1.bf16.msra.mxu1 %v3165_v18  ;;  %v4177_v2 = vpack.c.bf16 %v970_v59, %v966_v57  ;;  %v4212_v15 = vld [vmem:[%s5649_s0 + $0x20] sm:$0xff]  ;;  %v3187_v17 = vpack.c.bf16 %v87_v14, %v83_v13  ;;  %v82_v18 = vld [vmem:[%s5647_s1 + $0x150] sm:$0xff]  ;;  %v95_v22 = vld [vmem:[%s5647_s1 + $0x1b8] sm:$0xff] }
  0x23   :  { %3168 = vmatprep.subr.bf16.mxu1 %v3167_v20  ;;  %v86_v20 = vld [vmem:[%s5647_s1 + $0x170] sm:$0xff]  ;;  %v4235_v23 = vld [vmem:[%s5649_s0 + $0x28] sm:$0xff]  ;;  %v3191_v26 = vpack.c.bf16 %v95_v22, %v91_v21  ;;  %v99_v29 = vld [vmem:[%s5647_s1 + $0x1d8] sm:$0xff] }
  0x24   :  { %3222 = vmatpush1.bf16.msra.mxu0 %v4113_v38  ;;  %5729 = vst [vmem:[#allocation7_spill] sm:$0xff] %v4177_v2  ;;  %v3189_v25 = vpack.c.bf16 %v86_v20, %v82_v18  ;;  %v90_v27 = vld [vmem:[%s5647_s1 + $0x190] sm:$0xff]  ;;  %v913_v42 = vld [vmem:[%s5648_s2 + $0x18] sm:$0xff] }
  0x25   :  { %191 = vmatmul.mubr.f32.vlgmr.msra.gmra.mrb[0].mxu1 %v4100_v30  ;;  %3224 = vmatprep.subr.bf16.mxu0 %v4118_v40  ;;  %v94_v28 = vld [vmem:[%s5647_s1 + $0x1b0] sm:$0xff]  ;;  %v917_v43 = vld [vmem:[%s5648_s2 + $0x38] sm:$0xff] }
  0x26   :  { %3170 = vmatpush1.bf16.msra.mxu1 %v3169_v31  ;;  %196 = vmatprep.mubr.f32.mxu1 %v5656_v3  ;;  %v103_v31 = vld [vmem:[%s5647_s1 + $0x1f8] sm:$0xff]  ;;  %v3193_v34 = vpack.c.bf16 %v94_v28, %v90_v27  ;;  %v98_v36 = vld [vmem:[%s5647_s1 + $0x1d0] sm:$0xff] }
  0x27   :  { %3172 = vmatprep.subr.bf16.mxu1 %v3171_v33  ;;  %v4256_v33 = vld [vmem:[%s5649_s0 + $0x30] sm:$0xff]  ;;  %v3195_v35 = vpack.c.bf16 %v103_v31, %v99_v29  ;;  %v4277_v44 = vld [vmem:[%s5649_s0 + $0x38] sm:$0xff] }
  0x28   :  { %3226 = vmatpush1.bf16.msra.mxu0 %v4149_v54  ;;  %v102_v39 = vld [vmem:[%s5647_s1 + $0x1f0] sm:$0xff]  ;;  %v921_v51 = vld [vmem:[%s5648_s2 + $0x58] sm:$0xff] }
  0x29   :  { %197 = vmatmul.mubr.f32.gmra.mrb[2].mxu1 %v4137_v46  ;;  %3228 = vmatprep.subr.bf16.mxu0 %v4155_v56  ;;  %v3197_v45 = vpack.c.bf16 %v102_v39, %v98_v36  ;;  %v916_v50 = vld [vmem:[%s5648_s2 + $0x30] sm:$0xff]  ;;  %v925_v53 = vld [vmem:[%s5648_s2 + $0x78] sm:$0xff] }
  0x2a   :  { %3174 = vmatpush1.bf16.msra.mxu1 %v3173_v47  ;;  %202 = vmatprep.mubr.f32.mxu1 %v5656_v3  ;;  %v4279_v47 = vpack.c.bf16 %v917_v43, %v913_v42  ;;  %v4300_v57 = vpack.c.bf16 %v925_v53, %v921_v51  ;;  %v920_v59 = vld [vmem:[%s5648_s2 + $0x50] sm:$0xff]  ;;  %v933_v63 = vld [vmem:[%s5648_s2 + $0xb8] sm:$0xff]  ;;  %v106_v51 = vlaneseq }
  0x2b   :  { %3176 = vmatprep.subr.bf16.mxu1 %v3175_v49  ;;  %v912_v49 = vld [vmem:[%s5648_s2 + $0x10] sm:$0xff]  ;;  %v945_v14 = vld [vmem:[%s5648_s2 + $0x118] sm:$0xff] }
  0x2c   :  { %3230 = vmatpush1.bf16.msra.mxu0 %v4177_v2  ;;  %5730 = vst [vmem:[#allocation8_spill] sm:$0xff] %v4279_v47  ;;  %v4297_v55 = vpack.c.bf16 %v916_v50, %v912_v49  ;;  %v928_v5 = vld [vmem:[%s5648_s2 + $0x90] sm:$0xff]  ;;  %v953_v21 = vld [vmem:[%s5648_s2 + $0x158] sm:$0xff] }
  0x2d   :  { %203 = vmatmul.mubr.f32.gmra.mrb[4].mxu1 %v4168_v60  ;;  %3264 = vmatprep.subr.bf16.mxu0 %v3940_v32  ;;  %v936_v13 = vld [vmem:[%s5648_s2 + $0xd0] sm:$0xff]  ;;  %v957_v22 = vld [vmem:[%s5648_s2 + $0x178] sm:$0xff] }
  0x2e   :  { %3178 = vmatpush1.bf16.msra.mxu1 %v3177_v61  ;;  %208 = vmatprep.mubr.f32.mxu1 %v5656_v3  ;;  %v924_v61 = vld [vmem:[%s5648_s2 + $0x70] sm:$0xff]  ;;  %v961_v28 = vld [vmem:[%s5648_s2 + $0x198] sm:$0xff] }
  0x2f   :  { %3180 = vmatprep.subr.bf16.mxu1 %v3179_v62  ;;  %1045 = vmatmul.mubr.f32.vlgmr.msra.gmra.mrb[0].mxu0 %v5656_v3  ;;  %v929_v62 = vld [vmem:[%s5648_s2 + $0x98] sm:$0xff]  ;;  %v4319_v1 = vpack.c.bf16 %v924_v61, %v920_v59  ;;  %v944_v20 = vld [vmem:[%s5648_s2 + $0x110] sm:$0xff]  ;;  %v4464_v61 = vshrl.u32 %v106_v51, 7 }
  0x30   :  { %3266 = vmatpush1.bf16.msra.mxu0 %v3954_v37  ;;  %1213 = vmatprep.mubr.f32.mxu0 %v5656_v3  ;;  %v4322_v4 = vpack.c.bf16 %v933_v63, %v929_v62  ;;  %v952_v27 = vld [vmem:[%s5648_s2 + $0x150] sm:$0xff]  ;;  %v965_v29 = vld [vmem:[%s5648_s2 + $0x1b8] sm:$0xff] }
  0x31   :  { %209 = vmatmul.mubr.f32.gmra.mrb[6].mxu1 %v4191_v7  ;;  %3268 = vmatprep.subr.bf16.mxu0 %v3964_v41  ;;  %v964_v36 = vld [vmem:[%s5648_s2 + $0x1b0] sm:$0xff]  ;;  %v973_v39 = vld [vmem:[%s5648_s2 + $0x1f8] sm:$0xff]  ;;  %5732 = vst [vmem:[#allocation10_spill] sm:$0xff] %v4464_v61 }
  0x32   :  { %3182 = vmatpush1.bf16.msra.mxu1 %v3181_v8  ;;  %214 = vmatprep.mubr.f32.mxu1 %v5656_v3  ;;  %v937_v8 = vld [vmem:[%s5648_s2 + $0xd8] sm:$0xff]  ;;  %v972_v49 = vld [vmem:[%s5648_s2 + $0x1f0] sm:$0xff] }
  0x33   :  { %3184 = vmatprep.subr.bf16.mxu1 %v3183_v9  ;;  %v941_v9 = vld [vmem:[%s5648_s2 + $0xf8] sm:$0xff] }
  0x34   :  { %3270 = vmatpush1.bf16.msra.mxu0 %v3981_v48  ;;  %v4344_v12 = vpack.c.bf16 %v941_v9, %v937_v8  ;;  %v4470_v8 = vld [vmem:[%s5650_s3] sm:$0xf]  ;;  %v112_v9 = vsub.s32 1, %v4464_v61 }
  0x35   :  { %215 = vmatmul.mubr.f32.gmra.mrb[8].mxu1 %v4212_v15  ;;  %3272 = vmatprep.subr.bf16.mxu0 %v3993_v52 }
  0x36   :  { %3186 = vmatpush1.bf16.msra.mxu1 %v3185_v16  ;;  %220 = vmatprep.mubr.f32.mxu1 %v5656_v3  ;;  %v949_v16 = vld [vmem:[%s5648_s2 + $0x138] sm:$0xff] }
  0x37   :  { %3188 = vmatprep.subr.bf16.mxu1 %v3187_v17  ;;  %v4366_v18 = vpack.c.bf16 %v949_v16, %v945_v14 }
  0x38   :  { %3274 = vmatpush1.bf16.msra.mxu0 %v4008_v58 }
  0x39   :  { %221 = vmatmul.mubr.f32.gmra.mrb[10].mxu1 %v4235_v23  ;;  %3276 = vmatprep.subr.bf16.mxu0 %v4023_v0 }
  0x3a   :  { %3190 = vmatpush1.bf16.msra.mxu1 %v3189_v25  ;;  %226 = vmatprep.mubr.f32.mxu1 %v5656_v3 }
  0x3b   :  { %3192 = vmatprep.subr.bf16.mxu1 %v3191_v26  ;;  %v4388_v26 = vpack.c.bf16 %v957_v22, %v953_v21 }
  0x3c   :  { %3278 = vmatpush1.bf16.msra.mxu0 %v4035_v6 }
  0x3d   :  { %227 = vmatmul.mubr.f32.gmra.mrb[12].mxu1 %v4256_v33  ;;  %3280 = vmatprep.subr.bf16.mxu0 %v4047_v11 }
  0x3e   :  { %3194 = vmatpush1.bf16.msra.mxu1 %v3193_v34  ;;  %232 = vmatprep.mubr.f32.mxu1 %v5656_v3  ;;  %v4408_v34 = vpack.c.bf16 %v965_v29, %v961_v28 }
  0x3f   :  { %3196 = vmatprep.subr.bf16.mxu1 %v3195_v35  ;;  %v960_v35 = vld [vmem:[%s5648_s2 + $0x190] sm:$0xff] }
  0x40   :  { %3282 = vmatpush1.bf16.msra.mxu0 %v4068_v19  ;;  %v4425_v42 = vpack.c.bf16 %v964_v36, %v960_v35 }
  0x41   :  { %233 = vmatmul.mubr.f32.gmra.mrb[14].mxu1 %v4277_v44  ;;  %3284 = vmatprep.subr.bf16.mxu0 %v4080_v24 }
  0x42   :  { %3198 = vmatpush1.bf16.msra.mxu1 %v3197_v45  ;;  %303 = vmatprep.mubr.f32.mxu1 %v5656_v3  ;;  %v968_v45 = vld [vmem:[%s5648_s2 + $0x1d0] sm:$0xff] }
  0x43   :  { %3232 = vmatprep.subr.bf16.mxu1 %v4279_v47 }
  0x44   :  { %3286 = vmatpush1.bf16.msra.mxu0 %v4113_v38 }
  0x45   :  { %304 = vmatmul.mubr.f32.vlgmr.msra.gmra.mrb[16].mxu1 %v4100_v30  ;;  %v932_v30 = vld [vmem:[%s5648_s2 + $0xb0] sm:$0xff]  ;;  %3288 = vmatprep.subr.bf16.mxu0 %v4118_v40 }
  0x46   :  { %3234 = vmatpush1.bf16.msra.mxu1 %v4297_v55  ;;  %309 = vmatprep.mubr.f32.mxu1 %v5656_v3  ;;  %v4341_v10 = vpack.c.bf16 %v932_v30, %v928_v5  ;;  %v108_v5 = vsub.s32 0, %v4464_v61 }
  0x47   :  { %3236 = vmatprep.subr.bf16.mxu1 %v4300_v57 }
  0x48   :  { %3290 = vmatpush1.bf16.msra.mxu0 %v4149_v54  ;;  %v109_v16 = vrot.slane %v4470_v8, %v108_v5 }
  0x49   :  { %310 = vmatmul.mubr.f32.gmra.mrb[18].mxu1 %v4137_v46  ;;  %v940_v46 = vld [vmem:[%s5648_s2 + $0xf0] sm:$0xff]  ;;  %3292 = vmatprep.subr.bf16.mxu0 %v4155_v56 }
  0x4a   :  { %3238 = vmatpush1.bf16.msra.mxu1 %v4319_v1  ;;  %315 = vmatprep.mubr.f32.mxu1 %v5656_v3  ;;  %v4363_v17 = vpack.c.bf16 %v940_v46, %v936_v13 }
  0x4b   :  { %3240 = vmatprep.subr.bf16.mxu1 %v4322_v4 }
  0x4c   :  { %3294 = vmatpush1.bf16.msra.mxu0 %v4177_v2 }
  0x4d   :  { %316 = vmatmul.mubr.f32.gmra.mrb[20].mxu1 %v4168_v60  ;;  %v948_v60 = vld [vmem:[%s5648_s2 + $0x130] sm:$0xff]  ;;  %3328 = vmatprep.subr.bf16.mxu0 %v3940_v32 }
  0x4e   :  { %3242 = vmatpush1.bf16.msra.mxu1 %v4341_v10  ;;  %321 = vmatprep.mubr.f32.mxu1 %v5656_v3  ;;  %v4385_v25 = vpack.c.bf16 %v948_v60, %v944_v20  ;;  %v113_v60 = vrot.slane %v4470_v8, %v112_v9 }
  0x4f   :  { %3244 = vmatprep.subr.bf16.mxu1 %v4344_v12 }
  0x51   :  { %322 = vmatmul.mubr.f32.gmra.mrb[22].mxu1 %v4191_v7  ;;  %v956_v7 = vld [vmem:[%s5648_s2 + $0x170] sm:$0xff] }
  0x52   :  { %3246 = vmatpush1.bf16.msra.mxu1 %v4363_v17  ;;  %327 = vmatprep.mubr.f32.mxu1 %v5656_v3  ;;  %v4405_v31 = vpack.c.bf16 %v956_v7, %v952_v27 }
  0x53   :  { %3248 = vmatprep.subr.bf16.mxu1 %v4366_v18 }
  0x55   :  { %328 = vmatmul.mubr.f32.gmra.mrb[24].mxu1 %v4212_v15  ;;  %v969_v15 = vld [vmem:[%s5648_s2 + $0x1d8] sm:$0xff] }
  0x56   :  { %3250 = vmatpush1.bf16.msra.mxu1 %v4385_v25  ;;  %333 = vmatprep.mubr.f32.mxu1 %v5656_v3  ;;  %v4428_v43 = vpack.c.bf16 %v973_v39, %v969_v15 }
  0x57   :  { %3252 = vmatprep.subr.bf16.mxu1 %v4388_v26 }
  0x59   :  { %334 = vmatmul.mubr.f32.gmra.mrb[26].mxu1 %v4235_v23  ;;  %v4439_v23 = vpack.c.bf16 %v972_v49, %v968_v45 }
  0x5a   :  { %3254 = vmatpush1.bf16.msra.mxu1 %v4405_v31  ;;  %339 = vmatprep.mubr.f32.mxu1 %v5656_v3 }
  0x5b   :  { %3256 = vmatprep.subr.bf16.mxu1 %v4408_v34  ;;  %5731 = vst [vmem:[#allocation9_spill] sm:$0xff] %v4439_v23 }
  0x5d   :  { %340 = vmatmul.mubr.f32.gmra.mrb[28].mxu1 %v4256_v33 }
  0x5e   :  { %3258 = vmatpush1.bf16.msra.mxu1 %v4425_v42  ;;  %345 = vmatprep.mubr.f32.mxu1 %v5656_v3 }
  0x5f   :  { %3260 = vmatprep.subr.bf16.mxu1 %v4428_v43 }
  0x61   :  { %346 = vmatmul.mubr.f32.gmra.mrb[30].mxu1 %v4277_v44 }
  0x62   :  { %3262 = vmatpush1.bf16.msra.mxu1 %v4439_v23  ;;  %1115 = vmatprep.mubr.f32.mxu1 %v5656_v3 }
  0x63   :  { %3296 = vmatprep.subr.bf16.mxu1 %v4279_v47 }
  0x65   :  { %1116 = vmatmul.mubr.f32.vlgmr.msra.gmra.mrb[32].mxu1 %v5656_v3 }
  0x66   :  { %3298 = vmatpush1.bf16.msra.mxu1 %v4297_v55  ;;  %1284 = vmatprep.mubr.f32.mxu1 %v5656_v3 }
  0x67   :  { %3300 = vmatprep.subr.bf16.mxu1 %v4300_v57 }
  0x6a   :  { %3302 = vmatpush1.bf16.msra.mxu1 %v4319_v1 }
  0x6b   :  { %3304 = vmatprep.subr.bf16.mxu1 %v4322_v4 }
  0x6e   :  { %3306 = vmatpush1.bf16.msra.mxu1 %v4341_v10 }
  0x6f   :  { %3308 = vmatprep.subr.bf16.mxu1 %v4344_v12 }
  0x72   :  { %3310 = vmatpush1.bf16.msra.mxu1 %v4363_v17 }
  0x73   :  { %3312 = vmatprep.subr.bf16.mxu1 %v4366_v18 }
  0x76   :  { %3314 = vmatpush1.bf16.msra.mxu1 %v4385_v25 }
  0x77   :  { %3316 = vmatprep.subr.bf16.mxu1 %v4388_v26 }
  0x7a   :  { %3318 = vmatpush1.bf16.msra.mxu1 %v4405_v31 }
  0x7b   :  { %3320 = vmatprep.subr.bf16.mxu1 %v4408_v34 }
  0x7e   :  { %3322 = vmatpush1.bf16.msra.mxu1 %v4425_v42 }
  0x7f   :  { %3324 = vmatprep.subr.bf16.mxu1 %v4428_v43 }
  0x82   :  { %3326 = vmatpush1.bf16.msra.mxu1 %v4439_v23 }
  0x83   :  { %3360 = vmatprep.subr.bf16.mxu1 %v4279_v47 }
  0xf8   :  { %v192_v33 = vpop.f32.mrb[0].mxu1 }
  0xf9   :  { %v194_v44 = vpop.f32.mrb[1].mxu1 }
  0xfc   :  { %v198_v50 = vpop.f32.mrb[2].mxu1 }
  0xfd   :  { %v200_v53 = vpop.f32.mrb[3].mxu1  ;;  %v4479_v21 = vadd.f32 %v198_v50, %v109_v16 }
  0xfe   :  { %v4481_v22 = vadd.f32 %v200_v53, %v113_v60 }
  0xff   :  { %5733 = vst [vmem:[#allocation11_spill] sm:$0xff] %v4479_v21  ;;  %v384_v49 = vrot.slane %v4479_v21, 7 }
 0x100   :  { %v204_v59 = vpop.f32.mrb[4].mxu1  ;;  %5734 = vst [vmem:[#allocation12_spill] sm:$0xff] %v4481_v22 }
 0x101   :  { %v206_v62 = vpop.f32.mrb[5].mxu1  ;;  %v4483_v27 = vadd.f32 %v204_v59, %v109_v16  ;;  %v405_v59 = vrot.slane %v4481_v22, 7 }
 0x102   :  { %v4473_v13 = vpop.f32.mrb[0].mxu0  ;;  %v4485_v28 = vadd.f32 %v206_v62, %v113_v60  ;;  %v4502_v62 = vadd.f32 %v192_v33, %v109_v16 }
 0x103   :  { %v4475_v46 = vpop.f32.mrb[1].mxu0  ;;  %5735 = vst [vmem:[#allocation13_spill] sm:$0xff] %v4483_v27  ;;  %v387_v53 = vrot.slane %v4483_v27, 6 }
 0x104   :  { %v210_v63 = vpop.f32.mrb[6].mxu1  ;;  %5736 = vst [vmem:[#allocation14_spill] sm:$0xff] %v4485_v28  ;;  %5743 = vst [vmem:[#allocation21_spill] sm:$0xff] %v4502_v62  ;;  %v407_v9 = vrot.slane %v4485_v28, 6  ;;  %v386_v3 = vsel %vm385_vm0, %v384_v49, %v4502_v62 }
 0x105   :  { %v212_v30 = vpop.f32.mrb[7].mxu1  ;;  %v4487_v29 = vadd.f32 %v210_v63, %v109_v16  ;;  %v389_v21 = vsel %vm388_vm1, %v387_v53, %v386_v3 }
 0x106   :  { %v4489_v36 = vadd.f32 %v212_v30, %v113_v60 }
 0x107   :  { %5737 = vst [vmem:[#allocation15_spill] sm:$0xff] %v4487_v29  ;;  %v390_v30 = vrot.slane %v4487_v29, 5 }
 0x108   :  { %v216_v14 = vpop.f32.mrb[8].mxu1  ;;  %5738 = vst [vmem:[#allocation16_spill] sm:$0xff] %v4489_v36 }
 0x109   :  { %v218_v20 = vpop.f32.mrb[9].mxu1  ;;  %v4491_v15 = vadd.f32 %v216_v14, %v109_v16  ;;  %v4508_v14 = vadd.f32 %v194_v44, %v113_v60  ;;  %v392_v49 = vsel %vm391_vm2, %v390_v30, %v389_v21 }
 0x10a   :  { %v4493_v39 = vadd.f32 %v218_v20, %v113_v60 }
 0x10b   :  { %5739 = vst [vmem:[#allocation17_spill] sm:$0xff] %v4491_v15  ;;  %5745 = vst [vmem:[#allocation23_spill] sm:$0xff] %v4508_v14 }
 0x10c   :  { %v222_v7 = vpop.f32.mrb[10].mxu1  ;;  %5740 = vst [vmem:[#allocation18_spill] sm:$0xff] %v4493_v39 }
 0x10d   :  { %v224_v35 = vpop.f32.mrb[11].mxu1  ;;  %v4495_v45 = vadd.f32 %v222_v7, %v109_v16  ;;  %v393_v7 = vrot.slane %v4491_v15, 4 }
 0x10e   :  { %v4498_v50 = vadd.f32 %v224_v35, %v113_v60  ;;  %v409_v35 = vrot.slane %v4489_v36, 5 }
 0x10f   :  { %5741 = vst [vmem:[#allocation19_spill] sm:$0xff] %v4495_v45  ;;  %v396_v33 = vrot.slane %v4495_v45, 3  ;;  %v395_v3 = vsel %vm394_vm3, %v393_v7, %v392_v49 }
 0x110   :  { %5742 = vst [vmem:[#allocation20_spill] sm:$0xff] %v4498_v50  ;;  %v228_v51 = vpop.f32.mrb[12].mxu1  ;;  %v413_v15 = vrot.slane %v4498_v50, 3 }
 0x111   :  { %v4504_v63 = vadd.f32 %v228_v51, %v109_v16  ;;  %v230_v5 = vpop.f32.mrb[13].mxu1  ;;  %v411_v51 = vrot.slane %v4493_v39, 4 }
 0x112   :  { %v4510_v20 = vadd.f32 %v230_v5, %v113_v60  ;;  %v406_v5 = vsel %vm385_vm0, %v405_v59, %v4508_v14  ;;  %v398_v59 = vsel %vm397_vm4, %v396_v33, %v395_v3  ;;  %v116_v33 = vsub.s32 2, %v4464_v61 }
 0x113   :  { %5744 = vst [vmem:[#allocation22_spill] sm:$0xff] %v4504_v63  ;;  %v399_v44 = vrot.slane %v4504_v63, 2  ;;  %v408_v29 = vsel %vm388_vm1, %v407_v9, %v406_v5 }
 0x114   :  { %5746 = vst [vmem:[#allocation24_spill] sm:$0xff] %v4510_v20  ;;  %v234_v22 = vpop.f32.mrb[14].mxu1  ;;  %v415_v45 = vrot.slane %v4510_v20, 2  ;;  %v410_v53 = vsel %vm391_vm2, %v409_v35, %v408_v29 }
 0x115   :  { %v4523_v28 = vadd.f32 %v234_v22, %v109_v16  ;;  %v236_v36 = vpop.f32.mrb[15].mxu1  ;;  %v412_v22 = vsel %vm394_vm3, %v411_v51, %v410_v53  ;;  %v401_v21 = vsel %vm400_vm5, %v399_v44, %v398_v59  ;;  %v120_v44 = vsub.s32 3, %v4464_v61 }
 0x116   :  { %v4528_v39 = vadd.f32 %v236_v36, %v113_v60  ;;  %v414_v30 = vsel %vm397_vm4, %v413_v15, %v412_v22  ;;  %v4546_v15 = vrot.slane %v4470_v8, %v116_v33 }
 0x117   :  { %5747 = vst [vmem:[#allocation25_spill] sm:$0xff] %v4523_v28  ;;  %v402_v16 = vrot.slane %v4523_v28, 1  ;;  %v416_v29 = vsel %vm400_vm5, %v415_v45, %v414_v30  ;;  %v4549_v53 = vrot.slane %v4470_v8, %v120_v44 }
 0x118   :  { %5748 = vst [vmem:[#allocation26_spill] sm:$0xff] %v4528_v39  ;;  %v305_v50 = vpop.f32.mrb[16].mxu1  ;;  %v417_v60 = vrot.slane %v4528_v39, 1 }
 0x119   :  { %v307_v36 = vpop.f32.mrb[17].mxu1  ;;  %v404_v9 = vsel %vm403_vm6, %v402_v16, %v401_v21  ;;  %v4555_v59 = vadd.f32 %v305_v50, %v4546_v15 }
 0x11a   :  { %v1122_v7 = vadd.f32 %v4473_v13, %v404_v9  ;;  %v418_v35 = vsel %vm403_vm6, %v417_v60, %v416_v29  ;;  %v4565_v9 = vadd.f32 %v307_v36, %v4549_v53 }
 0x11b   :  { %v1123_v51 = vadd.f32 %v4475_v46, %v418_v35  ;;  %v548_v33 = vrot.slane %v4555_v59, 2  ;;  %v483_v44 = vrot.slane %v4555_v59, 1 }
 0x11c   :  { %v311_v5 = vpop.f32.mrb[18].mxu1  ;;  %v1126_v16 = vmul.f32 0.5, %v1122_v7  ;;  %5750 = vst [vmem:[#allocation28_spill] sm:$0xff] %v4565_v9 }
 0x11d   :  { %v313_v49 = vpop.f32.mrb[19].mxu1  ;;  %v4552_v45 = vadd.f32 %v311_v5, %v4546_v15  ;;  %v1130_v30 = vmul.f32 0.5, %v1123_v51 }
 0x11e   :  { %v4558_v46 = vadd.f32 %v313_v49, %v4549_v53  ;;  %3745 = vtanh.f32 %v1126_v16 }
 0x11f   :  { %v549_v8 = vrot.slane %v4552_v45, 1  ;;  %v419_v29 = vrot.slane %v4552_v45, 7  ;;  %v614_v36 = vrot.slane %v4552_v45, 2  ;;  %3747 = vtanh.f32 %v1130_v30 }
 0x120   :  { %v317_v3 = vpop.f32.mrb[20].mxu1  ;;  %5749 = vst [vmem:[#allocation27_spill] sm:$0xff] %v4558_v46  ;;  %v433_v7 = vrot.slane %v4558_v46, 7  ;;  %v484_v46 = vsel %vm385_vm0, %v4552_v45, %v483_v44 }
 0x121   :  { %v319_v13 = vpop.f32.mrb[21].mxu1  ;;  %v4561_v22 = vadd.f32 %v317_v3, %v4546_v15  ;;  %v420_v16 = vsel %vm385_vm0, %v419_v29, %v4555_v59 }
 0x122   :  { %v4569_v50 = vadd.f32 %v319_v13, %v4549_v53  ;;  %v550_v13 = vsel %vm385_vm0, %v549_v8, %v548_v33 }
 0x123   :  { %v421_v5 = vrot.slane %v4561_v22, 6  ;;  %v485_v39 = vrot.slane %v4561_v22, 7  ;;  %v616_v33 = vrot.slane %v4561_v22, 1  ;;  %v551_v29 = vsel %vm388_vm1, %v4561_v22, %v550_v13 }
 0x124   :  { %v323_v21 = vpop.f32.mrb[22].mxu1  ;;  %5751 = vst [vmem:[#allocation29_spill] sm:$0xff] %v4569_v50  ;;  %v435_v8 = vrot.slane %v4569_v50, 6 }
 0x125   :  { %v325_v60 = vpop.f32.mrb[23].mxu1  ;;  %v4572_v35 = vadd.f32 %v323_v21, %v4546_v15  ;;  %v613_v21 = vrot.slane %v4555_v59, 3 }
 0x126   :  { %v4580_v49 = vadd.f32 %v325_v60, %v4549_v53  ;;  %v434_v60 = vsel %vm385_vm0, %v433_v7, %v4565_v9 }
 0x127   :  { %v423_v30 = vrot.slane %v4572_v35, 5  ;;  %v487_v28 = vrot.slane %v4572_v35, 6  ;;  %v615_v44 = vsel %vm385_vm0, %v614_v36, %v613_v21  ;;  %v552_v50 = vrot.slane %v4572_v35, 7 }
 0x128   :  { %v329_v51 = vpop.f32.mrb[24].mxu1  ;;  %5752 = vst [vmem:[#allocation30_spill] sm:$0xff] %v4580_v49  ;;  %v437_v9 = vrot.slane %v4580_v49, 5  ;;  %v617_v21 = vsel %vm388_vm1, %v616_v33, %v615_v44 }
 0x129   :  { %v331_v3 = vpop.f32.mrb[25].mxu1  ;;  %v4585_v61 = vadd.f32 %v329_v51, %v4546_v15  ;;  %v422_v51 = vsel %vm388_vm1, %v421_v5, %v420_v16  ;;  %v486_v16 = vsel %vm388_vm1, %v485_v39, %v484_v46 }
 0x12a   :  { %v4603_v63 = vadd.f32 %v331_v3, %v4549_v53  ;;  %v424_v3 = vsel %vm391_vm2, %v423_v30, %v422_v51  ;;  %v488_v47 = vsel %vm391_vm2, %v487_v28, %v486_v16 }
 0x12b   :  { %v425_v5 = vrot.slane %v4585_v61, 4  ;;  %v489_v62 = vrot.slane %v4585_v61, 5  ;;  %v554_v13 = vrot.slane %v4585_v61, 6 }
 0x12c   :  { %v335_v20 = vpop.f32.mrb[26].mxu1  ;;  %5753 = vst [vmem:[#allocation31_spill] sm:$0xff] %v4603_v63  ;;  %v439_v30 = vrot.slane %v4603_v63, 4 }
 0x12d   :  { %v4606_v14 = vadd.f32 %v335_v20, %v4546_v15  ;;  %v337_v7 = vpop.f32.mrb[27].mxu1  ;;  %v436_v20 = vsel %vm388_vm1, %v435_v8, %v434_v60  ;;  %v553_v60 = vsel %vm391_vm2, %v552_v50, %v551_v29  ;;  %v3746_v8 = vpop.eup %3745  ;;  %v426_v28 = vsel %vm394_vm3, %v425_v5, %v424_v3 }
 0x12e   :  { %v4615_v36 = vadd.f32 %v337_v7, %v4549_v53  ;;  %v438_v23 = vsel %vm391_vm2, %v437_v9, %v436_v20  ;;  %v490_v51 = vsel %vm394_vm3, %v489_v62, %v488_v47  ;;  %v555_v44 = vsel %vm394_vm3, %v554_v13, %v553_v60  ;;  %v3748_v16 = vpop.eup %3747 }
 0x12f   :  { %v427_v27 = vrot.slane %v4606_v14, 3  ;;  %v491_v39 = vrot.slane %v4606_v14, 4  ;;  %v556_v46 = vrot.slane %v4606_v14, 5 }
 0x130   :  { %5754 = vst [vmem:[#allocation32_spill] sm:$0xff] %v4615_v36  ;;  %v341_v49 = vpop.f32.mrb[28].mxu1  ;;  %v441_v2 = vrot.slane %v4615_v36, 3 }
 0x131   :  { %v4625_v32 = vadd.f32 %v341_v49, %v4546_v15  ;;  %v343_v7 = vpop.f32.mrb[29].mxu1  ;;  %v428_v29 = vsel %vm397_vm4, %v427_v27, %v426_v28  ;;  %v492_v5 = vsel %vm397_vm4, %v491_v39, %v490_v51  ;;  %v557_v47 = vsel %vm397_vm4, %v556_v46, %v555_v44 }
 0x132   :  { %v4631_v33 = vadd.f32 %v343_v7, %v4549_v53  ;;  %v440_v27 = vsel %vm394_vm3, %v439_v30, %v438_v23  ;;  %v619_v28 = vrot.slane %v4585_v61, 7  ;;  %v621_v23 = vrot.slane %v4606_v14, 6 }
 0x133   :  { %v429_v49 = vrot.slane %v4625_v32, 2  ;;  %v493_v9 = vrot.slane %v4625_v32, 3  ;;  %v558_v20 = vrot.slane %v4625_v32, 4  ;;  %v442_v46 = vsel %vm397_vm4, %v441_v2, %v440_v27 }
 0x134   :  { %v347_v50 = vpop.f32.mrb[30].mxu1  ;;  %v443_v7 = vrot.slane %v4631_v33, 2 }
 0x135   :  { %v4645_v62 = vadd.f32 %v347_v50, %v4546_v15  ;;  %v349_v13 = vpop.f32.mrb[31].mxu1  ;;  %v430_v3 = vsel %vm400_vm5, %v429_v49, %v428_v29  ;;  %v494_v60 = vsel %vm400_vm5, %v493_v9, %v492_v5  ;;  %v559_v36 = vsel %vm400_vm5, %v558_v20, %v557_v47 }
 0x136   :  { %v4651_v63 = vadd.f32 %v349_v13, %v4549_v53  ;;  %v444_v49 = vsel %vm400_vm5, %v443_v7, %v442_v46  ;;  %v618_v53 = vsel %vm391_vm2, %v4572_v35, %v617_v21  ;;  %v623_v29 = vrot.slane %v4625_v32, 5 }
 0x137   :  { %v431_v39 = vrot.slane %v4645_v62, 1  ;;  %v495_v15 = vrot.slane %v4645_v62, 2  ;;  %v560_v51 = vrot.slane %v4645_v62, 3  ;;  %v620_v47 = vsel %vm394_vm3, %v619_v28, %v618_v53 }
 0x138   :  { %5755 = vst [vmem:[#allocation33_spill] sm:$0xff] %v4651_v63  ;;  %v1117_v44 = vpop.f32.mrb[32].mxu1  ;;  %v445_v9 = vrot.slane %v4651_v63, 1  ;;  %v622_v21 = vsel %vm397_vm4, %v621_v23, %v620_v47  ;;  %v625_v27 = vrot.slane %v4645_v62, 4  ;;  %v1128_v46 = vmul.f32 0.5, %v3746_v8 }
 0x139   :  { %v432_v30 = vsel %vm403_vm6, %v431_v39, %v430_v3  ;;  %v1119_v20 = vpop.f32.mrb[33].mxu1  ;;  %v4666_v50 = vsel %vm403_vm6, %v495_v15, %v494_v60  ;;  %v4669_v2 = vsel %vm403_vm6, %v560_v51, %v559_v36  ;;  %v624_v3 = vsel %vm400_vm5, %v623_v29, %v622_v21 }
 0x13a   :  { %5756 = vst [vmem:[#allocation34_spill] sm:$0xff] %v4669_v2  ;;  %v1124_v5 = vadd.f32 %v1117_v44, %v432_v30  ;;  %v446_v7 = vsel %vm403_vm6, %v445_v9, %v444_v49  ;;  %v4678_v60 = vsel %vm403_vm6, %v625_v27, %v624_v3  ;;  %v1132_v36 = vmul.f32 0.5, %v3748_v16 }
 0x13b   :  { %v1125_v13 = vadd.f32 %v1119_v20, %v446_v7  ;;  %5757 = vst [vmem:[#allocation35_spill] sm:$0xff] %v4678_v60  ;;  %v678_v15 = vrot.slane %v4555_v59, 4  ;;  %v679_v51 = vrot.slane %v4552_v45, 3  ;;  %v681_v28 = vrot.slane %v4561_v22, 2  ;;  %v5780_v60 = vld [vmem:[#allocation20_spill] sm:$0xff] }
 0x13c   :  { %3749 = vtanh.f32 %v1124_v5  ;;  %v1133_v44 = vadd.f32 0.5, %v1132_v36  ;;  %v683_v49 = vrot.slane %v4572_v35, 1  ;;  %v686_v53 = vrot.slane %v4606_v14, 7 }
 0x13d   :  { %v1135_v39 = vmul.f32 0.5, %v1125_v13  ;;  %v680_v9 = vsel %vm385_vm0, %v679_v51, %v678_v15  ;;  %v1129_v23 = vadd.f32 0.5, %v1128_v46  ;;  %v688_v16 = vrot.slane %v4625_v32, 6 }
 0x13e   :  { %v682_v30 = vsel %vm388_vm1, %v681_v28, %v680_v9  ;;  %v690_v29 = vrot.slane %v4645_v62, 5  ;;  %v1139_v5 = vmul.f32 0.0, %v1133_v44  ;;  %v743_v46 = vrot.slane %v4555_v59, 5 }
 0x13f   :  { %3751 = vtanh.f32 %v1135_v39  ;;  %v684_v20 = vsel %vm391_vm2, %v683_v49, %v682_v30  ;;  %v744_v15 = vrot.slane %v4552_v45, 4  ;;  %v746_v51 = vrot.slane %v4561_v22, 3 }
 0x140   :  { %v685_v47 = vsel %vm394_vm3, %v4585_v61, %v684_v20  ;;  %v748_v28 = vrot.slane %v4572_v35, 2  ;;  %v750_v49 = vrot.slane %v4585_v61, 1  ;;  %v477_v2 = vrot.slane %v5780_v60, 4 }
 0x141   :  { %v687_v13 = vsel %vm397_vm4, %v686_v53, %v685_v47  ;;  %v745_v44 = vsel %vm385_vm0, %v744_v15, %v743_v46  ;;  %v753_v53 = vrot.slane %v4625_v32, 7  ;;  %v813_v46 = vrot.slane %v4572_v35, 3 }
 0x142   :  { %v689_v27 = vsel %vm400_vm5, %v688_v16, %v687_v13  ;;  %v747_v9 = vsel %vm388_vm1, %v746_v51, %v745_v44  ;;  %v755_v16 = vrot.slane %v4645_v62, 6  ;;  %v5761_v13 = vmov 0.0  }
 0x143   :  { %v4697_v3 = vsel %vm403_vm6, %v690_v29, %v689_v27  ;;  %v749_v30 = vsel %vm391_vm2, %v748_v28, %v747_v9  ;;  %v808_v27 = vrot.slane %v4555_v59, 6  ;;  %v815_v51 = vrot.slane %v4585_v61, 2 }
 0x144   :  { %5758 = vst [vmem:[#allocation36_spill] sm:$0xff] %v4697_v3  ;;  %v751_v20 = vsel %vm394_vm3, %v750_v49, %v749_v30  ;;  %v817_v44 = vrot.slane %v4606_v14, 1  ;;  %v820_v9 = vrot.slane %v4645_v62, 7 }
 0x146   :  { %v3750_v8 = vpop.eup %3749 }
 0x147   :  { %v1140_v7 = vmul.f32 %v3750_v8, %v1129_v23 }
 0x149   :  { %v4693_v21 = vadd.f32 %v1140_v7, %v1139_v5  ;;  %v3752_v36 = vpop.eup %3751  ;;  %v752_v5 = vsel %vm397_vm4, %v4606_v14, %v751_v20  ;;  %v874_v20 = vrot.slane %v4552_v45, 6 }
 0x14a   :  { %v1137_v39 = vmul.f32 0.5, %v3752_v36  ;;  %v754_v7 = vsel %vm400_vm5, %v753_v53, %v752_v5  ;;  %v809_v36 = vrot.slane %v4552_v45, 5  ;;  %v876_v5 = vrot.slane %v4561_v22, 5 }
 0x14b   :  { %3753 = vtanh.f32 %v4693_v21  ;;  %v4719_v47 = vsel %vm403_vm6, %v755_v16, %v754_v7  ;;  %v878_v7 = vrot.slane %v4572_v35, 4 }
 0x14c   :  { %v1138_v23 = vadd.f32 0.5, %v1137_v39  ;;  %5760 = vst [vmem:[#allocation38_spill] sm:$0xff] %v4719_v47  ;;  %v811_v39 = vrot.slane %v4561_v22, 4  ;;  %v810_v15 = vsel %vm385_vm0, %v809_v36, %v808_v27  ;;  %v880_v36 = vrot.slane %v4585_v61, 3  ;;  %v5779_v47 = vld [vmem:[#allocation12_spill] sm:$0xff] }
 0x14e   :  { %v812_v28 = vsel %vm388_vm1, %v811_v39, %v810_v15  ;;  %v884_v39 = vrot.slane %v4625_v32, 1  ;;  %v5765_v15 = vld [vmem:[#allocation9_spill] sm:$0xff] }
 0x14f   :  { %v814_v49 = vsel %vm391_vm2, %v813_v46, %v812_v28  ;;  %v5767_v28 = vld [vmem:[#allocation8_spill] sm:$0xff] }
 0x150   :  { %v816_v53 = vsel %vm394_vm3, %v815_v51, %v814_v49  ;;  %v5766_v51 = vld [vmem:[#allocation6_spill] sm:$0xff] }
 0x155   :  { %v3754_v8 = vpop.eup %3753 }
 0x156   :  { %v4711_v29 = vmul.f32 %v3754_v8, %v1138_v23  ;;  %v818_v23 = vsel %vm397_vm4, %v817_v44, %v816_v53  ;;  %v873_v8 = vrot.slane %v4555_v59, 7  ;;  %v882_v59 = vrot.slane %v4606_v14, 2  ;;  %v5768_v44 = vld [vmem:[#allocation13_spill] sm:$0xff] }
 0x157   :  { %v819_v30 = vsel %vm400_vm5, %v4625_v32, %v818_v23  ;;  %v5764_v32 = vld [vmem:[#allocation7_spill] sm:$0xff]  ;;  %v457_v49 = vrot.slane %v5768_v44, 7  ;;  %v5781_v44 = vld [vmem:[#allocation25_spill] sm:$0xff] }
 0x158   :  { %5759 = vst [vmem:[#allocation37_spill] sm:$0xff] %v4711_v29  ;;  %1214 = vmatmul.mubr.f32.vlgmr.msra.gmra.mrb[2].mxu0 %v4711_v29  ;;  %1285 = vmatmul.mubr.f32.vlgmr.msra.gmra.mrb[34].mxu1 %v4711_v29  ;;  %v4754_v16 = vsel %vm403_vm6, %v820_v9, %v819_v30  ;;  %v875_v27 = vsel %vm385_vm0, %v874_v20, %v873_v8  ;;  %v5769_v9 = vld [vmem:[#allocation21_spill] sm:$0xff]  ;;  %v5770_v23 = vld [vmem:[#allocation15_spill] sm:$0xff]  ;;  %v5771_v8 = vld [vmem:[#allocation14_spill] sm:$0xff] }
 0x159   :  { %3330 = vmatpush1.bf16.msra.mxu0 %v3954_v37  ;;  %3362 = vmatpush1.bf16.msra.mxu1 %v4297_v55  ;;  %5762 = vst [vmem:[#allocation39_spill] sm:$0xff] %v4754_v16  ;;  %v877_v45 = vsel %vm388_vm1, %v876_v5, %v875_v27  ;;  %v455_v53 = vrot.slane %v5769_v9, 1  ;;  %v459_v30 = vrot.slane %v5770_v23, 6  ;;  %v471_v20 = vrot.slane %v5771_v8, 7  ;;  %v5772_v5 = vld [vmem:[#allocation17_spill] sm:$0xff]  ;;  %v5778_v29 = vld [vmem:[#allocation22_spill] sm:$0xff] }
 0x15a   :  { %3332 = vmatprep.subr.bf16.mxu0 %v3964_v41  ;;  %3364 = vmatprep.subr.bf16.mxu1 %v4300_v57  ;;  %v879_v46 = vsel %vm391_vm2, %v878_v7, %v877_v45  ;;  %v461_v7 = vrot.slane %v5772_v5, 5  ;;  %v5775_v45 = vld [vmem:[#allocation11_spill] sm:$0xff]  ;;  %v465_v16 = vrot.slane %v5778_v29, 3 }
 0x15b   :  { %1383 = vmatprep.mubr.f32.mxu0 %v5761_v13  ;;  %1454 = vmatprep.mubr.f32.mxu1 %v5761_v13  ;;  %v881_v22 = vsel %vm394_vm3, %v880_v36, %v879_v46  ;;  %v5774_v36 = vld [vmem:[#allocation16_spill] sm:$0xff]  ;;  %v5776_v46 = vld [vmem:[#allocation19_spill] sm:$0xff] }
 0x15c   :  { %v883_v61 = vsel %vm397_vm4, %v882_v59, %v881_v22  ;;  %v473_v59 = vrot.slane %v5774_v36, 6  ;;  %v463_v22 = vrot.slane %v5776_v46, 4  ;;  %v467_v36 = vrot.slane %v5781_v44, 2 }
 0x15d   :  { %3334 = vmatpush1.bf16.msra.mxu0 %v3981_v48  ;;  %3366 = vmatpush1.bf16.msra.mxu1 %v4319_v1  ;;  %v885_v14 = vsel %vm400_vm5, %v884_v39, %v883_v61  ;;  %v456_v39 = vsel %vm385_vm0, %v5775_v45, %v455_v53  ;;  %v5777_v61 = vld [vmem:[#allocation18_spill] sm:$0xff]  ;;  %v5782_v53 = vld [vmem:[#allocation24_spill] sm:$0xff] }
 0x15e   :  { %3336 = vmatprep.subr.bf16.mxu0 %v3993_v52  ;;  %3368 = vmatprep.subr.bf16.mxu1 %v4322_v4  ;;  %v4783_v35 = vsel %vm403_vm6, %v4645_v62, %v885_v14  ;;  %v5773_v62 = vld [vmem:[#allocation23_spill] sm:$0xff]  ;;  %v475_v14 = vrot.slane %v5777_v61, 5  ;;  %v479_v23 = vrot.slane %v5782_v53, 3 }
 0x15f   :  { %5763 = vst [vmem:[#allocation40_spill] sm:$0xff] %v4783_v35  ;;  %v469_v27 = vrot.slane %v5773_v62, 1  ;;  %v458_v35 = vsel %vm388_vm1, %v457_v49, %v456_v39  ;;  %v5783_v49 = vld [vmem:[#allocation26_spill] sm:$0xff] }
 0x160   :  { %v460_v8 = vsel %vm391_vm2, %v459_v30, %v458_v35  ;;  %v481_v39 = vrot.slane %v5783_v49, 2  ;;  %v5784_v30 = vld [vmem:[#allocation29_spill] sm:$0xff] }
 0x161   :  { %3338 = vmatpush1.bf16.msra.mxu0 %v4008_v58  ;;  %3370 = vmatpush1.bf16.msra.mxu1 %v4341_v10  ;;  %v470_v3 = vsel %vm385_vm0, %v5779_v47, %v469_v27  ;;  %v462_v46 = vsel %vm394_vm3, %v461_v7, %v460_v8  ;;  %v499_v44 = vrot.slane %v5784_v30, 7  ;;  %v5785_v7 = vld [vmem:[#allocation28_spill] sm:$0xff] }
 0x162   :  { %3340 = vmatprep.subr.bf16.mxu0 %v4023_v0  ;;  %3372 = vmatprep.subr.bf16.mxu1 %v4344_v12  ;;  %v472_v5 = vsel %vm388_vm1, %v471_v20, %v470_v3  ;;  %v464_v29 = vsel %vm397_vm4, %v463_v22, %v462_v46 }
 0x163   :  { %v474_v61 = vsel %vm391_vm2, %v473_v59, %v472_v5  ;;  %v466_v60 = vsel %vm400_vm5, %v465_v16, %v464_v29  ;;  %v497_v5 = vrot.slane %v5785_v7, 1  ;;  %v5786_v59 = vld [vmem:[#allocation30_spill] sm:$0xff]  ;;  %v5787_v16 = vld [vmem:[#allocation31_spill] sm:$0xff] }
 0x164   :  { %v476_v27 = vsel %vm394_vm3, %v475_v14, %v474_v61  ;;  %v468_v3 = vsel %vm403_vm6, %v467_v36, %v466_v60  ;;  %v501_v49 = vrot.slane %v5786_v59, 6  ;;  %v5789_v36 = vld [vmem:[#allocation32_spill] sm:$0xff]  ;;  %v507_v59 = vrot.slane %v4631_v33, 3 }
 0x165   :  { %3342 = vmatpush1.bf16.msra.mxu0 %v4035_v6  ;;  %3374 = vmatpush1.bf16.msra.mxu1 %v4363_v17  ;;  %v478_v35 = vsel %vm397_vm4, %v477_v2, %v476_v27  ;;  %v503_v2 = vrot.slane %v5787_v16, 5  ;;  %v5788_v27 = vld [vmem:[#allocation27_spill] sm:$0xff]  ;;  %v505_v30 = vrot.slane %v5789_v36, 4 }
 0x166   :  { %3344 = vmatprep.subr.bf16.mxu0 %v4047_v11  ;;  %3376 = vmatprep.subr.bf16.mxu1 %v4366_v18  ;;  %v480_v8 = vsel %vm400_vm5, %v479_v23, %v478_v35  ;;  %v498_v60 = vsel %vm385_vm0, %v5788_v27, %v497_v5 }
 0x167   :  { %v482_v22 = vsel %vm403_vm6, %v481_v39, %v480_v8  ;;  %v500_v35 = vsel %vm388_vm1, %v499_v44, %v498_v60 }
 0x169   :  { %3346 = vmatpush1.bf16.msra.mxu0 %v4068_v19  ;;  %3378 = vmatpush1.bf16.msra.mxu1 %v4385_v25 }
 0x16a   :  { %3348 = vmatprep.subr.bf16.mxu0 %v4080_v24  ;;  %3380 = vmatprep.subr.bf16.mxu1 %v4388_v26 }
 0x16d   :  { %3350 = vmatpush1.bf16.msra.mxu0 %v4113_v38  ;;  %3382 = vmatpush1.bf16.msra.mxu1 %v4405_v31 }
 0x16e   :  { %3352 = vmatprep.subr.bf16.mxu0 %v4118_v40  ;;  %3384 = vmatprep.subr.bf16.mxu1 %v4408_v34 }
 0x171   :  { %3354 = vmatpush1.bf16.msra.mxu0 %v4149_v54  ;;  %3386 = vmatpush1.bf16.msra.mxu1 %v4425_v42 }
 0x172   :  { %3356 = vmatprep.subr.bf16.mxu0 %v4155_v56  ;;  %3388 = vmatprep.subr.bf16.mxu1 %v4428_v43 }
 0x175   :  { %3358 = vmatpush1.bf16.msra.mxu0 %v5764_v32  ;;  %3390 = vmatpush1.bf16.msra.mxu1 %v5765_v15 }
 0x176   :  { %3392 = vmatprep.subr.bf16.mxu0 %v5766_v51  ;;  %3424 = vmatprep.subr.bf16.mxu1 %v5767_v28 }
 0x22b   :  { %v1215_v20 = vpop.f32.mrb[2].mxu0  ;;  %v1286_v53 = vpop.f32.mrb[34].mxu1 }
 0x22c   :  { %v1291_v62 = vadd.f32 %v1215_v20, %v468_v3  ;;  %v1293_v46 = vadd.f32 %v1286_v53, %v4666_v50  ;;  %v1217_v29 = vpop.f32.mrb[3].mxu0  ;;  %v1288_v61 = vpop.f32.mrb[35].mxu1  ;;  %v502_v50 = vsel %vm391_vm2, %v501_v49, %v500_v35  ;;  %v509_v53 = vrot.slane %v4651_v63, 2 }
 0x22d   :  { %v1292_v14 = vadd.f32 %v1217_v29, %v482_v22  ;;  %v504_v39 = vsel %vm394_vm3, %v503_v2, %v502_v50 }
 0x22e   :  { %v1295_v23 = vmul.f32 0.5, %v1291_v62  ;;  %v506_v20 = vsel %vm397_vm4, %v505_v30, %v504_v39  ;;  %v5791_v39 = vld [vmem:[#allocation23_spill] sm:$0xff] }
 0x22f   :  { %v1299_v3 = vmul.f32 0.5, %v1292_v14  ;;  %v508_v8 = vsel %vm400_vm5, %v507_v59, %v506_v20  ;;  %v534_v20 = vrot.slane %v5791_v39, 2  ;;  %v5802_v39 = vld [vmem:[#allocation24_spill] sm:$0xff] }
 0x230   :  { %3755 = vtanh.f32 %v1295_v23  ;;  %v510_v5 = vsel %vm403_vm6, %v509_v53, %v508_v8  ;;  %v520_v53 = vrot.slane %v5769_v9, 2 }
 0x231   :  { %3757 = vtanh.f32 %v1299_v3  ;;  %v1294_v62 = vadd.f32 %v1288_v61, %v510_v5  ;;  %v5792_v5 = vld [vmem:[#allocation15_spill] sm:$0xff] }
 0x232   :  { %3759 = vtanh.f32 %v1293_v46 }
 0x233   :  { %v1304_v44 = vmul.f32 0.5, %v1294_v62  ;;  %v524_v62 = vrot.slane %v5792_v5, 7 }
 0x235   :  { %3761 = vtanh.f32 %v1304_v44 }
 0x23a   :  { %v3756_v22 = vpop.eup %3755 }
 0x23b   :  { %v3758_v29 = vpop.eup %3757  ;;  %v1297_v14 = vmul.f32 0.5, %v3756_v22  ;;  %v5793_v22 = vld [vmem:[#allocation17_spill] sm:$0xff] }
 0x23c   :  { %v1301_v60 = vmul.f32 0.5, %v3758_v29  ;;  %v3760_v35 = vpop.eup %3759  ;;  %v526_v29 = vrot.slane %v5793_v22, 6 }
 0x23d   :  { %v1298_v49 = vadd.f32 0.5, %v1297_v14  ;;  %v5794_v14 = vld [vmem:[#allocation16_spill] sm:$0xff] }
 0x23e   :  { %v1302_v23 = vadd.f32 0.5, %v1301_v60  ;;  %v538_v60 = vrot.slane %v5794_v14, 7  ;;  %v544_v14 = vrot.slane %v5802_v39, 4 }
 0x23f   :  { %v1309_v63 = vmul.f32 %v3760_v35, %v1298_v49  ;;  %v3762_v30 = vpop.eup %3761  ;;  %v5795_v49 = vld [vmem:[#allocation19_spill] sm:$0xff] }
 0x240   :  { %v1308_v2 = vmul.f32 %v1302_v23, %v4693_v21  ;;  %v1306_v59 = vmul.f32 0.5, %v3762_v30  ;;  %v535_v21 = vrot.slane %v5779_v47, 1  ;;  %v528_v35 = vrot.slane %v5795_v49, 5  ;;  %v5796_v23 = vld [vmem:[#allocation18_spill] sm:$0xff]  ;;  %v5797_v30 = vld [vmem:[#allocation13_spill] sm:$0xff] }
 0x241   :  { %v563_v49 = vrot.slane %v5788_v27, 1 }
 0x242   :  { %v4836_v3 = vadd.f32 %v1309_v63, %v1308_v2  ;;  %v1307_v46 = vadd.f32 0.5, %v1306_v59  ;;  %v521_v63 = vrot.slane %v5775_v45, 1  ;;  %v536_v44 = vsel %vm385_vm0, %v535_v21, %v534_v20  ;;  %v5801_v20 = vld [vmem:[#allocation25_spill] sm:$0xff] }
 0x243   :  { %v540_v2 = vrot.slane %v5796_v23, 6  ;;  %v532_v22 = vrot.slane %v5801_v20, 3 }
 0x244   :  { %3763 = vtanh.f32 %v4836_v3  ;;  %v522_v8 = vsel %vm385_vm0, %v521_v63, %v520_v53  ;;  %v5800_v53 = vld [vmem:[#allocation20_spill] sm:$0xff] }
 0x245   :  { %v523_v59 = vsel %vm388_vm1, %v5797_v30, %v522_v8  ;;  %v542_v5 = vrot.slane %v5800_v53, 5  ;;  %v5803_v8 = vld [vmem:[#allocation26_spill] sm:$0xff]  ;;  %v562_v53 = vrot.slane %v5785_v7, 2 }
 0x246   :  { %v525_v21 = vsel %vm391_vm2, %v524_v62, %v523_v59  ;;  %v546_v47 = vrot.slane %v5803_v8, 3 }
 0x247   :  { %v527_v23 = vsel %vm394_vm3, %v526_v29, %v525_v21 }
 0x24e   :  { %v3764_v61 = vpop.eup %3763 }
 0x24f   :  { %v4839_v50 = vmul.f32 %v3764_v61, %v1307_v46  ;;  %v5798_v46 = vld [vmem:[#allocation22_spill] sm:$0xff] }
 0x250   :  { %v530_v61 = vrot.slane %v5798_v46, 4  ;;  %v529_v46 = vsel %vm397_vm4, %v528_v35, %v527_v23  ;;  %v5805_v35 = vld [vmem:[#allocation34_spill] sm:$0xff] }
 0x251   :  { %5790 = vst [vmem:[#allocation7_spill] sm:$0xff] %v4839_v50  ;;  %1384 = vmatmul.mubr.f32.vlgmr.msra.gmra.mrb[4].mxu0 %v4839_v50  ;;  %1455 = vmatmul.mubr.f32.vlgmr.msra.gmra.mrb[36].mxu1 %v4839_v50  ;;  %v5799_v50 = vld [vmem:[#allocation14_spill] sm:$0xff] }
 0x252   :  { %3394 = vmatpush1.bf16.msra.mxu0 %v3954_v37  ;;  %3426 = vmatpush1.bf16.msra.mxu1 %v4297_v55  ;;  %v537_v63 = vsel %vm388_vm1, %v5799_v50, %v536_v44  ;;  %v531_v62 = vsel %vm400_vm5, %v530_v61, %v529_v46  ;;  %v568_v46 = vrot.slane %v5787_v16, 6 }
 0x253   :  { %3396 = vmatprep.subr.bf16.mxu0 %v3964_v41  ;;  %3428 = vmatprep.subr.bf16.mxu1 %v4300_v57  ;;  %v539_v9 = vsel %vm391_vm2, %v538_v60, %v537_v63  ;;  %v533_v20 = vsel %vm403_vm6, %v532_v22, %v531_v62  ;;  %v564_v60 = vsel %vm385_vm0, %v563_v49, %v562_v53  ;;  %v5804_v63 = vld [vmem:[#allocation30_spill] sm:$0xff]  ;;  %v570_v22 = vrot.slane %v5789_v36, 5  ;;  %v5806_v62 = vld [vmem:[#allocation29_spill] sm:$0xff] }
 0x254   :  { %1553 = vmatprep.mubr.f32.mxu0 %v5761_v13  ;;  %1624 = vmatprep.mubr.f32.mxu1 %v5761_v13  ;;  %v541_v44 = vsel %vm394_vm3, %v540_v2, %v539_v9  ;;  %v566_v21 = vrot.slane %v5804_v63, 7  ;;  %v572_v49 = vrot.slane %v4631_v33, 4 }
 0x255   :  { %v543_v59 = vsel %vm397_vm4, %v542_v5, %v541_v44 }
 0x256   :  { %3398 = vmatpush1.bf16.msra.mxu0 %v3981_v48  ;;  %3430 = vmatpush1.bf16.msra.mxu1 %v4319_v1  ;;  %v545_v29 = vsel %vm400_vm5, %v544_v14, %v543_v59  ;;  %v565_v14 = vsel %vm388_vm1, %v5806_v62, %v564_v60 }
 0x257   :  { %3400 = vmatprep.subr.bf16.mxu0 %v3993_v52  ;;  %3432 = vmatprep.subr.bf16.mxu1 %v4322_v4  ;;  %v547_v9 = vsel %vm403_vm6, %v546_v47, %v545_v29 }
 0x25a   :  { %3402 = vmatpush1.bf16.msra.mxu0 %v4008_v58  ;;  %3434 = vmatpush1.bf16.msra.mxu1 %v4341_v10 }
 0x25b   :  { %3404 = vmatprep.subr.bf16.mxu0 %v4023_v0  ;;  %3436 = vmatprep.subr.bf16.mxu1 %v4344_v12 }
 0x25e   :  { %3406 = vmatpush1.bf16.msra.mxu0 %v4035_v6  ;;  %3438 = vmatpush1.bf16.msra.mxu1 %v4363_v17 }
 0x25f   :  { %3408 = vmatprep.subr.bf16.mxu0 %v4047_v11  ;;  %3440 = vmatprep.subr.bf16.mxu1 %v4366_v18 }
 0x262   :  { %3410 = vmatpush1.bf16.msra.mxu0 %v4068_v19  ;;  %3442 = vmatpush1.bf16.msra.mxu1 %v4385_v25 }
 0x263   :  { %3412 = vmatprep.subr.bf16.mxu0 %v4080_v24  ;;  %3444 = vmatprep.subr.bf16.mxu1 %v4388_v26 }
 0x266   :  { %3414 = vmatpush1.bf16.msra.mxu0 %v4113_v38  ;;  %3446 = vmatpush1.bf16.msra.mxu1 %v4405_v31 }
 0x267   :  { %3416 = vmatprep.subr.bf16.mxu0 %v4118_v40  ;;  %3448 = vmatprep.subr.bf16.mxu1 %v4408_v34 }
 0x26a   :  { %3418 = vmatpush1.bf16.msra.mxu0 %v4149_v54  ;;  %3450 = vmatpush1.bf16.msra.mxu1 %v4425_v42 }
 0x26b   :  { %3420 = vmatprep.subr.bf16.mxu0 %v4155_v56  ;;  %3452 = vmatprep.subr.bf16.mxu1 %v4428_v43 }
 0x26e   :  { %3422 = vmatpush1.bf16.msra.mxu0 %v5764_v32  ;;  %3454 = vmatpush1.bf16.msra.mxu1 %v5765_v15 }
 0x26f   :  { %3456 = vmatprep.subr.bf16.mxu0 %v5766_v51  ;;  %3488 = vmatprep.subr.bf16.mxu1 %v5767_v28 }
 0x324   :  { %v1385_v39 = vpop.f32.mrb[4].mxu0  ;;  %v1456_v27 = vpop.f32.mrb[36].mxu1 }
 0x325   :  { %v1461_v8 = vadd.f32 %v1385_v39, %v533_v20  ;;  %v1463_v23 = vadd.f32 %v1456_v27, %v5805_v35  ;;  %v1387_v2 = vpop.f32.mrb[5].mxu0  ;;  %v1458_v61 = vpop.f32.mrb[37].mxu1  ;;  %v567_v39 = vsel %vm391_vm2, %v566_v21, %v565_v14  ;;  %v5807_v20 = vld [vmem:[#allocation33_spill] sm:$0xff] }
 0x326   :  { %v1462_v5 = vadd.f32 %v1387_v2, %v547_v9  ;;  %v574_v27 = vrot.slane %v5807_v20, 3  ;;  %v569_v47 = vsel %vm394_vm3, %v568_v46, %v567_v39 }
 0x327   :  { %v1465_v44 = vmul.f32 0.5, %v1461_v8  ;;  %v571_v59 = vsel %vm397_vm4, %v570_v22, %v569_v47  ;;  %v5810_v47 = vld [vmem:[#allocation21_spill] sm:$0xff] }
 0x328   :  { %v1469_v53 = vmul.f32 0.5, %v1462_v5  ;;  %v573_v29 = vsel %vm400_vm5, %v572_v49, %v571_v59  ;;  %v585_v59 = vrot.slane %v5810_v47, 3 }
 0x329   :  { %3765 = vtanh.f32 %v1465_v44  ;;  %v575_v8 = vsel %vm403_vm6, %v574_v27, %v573_v29  ;;  %v602_v29 = vrot.slane %v5799_v50, 1 }
 0x32a   :  { %3767 = vtanh.f32 %v1469_v53  ;;  %v1464_v35 = vadd.f32 %v1458_v61, %v575_v8  ;;  %v5811_v8 = vld [vmem:[#allocation23_spill] sm:$0xff] }
 0x32b   :  { %3769 = vtanh.f32 %v1463_v23 }
 0x32c   :  { %v1474_v60 = vmul.f32 0.5, %v1464_v35  ;;  %v599_v35 = vrot.slane %v5811_v8, 3  ;;  %v5817_v8 = vld [vmem:[#allocation22_spill] sm:$0xff] }
 0x32d   :  { %v595_v47 = vrot.slane %v5817_v8, 5 }
 0x32e   :  { %3771 = vtanh.f32 %v1474_v60 }
 0x333   :  { %v3766_v9 = vpop.eup %3765 }
 0x334   :  { %v3768_v2 = vpop.eup %3767  ;;  %v1467_v5 = vmul.f32 0.5, %v3766_v9 }
 0x335   :  { %v1471_v63 = vmul.f32 0.5, %v3768_v2  ;;  %v3770_v14 = vpop.eup %3769 }
 0x336   :  { %v1468_v21 = vadd.f32 0.5, %v1467_v5  ;;  %v5812_v5 = vld [vmem:[#allocation17_spill] sm:$0xff] }
 0x337   :  { %v1472_v44 = vadd.f32 0.5, %v1471_v63  ;;  %v588_v63 = vrot.slane %v5797_v30, 1 }
 0x338   :  { %v1479_v20 = vmul.f32 %v3770_v14, %v1468_v21  ;;  %v3772_v22 = vpop.eup %3771  ;;  %v591_v21 = vrot.slane %v5812_v5, 7  ;;  %v5821_v5 = vld [vmem:[#allocation26_spill] sm:$0xff] }
 0x339   :  { %v1478_v46 = vmul.f32 %v1472_v44, %v4836_v3  ;;  %v1476_v49 = vmul.f32 0.5, %v3772_v22  ;;  %v586_v3 = vrot.slane %v5775_v45, 2  ;;  %v5813_v44 = vld [vmem:[#allocation18_spill] sm:$0xff]  ;;  %v5814_v22 = vld [vmem:[#allocation19_spill] sm:$0xff] }
 0x33b   :  { %v4924_v53 = vadd.f32 %v1479_v20, %v1478_v46  ;;  %v1477_v23 = vadd.f32 0.5, %v1476_v49  ;;  %v5809_v20 = vld [vmem:[#allocation12_spill] sm:$0xff]  ;;  %v587_v60 = vsel %vm385_vm0, %v586_v3, %v585_v59  ;;  %v605_v46 = vrot.slane %v5813_v44, 7 }
 0x33c   :  { %v600_v27 = vrot.slane %v5809_v20, 2  ;;  %v589_v9 = vsel %vm388_vm1, %v588_v63, %v587_v60  ;;  %v593_v49 = vrot.slane %v5814_v22, 6  ;;  %v5818_v3 = vld [vmem:[#allocation24_spill] sm:$0xff]  ;;  %v5819_v63 = vld [vmem:[#allocation25_spill] sm:$0xff]  ;;  %v630_v20 = vrot.slane %v5806_v62, 1 }
 0x33d   :  { %3773 = vtanh.f32 %v4924_v53  ;;  %v609_v59 = vrot.slane %v5818_v3, 5  ;;  %v597_v60 = vrot.slane %v5819_v63, 4  ;;  %v627_v3 = vrot.slane %v5785_v7, 3 }
 0x33e   :  { %v601_v2 = vsel %vm385_vm0, %v600_v27, %v599_v35  ;;  %v5820_v27 = vld [vmem:[#allocation16_spill] sm:$0xff] }
 0x33f   :  { %v603_v14 = vsel %vm388_vm1, %v602_v29, %v601_v2  ;;  %v611_v29 = vrot.slane %v5821_v5, 4  ;;  %v5822_v2 = vld [vmem:[#allocation27_spill] sm:$0xff] }
 0x340   :  { %v604_v35 = vsel %vm391_vm2, %v5820_v27, %v603_v14  ;;  %v628_v44 = vrot.slane %v5822_v2, 2 }
 0x347   :  { %v3774_v61 = vpop.eup %3773 }
 0x348   :  { %v4927_v39 = vmul.f32 %v3774_v61, %v1477_v23  ;;  %v5815_v23 = vld [vmem:[#allocation20_spill] sm:$0xff] }
 0x349   :  { %v607_v61 = vrot.slane %v5815_v23, 6  ;;  %v606_v23 = vsel %vm394_vm3, %v605_v46, %v604_v35  ;;  %v5823_v35 = vld [vmem:[#allocation35_spill] sm:$0xff] }
 0x34a   :  { %5808 = vst [vmem:[#allocation9_spill] sm:$0xff] %v4927_v39  ;;  %1554 = vmatmul.mubr.f32.vlgmr.msra.gmra.mrb[6].mxu0 %v4927_v39  ;;  %1625 = vmatmul.mubr.f32.vlgmr.msra.gmra.mrb[38].mxu1 %v4927_v39  ;;  %v5816_v39 = vld [vmem:[#allocation15_spill] sm:$0xff] }
 0x34b   :  { %3458 = vmatpush1.bf16.msra.mxu0 %v3954_v37  ;;  %3490 = vmatpush1.bf16.msra.mxu1 %v4297_v55  ;;  %v590_v50 = vsel %vm391_vm2, %v5816_v39, %v589_v9  ;;  %v608_v8 = vsel %vm397_vm4, %v607_v61, %v606_v23  ;;  %v633_v23 = vrot.slane %v5787_v16, 7 }
 0x34c   :  { %3460 = vmatprep.subr.bf16.mxu0 %v3964_v41  ;;  %3492 = vmatprep.subr.bf16.mxu1 %v4300_v57  ;;  %v592_v22 = vsel %vm394_vm3, %v591_v21, %v590_v50  ;;  %v610_v14 = vsel %vm400_vm5, %v609_v59, %v608_v8  ;;  %v629_v21 = vsel %vm385_vm0, %v628_v44, %v627_v3  ;;  %v635_v8 = vrot.slane %v5789_v36, 6  ;;  %v5825_v44 = vld [vmem:[#allocation33_spill] sm:$0xff] }
 0x34d   :  { %1723 = vmatprep.mubr.f32.mxu0 %v5761_v13  ;;  %1794 = vmatprep.mubr.f32.mxu1 %v5761_v13  ;;  %v594_v9 = vsel %vm397_vm4, %v593_v49, %v592_v22  ;;  %v612_v50 = vsel %vm403_vm6, %v611_v29, %v610_v14  ;;  %v631_v49 = vsel %vm388_vm1, %v630_v20, %v629_v21 }
 0x34e   :  { %v596_v63 = vsel %vm400_vm5, %v595_v47, %v594_v9  ;;  %v5824_v9 = vld [vmem:[#allocation30_spill] sm:$0xff] }
 0x34f   :  { %3462 = vmatpush1.bf16.msra.mxu0 %v3981_v48  ;;  %3494 = vmatpush1.bf16.msra.mxu1 %v4319_v1  ;;  %v598_v5 = vsel %vm403_vm6, %v597_v60, %v596_v63  ;;  %v637_v63 = vrot.slane %v4631_v33, 5  ;;  %v632_v29 = vsel %vm391_vm2, %v5824_v9, %v631_v49 }
 0x350   :  { %3464 = vmatprep.subr.bf16.mxu0 %v3993_v52  ;;  %3496 = vmatprep.subr.bf16.mxu1 %v4322_v4  ;;  %v634_v3 = vsel %vm394_vm3, %v633_v23, %v632_v29 }
 0x351   :  { %v636_v20 = vsel %vm397_vm4, %v635_v8, %v634_v3 }
 0x353   :  { %3466 = vmatpush1.bf16.msra.mxu0 %v4008_v58  ;;  %3498 = vmatpush1.bf16.msra.mxu1 %v4341_v10 }
 0x354   :  { %3468 = vmatprep.subr.bf16.mxu0 %v4023_v0  ;;  %3500 = vmatprep.subr.bf16.mxu1 %v4344_v12 }
 0x357   :  { %3470 = vmatpush1.bf16.msra.mxu0 %v4035_v6  ;;  %3502 = vmatpush1.bf16.msra.mxu1 %v4363_v17 }
 0x358   :  { %3472 = vmatprep.subr.bf16.mxu0 %v4047_v11  ;;  %3504 = vmatprep.subr.bf16.mxu1 %v4366_v18 }
 0x35b   :  { %3474 = vmatpush1.bf16.msra.mxu0 %v4068_v19  ;;  %3506 = vmatpush1.bf16.msra.mxu1 %v4385_v25 }
 0x35c   :  { %3476 = vmatprep.subr.bf16.mxu0 %v4080_v24  ;;  %3508 = vmatprep.subr.bf16.mxu1 %v4388_v26 }
 0x35f   :  { %3478 = vmatpush1.bf16.msra.mxu0 %v4113_v38  ;;  %3510 = vmatpush1.bf16.msra.mxu1 %v4405_v31 }
 0x360   :  { %3480 = vmatprep.subr.bf16.mxu0 %v4118_v40  ;;  %3512 = vmatprep.subr.bf16.mxu1 %v4408_v34 }
 0x363   :  { %3482 = vmatpush1.bf16.msra.mxu0 %v4149_v54  ;;  %3514 = vmatpush1.bf16.msra.mxu1 %v4425_v42 }
 0x364   :  { %3484 = vmatprep.subr.bf16.mxu0 %v4155_v56  ;;  %3516 = vmatprep.subr.bf16.mxu1 %v4428_v43 }
 0x367   :  { %3486 = vmatpush1.bf16.msra.mxu0 %v5764_v32  ;;  %3518 = vmatpush1.bf16.msra.mxu1 %v5765_v15 }
 0x368   :  { %3520 = vmatprep.subr.bf16.mxu0 %v5766_v51  ;;  %3552 = vmatprep.subr.bf16.mxu1 %v5767_v28 }
 0x41d   :  { %v1555_v27 = vpop.f32.mrb[6].mxu0  ;;  %v1626_v2 = vpop.f32.mrb[38].mxu1 }
 0x41e   :  { %v1631_v46 = vadd.f32 %v1555_v27, %v598_v5  ;;  %v1633_v62 = vadd.f32 %v1626_v2, %v5823_v35  ;;  %v1557_v22 = vpop.f32.mrb[7].mxu0  ;;  %v1628_v61 = vpop.f32.mrb[39].mxu1  ;;  %v639_v5 = vrot.slane %v5825_v44, 4  ;;  %v638_v27 = vsel %vm400_vm5, %v637_v63, %v636_v20  ;;  %v5828_v20 = vld [vmem:[#allocation21_spill] sm:$0xff] }
 0x41f   :  { %v1632_v47 = vadd.f32 %v1557_v22, %v612_v50 }
 0x420   :  { %v1635_v59 = vmul.f32 0.5, %v1631_v46  ;;  %v640_v2 = vsel %vm403_vm6, %v639_v5, %v638_v27  ;;  %v5827_v5 = vld [vmem:[#allocation12_spill] sm:$0xff]  ;;  %v650_v27 = vrot.slane %v5828_v20, 4  ;;  %v5835_v20 = vld [vmem:[#allocation25_spill] sm:$0xff] }
 0x421   :  { %v1639_v60 = vmul.f32 0.5, %v1632_v47  ;;  %v1634_v14 = vadd.f32 %v1628_v61, %v640_v2  ;;  %v665_v3 = vrot.slane %v5827_v5, 3  ;;  %v655_v2 = vrot.slane %v5816_v39, 1  ;;  %v5834_v39 = vld [vmem:[#allocation20_spill] sm:$0xff] }
 0x422   :  { %3775 = vtanh.f32 %v1635_v59  ;;  %v5836_v5 = vld [vmem:[#allocation24_spill] sm:$0xff] }
 0x423   :  { %3777 = vtanh.f32 %v1639_v60  ;;  %v1644_v50 = vmul.f32 0.5, %v1634_v14  ;;  %v5829_v14 = vld [vmem:[#allocation14_spill] sm:$0xff] }
 0x424   :  { %3779 = vtanh.f32 %v1633_v62 }
 0x425   :  { %3781 = vtanh.f32 %v1644_v50  ;;  %v667_v50 = vrot.slane %v5829_v14, 2 }
 0x42c   :  { %v3776_v21 = vpop.eup %3775 }
 0x42d   :  { %v3778_v46 = vpop.eup %3777  ;;  %v1637_v35 = vmul.f32 0.5, %v3776_v21  ;;  %v5830_v21 = vld [vmem:[#allocation23_spill] sm:$0xff] }
 0x42e   :  { %v1641_v22 = vmul.f32 0.5, %v3778_v46  ;;  %v3780_v47 = vpop.eup %3779  ;;  %v664_v46 = vrot.slane %v5830_v21, 4  ;;  %v672_v21 = vrot.slane %v5834_v39, 7  ;;  %v697_v39 = vrot.slane %v5824_v9, 1 }
 0x42f   :  { %v1638_v49 = vadd.f32 0.5, %v1637_v35  ;;  %v3782_v8 = vpop.eup %3781  ;;  %v5831_v35 = vld [vmem:[#allocation16_spill] sm:$0xff] }
 0x430   :  { %v1642_v59 = vadd.f32 0.5, %v1641_v22  ;;  %v1646_v63 = vmul.f32 0.5, %v3782_v8  ;;  %v669_v22 = vrot.slane %v5831_v35, 1  ;;  %v5832_v8 = vld [vmem:[#allocation19_spill] sm:$0xff]  ;;  %v662_v35 = vrot.slane %v5835_v20, 5 }
 0x431   :  { %v1649_v16 = vmul.f32 %v3780_v47, %v1638_v49 }
 0x432   :  { %v1648_v23 = vmul.f32 %v1642_v59, %v4924_v53  ;;  %v1647_v62 = vadd.f32 0.5, %v1646_v63  ;;  %v653_v53 = vrot.slane %v5797_v30, 2  ;;  %v666_v59 = vsel %vm385_vm0, %v665_v3, %v664_v46 }
 0x433   :  { %v658_v63 = vrot.slane %v5832_v8, 7 }
 0x434   :  { %v5012_v60 = vadd.f32 %v1649_v16, %v1648_v23  ;;  %v651_v16 = vrot.slane %v5775_v45, 3 }
 0x436   :  { %3783 = vtanh.f32 %v5012_v60  ;;  %v652_v49 = vsel %vm385_vm0, %v651_v16, %v650_v27  ;;  %v674_v16 = vrot.slane %v5836_v5, 6  ;;  %v5837_v27 = vld [vmem:[#allocation27_spill] sm:$0xff] }
 0x437   :  { %v654_v47 = vsel %vm388_vm1, %v653_v53, %v652_v49  ;;  %v693_v53 = vrot.slane %v5837_v27, 3  ;;  %v5838_v49 = vld [vmem:[#allocation17_spill] sm:$0xff] }
 0x438   :  { %v656_v23 = vsel %vm391_vm2, %v655_v2, %v654_v47  ;;  %v5839_v2 = vld [vmem:[#allocation26_spill] sm:$0xff]  ;;  %v5840_v47 = vld [vmem:[#allocation29_spill] sm:$0xff] }
 0x439   :  { %v657_v3 = vsel %vm394_vm3, %v5838_v49, %v656_v23  ;;  %v676_v46 = vrot.slane %v5839_v2, 5  ;;  %v695_v8 = vrot.slane %v5840_v47, 2 }
 0x440   :  { %v3784_v61 = vpop.eup %3783 }
 0x441   :  { %v5015_v29 = vmul.f32 %v3784_v61, %v1647_v62  ;;  %v668_v62 = vsel %vm388_vm1, %v667_v50, %v666_v59  ;;  %v5833_v61 = vld [vmem:[#allocation22_spill] sm:$0xff]  ;;  %v659_v50 = vsel %vm397_vm4, %v658_v63, %v657_v3  ;;  %v5842_v3 = vld [vmem:[#allocation36_spill] sm:$0xff] }
 0x442   :  { %v670_v14 = vsel %vm391_vm2, %v669_v22, %v668_v62  ;;  %v5841_v59 = vld [vmem:[#allocation18_spill] sm:$0xff]  ;;  %v692_v62 = vrot.slane %v5785_v7, 4 }
 0x443   :  { %5826 = vst [vmem:[#allocation6_spill] sm:$0xff] %v5015_v29  ;;  %1724 = vmatmul.mubr.f32.vlgmr.msra.gmra.mrb[8].mxu0 %v5015_v29  ;;  %1795 = vmatmul.mubr.f32.vlgmr.msra.gmra.mrb[40].mxu1 %v5015_v29  ;;  %v660_v29 = vrot.slane %v5833_v61, 6  ;;  %v671_v22 = vsel %vm394_vm3, %v5841_v59, %v670_v14 }
 0x444   :  { %3522 = vmatpush1.bf16.msra.mxu0 %v3954_v37  ;;  %3554 = vmatpush1.bf16.msra.mxu1 %v4297_v55  ;;  %v673_v27 = vsel %vm397_vm4, %v672_v21, %v671_v22  ;;  %v694_v47 = vsel %vm385_vm0, %v693_v53, %v692_v62 }
 0x445   :  { %3524 = vmatprep.subr.bf16.mxu0 %v3964_v41  ;;  %3556 = vmatprep.subr.bf16.mxu1 %v4300_v57  ;;  %v661_v5 = vsel %vm400_vm5, %v660_v29, %v659_v50  ;;  %v675_v2 = vsel %vm400_vm5, %v674_v16, %v673_v27  ;;  %v696_v9 = vsel %vm388_vm1, %v695_v8, %v694_v47  ;;  %v702_v50 = vrot.slane %v4631_v33, 6 }
 0x446   :  { %1893 = vmatprep.mubr.f32.mxu0 %v5761_v13  ;;  %1964 = vmatprep.mubr.f32.mxu1 %v5761_v13  ;;  %v663_v20 = vsel %vm403_vm6, %v662_v35, %v661_v5  ;;  %v677_v14 = vsel %vm403_vm6, %v676_v46, %v675_v2  ;;  %v698_v21 = vsel %vm391_vm2, %v697_v39, %v696_v9  ;;  %v700_v5 = vrot.slane %v5789_v36, 7 }
 0x447   :  { %v704_v27 = vrot.slane %v5825_v44, 5 }
 0x448   :  { %3526 = vmatpush1.bf16.msra.mxu0 %v3981_v48  ;;  %3558 = vmatpush1.bf16.msra.mxu1 %v4319_v1 }
 0x449   :  { %3528 = vmatprep.subr.bf16.mxu0 %v3993_v52  ;;  %3560 = vmatprep.subr.bf16.mxu1 %v4322_v4 }
 0x44c   :  { %3530 = vmatpush1.bf16.msra.mxu0 %v4008_v58  ;;  %3562 = vmatpush1.bf16.msra.mxu1 %v4341_v10 }
 0x44d   :  { %3532 = vmatprep.subr.bf16.mxu0 %v4023_v0  ;;  %3564 = vmatprep.subr.bf16.mxu1 %v4344_v12 }
 0x450   :  { %3534 = vmatpush1.bf16.msra.mxu0 %v4035_v6  ;;  %3566 = vmatpush1.bf16.msra.mxu1 %v4363_v17 }
 0x451   :  { %3536 = vmatprep.subr.bf16.mxu0 %v4047_v11  ;;  %3568 = vmatprep.subr.bf16.mxu1 %v4366_v18 }
 0x454   :  { %3538 = vmatpush1.bf16.msra.mxu0 %v4068_v19  ;;  %3570 = vmatpush1.bf16.msra.mxu1 %v4385_v25 }
 0x455   :  { %3540 = vmatprep.subr.bf16.mxu0 %v4080_v24  ;;  %3572 = vmatprep.subr.bf16.mxu1 %v4388_v26 }
 0x458   :  { %3542 = vmatpush1.bf16.msra.mxu0 %v4113_v38  ;;  %3574 = vmatpush1.bf16.msra.mxu1 %v4405_v31 }
 0x459   :  { %3544 = vmatprep.subr.bf16.mxu0 %v4118_v40  ;;  %3576 = vmatprep.subr.bf16.mxu1 %v4408_v34 }
 0x45c   :  { %3546 = vmatpush1.bf16.msra.mxu0 %v4149_v54  ;;  %3578 = vmatpush1.bf16.msra.mxu1 %v4425_v42 }
 0x45d   :  { %3548 = vmatprep.subr.bf16.mxu0 %v4155_v56  ;;  %3580 = vmatprep.subr.bf16.mxu1 %v4428_v43 }
 0x460   :  { %3550 = vmatpush1.bf16.msra.mxu0 %v5764_v32  ;;  %3582 = vmatpush1.bf16.msra.mxu1 %v5765_v15 }
 0x461   :  { %3584 = vmatprep.subr.bf16.mxu0 %v5766_v51  ;;  %3616 = vmatprep.subr.bf16.mxu1 %v5767_v28 }
 0x516   :  { %v1725_v23 = vpop.f32.mrb[8].mxu0  ;;  %v1796_v61 = vpop.f32.mrb[40].mxu1 }
 0x517   :  { %v1801_v63 = vadd.f32 %v1725_v23, %v663_v20  ;;  %v1803_v49 = vadd.f32 %v1796_v61, %v5842_v3  ;;  %v1727_v7 = vpop.f32.mrb[9].mxu0  ;;  %v1798_v59 = vpop.f32.mrb[41].mxu1  ;;  %v5843_v20 = vld [vmem:[#allocation31_spill] sm:$0xff] }
 0x518   :  { %v1802_v29 = vadd.f32 %v1727_v7, %v677_v14  ;;  %v699_v61 = vsel %vm394_vm3, %v5843_v20, %v698_v21 }
 0x519   :  { %v1805_v35 = vmul.f32 0.5, %v1801_v63  ;;  %v701_v53 = vsel %vm397_vm4, %v700_v5, %v699_v61  ;;  %v5846_v61 = vld [vmem:[#allocation21_spill] sm:$0xff] }
 0x51a   :  { %v1809_v16 = vmul.f32 0.5, %v1802_v29  ;;  %v703_v8 = vsel %vm400_vm5, %v702_v50, %v701_v53  ;;  %v718_v50 = vrot.slane %v5797_v30, 3  ;;  %v715_v53 = vrot.slane %v5846_v61, 5 }
 0x51b   :  { %3785 = vtanh.f32 %v1805_v35  ;;  %v705_v7 = vsel %vm403_vm6, %v704_v27, %v703_v8  ;;  %v5847_v8 = vld [vmem:[#allocation15_spill] sm:$0xff] }
 0x51c   :  { %3787 = vtanh.f32 %v1809_v16  ;;  %v1804_v39 = vadd.f32 %v1798_v59, %v705_v7  ;;  %v5845_v16 = vld [vmem:[#allocation12_spill] sm:$0xff]  ;;  %v720_v7 = vrot.slane %v5847_v8, 2 }
 0x51d   :  { %3789 = vtanh.f32 %v1803_v49  ;;  %v730_v27 = vrot.slane %v5845_v16, 4 }
 0x51e   :  { %v1814_v9 = vmul.f32 0.5, %v1804_v39  ;;  %v5848_v39 = vld [vmem:[#allocation14_spill] sm:$0xff] }
 0x520   :  { %3791 = vtanh.f32 %v1814_v9  ;;  %v732_v9 = vrot.slane %v5848_v39, 3  ;;  %v5856_v39 = vld [vmem:[#allocation27_spill] sm:$0xff] }
 0x525   :  { %v3786_v2 = vpop.eup %3785 }
 0x526   :  { %v3788_v46 = vpop.eup %3787  ;;  %v1807_v47 = vmul.f32 0.5, %v3786_v2  ;;  %v5849_v2 = vld [vmem:[#allocation17_spill] sm:$0xff] }
 0x527   :  { %v1811_v22 = vmul.f32 0.5, %v3788_v46  ;;  %v3790_v23 = vpop.eup %3789  ;;  %v722_v46 = vrot.slane %v5849_v2, 1  ;;  %v5854_v2 = vld [vmem:[#allocation25_spill] sm:$0xff] }
 0x528   :  { %v1808_v62 = vadd.f32 0.5, %v1807_v47  ;;  %v5850_v47 = vld [vmem:[#allocation23_spill] sm:$0xff] }
 0x529   :  { %v1812_v63 = vadd.f32 0.5, %v1811_v22  ;;  %v729_v22 = vrot.slane %v5850_v47, 5 }
 0x52a   :  { %v1819_v3 = vmul.f32 %v3790_v23, %v1808_v62  ;;  %v3792_v21 = vpop.eup %3791  ;;  %v5851_v62 = vld [vmem:[#allocation16_spill] sm:$0xff]  ;;  %v5852_v23 = vld [vmem:[#allocation18_spill] sm:$0xff] }
 0x52b   :  { %v1818_v14 = vmul.f32 %v1812_v63, %v5012_v60  ;;  %v1816_v5 = vmul.f32 0.5, %v3792_v21  ;;  %v716_v60 = vrot.slane %v5775_v45, 4  ;;  %v736_v63 = vrot.slane %v5852_v23, 1 }
 0x52d   :  { %v5100_v29 = vadd.f32 %v1819_v3, %v1818_v14  ;;  %v1817_v49 = vadd.f32 0.5, %v1816_v5  ;;  %v731_v14 = vsel %vm385_vm0, %v730_v27, %v729_v22  ;;  %v5858_v22 = vld [vmem:[#allocation29_spill] sm:$0xff] }
 0x52e   :  { %v733_v5 = vsel %vm388_vm1, %v732_v9, %v731_v14 }
 0x52f   :  { %3793 = vtanh.f32 %v5100_v29 }
 0x539   :  { %v3794_v59 = vpop.eup %3793 }
 0x53a   :  { %v5103_v35 = vmul.f32 %v3794_v59, %v1817_v49  ;;  %v5853_v59 = vld [vmem:[#allocation22_spill] sm:$0xff] }
 0x53c   :  { %5844 = vst [vmem:[#allocation8_spill] sm:$0xff] %v5103_v35  ;;  %1894 = vmatmul.mubr.f32.vlgmr.msra.gmra.mrb[10].mxu0 %v5103_v35  ;;  %1965 = vmatmul.mubr.f32.vlgmr.msra.gmra.mrb[42].mxu1 %v5103_v35  ;;  %v725_v35 = vrot.slane %v5853_v59, 7 }
 0x53d   :  { %3586 = vmatpush1.bf16.msra.mxu0 %v3954_v37  ;;  %3618 = vmatpush1.bf16.msra.mxu1 %v4297_v55 }
 0x53e   :  { %3588 = vmatprep.subr.bf16.mxu0 %v3964_v41  ;;  %3620 = vmatprep.subr.bf16.mxu1 %v4300_v57 }
 0x53f   :  { %2063 = vmatprep.mubr.f32.mxu0 %v5761_v13  ;;  %2134 = vmatprep.mubr.f32.mxu1 %v5761_v13 }
 0x541   :  { %3590 = vmatpush1.bf16.msra.mxu0 %v3981_v48  ;;  %3622 = vmatpush1.bf16.msra.mxu1 %v4319_v1 }
 0x542   :  { %3592 = vmatprep.subr.bf16.mxu0 %v3993_v52  ;;  %3624 = vmatprep.subr.bf16.mxu1 %v4322_v4 }
 0x545   :  { %3594 = vmatpush1.bf16.msra.mxu0 %v4008_v58  ;;  %3626 = vmatpush1.bf16.msra.mxu1 %v4341_v10 }
 0x546   :  { %3596 = vmatprep.subr.bf16.mxu0 %v4023_v0  ;;  %3628 = vmatprep.subr.bf16.mxu1 %v4344_v12 }
 0x549   :  { %3598 = vmatpush1.bf16.msra.mxu0 %v4035_v6  ;;  %3630 = vmatpush1.bf16.msra.mxu1 %v4363_v17 }
 0x54a   :  { %3600 = vmatprep.subr.bf16.mxu0 %v4047_v11  ;;  %3632 = vmatprep.subr.bf16.mxu1 %v4366_v18 }
 0x54d   :  { %3602 = vmatpush1.bf16.msra.mxu0 %v4068_v19  ;;  %3634 = vmatpush1.bf16.msra.mxu1 %v4385_v25 }
 0x54e   :  { %3604 = vmatprep.subr.bf16.mxu0 %v4080_v24  ;;  %3636 = vmatprep.subr.bf16.mxu1 %v4388_v26 }
 0x551   :  { %3606 = vmatpush1.bf16.msra.mxu0 %v4113_v38  ;;  %3638 = vmatpush1.bf16.msra.mxu1 %v4405_v31 }
 0x552   :  { %3608 = vmatprep.subr.bf16.mxu0 %v4118_v40  ;;  %3640 = vmatprep.subr.bf16.mxu1 %v4408_v34 }
 0x555   :  { %3610 = vmatpush1.bf16.msra.mxu0 %v4149_v54  ;;  %3642 = vmatpush1.bf16.msra.mxu1 %v4425_v42 }
 0x556   :  { %3612 = vmatprep.subr.bf16.mxu0 %v4155_v56  ;;  %3644 = vmatprep.subr.bf16.mxu1 %v4428_v43 }
 0x559   :  { %3614 = vmatpush1.bf16.msra.mxu0 %v5764_v32  ;;  %3646 = vmatpush1.bf16.msra.mxu1 %v5765_v15 }
 0x55a   :  { %3648 = vmatprep.subr.bf16.mxu0 %v5766_v51  ;;  %3680 = vmatprep.subr.bf16.mxu1 %v5767_v28  ;;  %v734_v51 = vrot.slane %v5851_v62, 2  ;;  %v717_v28 = vsel %vm385_vm0, %v716_v60, %v715_v53  ;;  %v727_v62 = vrot.slane %v5854_v2, 6  ;;  %v5855_v53 = vld [vmem:[#allocation24_spill] sm:$0xff] }
 0x55b   :  { %v719_v3 = vsel %vm388_vm1, %v718_v50, %v717_v28  ;;  %v739_v23 = vrot.slane %v5855_v53, 7  ;;  %v758_v50 = vrot.slane %v5856_v39, 4  ;;  %v5857_v28 = vld [vmem:[#allocation26_spill] sm:$0xff] }
 0x55c   :  { %v721_v21 = vsel %vm391_vm2, %v720_v7, %v719_v3  ;;  %v735_v47 = vsel %vm391_vm2, %v734_v51, %v733_v5  ;;  %v741_v27 = vrot.slane %v5857_v28, 6  ;;  %v760_v7 = vrot.slane %v5858_v22, 3  ;;  %v5859_v3 = vld [vmem:[#allocation19_spill] sm:$0xff]  ;;  %v5862_v5 = vld [vmem:[#allocation20_spill] sm:$0xff] }
 0x55d   :  { %v723_v49 = vsel %vm394_vm3, %v722_v46, %v721_v21  ;;  %v737_v60 = vsel %vm394_vm3, %v736_v63, %v735_v47  ;;  %v5860_v46 = vld [vmem:[#allocation28_spill] sm:$0xff]  ;;  %v5861_v21 = vld [vmem:[#allocation30_spill] sm:$0xff]  ;;  %v764_v63 = vrot.slane %v5843_v20, 1 }
 0x55e   :  { %v724_v9 = vsel %vm397_vm4, %v5859_v3, %v723_v49  ;;  %v757_v14 = vrot.slane %v5860_v46, 5  ;;  %v762_v59 = vrot.slane %v5861_v21, 2  ;;  %v738_v47 = vsel %vm397_vm4, %v5862_v5, %v737_v60  ;;  %v5863_v3 = vld [vmem:[#allocation38_spill] sm:$0xff] }
 0x55f   :  { %v726_v51 = vsel %vm400_vm5, %v725_v35, %v724_v9  ;;  %v740_v22 = vsel %vm400_vm5, %v739_v23, %v738_v47 }
 0x560   :  { %v728_v53 = vsel %vm403_vm6, %v727_v62, %v726_v51  ;;  %v759_v2 = vsel %vm385_vm0, %v758_v50, %v757_v14  ;;  %v742_v21 = vsel %vm403_vm6, %v741_v27, %v740_v22  ;;  %v767_v51 = vrot.slane %v4631_v33, 7 }
 0x561   :  { %v761_v35 = vsel %vm388_vm1, %v760_v7, %v759_v2  ;;  %v769_v50 = vrot.slane %v5825_v44, 6 }
 0x562   :  { %v763_v20 = vsel %vm391_vm2, %v762_v59, %v761_v35 }
 0x563   :  { %v765_v62 = vsel %vm394_vm3, %v764_v63, %v763_v20 }
 0x60f   :  { %v1895_v39 = vpop.f32.mrb[10].mxu0  ;;  %v1966_v28 = vpop.f32.mrb[42].mxu1 }
 0x610   :  { %v1971_v49 = vadd.f32 %v1895_v39, %v728_v53  ;;  %v1973_v46 = vadd.f32 %v1966_v28, %v5863_v3  ;;  %v1897_v8 = vpop.f32.mrb[11].mxu0  ;;  %v1968_v9 = vpop.f32.mrb[43].mxu1  ;;  %v766_v39 = vsel %vm397_vm4, %v5789_v36, %v765_v62 }
 0x611   :  { %v1972_v60 = vadd.f32 %v1897_v8, %v742_v21  ;;  %v768_v53 = vsel %vm400_vm5, %v767_v51, %v766_v39  ;;  %v5873_v51 = vld [vmem:[#allocation27_spill] sm:$0xff]  ;;  %v5874_v39 = vld [vmem:[#allocation26_spill] sm:$0xff] }
 0x612   :  { %v1975_v5 = vmul.f32 0.5, %v1971_v49  ;;  %v770_v2 = vsel %vm403_vm6, %v769_v50, %v768_v53  ;;  %v806_v53 = vrot.slane %v5874_v39, 7 }
 0x613   :  { %v1979_v23 = vmul.f32 0.5, %v1972_v60  ;;  %v1974_v8 = vadd.f32 %v1968_v9, %v770_v2  ;;  %v5875_v2 = vld [vmem:[#allocation29_spill] sm:$0xff] }
 0x614   :  { %3795 = vtanh.f32 %v1975_v5 }
 0x615   :  { %3797 = vtanh.f32 %v1979_v23  ;;  %v1984_v59 = vmul.f32 0.5, %v1974_v8  ;;  %v823_v23 = vrot.slane %v5873_v51, 5  ;;  %v825_v8 = vrot.slane %v5875_v2, 4 }
 0x616   :  { %3799 = vtanh.f32 %v1973_v46 }
 0x617   :  { %3801 = vtanh.f32 %v1984_v59  ;;  %v5876_v59 = vld [vmem:[#allocation28_spill] sm:$0xff] }
 0x61e   :  { %v3796_v28 = vpop.eup %3795 }
 0x61f   :  { %v3798_v27 = vpop.eup %3797  ;;  %v1977_v20 = vmul.f32 0.5, %v3796_v28  ;;  %v822_v28 = vrot.slane %v5876_v59, 6 }
 0x620   :  { %v1981_v22 = vmul.f32 0.5, %v3798_v27  ;;  %v3800_v3 = vpop.eup %3799  ;;  %v5877_v27 = vld [vmem:[#allocation30_spill] sm:$0xff] }
 0x621   :  { %v1978_v7 = vadd.f32 0.5, %v1977_v20  ;;  %v3802_v63 = vpop.eup %3801  ;;  %v827_v20 = vrot.slane %v5877_v27, 3 }
 0x622   :  { %v1982_v14 = vadd.f32 0.5, %v1981_v22  ;;  %v1986_v49 = vmul.f32 0.5, %v3802_v63  ;;  %v5878_v22 = vld [vmem:[#allocation22_spill] sm:$0xff] }
 0x623   :  { %v1989_v21 = vmul.f32 %v3800_v3, %v1978_v7  ;;  %v5879_v3 = vld [vmem:[#allocation31_spill] sm:$0xff] }
 0x624   :  { %v1988_v5 = vmul.f32 %v1982_v14, %v5100_v29  ;;  %v1987_v46 = vadd.f32 0.5, %v1986_v49  ;;  %v5872_v29 = vld [vmem:[#allocation25_spill] sm:$0xff]  ;;  %v829_v14 = vrot.slane %v5879_v3, 2  ;;  %v5880_v49 = vld [vmem:[#allocation24_spill] sm:$0xff] }
 0x625   :  { %v792_v60 = vrot.slane %v5872_v29, 7 }
 0x626   :  { %v5188_v47 = vadd.f32 %v1989_v21, %v1988_v5 }
 0x628   :  { %3803 = vtanh.f32 %v5188_v47 }
 0x632   :  { %v3804_v35 = vpop.eup %3803 }
 0x633   :  { %v5191_v9 = vmul.f32 %v3804_v35, %v1987_v46  ;;  %v824_v35 = vsel %vm385_vm0, %v823_v23, %v822_v28 }
 0x635   :  { %2064 = vmatmul.mubr.f32.vlgmr.msra.gmra.mrb[12].mxu0 %v5191_v9  ;;  %2135 = vmatmul.mubr.f32.vlgmr.msra.gmra.mrb[44].mxu1 %v5191_v9 }
 0x636   :  { %3650 = vmatpush1.bf16.msra.mxu0 %v3954_v37  ;;  %3682 = vmatpush1.bf16.msra.mxu1 %v4297_v55  ;;  %v2345_v37 = vld [vmem:[%s5651_s4] sm:$0xff] }
 0x637   :  { %3652 = vmatprep.subr.bf16.mxu0 %v3964_v41  ;;  %3684 = vmatprep.subr.bf16.mxu1 %v4300_v57  ;;  %v2346_v41 = vld [vmem:[%s5651_s4 + $0x8] sm:$0xff]  ;;  %v5868_v57 = vld [vmem:[#allocation16_spill] sm:$0xff] }
 0x638   :  { %2233 = vmatprep.mubr.f32.mxu0 %v5761_v13  ;;  %2304 = vmatprep.mubr.f32.mxu1 %v5761_v13 }
 0x63a   :  { %3654 = vmatpush1.bf16.msra.mxu0 %v3981_v48  ;;  %3686 = vmatpush1.bf16.msra.mxu1 %v4319_v1  ;;  %v5233_v48 = vpack.c.bf16 %v2346_v41, %v2345_v37  ;;  %v799_v1 = vrot.slane %v5868_v57, 3  ;;  %v831_v37 = vrot.slane %v5789_v36, 1 }
 0x63b   :  { %3656 = vmatprep.subr.bf16.mxu0 %v3993_v52  ;;  %3688 = vmatprep.subr.bf16.mxu1 %v4322_v4  ;;  %v781_v52 = vrot.slane %v5775_v45, 5 }
 0x63e   :  { %3658 = vmatpush1.bf16.msra.mxu0 %v4008_v58  ;;  %3690 = vmatpush1.bf16.msra.mxu1 %v4341_v10  ;;  %v783_v58 = vrot.slane %v5797_v30, 4  ;;  %v5869_v10 = vld [vmem:[#allocation19_spill] sm:$0xff] }
 0x63f   :  { %3660 = vmatprep.subr.bf16.mxu0 %v4023_v0  ;;  %3692 = vmatprep.subr.bf16.mxu1 %v4344_v12  ;;  %v795_v0 = vrot.slane %v5845_v16, 5  ;;  %v789_v12 = vrot.slane %v5869_v10, 1 }
 0x642   :  { %3662 = vmatpush1.bf16.msra.mxu0 %v4035_v6  ;;  %3694 = vmatpush1.bf16.msra.mxu1 %v4363_v17  ;;  %v780_v6 = vrot.slane %v5846_v61, 6  ;;  %v5870_v17 = vld [vmem:[#allocation18_spill] sm:$0xff] }
 0x643   :  { %3664 = vmatprep.subr.bf16.mxu0 %v4047_v11  ;;  %3696 = vmatprep.subr.bf16.mxu1 %v4366_v18  ;;  %v5864_v11 = vld [vmem:[#allocation15_spill] sm:$0xff]  ;;  %v801_v18 = vrot.slane %v5870_v17, 2 }
 0x644   :  { %v782_v4 = vsel %vm385_vm0, %v781_v52, %v780_v6  ;;  %v5881_v52 = vld [vmem:[#allocation39_spill] sm:$0xff] }
 0x646   :  { %3666 = vmatpush1.bf16.msra.mxu0 %v4068_v19  ;;  %3698 = vmatpush1.bf16.msra.mxu1 %v4385_v25  ;;  %v785_v19 = vrot.slane %v5864_v11, 3  ;;  %v784_v25 = vsel %vm388_vm1, %v783_v58, %v782_v4 }
 0x647   :  { %3668 = vmatprep.subr.bf16.mxu0 %v4080_v24  ;;  %3700 = vmatprep.subr.bf16.mxu1 %v4388_v26  ;;  %v5865_v24 = vld [vmem:[#allocation14_spill] sm:$0xff] }
 0x64a   :  { %3670 = vmatpush1.bf16.msra.mxu0 %v4113_v38  ;;  %3702 = vmatpush1.bf16.msra.mxu1 %v4405_v31  ;;  %v797_v38 = vrot.slane %v5865_v24, 4  ;;  %v5871_v31 = vld [vmem:[#allocation20_spill] sm:$0xff] }
 0x64b   :  { %3672 = vmatprep.subr.bf16.mxu0 %v4118_v40  ;;  %3704 = vmatprep.subr.bf16.mxu1 %v4408_v34  ;;  %v5866_v40 = vld [vmem:[#allocation17_spill] sm:$0xff]  ;;  %v803_v34 = vrot.slane %v5871_v31, 1 }
 0x64e   :  { %3674 = vmatpush1.bf16.msra.mxu0 %v4149_v54  ;;  %3706 = vmatpush1.bf16.msra.mxu1 %v4425_v42  ;;  %v787_v54 = vrot.slane %v5866_v40, 2  ;;  %v786_v42 = vsel %vm391_vm2, %v785_v19, %v784_v25  ;;  %v826_v19 = vsel %vm388_vm1, %v825_v8, %v824_v35  ;;  %v834_v25 = vrot.slane %v5825_v44, 7 }
 0x64f   :  { %3676 = vmatprep.subr.bf16.mxu0 %v4155_v56  ;;  %3708 = vmatprep.subr.bf16.mxu1 %v4428_v43  ;;  %v5867_v56 = vld [vmem:[#allocation23_spill] sm:$0xff] }
 0x650   :  { %v794_v55 = vrot.slane %v5867_v56, 6  ;;  %v788_v13 = vsel %vm394_vm3, %v787_v54, %v786_v42 }
 0x652   :  { %3678 = vmatpush1.bf16.msra.mxu0 %v5764_v32  ;;  %3710 = vmatpush1.bf16.msra.mxu1 %v5765_v15  ;;  %v796_v26 = vsel %vm385_vm0, %v795_v0, %v794_v55  ;;  %v790_v15 = vsel %vm397_vm4, %v789_v12, %v788_v13  ;;  %v828_v55 = vsel %vm391_vm2, %v827_v20, %v826_v19  ;;  %v2353_v19 = vld [vmem:[%s5651_s4 + $0x40] sm:$0xff] }
 0x653   :  { %3712 = vmatprep.subr.bf16.mxu0 %v5233_v48  ;;  %v798_v43 = vsel %vm388_vm1, %v797_v38, %v796_v26  ;;  %v791_v7 = vsel %vm400_vm5, %v5878_v22, %v790_v15  ;;  %v830_v4 = vsel %vm394_vm3, %v829_v14, %v828_v55  ;;  %v2347_v14 = vld [vmem:[%s5651_s4 + $0x10] sm:$0xff]  ;;  %v2356_v55 = vld [vmem:[%s5651_s4 + $0x58] sm:$0xff] }
 0x654   :  { %v800_v32 = vsel %vm391_vm2, %v799_v1, %v798_v43  ;;  %v793_v21 = vsel %vm403_vm6, %v792_v60, %v791_v7 }
 0x655   :  { %v802_v62 = vsel %vm394_vm3, %v801_v18, %v800_v32  ;;  %v832_v18 = vsel %vm397_vm4, %v831_v37, %v830_v4  ;;  %v2350_v37 = vld [vmem:[%s5651_s4 + $0x28] sm:$0xff]  ;;  %v2357_v4 = vld [vmem:[%s5651_s4 + $0x60] sm:$0xff] }
 0x656   :  { %v804_v50 = vsel %vm397_vm4, %v803_v34, %v802_v62  ;;  %v833_v26 = vsel %vm400_vm5, %v4631_v33, %v832_v18 }
 0x657   :  { %v805_v46 = vsel %vm400_vm5, %v5880_v49, %v804_v50  ;;  %v835_v34 = vsel %vm403_vm6, %v834_v25, %v833_v26  ;;  %v2359_v25 = vld [vmem:[%s5651_s4 + $0x70] sm:$0xff]  ;;  %v2360_v26 = vld [vmem:[%s5651_s4 + $0x78] sm:$0xff] }
 0x658   :  { %v807_v0 = vsel %vm403_vm6, %v806_v53, %v805_v46 }
 0x708   :  { %v2065_v5 = vpop.f32.mrb[12].mxu0  ;;  %v2136_v63 = vpop.f32.mrb[44].mxu1 }
 0x709   :  { %v2141_v41 = vadd.f32 %v2065_v5, %v793_v21  ;;  %v2143_v58 = vadd.f32 %v2136_v63, %v5881_v52  ;;  %v2067_v6 = vpop.f32.mrb[13].mxu0  ;;  %v2138_v38 = vpop.f32.mrb[45].mxu1  ;;  %v2348_v21 = vld [vmem:[%s5651_s4 + $0x18] sm:$0xff] }
 0x70a   :  { %v2142_v54 = vadd.f32 %v2067_v6, %v807_v0  ;;  %v2144_v42 = vadd.f32 %v2138_v38, %v835_v34  ;;  %v3715_v35 = vpack.c.bf16 %v2348_v21, %v2347_v14  ;;  %v2352_v0 = vld [vmem:[%s5651_s4 + $0x38] sm:$0xff]  ;;  %v3739_v34 = vpack.c.bf16 %v2360_v26, %v2359_v25 }
 0x70b   :  { %v2145_v1 = vmul.f32 0.5, %v2141_v41  ;;  %v5882_v41 = vld [vmem:[#allocation37_spill] sm:$0xff] }
 0x70c   :  { %v2149_v12 = vmul.f32 0.5, %v2142_v54  ;;  %v2154_v43 = vmul.f32 0.5, %v2144_v42  ;;  %v2355_v54 = vld [vmem:[%s5651_s4 + $0x50] sm:$0xff]  ;;  %v5883_v42 = vld [vmem:[#allocation7_spill] sm:$0xff] }
 0x70d   :  { %3805 = vtanh.f32 %v2145_v1  ;;  %v3731_v1 = vpack.c.bf16 %v2356_v55, %v2355_v54 }
 0x70e   :  { %3807 = vtanh.f32 %v2149_v12  ;;  %v2358_v12 = vld [vmem:[%s5651_s4 + $0x68] sm:$0xff] }
 0x70f   :  { %3809 = vtanh.f32 %v2143_v58  ;;  %v2351_v58 = vld [vmem:[%s5651_s4 + $0x30] sm:$0xff]  ;;  %v3735_v18 = vpack.c.bf16 %v2358_v12, %v2357_v4 }
 0x710   :  { %3811 = vtanh.f32 %v2154_v43  ;;  %v3723_v6 = vpack.c.bf16 %v2352_v0, %v2351_v58  ;;  %v5884_v43 = vld [vmem:[#allocation9_spill] sm:$0xff]  ;;  %v896_v58 = vrot.slane %v5789_v36, 2  ;;  %v898_v0 = vrot.slane %v4631_v33, 1 }
 0x717   :  { %v3806_v13 = vpop.eup %3805 }
 0x718   :  { %v3808_v32 = vpop.eup %3807  ;;  %v2147_v15 = vmul.f32 0.5, %v3806_v13  ;;  %v5885_v13 = vld [vmem:[#allocation6_spill] sm:$0xff] }
 0x719   :  { %v2151_v60 = vmul.f32 0.5, %v3808_v32  ;;  %v3810_v23 = vpop.eup %3809  ;;  %v5886_v32 = vld [vmem:[#allocation8_spill] sm:$0xff] }
 0x71a   :  { %v2148_v62 = vadd.f32 0.5, %v2147_v15  ;;  %v3812_v20 = vpop.eup %3811  ;;  %v846_v15 = vrot.slane %v5775_v45, 6  ;;  %v854_v45 = vrot.slane %v5869_v10, 2 }
 0x71b   :  { %v2152_v50 = vadd.f32 0.5, %v2151_v60  ;;  %v2156_v7 = vmul.f32 0.5, %v3812_v20  ;;  %v848_v60 = vrot.slane %v5797_v30, 5  ;;  %v859_v20 = vrot.slane %v5867_v56, 7 }
 0x71c   :  { %v2159_v53 = vmul.f32 %v3810_v23, %v2148_v62  ;;  %v860_v62 = vrot.slane %v5845_v16, 6  ;;  %v845_v23 = vrot.slane %v5846_v61, 7  ;;  %v866_v30 = vrot.slane %v5870_v17, 3 }
 0x71d   :  { %v2158_v8 = vmul.f32 %v2152_v50, %v5188_v47  ;;  %v2157_v5 = vadd.f32 0.5, %v2156_v7  ;;  %v2349_v47 = vld [vmem:[%s5651_s4 + $0x20] sm:$0xff]  ;;  %v850_v50 = vrot.slane %v5864_v11, 4  ;;  %v864_v7 = vrot.slane %v5868_v57, 4 }
 0x71e   :  { %v3719_v52 = vpack.c.bf16 %v2350_v37, %v2349_v47  ;;  %v856_v61 = vrot.slane %v5878_v22, 1  ;;  %v861_v11 = vsel %vm385_vm0, %v860_v62, %v859_v20  ;;  %v870_v57 = vrot.slane %v5880_v49, 1 }
 0x71f   :  { %v5283_v28 = vadd.f32 %v2159_v53, %v2158_v8  ;;  %v862_v53 = vrot.slane %v5865_v24, 5  ;;  %v852_v8 = vrot.slane %v5866_v40, 3  ;;  %v868_v24 = vrot.slane %v5871_v31, 2 }
 0x720   :  { %v888_v22 = vrot.slane %v5873_v51, 6  ;;  %v887_v49 = vrot.slane %v5876_v59, 7  ;;  %v894_v47 = vrot.slane %v5879_v3, 3  ;;  %v3826_v62 = vmov 1966171168  }
 0x721   :  { %3813 = vtanh.f32 %v5283_v28  ;;  %v863_v56 = vsel %vm388_vm1, %v862_v53, %v861_v11  ;;  %v5388_v53 = vld [vmem:[%s5653_s5] ss:$0 sm:$0xff] }
 0x722   :  { %v865_v10 = vsel %vm391_vm2, %v864_v7, %v863_v56  ;;  %v889_v51 = vsel %vm385_vm0, %v888_v22, %v887_v49 }
 0x723   :  { %v867_v21 = vsel %vm394_vm3, %v866_v30, %v865_v10 }
 0x724   :  { %v869_v31 = vsel %vm397_vm4, %v868_v24, %v867_v21 }
 0x72b   :  { %v3814_v63 = vpop.eup %3813 }
 0x72c   :  { %v2162_v46 = vmul.f32 %v3814_v63, %v2157_v5  ;;  %v890_v63 = vrot.slane %v5875_v2, 5 }
 0x72e   :  { %2234 = vmatmul.mubr.f32.vlgmr.msra.gmra.mrb[14].mxu0 %v2162_v46  ;;  %2305 = vmatmul.mubr.f32.vlgmr.msra.gmra.mrb[46].mxu1 %v2162_v46  ;;  %v891_v3 = vsel %vm388_vm1, %v890_v63, %v889_v51 }
 0x72f   :  { %3714 = vmatpush3.bf16.msra.mxu0 %v5233_v48  ;;  %3123 = vmatprep.mubr.f32.mxu0 %v5882_v41  ;;  %v2354_v48 = vld [vmem:[%s5651_s4 + $0x48] sm:$0xff] }
 0x730   :  { %3716 = vmatprep.subr.bf16.mxu0 %v3715_v35  ;;  %v3727_v38 = vpack.c.bf16 %v2354_v48, %v2353_v19 }
 0x733   :  { %3718 = vmatpush3.bf16.msra.mxu0 %v3715_v35  ;;  %v892_v35 = vrot.slane %v5877_v27, 4 }
 0x734   :  { %3720 = vmatprep.subr.bf16.mxu0 %v3719_v52 }
 0x737   :  { %3722 = vmatpush3.bf16.msra.mxu0 %v3719_v52 }
 0x738   :  { %3724 = vmatprep.subr.bf16.mxu0 %v3723_v6 }
 0x73b   :  { %3726 = vmatpush3.bf16.msra.mxu0 %v3723_v6  ;;  %v5887_v6 = vld [vmem:[#allocation40_spill] sm:$0xff] }
 0x73c   :  { %3728 = vmatprep.subr.bf16.mxu0 %v3727_v38 }
 0x73f   :  { %3730 = vmatpush3.bf16.msra.mxu0 %v3727_v38 }
 0x740   :  { %3732 = vmatprep.subr.bf16.mxu0 %v3731_v1 }
 0x743   :  { %3734 = vmatpush3.bf16.msra.mxu0 %v3731_v1 }
 0x744   :  { %3736 = vmatprep.subr.bf16.mxu0 %v3735_v18 }
 0x747   :  { %3738 = vmatpush3.bf16.msra.mxu0 %v3735_v18 }
 0x748   :  { %3740 = vmatprep.subr.bf16.mxu0 %v3739_v34 }
 0x74b   :  { %3742 = vmatpush3.bf16.msra.mxu0 %v3739_v34 }
 0x74e   :  { %3124 = vmatmul.mubr.f32.vlgmr.msra.gmra.mrb[16].mxu0 %v5883_v42 }
 0x74f   :  { %3126 = vmatprep.mubr.f32.mxu0 %v5884_v43 }
 0x752   :  { %3127 = vmatmul.mubr.f32.gmra.mrb[18].mxu0 %v5885_v13 }
 0x753   :  { %3129 = vmatprep.mubr.f32.mxu0 %v5886_v32 }
 0x756   :  { %3130 = vmatmul.mubr.f32.gmra.mrb[20].mxu0 %v5191_v9  ;;  %v847_v9 = vsel %vm385_vm0, %v846_v15, %v845_v23  ;;  %v2492_v23 = vunpack.c.l.s4 %v3826_v62 }
 0x757   :  { %3132 = vmatprep.mubr.f32.mxu0 %v2162_v46  ;;  %v849_v16 = vsel %vm388_vm1, %v848_v60, %v847_v9  ;;  %v871_v46 = vsel %vm400_vm5, %v870_v57, %v869_v31 }
 0x758   :  { %v851_v40 = vsel %vm391_vm2, %v850_v50, %v849_v16  ;;  %v872_v59 = vsel %vm403_vm6, %v5874_v39, %v871_v46 }
 0x759   :  { %v853_v14 = vsel %vm394_vm3, %v852_v8, %v851_v40  ;;  %v2493_v8 = vunpack.c.0.s8 %v2492_v23 }
 0x75a   :  { %v855_v17 = vsel %vm397_vm4, %v854_v45, %v853_v14 }
 0x75b   :  { %v857_v5 = vsel %vm400_vm5, %v856_v61, %v855_v17  ;;  %v5888_v61 = vld [vmem:[#allocation10_spill] sm:$0xff] }
 0x75c   :  { %v858_v37 = vsel %vm403_vm6, %v5872_v29, %v857_v5  ;;  %v893_v29 = vsel %vm391_vm2, %v892_v35, %v891_v3  ;;  %v5393_v11 = vsub.s32 %v2493_v8, %v5888_v61 }
 0x75d   :  { %v895_v55 = vsel %vm394_vm3, %v894_v47, %v893_v29 }
 0x75e   :  { %v897_v36 = vsel %vm397_vm4, %v896_v58, %v895_v55 }
 0x75f   :  { %v899_v33 = vsel %vm400_vm5, %v898_v0, %v897_v36 }
 0x760   :  { %v900_v39 = vsel %vm403_vm6, %v5825_v44, %v899_v33 }
 0x801   :  { %v2235_v41 = vpop.f32.mrb[14].mxu0  ;;  %v2306_v52 = vpop.f32.mrb[46].mxu1 }
 0x802   :  { %v2311_v2 = vadd.f32 %v2235_v41, %v858_v37  ;;  %v2313_v19 = vadd.f32 %v2306_v52, %v5887_v6  ;;  %v2237_v27 = vpop.f32.mrb[15].mxu0  ;;  %v2308_v48 = vpop.f32.mrb[47].mxu1 }
 0x803   :  { %v2312_v38 = vadd.f32 %v2237_v27, %v872_v59  ;;  %v2314_v4 = vadd.f32 %v2308_v48, %v900_v39 }
 0x804   :  { %v2315_v54 = vmul.f32 0.5, %v2311_v2 }
 0x805   :  { %v2319_v1 = vmul.f32 0.5, %v2312_v38  ;;  %v2324_v12 = vmul.f32 0.5, %v2314_v4 }
 0x806   :  { %3815 = vtanh.f32 %v2315_v54 }
 0x807   :  { %3817 = vtanh.f32 %v2319_v1 }
 0x808   :  { %3819 = vtanh.f32 %v2313_v19 }
 0x809   :  { %3821 = vtanh.f32 %v2324_v12 }
 0x810   :  { %v3816_v18 = vpop.eup %3815 }
 0x811   :  { %v3818_v25 = vpop.eup %3817  ;;  %v2317_v26 = vmul.f32 0.5, %v3816_v18 }
 0x812   :  { %v2321_v34 = vmul.f32 0.5, %v3818_v25  ;;  %v3820_v43 = vpop.eup %3819 }
 0x813   :  { %v2318_v42 = vadd.f32 0.5, %v2317_v26  ;;  %v3822_v44 = vpop.eup %3821 }
 0x814   :  { %v2322_v13 = vadd.f32 0.5, %v2321_v34  ;;  %v2326_v50 = vmul.f32 0.5, %v3822_v44 }
 0x815   :  { %v2329_v32 = vmul.f32 %v3820_v43, %v2318_v42 }
 0x816   :  { %v2328_v15 = vmul.f32 %v2322_v13, %v5283_v28  ;;  %v2327_v9 = vadd.f32 0.5, %v2326_v50 }
 0x818   :  { %v2330_v60 = vadd.f32 %v2329_v32, %v2328_v15 }
 0x81a   :  { %3823 = vtanh.f32 %v2330_v60  ;;  %3021 = vst [vmem:[%s5652_s8] sm:$0xff] %v2330_v60 }
 0x821   :  { %v3125_v20 = vpop.f32.mrb[16].mxu0 }
 0x822   :  { %v2440_v7 = vadd.f32 %v3125_v20, %v5388_v53  ;;  %v2434_v28 = vpop.f32.mrb[17].mxu0 }
 0x823   :  { %v2435_v45 = vadd.f32 %v5388_v53, %v2434_v28 }
 0x824   :  { %v3824_v30 = vpop.eup %3823  ;;  %v2474_v16 = vmax.f32 %v2440_v7, 0.0 }
 0x825   :  { %v2473_v24 = vmax.f32 %v2435_v45, 0.0  ;;  %v3128_v40 = vpop.f32.mrb[18].mxu0  ;;  %v2332_v56 = vmul.f32 %v3824_v30, %v2327_v9 }
 0x826   :  { %v2482_v57 = vmul.f32 -1.0, %v2474_v16  ;;  %v2450_v14 = vadd.f32 %v3128_v40, %v5388_v53  ;;  %v2444_v10 = vpop.f32.mrb[19].mxu0 }
 0x827   :  { %v2481_v17 = vmul.f32 -1.0, %v2473_v24  ;;  %v2445_v21 = vadd.f32 %v5388_v53, %v2444_v10  ;;  %3133 = vmatmul.mubr.f32.gmra.mrb[22].mxu0 %v2332_v56  ;;  %3020 = vst [vmem:[%s5654_s7] sm:$0xff] %v2332_v56 }
 0x828   :  { %v2556_v22 = vcombine.high %v2482_v57, %v2482_v57  ;;  %v2563_v5 = vrot.slane %v2482_v57, %v5393_v11  ;;  %v2476_v31 = vmax.f32 %v2450_v14, 0.0 }
 0x829   :  { %v2490_v63 = vcombine.high %v2481_v17, %v2481_v17  ;;  %v2497_v46 = vrot.slane %v2481_v17, %v5393_v11  ;;  %v2475_v49 = vmax.f32 %v2445_v21, 0.0  ;;  %v3131_v35 = vpop.f32.mrb[20].mxu0 }
 0x82a   :  { %v2570_v47 = vrot.slane %v2556_v22, %v5393_v11  ;;  %v2571_v37 = vcombine.high %v2563_v5, %v2563_v5  ;;  %v2579_v41 = vrot.slane %v2563_v5, %v5393_v11  ;;  %3039 = vst.sshfl [vmem:[%s5655_s6 + $0x1] sm:$0x1 pattern:$0x73625140] %v2563_v5  ;;  %v2484_v52 = vmul.f32 -1.0, %v2476_v31  ;;  %v5407_v51 = vpop.f32.mrb[21].mxu0 }
 0x82b   :  { %v2504_v58 = vrot.slane %v2490_v63, %v5393_v11  ;;  %v2505_v0 = vcombine.high %v2497_v46, %v2497_v46  ;;  %v2513_v2 = vrot.slane %v2497_v46, %v5393_v11  ;;  %3035 = vst.sshfl [vmem:[%s5655_s6] sm:$0x1 pattern:$0x73625140] %v2497_v46  ;;  %v2483_v6 = vmul.f32 -1.0, %v2475_v49 }
 0x82c   :  { %v2572_v19 = vcombine.high %v2570_v47, %v2570_v47  ;;  %v2586_v59 = vrot.slane %v2570_v47, %v5393_v11  ;;  %v2593_v27 = vrot.slane %v2571_v37, %v5393_v11  ;;  %v2601_v3 = vcombine.high %v2579_v41, %v2579_v41  ;;  %3040 = vst.sshfl [vmem:[%s5655_s6 + $0x9] sm:$0x1 pattern:$0x73625140] %v2571_v37 }
 0x82d   :  { %3041 = vst.sshfl [vmem:[%s5655_s6 + $0x21] sm:$0x1 pattern:$0x73625140] %v2570_v47  ;;  %v2506_v48 = vcombine.high %v2504_v58, %v2504_v58  ;;  %v2520_v38 = vrot.slane %v2504_v58, %v5393_v11  ;;  %v2527_v29 = vrot.slane %v2505_v0, %v5393_v11  ;;  %v2535_v54 = vcombine.high %v2513_v2, %v2513_v2 }
 0x82e   :  { %3036 = vst.sshfl [vmem:[%s5655_s6 + $0x8] sm:$0x1 pattern:$0x73625140] %v2505_v0  ;;  %v2600_v55 = vrot.slane %v2572_v19, %v5393_v11  ;;  %v2602_v1 = vcombine.high %v2586_v59, %v2586_v59  ;;  %v2603_v36 = vcombine.high %v2593_v27, %v2593_v27  ;;  %2615 = vst [vmem:[%s5655_s6 + $0x11] sm:$0x1] %v2601_v3 }
 0x82f   :  { %3037 = vst.sshfl [vmem:[%s5655_s6 + $0x20] sm:$0x1 pattern:$0x73625140] %v2504_v58  ;;  %v2688_v33 = vcombine.high %v2484_v52, %v2484_v52  ;;  %v2534_v39 = vrot.slane %v2506_v48, %v5393_v11  ;;  %v2536_v4 = vcombine.high %v2520_v38, %v2520_v38  ;;  %v2537_v12 = vcombine.high %v2527_v29, %v2527_v29 }
 0x830   :  { %3042 = vst.sshfl [vmem:[%s5655_s6 + $0x29] sm:$0x1 pattern:$0x73625140] %v2572_v19  ;;  %2549 = vst [vmem:[%s5655_s6 + $0x10] sm:$0x1] %v2535_v54  ;;  %v2695_v18 = vrot.slane %v2484_v52, %v5393_v11  ;;  %v2604_v25 = vcombine.high %v2600_v55, %v2600_v55  ;;  %v2622_v34 = vcombine.high %v2483_v6, %v2483_v6 }
 0x831   :  { %3038 = vst.sshfl [vmem:[%s5655_s6 + $0x28] sm:$0x1 pattern:$0x73625140] %v2506_v48  ;;  %2616 = vst [vmem:[%s5655_s6 + $0x19] sm:$0x1] %v2603_v36  ;;  %v2702_v26 = vrot.slane %v2688_v33, %v5393_v11  ;;  %v2629_v42 = vrot.slane %v2483_v6, %v5393_v11  ;;  %v2538_v43 = vcombine.high %v2534_v39, %v2534_v39 }
 0x832   :  { %2619 = vst [vmem:[%s5655_s6 + $0x31] sm:$0x1] %v2602_v1  ;;  %2550 = vst [vmem:[%s5655_s6 + $0x18] sm:$0x1] %v2537_v12  ;;  %v2703_v13 = vcombine.high %v2695_v18, %v2695_v18  ;;  %v2711_v32 = vrot.slane %v2695_v18, %v5393_v11  ;;  %v2460_v15 = vadd.f32 %v3131_v35, %v5388_v53 }
 0x833   :  { %2553 = vst [vmem:[%s5655_s6 + $0x30] sm:$0x1] %v2536_v4  ;;  %3047 = vst.sshfl [vmem:[%s5655_s6 + $0x3] sm:$0x1 pattern:$0x73625140] %v2695_v18  ;;  %v2704_v60 = vcombine.high %v2702_v26, %v2702_v26  ;;  %v2718_v44 = vrot.slane %v2702_v26, %v5393_v11  ;;  %v2636_v62 = vrot.slane %v2622_v34, %v5393_v11 }
 0x834   :  { %2620 = vst [vmem:[%s5655_s6 + $0x39] sm:$0x1] %v2604_v25  ;;  %3049 = vst.sshfl [vmem:[%s5655_s6 + $0x23] sm:$0x1 pattern:$0x73625140] %v2702_v26  ;;  %v2637_v23 = vcombine.high %v2629_v42, %v2629_v42  ;;  %v2725_v50 = vrot.slane %v2703_v13, %v5393_v11  ;;  %v2733_v8 = vcombine.high %v2711_v32, %v2711_v32 }
 0x835   :  { %3043 = vst.sshfl [vmem:[%s5655_s6 + $0x2] sm:$0x1 pattern:$0x73625140] %v2629_v42  ;;  %2554 = vst [vmem:[%s5655_s6 + $0x38] sm:$0x1] %v2538_v43  ;;  %v2645_v20 = vrot.slane %v2629_v42, %v5393_v11  ;;  %v2732_v28 = vrot.slane %v2704_v60, %v5393_v11  ;;  %v2734_v9 = vcombine.high %v2718_v44, %v2718_v44 }
 0x836   :  { %3048 = vst.sshfl [vmem:[%s5655_s6 + $0xb] sm:$0x1 pattern:$0x73625140] %v2703_v13  ;;  %v2478_v7 = vmax.f32 %v2460_v15, 0.0  ;;  %v2638_v45 = vcombine.high %v2636_v62, %v2636_v62  ;;  %v2652_v30 = vrot.slane %v2636_v62, %v5393_v11  ;;  %v2735_v16 = vcombine.high %v2725_v50, %v2725_v50 }
 0x837   :  { %3050 = vst.sshfl [vmem:[%s5655_s6 + $0x2b] sm:$0x1 pattern:$0x73625140] %v2704_v60  ;;  %2747 = vst [vmem:[%s5655_s6 + $0x13] sm:$0x1] %v2733_v8  ;;  %v2659_v61 = vrot.slane %v2637_v23, %v5393_v11  ;;  %v2667_v24 = vcombine.high %v2645_v20, %v2645_v20  ;;  %v2736_v56 = vcombine.high %v2732_v28, %v2732_v28 }
 0x838   :  { %3044 = vst.sshfl [vmem:[%s5655_s6 + $0xa] sm:$0x1 pattern:$0x73625140] %v2637_v23  ;;  %v2486_v40 = vmul.f32 -1.0, %v2478_v7  ;;  %v2666_v57 = vrot.slane %v2638_v45, %v5393_v11  ;;  %v2668_v14 = vcombine.high %v2652_v30, %v2652_v30  ;;  %v2455_v10 = vadd.f32 %v5388_v53, %v5407_v51 }
 0x839   :  { %3045 = vst.sshfl [vmem:[%s5655_s6 + $0x22] sm:$0x1 pattern:$0x73625140] %v2636_v62  ;;  %2751 = vst [vmem:[%s5655_s6 + $0x33] sm:$0x1] %v2734_v9  ;;  %v2669_v17 = vcombine.high %v2659_v61, %v2659_v61 }
 0x83a   :  { %3046 = vst.sshfl [vmem:[%s5655_s6 + $0x2a] sm:$0x1 pattern:$0x73625140] %v2638_v45  ;;  %2748 = vst [vmem:[%s5655_s6 + $0x1b] sm:$0x1] %v2735_v16  ;;  %v2820_v21 = vcombine.high %v2486_v40, %v2486_v40  ;;  %v2827_v22 = vrot.slane %v2486_v40, %v5393_v11  ;;  %v2670_v5 = vcombine.high %v2666_v57, %v2666_v57 }
 0x83b   :  { %2681 = vst [vmem:[%s5655_s6 + $0x12] sm:$0x1] %v2667_v24  ;;  %2752 = vst [vmem:[%s5655_s6 + $0x3b] sm:$0x1] %v2736_v56  ;;  %v2477_v31 = vmax.f32 %v2455_v10, 0.0 }
 0x83c   :  { %2685 = vst [vmem:[%s5655_s6 + $0x32] sm:$0x1] %v2668_v14  ;;  %2682 = vst [vmem:[%s5655_s6 + $0x1a] sm:$0x1] %v2669_v17  ;;  %v2834_v63 = vrot.slane %v2820_v21, %v5393_v11  ;;  %v2835_v46 = vcombine.high %v2827_v22, %v2827_v22  ;;  %v2843_v49 = vrot.slane %v2827_v22, %v5393_v11 }
 0x83d   :  { %3055 = vst.sshfl [vmem:[%s5655_s6 + $0x5] sm:$0x1 pattern:$0x73625140] %v2827_v22  ;;  %2686 = vst [vmem:[%s5655_s6 + $0x3a] sm:$0x1] %v2670_v5 }
 0x83e   :  { %v2485_v35 = vmul.f32 -1.0, %v2477_v31  ;;  %v2836_v47 = vcombine.high %v2834_v63, %v2834_v63  ;;  %v2850_v37 = vrot.slane %v2834_v63, %v5393_v11  ;;  %v2857_v41 = vrot.slane %v2835_v46, %v5393_v11  ;;  %3056 = vst.sshfl [vmem:[%s5655_s6 + $0xd] sm:$0x1 pattern:$0x73625140] %v2835_v46 }
 0x83f   :  { %v2865_v52 = vcombine.high %v2843_v49, %v2843_v49  ;;  %3057 = vst.sshfl [vmem:[%s5655_s6 + $0x25] sm:$0x1 pattern:$0x73625140] %v2834_v63 }
 0x840   :  { %v2754_v51 = vcombine.high %v2485_v35, %v2485_v35  ;;  %v2761_v58 = vrot.slane %v2485_v35, %v5393_v11  ;;  %v2864_v0 = vrot.slane %v2836_v47, %v5393_v11  ;;  %v2866_v2 = vcombine.high %v2850_v37, %v2850_v37  ;;  %3058 = vst.sshfl [vmem:[%s5655_s6 + $0x2d] sm:$0x1 pattern:$0x73625140] %v2836_v47 }
 0x841   :  { %v2867_v6 = vcombine.high %v2857_v41, %v2857_v41  ;;  %2879 = vst [vmem:[%s5655_s6 + $0x15] sm:$0x1] %v2865_v52 }
 0x842   :  { %v2768_v19 = vrot.slane %v2754_v51, %v5393_v11  ;;  %v2769_v59 = vcombine.high %v2761_v58, %v2761_v58  ;;  %v2777_v27 = vrot.slane %v2761_v58, %v5393_v11  ;;  %3051 = vst.sshfl [vmem:[%s5655_s6 + $0x4] sm:$0x1 pattern:$0x73625140] %v2761_v58  ;;  %v2868_v3 = vcombine.high %v2864_v0, %v2864_v0 }
 0x843   :  { %2880 = vst [vmem:[%s5655_s6 + $0x1d] sm:$0x1] %v2867_v6  ;;  %2883 = vst [vmem:[%s5655_s6 + $0x35] sm:$0x1] %v2866_v2 }
 0x844   :  { %v2770_v48 = vcombine.high %v2768_v19, %v2768_v19  ;;  %v2784_v38 = vrot.slane %v2768_v19, %v5393_v11  ;;  %v2791_v29 = vrot.slane %v2769_v59, %v5393_v11  ;;  %v2799_v54 = vcombine.high %v2777_v27, %v2777_v27  ;;  %3052 = vst.sshfl [vmem:[%s5655_s6 + $0xc] sm:$0x1 pattern:$0x73625140] %v2769_v59 }
 0x845   :  { %3053 = vst.sshfl [vmem:[%s5655_s6 + $0x24] sm:$0x1 pattern:$0x73625140] %v2768_v19  ;;  %2884 = vst [vmem:[%s5655_s6 + $0x3d] sm:$0x1] %v2868_v3 }
 0x846   :  { %v2798_v55 = vrot.slane %v2770_v48, %v5393_v11  ;;  %v2800_v1 = vcombine.high %v2784_v38, %v2784_v38  ;;  %v2801_v36 = vcombine.high %v2791_v29, %v2791_v29  ;;  %2813 = vst [vmem:[%s5655_s6 + $0x14] sm:$0x1] %v2799_v54  ;;  %3054 = vst.sshfl [vmem:[%s5655_s6 + $0x2c] sm:$0x1 pattern:$0x73625140] %v2770_v48 }
 0x848   :  { %v2802_v33 = vcombine.high %v2798_v55, %v2798_v55  ;;  %2814 = vst [vmem:[%s5655_s6 + $0x1c] sm:$0x1] %v2801_v36  ;;  %2817 = vst [vmem:[%s5655_s6 + $0x34] sm:$0x1] %v2800_v1 }
 0x84a   :  { %2818 = vst [vmem:[%s5655_s6 + $0x3c] sm:$0x1] %v2802_v33 }
 0x8fa   :  { %v3134_v39 = vpop.f32.mrb[22].mxu0 }
 0x8fb   :  { %v2470_v4 = vadd.f32 %v3134_v39, %v5388_v53  ;;  %v2464_v12 = vpop.f32.mrb[23].mxu0 }
 0x8fc   :  { %v2465_v18 = vadd.f32 %v5388_v53, %v2464_v12 }
 0x8fd   :  { %v2480_v25 = vmax.f32 %v2470_v4, 0.0 }
 0x8fe   :  { %v2479_v26 = vmax.f32 %v2465_v18, 0.0 }
 0x8ff   :  { %v2488_v34 = vmul.f32 -1.0, %v2480_v25 }
 0x900   :  { %v2487_v42 = vmul.f32 -1.0, %v2479_v26 }
 0x901   :  { %v2952_v43 = vcombine.high %v2488_v34, %v2488_v34  ;;  %v2959_v13 = vrot.slane %v2488_v34, %v5393_v11 }
 0x902   :  { %v2886_v32 = vcombine.high %v2487_v42, %v2487_v42  ;;  %v2893_v15 = vrot.slane %v2487_v42, %v5393_v11 }
 0x903   :  { %v2966_v60 = vrot.slane %v2952_v43, %v5393_v11  ;;  %v2967_v44 = vcombine.high %v2959_v13, %v2959_v13  ;;  %v2975_v62 = vrot.slane %v2959_v13, %v5393_v11  ;;  %3063 = vst.sshfl [vmem:[%s5655_s6 + $0x7] sm:$0x1 pattern:$0x73625140] %v2959_v13 }
 0x904   :  { %v2900_v53 = vrot.slane %v2886_v32, %v5393_v11  ;;  %v2901_v23 = vcombine.high %v2893_v15, %v2893_v15  ;;  %v2909_v50 = vrot.slane %v2893_v15, %v5393_v11  ;;  %3059 = vst.sshfl [vmem:[%s5655_s6 + $0x6] sm:$0x1 pattern:$0x73625140] %v2893_v15 }
 0x905   :  { %v2968_v8 = vcombine.high %v2966_v60, %v2966_v60  ;;  %v2982_v20 = vrot.slane %v2966_v60, %v5393_v11  ;;  %v2989_v7 = vrot.slane %v2967_v44, %v5393_v11  ;;  %v2997_v28 = vcombine.high %v2975_v62, %v2975_v62  ;;  %3064 = vst.sshfl [vmem:[%s5655_s6 + $0xf] sm:$0x1 pattern:$0x73625140] %v2967_v44 }
 0x906   :  { %3065 = vst.sshfl [vmem:[%s5655_s6 + $0x27] sm:$0x1 pattern:$0x73625140] %v2966_v60  ;;  %v2902_v9 = vcombine.high %v2900_v53, %v2900_v53  ;;  %v2916_v45 = vrot.slane %v2900_v53, %v5393_v11  ;;  %v2923_v30 = vrot.slane %v2901_v23, %v5393_v11  ;;  %v2931_v16 = vcombine.high %v2909_v50, %v2909_v50 }
 0x907   :  { %3060 = vst.sshfl [vmem:[%s5655_s6 + $0xe] sm:$0x1 pattern:$0x73625140] %v2901_v23  ;;  %v2996_v61 = vrot.slane %v2968_v8, %v5393_v11  ;;  %v2998_v24 = vcombine.high %v2982_v20, %v2982_v20  ;;  %v2999_v40 = vcombine.high %v2989_v7, %v2989_v7  ;;  %3011 = vst [vmem:[%s5655_s6 + $0x17] sm:$0x1] %v2997_v28 }
 0x908   :  { %3061 = vst.sshfl [vmem:[%s5655_s6 + $0x26] sm:$0x1 pattern:$0x73625140] %v2900_v53  ;;  %v2930_v56 = vrot.slane %v2902_v9, %v5393_v11  ;;  %v2932_v57 = vcombine.high %v2916_v45, %v2916_v45  ;;  %v2933_v14 = vcombine.high %v2923_v30, %v2923_v30  ;;  %2945 = vst [vmem:[%s5655_s6 + $0x16] sm:$0x1] %v2931_v16 }
 0x909   :  { %3066 = vst.sshfl [vmem:[%s5655_s6 + $0x2f] sm:$0x1 pattern:$0x73625140] %v2968_v8  ;;  %v3000_v10 = vcombine.high %v2996_v61, %v2996_v61  ;;  %3012 = vst [vmem:[%s5655_s6 + $0x1f] sm:$0x1] %v2999_v40 }
 0x90a   :  { %3062 = vst.sshfl [vmem:[%s5655_s6 + $0x2e] sm:$0x1 pattern:$0x73625140] %v2902_v9  ;;  %3015 = vst [vmem:[%s5655_s6 + $0x37] sm:$0x1] %v2998_v24  ;;  %v2934_v11 = vcombine.high %v2930_v56, %v2930_v56 }
 0x90b   :  { %2946 = vst [vmem:[%s5655_s6 + $0x1e] sm:$0x1] %v2933_v14  ;;  %2949 = vst [vmem:[%s5655_s6 + $0x36] sm:$0x1] %v2932_v57 }
 0x90c   :  { %3016 = vst [vmem:[%s5655_s6 + $0x3f] sm:$0x1] %v3000_v10  ;;  %2950 = vst [vmem:[%s5655_s6 + $0x3e] sm:$0x1] %v2934_v11 }

// kernel: lstm_encoder_forward.1
= control target key start
LH: loop header
LB: loop body
LE: loop exit
PB: predicated region body
PF: predicated region fallthrough
CT: control target
= control target key end

     0   :  { %v5656_v3 = vmov 0.0   ;;  %vm385_vm0 = vcmask 1041409   ;;  %vm388_vm1 = vcmask 1042434   ;;  %vm391_vm2 = vcmask 1043459   ;;  %s5647_s1 = inlined_call_operand.vmem [shape: f32[128,512], index: 1, kind: input, shape index: {}]   ;;  %s5648_s2 = inlined_call_operand.vmem [shape: f32[128,512], index: 2, kind: input, shape index: {}]   ;;  %s5649_s0 = inlined_call_operand.vmem [shape: f32[8,8,128], index: 0, kind: input, shape index: {}]   ;;  %s5650_s3 = inlined_call_operand.vmem [shape: f32[1,512], index: 3, kind: input, shape index: {}]   ;;  %s5651_s4 = inlined_call_operand.vmem [shape: f32[128,128], index: 4, kind: input, shape index: {}]   ;;  %s5652_s8 = inlined_call_operand.vmem [shape: f32[8,128], index: 8, kind: output, shape index: {2}]   ;;  %s5653_s5 = inlined_call_operand.vmem [shape: f32[1,128], index: 5, kind: input, shape index: {}]   ;;  %s5654_s7 = inlined_call_operand.vmem [shape: f32[8,128], index: 7, kind: output, shape index: {1}]   ;;  %s5655_s6 = inlined_call_operand.vmem [shape: f32[8,8,128], index: 6, kind: output, shape index: {0}]  }
   0x1   :  { %v41_v0 = vld [vmem:[%s5647_s1 + $0x8] sm:$0xff]  ;;  %v40_v2 = vld [vmem:[%s5647_s1] sm:$0xff]  ;;  %190 = vmatprep.mubr.f32.mxu1 %v5656_v3  ;;  %1044 = vmatprep.mubr.f32.mxu0 %v5656_v3  ;;  %vm394_vm3 = vcmask 1044484   ;;  %vm397_vm4 = vcmask 1045509   ;;  %vm400_vm5 = vcmask 1046534   ;;  %vm403_vm6 = vcmask 1047559  }
   0x2   :  { %v45_v1 = vld [vmem:[%s5647_s1 + $0x28] sm:$0xff]  ;;  %v44_v5 = vld [vmem:[%s5647_s1 + $0x20] sm:$0xff] }
   0x3   :  { %v3135_v4 = vpack.c.bf16 %v45_v1, %v41_v0  ;;  %v49_v6 = vld [vmem:[%s5647_s1 + $0x48] sm:$0xff]  ;;  %v3137_v8 = vpack.c.bf16 %v44_v5, %v40_v2  ;;  %v48_v10 = vld [vmem:[%s5647_s1 + $0x40] sm:$0xff] }
   0x4   :  { %v53_v7 = vld [vmem:[%s5647_s1 + $0x68] sm:$0xff]  ;;  %v52_v11 = vld [vmem:[%s5647_s1 + $0x60] sm:$0xff] }
   0x5   :  { %v3139_v9 = vpack.c.bf16 %v53_v7, %v49_v6  ;;  %v57_v12 = vld [vmem:[%s5647_s1 + $0x88] sm:$0xff]  ;;  %3136 = vmatprep.subr.bf16.mxu1 %v3135_v4  ;;  %v3141_v14 = vpack.c.bf16 %v52_v11, %v48_v10  ;;  %v56_v16 = vld [vmem:[%s5647_s1 + $0x80] sm:$0xff] }
   0x6   :  { %v61_v13 = vld [vmem:[%s5647_s1 + $0xa8] sm:$0xff]  ;;  %3138 = vmatpush1.bf16.msra.mxu1 %v3137_v8  ;;  %v60_v17 = vld [vmem:[%s5647_s1 + $0xa0] sm:$0xff] }
   0x7   :  { %3140 = vmatprep.subr.bf16.mxu1 %v3139_v9  ;;  %v3143_v15 = vpack.c.bf16 %v61_v13, %v57_v12  ;;  %v65_v18 = vld [vmem:[%s5647_s1 + $0xc8] sm:$0xff]  ;;  %v3145_v20 = vpack.c.bf16 %v60_v17, %v56_v16  ;;  %v64_v22 = vld [vmem:[%s5647_s1 + $0xc0] sm:$0xff] }
   0x8   :  { %v69_v19 = vld [vmem:[%s5647_s1 + $0xe8] sm:$0xff]  ;;  %v68_v23 = vld [vmem:[%s5647_s1 + $0xe0] sm:$0xff] }
   0x9   :  { %v3147_v21 = vpack.c.bf16 %v69_v19, %v65_v18  ;;  %v73_v24 = vld [vmem:[%s5647_s1 + $0x108] sm:$0xff]  ;;  %v3149_v26 = vpack.c.bf16 %v68_v23, %v64_v22  ;;  %v72_v27 = vld [vmem:[%s5647_s1 + $0x100] sm:$0xff]  ;;  %v46_v22 = vld [vmem:[%s5647_s1 + $0x30] sm:$0xff] }
   0xa   :  { %3142 = vmatpush1.bf16.msra.mxu1 %v3141_v14  ;;  %v77_v25 = vld [vmem:[%s5647_s1 + $0x128] sm:$0xff]  ;;  %v76_v31 = vld [vmem:[%s5647_s1 + $0x120] sm:$0xff]  ;;  %v43_v14 = vld [vmem:[%s5647_s1 + $0x18] sm:$0xff] }
   0xb   :  { %3144 = vmatprep.subr.bf16.mxu1 %v3143_v15  ;;  %v911_v28 = vld [vmem:[%s5648_s2 + $0x8] sm:$0xff]  ;;  %v3151_v30 = vpack.c.bf16 %v77_v25, %v73_v24  ;;  %v910_v33 = vld [vmem:[%s5648_s2] sm:$0xff]  ;;  %v3153_v40 = vpack.c.bf16 %v76_v31, %v72_v27  ;;  %v47_v15 = vld [vmem:[%s5647_s1 + $0x38] sm:$0xff] }
   0xc   :  { %v915_v29 = vld [vmem:[%s5648_s2 + $0x28] sm:$0xff]  ;;  %v914_v34 = vld [vmem:[%s5648_s2 + $0x20] sm:$0xff]  ;;  %v51_v23 = vld [vmem:[%s5647_s1 + $0x58] sm:$0xff] }
   0xd   :  { %v3940_v32 = vpack.c.bf16 %v915_v29, %v911_v28  ;;  %v81_v35 = vld [vmem:[%s5647_s1 + $0x148] sm:$0xff]  ;;  %v3954_v37 = vpack.c.bf16 %v914_v34, %v910_v33  ;;  %v918_v42 = vld [vmem:[%s5648_s2 + $0x40] sm:$0xff]  ;;  %v55_v25 = vld [vmem:[%s5647_s1 + $0x78] sm:$0xff] }
   0xe   :  { %3146 = vmatpush1.bf16.msra.mxu1 %v3145_v20  ;;  %v85_v36 = vld [vmem:[%s5647_s1 + $0x168] sm:$0xff]  ;;  %v922_v43 = vld [vmem:[%s5648_s2 + $0x60] sm:$0xff]  ;;  %v3167_v20 = vpack.c.bf16 %v47_v15, %v43_v14  ;;  %v3171_v33 = vpack.c.bf16 %v55_v25, %v51_v23  ;;  %v50_v34 = vld [vmem:[%s5647_s1 + $0x50] sm:$0xff] }
   0xf   :  { %3148 = vmatprep.subr.bf16.mxu1 %v3147_v21  ;;  %5728 = vst [vmem:[#allocation6_spill] sm:$0xff] %v3940_v32  ;;  %3200 = vmatprep.subr.bf16.mxu0 %v3940_v32  ;;  %v919_v38 = vld [vmem:[%s5648_s2 + $0x48] sm:$0xff]  ;;  %v3155_v44 = vpack.c.bf16 %v85_v36, %v81_v35  ;;  %v80_v45 = vld [vmem:[%s5647_s1 + $0x140] sm:$0xff]  ;;  %v3981_v48 = vpack.c.bf16 %v922_v43, %v918_v42  ;;  %v42_v21 = vld [vmem:[%s5647_s1 + $0x10] sm:$0xff] }
  0x10   :  { %v923_v39 = vld [vmem:[%s5648_s2 + $0x68] sm:$0xff]  ;;  %3202 = vmatpush1.bf16.msra.mxu0 %v3954_v37  ;;  %v84_v46 = vld [vmem:[%s5647_s1 + $0x160] sm:$0xff]  ;;  %v3169_v31 = vpack.c.bf16 %v46_v22, %v42_v21  ;;  %v54_v35 = vld [vmem:[%s5647_s1 + $0x70] sm:$0xff] }
  0x11   :  { %v3964_v41 = vpack.c.bf16 %v923_v39, %v919_v38  ;;  %v89_v47 = vld [vmem:[%s5647_s1 + $0x188] sm:$0xff]  ;;  %v926_v53 = vld [vmem:[%s5648_s2 + $0x80] sm:$0xff]  ;;  %v3157_v55 = vpack.c.bf16 %v84_v46, %v80_v45  ;;  %v59_v36 = vld [vmem:[%s5647_s1 + $0x98] sm:$0xff] }
  0x12   :  { %3150 = vmatpush1.bf16.msra.mxu1 %v3149_v26  ;;  %v93_v49 = vld [vmem:[%s5647_s1 + $0x1a8] sm:$0xff]  ;;  %v930_v54 = vld [vmem:[%s5648_s2 + $0xa0] sm:$0xff]  ;;  %v63_v39 = vld [vmem:[%s5647_s1 + $0xb8] sm:$0xff] }
  0x13   :  { %3152 = vmatprep.subr.bf16.mxu1 %v3151_v30  ;;  %3204 = vmatprep.subr.bf16.mxu0 %v3964_v41  ;;  %v927_v50 = vld [vmem:[%s5648_s2 + $0x88] sm:$0xff]  ;;  %v88_v56 = vld [vmem:[%s5647_s1 + $0x180] sm:$0xff]  ;;  %v4008_v58 = vpack.c.bf16 %v930_v54, %v926_v53  ;;  %v3159_v59 = vpack.c.bf16 %v93_v49, %v89_v47  ;;  %v3173_v47 = vpack.c.bf16 %v54_v35, %v50_v34  ;;  %v67_v53 = vld [vmem:[%s5647_s1 + $0xd8] sm:$0xff] }
  0x14   :  { %v931_v51 = vld [vmem:[%s5648_s2 + $0xa8] sm:$0xff]  ;;  %v92_v57 = vld [vmem:[%s5647_s1 + $0x1a0] sm:$0xff]  ;;  %3206 = vmatpush1.bf16.msra.mxu0 %v3981_v48  ;;  %v3175_v49 = vpack.c.bf16 %v63_v39, %v59_v36  ;;  %v87_v14 = vld [vmem:[%s5647_s1 + $0x178] sm:$0xff] }
  0x15   :  { %v3993_v52 = vpack.c.bf16 %v931_v51, %v927_v50  ;;  %v97_v60 = vld [vmem:[%s5647_s1 + $0x1c8] sm:$0xff]  ;;  %v934_v1 = vld [vmem:[%s5648_s2 + $0xc0] sm:$0xff]  ;;  %v3161_v4 = vpack.c.bf16 %v92_v57, %v88_v56  ;;  %v58_v50 = vld [vmem:[%s5647_s1 + $0x90] sm:$0xff] }
  0x16   :  { %3154 = vmatpush1.bf16.msra.mxu1 %v3153_v40  ;;  %v935_v61 = vld [vmem:[%s5648_s2 + $0xc8] sm:$0xff]  ;;  %v938_v2 = vld [vmem:[%s5648_s2 + $0xe0] sm:$0xff]  ;;  %v62_v51 = vld [vmem:[%s5647_s1 + $0xb0] sm:$0xff] }
  0x17   :  { %3156 = vmatprep.subr.bf16.mxu1 %v3155_v44  ;;  %3208 = vmatprep.subr.bf16.mxu0 %v3993_v52  ;;  %v939_v62 = vld [vmem:[%s5648_s2 + $0xe8] sm:$0xff]  ;;  %v96_v5 = vld [vmem:[%s5647_s1 + $0x1c0] sm:$0xff]  ;;  %v4035_v6 = vpack.c.bf16 %v938_v2, %v934_v1  ;;  %v70_v1 = vld [vmem:[%s5647_s1 + $0xf0] sm:$0xff] }
  0x18   :  { %v101_v63 = vld [vmem:[%s5647_s1 + $0x1e8] sm:$0xff]  ;;  %v4023_v0 = vpack.c.bf16 %v939_v62, %v935_v61  ;;  %3210 = vmatpush1.bf16.msra.mxu0 %v4008_v58  ;;  %v100_v10 = vld [vmem:[%s5647_s1 + $0x1e0] sm:$0xff]  ;;  %v3177_v61 = vpack.c.bf16 %v62_v51, %v58_v50  ;;  %v91_v21 = vld [vmem:[%s5647_s1 + $0x198] sm:$0xff] }
  0x19   :  { %v943_v7 = vld [vmem:[%s5648_s2 + $0x108] sm:$0xff]  ;;  %v3163_v9 = vpack.c.bf16 %v101_v63, %v97_v60  ;;  %v942_v12 = vld [vmem:[%s5648_s2 + $0x100] sm:$0xff]  ;;  %v3165_v18 = vpack.c.bf16 %v100_v10, %v96_v5  ;;  %v4168_v60 = vld [vmem:[%s5649_s0 + $0x10] sm:$0xff] }
  0x1a   :  { %3158 = vmatpush1.bf16.msra.mxu1 %v3157_v55  ;;  %v947_v8 = vld [vmem:[%s5648_s2 + $0x128] sm:$0xff]  ;;  %3212 = vmatprep.subr.bf16.mxu0 %v4023_v0  ;;  %v946_v13 = vld [vmem:[%s5648_s2 + $0x120] sm:$0xff]  ;;  %v71_v55 = vld [vmem:[%s5647_s1 + $0xf8] sm:$0xff] }
  0x1b   :  { %3160 = vmatprep.subr.bf16.mxu1 %v3159_v59  ;;  %v4047_v11 = vpack.c.bf16 %v947_v8, %v943_v7  ;;  %v951_v16 = vld [vmem:[%s5648_s2 + $0x148] sm:$0xff]  ;;  %v4068_v19 = vpack.c.bf16 %v946_v13, %v942_v12  ;;  %v950_v26 = vld [vmem:[%s5648_s2 + $0x140] sm:$0xff]  ;;  %v3179_v62 = vpack.c.bf16 %v71_v55, %v67_v53  ;;  %v66_v63 = vld [vmem:[%s5647_s1 + $0xd0] sm:$0xff] }
  0x1c   :  { %v955_v17 = vld [vmem:[%s5648_s2 + $0x168] sm:$0xff]  ;;  %3214 = vmatpush1.bf16.msra.mxu0 %v4035_v6  ;;  %v954_v27 = vld [vmem:[%s5648_s2 + $0x160] sm:$0xff]  ;;  %v79_v5 = vld [vmem:[%s5647_s1 + $0x138] sm:$0xff]  ;;  %v3181_v8 = vpack.c.bf16 %v70_v1, %v66_v63 }
  0x1d   :  { %3216 = vmatprep.subr.bf16.mxu0 %v4047_v11  ;;  %v4080_v24 = vpack.c.bf16 %v955_v17, %v951_v16  ;;  %v959_v28 = vld [vmem:[%s5648_s2 + $0x188] sm:$0xff]  ;;  %v4100_v30 = vld [vmem:[%s5649_s0] sm:$0xff]  ;;  %v4113_v38 = vpack.c.bf16 %v954_v27, %v950_v26  ;;  %v4191_v7 = vld [vmem:[%s5649_s0 + $0x18] sm:$0xff] }
  0x1e   :  { %3162 = vmatpush1.bf16.msra.mxu1 %v3161_v4  ;;  %v963_v29 = vld [vmem:[%s5648_s2 + $0x1a8] sm:$0xff]  ;;  %v958_v42 = vld [vmem:[%s5648_s2 + $0x180] sm:$0xff]  ;;  %v75_v4 = vld [vmem:[%s5647_s1 + $0x118] sm:$0xff] }
  0x1f   :  { %3164 = vmatprep.subr.bf16.mxu1 %v3163_v9  ;;  %v4118_v40 = vpack.c.bf16 %v963_v29, %v959_v28  ;;  %v962_v43 = vld [vmem:[%s5648_s2 + $0x1a0] sm:$0xff]  ;;  %v967_v44 = vld [vmem:[%s5648_s2 + $0x1c8] sm:$0xff]  ;;  %v3183_v9 = vpack.c.bf16 %v79_v5, %v75_v4  ;;  %v74_v10 = vld [vmem:[%s5647_s1 + $0x110] sm:$0xff] }
  0x20   :  { %3218 = vmatpush1.bf16.msra.mxu0 %v4068_v19  ;;  %v971_v45 = vld [vmem:[%s5648_s2 + $0x1e8] sm:$0xff]  ;;  %v4149_v54 = vpack.c.bf16 %v962_v43, %v958_v42  ;;  %v966_v57 = vld [vmem:[%s5648_s2 + $0x1c0] sm:$0xff]  ;;  %v78_v12 = vld [vmem:[%s5647_s1 + $0x130] sm:$0xff] }
  0x21   :  { %3220 = vmatprep.subr.bf16.mxu0 %v4080_v24  ;;  %v4137_v46 = vld [vmem:[%s5649_s0 + $0x8] sm:$0xff]  ;;  %v4155_v56 = vpack.c.bf16 %v971_v45, %v967_v44  ;;  %v970_v59 = vld [vmem:[%s5648_s2 + $0x1e0] sm:$0xff]  ;;  %v83_v13 = vld [vmem:[%s5647_s1 + $0x158] sm:$0xff]  ;;  %v3185_v16 = vpack.c.bf16 %v78_v12, %v74_v10 }
  0x22   :  { %3166 = vmatpush1.bf16.msra.mxu1 %v3165_v18  ;;  %v4177_v2 = vpack.c.bf16 %v970_v59, %v966_v57  ;;  %v4212_v15 = vld [vmem:[%s5649_s0 + $0x20] sm:$0xff]  ;;  %v3187_v17 = vpack.c.bf16 %v87_v14, %v83_v13  ;;  %v82_v18 = vld [vmem:[%s5647_s1 + $0x150] sm:$0xff]  ;;  %v95_v22 = vld [vmem:[%s5647_s1 + $0x1b8] sm:$0xff] }
  0x23   :  { %3168 = vmatprep.subr.bf16.mxu1 %v3167_v20  ;;  %v86_v20 = vld [vmem:[%s5647_s1 + $0x170] sm:$0xff]  ;;  %v4235_v23 = vld [vmem:[%s5649_s0 + $0x28] sm:$0xff]  ;;  %v3191_v26 = vpack.c.bf16 %v95_v22, %v91_v21  ;;  %v99_v29 = vld [vmem:[%s5647_s1 + $0x1d8] sm:$0xff] }
  0x24   :  { %3222 = vmatpush1.bf16.msra.mxu0 %v4113_v38  ;;  %5729 = vst [vmem:[#allocation7_spill] sm:$0xff] %v4177_v2  ;;  %v3189_v25 = vpack.c.bf16 %v86_v20, %v82_v18  ;;  %v90_v27 = vld [vmem:[%s5647_s1 + $0x190] sm:$0xff]  ;;  %v913_v42 = vld [vmem:[%s5648_s2 + $0x18] sm:$0xff] }
  0x25   :  { %191 = vmatmul.mubr.f32.vlgmr.msra.gmra.mrb[0].mxu1 %v4100_v30  ;;  %3224 = vmatprep.subr.bf16.mxu0 %v4118_v40  ;;  %v94_v28 = vld [vmem:[%s5647_s1 + $0x1b0] sm:$0xff]  ;;  %v917_v43 = vld [vmem:[%s5648_s2 + $0x38] sm:$0xff] }
  0x26   :  { %3170 = vmatpush1.bf16.msra.mxu1 %v3169_v31  ;;  %196 = vmatprep.mubr.f32.mxu1 %v5656_v3  ;;  %v103_v31 = vld [vmem:[%s5647_s1 + $0x1f8] sm:$0xff]  ;;  %v3193_v34 = vpack.c.bf16 %v94_v28, %v90_v27  ;;  %v98_v36 = vld [vmem:[%s5647_s1 + $0x1d0] sm:$0xff] }
  0x27   :  { %3172 = vmatprep.subr.bf16.mxu1 %v3171_v33  ;;  %v4256_v33 = vld [vmem:[%s5649_s0 + $0x30] sm:$0xff]  ;;  %v3195_v35 = vpack.c.bf16 %v103_v31, %v99_v29  ;;  %v4277_v44 = vld [vmem:[%s5649_s0 + $0x38] sm:$0xff] }
  0x28   :  { %3226 = vmatpush1.bf16.msra.mxu0 %v4149_v54  ;;  %v102_v39 = vld [vmem:[%s5647_s1 + $0x1f0] sm:$0xff]  ;;  %v921_v51 = vld [vmem:[%s5648_s2 + $0x58] sm:$0xff] }
  0x29   :  { %197 = vmatmul.mubr.f32.gmra.mrb[2].mxu1 %v4137_v46  ;;  %3228 = vmatprep.subr.bf16.mxu0 %v4155_v56  ;;  %v3197_v45 = vpack.c.bf16 %v102_v39, %v98_v36  ;;  %v916_v50 = vld [vmem:[%s5648_s2 + $0x30] sm:$0xff]  ;;  %v925_v53 = vld [vmem:[%s5648_s2 + $0x78] sm:$0xff] }
  0x2a   :  { %3174 = vmatpush1.bf16.msra.mxu1 %v3173_v47  ;;  %202 = vmatprep.mubr.f32.mxu1 %v5656_v3  ;;  %v4279_v47 = vpack.c.bf16 %v917_v43, %v913_v42  ;;  %v4300_v57 = vpack.c.bf16 %v925_v53, %v921_v51  ;;  %v920_v59 = vld [vmem:[%s5648_s2 + $0x50] sm:$0xff]  ;;  %v933_v63 = vld [vmem:[%s5648_s2 + $0xb8] sm:$0xff]  ;;  %v106_v51 = vlaneseq }
  0x2b   :  { %3176 = vmatprep.subr.bf16.mxu1 %v3175_v49  ;;  %v912_v49 = vld [vmem:[%s5648_s2 + $0x10] sm:$0xff]  ;;  %v945_v14 = vld [vmem:[%s5648_s2 + $0x118] sm:$0xff] }
  0x2c   :  { %3230 = vmatpush1.bf16.msra.mxu0 %v4177_v2  ;;  %5730 = vst [vmem:[#allocation8_spill] sm:$0xff] %v4279_v47  ;;  %v4297_v55 = vpack.c.bf16 %v916_v50, %v912_v49  ;;  %v928_v5 = vld [vmem:[%s5648_s2 + $0x90] sm:$0xff]  ;;  %v953_v21 = vld [vmem:[%s5648_s2 + $0x158] sm:$0xff] }
  0x2d   :  { %203 = vmatmul.mubr.f32.gmra.mrb[4].mxu1 %v4168_v60  ;;  %3264 = vmatprep.subr.bf16.mxu0 %v3940_v32  ;;  %v936_v13 = vld [vmem:[%s5648_s2 + $0xd0] sm:$0xff]  ;;  %v957_v22 = vld [vmem:[%s5648_s2 + $0x178] sm:$0xff] }
  0x2e   :  { %3178 = vmatpush1.bf16.msra.mxu1 %v3177_v61  ;;  %208 = vmatprep.mubr.f32.mxu1 %v5656_v3  ;;  %v924_v61 = vld [vmem:[%s5648_s2 + $0x70] sm:$0xff]  ;;  %v961_v28 = vld [vmem:[%s5648_s2 + $0x198] sm:$0xff] }
  0x2f   :  { %3180 = vmatprep.subr.bf16.mxu1 %v3179_v62  ;;  %1045 = vmatmul.mubr.f32.vlgmr.msra.gmra.mrb[0].mxu0 %v5656_v3  ;;  %v929_v62 = vld [vmem:[%s5648_s2 + $0x98] sm:$0xff]  ;;  %v4319_v1 = vpack.c.bf16 %v924_v61, %v920_v59  ;;  %v944_v20 = vld [vmem:[%s5648_s2 + $0x110] sm:$0xff]  ;;  %v4464_v61 = vshrl.u32 %v106_v51, 7 }
  0x30   :  { %3266 = vmatpush1.bf16.msra.mxu0 %v3954_v37  ;;  %1213 = vmatprep.mubr.f32.mxu0 %v5656_v3  ;;  %v4322_v4 = vpack.c.bf16 %v933_v63, %v929_v62  ;;  %v952_v27 = vld [vmem:[%s5648_s2 + $0x150] sm:$0xff]  ;;  %v965_v29 = vld [vmem:[%s5648_s2 + $0x1b8] sm:$0xff] }
  0x31   :  { %209 = vmatmul.mubr.f32.gmra.mrb[6].mxu1 %v4191_v7  ;;  %3268 = vmatprep.subr.bf16.mxu0 %v3964_v41  ;;  %v964_v36 = vld [vmem:[%s5648_s2 + $0x1b0] sm:$0xff]  ;;  %v973_v39 = vld [vmem:[%s5648_s2 + $0x1f8] sm:$0xff]  ;;  %5732 = vst [vmem:[#allocation10_spill] sm:$0xff] %v4464_v61 }
  0x32   :  { %3182 = vmatpush1.bf16.msra.mxu1 %v3181_v8  ;;  %214 = vmatprep.mubr.f32.mxu1 %v5656_v3  ;;  %v937_v8 = vld [vmem:[%s5648_s2 + $0xd8] sm:$0xff]  ;;  %v972_v49 = vld [vmem:[%s5648_s2 + $0x1f0] sm:$0xff] }
  0x33   :  { %3184 = vmatprep.subr.bf16.mxu1 %v3183_v9  ;;  %v941_v9 = vld [vmem:[%s5648_s2 + $0xf8] sm:$0xff] }
  0x34   :  { %3270 = vmatpush1.bf16.msra.mxu0 %v3981_v48  ;;  %v4344_v12 = vpack.c.bf16 %v941_v9, %v937_v8  ;;  %v4470_v8 = vld [vmem:[%s5650_s3] sm:$0xf]  ;;  %v112_v9 = vsub.s32 1, %v4464_v61 }
  0x35   :  { %215 = vmatmul.mubr.f32.gmra.mrb[8].mxu1 %v4212_v15  ;;  %3272 = vmatprep.subr.bf16.mxu0 %v3993_v52 }
  0x36   :  { %3186 = vmatpush1.bf16.msra.mxu1 %v3185_v16  ;;  %220 = vmatprep.mubr.f32.mxu1 %v5656_v3  ;;  %v949_v16 = vld [vmem:[%s5648_s2 + $0x138] sm:$0xff] }
  0x37   :  { %3188 = vmatprep.subr.bf16.mxu1 %v3187_v17  ;;  %v4366_v18 = vpack.c.bf16 %v949_v16, %v945_v14 }
  0x38   :  { %3274 = vmatpush1.bf16.msra.mxu0 %v4008_v58 }
  0x39   :  { %221 = vmatmul.mubr.f32.gmra.mrb[10].mxu1 %v4235_v23  ;;  %3276 = vmatprep.subr.bf16.mxu0 %v4023_v0 }
  0x3a   :  { %3190 = vmatpush1.bf16.msra.mxu1 %v3189_v25  ;;  %226 = vmatprep.mubr.f32.mxu1 %v5656_v3 }
  0x3b   :  { %3192 = vmatprep.subr.bf16.mxu1 %v3191_v26  ;;  %v4388_v26 = vpack.c.bf16 %v957_v22, %v953_v21 }
  0x3c   :  { %3278 = vmatpush1.bf16.msra.mxu0 %v4035_v6 }
  0x3d   :  { %227 = vmatmul.mubr.f32.gmra.mrb[12].mxu1 %v4256_v33  ;;  %3280 = vmatprep.subr.bf16.mxu0 %v4047_v11 }
  0x3e   :  { %3194 = vmatpush1.bf16.msra.mxu1 %v3193_v34  ;;  %232 = vmatprep.mubr.f32.mxu1 %v5656_v3  ;;  %v4408_v34 = vpack.c.bf16 %v965_v29, %v961_v28 }
  0x3f   :  { %3196 = vmatprep.subr.bf16.mxu1 %v3195_v35  ;;  %v960_v35 = vld [vmem:[%s5648_s2 + $0x190] sm:$0xff] }
  0x40   :  { %3282 = vmatpush1.bf16.msra.mxu0 %v4068_v19  ;;  %v4425_v42 = vpack.c.bf16 %v964_v36, %v960_v35 }
  0x41   :  { %233 = vmatmul.mubr.f32.gmra.mrb[14].mxu1 %v4277_v44  ;;  %3284 = vmatprep.subr.bf16.mxu0 %v4080_v24 }
  0x42   :  { %3198 = vmatpush1.bf16.msra.mxu1 %v3197_v45  ;;  %303 = vmatprep.mubr.f32.mxu1 %v5656_v3  ;;  %v968_v45 = vld [vmem:[%s5648_s2 + $0x1d0] sm:$0xff] }
  0x43   :  { %3232 = vmatprep.subr.bf16.mxu1 %v4279_v47 }
  0x44   :  { %3286 = vmatpush1.bf16.msra.mxu0 %v4113_v38 }
  0x45   :  { %304 = vmatmul.mubr.f32.vlgmr.msra.gmra.mrb[16].mxu1 %v4100_v30  ;;  %v932_v30 = vld [vmem:[%s5648_s2 + $0xb0] sm:$0xff]  ;;  %3288 = vmatprep.subr.bf16.mxu0 %v4118_v40 }
  0x46   :  { %3234 = vmatpush1.bf16.msra.mxu1 %v4297_v55  ;;  %309 = vmatprep.mubr.f32.mxu1 %v5656_v3  ;;  %v4341_v10 = vpack.c.bf16 %v932_v30, %v928_v5  ;;  %v108_v5 = vsub.s32 0, %v4464_v61 }
  0x47   :  { %3236 = vmatprep.subr.bf16.mxu1 %v4300_v57 }
  0x48   :  { %3290 = vmatpush1.bf16.msra.mxu0 %v4149_v54  ;;  %v109_v16 = vrot.slane %v4470_v8, %v108_v5 }
  0x49   :  { %310 = vmatmul.mubr.f32.gmra.mrb[18].mxu1 %v4137_v46  ;;  %v940_v46 = vld [vmem:[%s5648_s2 + $0xf0] sm:$0xff]  ;;  %3292 = vmatprep.subr.bf16.mxu0 %v4155_v56 }
  0x4a   :  { %3238 = vmatpush1.bf16.msra.mxu1 %v4319_v1  ;;  %315 = vmatprep.mubr.f32.mxu1 %v5656_v3  ;;  %v4363_v17 = vpack.c.bf16 %v940_v46, %v936_v13 }
  0x4b   :  { %3240 = vmatprep.subr.bf16.mxu1 %v4322_v4 }
  0x4c   :  { %3294 = vmatpush1.bf16.msra.mxu0 %v4177_v2 }
  0x4d   :  { %316 = vmatmul.mubr.f32.gmra.mrb[20].mxu1 %v4168_v60  ;;  %v948_v60 = vld [vmem:[%s5648_s2 + $0x130] sm:$0xff]  ;;  %3328 = vmatprep.subr.bf16.mxu0 %v3940_v32 }
  0x4e   :  { %3242 = vmatpush1.bf16.msra.mxu1 %v4341_v10  ;;  %321 = vmatprep.mubr.f32.mxu1 %v5656_v3  ;;  %v4385_v25 = vpack.c.bf16 %v948_v60, %v944_v20  ;;  %v113_v60 = vrot.slane %v4470_v8, %v112_v9 }
  0x4f   :  { %3244 = vmatprep.subr.bf16.mxu1 %v4344_v12 }
  0x51   :  { %322 = vmatmul.mubr.f32.gmra.mrb[22].mxu1 %v4191_v7  ;;  %v956_v7 = vld [vmem:[%s5648_s2 + $0x170] sm:$0xff] }
  0x52   :  { %3246 = vmatpush1.bf16.msra.mxu1 %v4363_v17  ;;  %327 = vmatprep.mubr.f32.mxu1 %v5656_v3  ;;  %v4405_v31 = vpack.c.bf16 %v956_v7, %v952_v27 }
  0x53   :  { %3248 = vmatprep.subr.bf16.mxu1 %v4366_v18 }
  0x55   :  { %328 = vmatmul.mubr.f32.gmra.mrb[24].mxu1 %v4212_v15  ;;  %v969_v15 = vld [vmem:[%s5648_s2 + $0x1d8] sm:$0xff] }
  0x56   :  { %3250 = vmatpush1.bf16.msra.mxu1 %v4385_v25  ;;  %333 = vmatprep.mubr.f32.mxu1 %v5656_v3  ;;  %v4428_v43 = vpack.c.bf16 %v973_v39, %v969_v15 }
  0x57   :  { %3252 = vmatprep.subr.bf16.mxu1 %v4388_v26 }
  0x59   :  { %334 = vmatmul.mubr.f32.gmra.mrb[26].mxu1 %v4235_v23  ;;  %v4439_v23 = vpack.c.bf16 %v972_v49, %v968_v45 }
  0x5a   :  { %3254 = vmatpush1.bf16.msra.mxu1 %v4405_v31  ;;  %339 = vmatprep.mubr.f32.mxu1 %v5656_v3 }
  0x5b   :  { %3256 = vmatprep.subr.bf16.mxu1 %v4408_v34  ;;  %5731 = vst [vmem:[#allocation9_spill] sm:$0xff] %v4439_v23 }
  0x5d   :  { %340 = vmatmul.mubr.f32.gmra.mrb[28].mxu1 %v4256_v33 }
  0x5e   :  { %3258 = vmatpush1.bf16.msra.mxu1 %v4425_v42  ;;  %345 = vmatprep.mubr.f32.mxu1 %v5656_v3 }
  0x5f   :  { %3260 = vmatprep.subr.bf16.mxu1 %v4428_v43 }
  0x61   :  { %346 = vmatmul.mubr.f32.gmra.mrb[30].mxu1 %v4277_v44 }
  0x62   :  { %3262 = vmatpush1.bf16.msra.mxu1 %v4439_v23  ;;  %1115 = vmatprep.mubr.f32.mxu1 %v5656_v3 }
  0x63   :  { %3296 = vmatprep.subr.bf16.mxu1 %v4279_v47 }
  0x65   :  { %1116 = vmatmul.mubr.f32.vlgmr.msra.gmra.mrb[32].mxu1 %v5656_v3 }
  0x66   :  { %3298 = vmatpush1.bf16.msra.mxu1 %v4297_v55  ;;  %1284 = vmatprep.mubr.f32.mxu1 %v5656_v3 }
  0x67   :  { %3300 = vmatprep.subr.bf16.mxu1 %v4300_v57 }
  0x6a   :  { %3302 = vmatpush1.bf16.msra.mxu1 %v4319_v1 }
  0x6b   :  { %3304 = vmatprep.subr.bf16.mxu1 %v4322_v4 }
  0x6e   :  { %3306 = vmatpush1.bf16.msra.mxu1 %v4341_v10 }
  0x6f   :  { %3308 = vmatprep.subr.bf16.mxu1 %v4344_v12 }
  0x72   :  { %3310 = vmatpush1.bf16.msra.mxu1 %v4363_v17 }
  0x73   :  { %3312 = vmatprep.subr.bf16.mxu1 %v4366_v18 }
  0x76   :  { %3314 = vmatpush1.bf16.msra.mxu1 %v4385_v25 }
  0x77   :  { %3316 = vmatprep.subr.bf16.mxu1 %v4388_v26 }
  0x7a   :  { %3318 = vmatpush1.bf16.msra.mxu1 %v4405_v31 }
  0x7b   :  { %3320 = vmatprep.subr.bf16.mxu1 %v4408_v34 }
  0x7e   :  { %3322 = vmatpush1.bf16.msra.mxu1 %v4425_v42 }
  0x7f   :  { %3324 = vmatprep.subr.bf16.mxu1 %v4428_v43 }
  0x82   :  { %3326 = vmatpush1.bf16.msra.mxu1 %v4439_v23 }
  0x83   :  { %3360 = vmatprep.subr.bf16.mxu1 %v4279_v47 }
  0xf8   :  { %v192_v33 = vpop.f32.mrb[0].mxu1 }
  0xf9   :  { %v194_v44 = vpop.f32.mrb[1].mxu1 }
  0xfc   :  { %v198_v50 = vpop.f32.mrb[2].mxu1 }
  0xfd   :  { %v200_v53 = vpop.f32.mrb[3].mxu1  ;;  %v4479_v21 = vadd.f32 %v198_v50, %v109_v16 }
  0xfe   :  { %v4481_v22 = vadd.f32 %v200_v53, %v113_v60 }
  0xff   :  { %5733 = vst [vmem:[#allocation11_spill] sm:$0xff] %v4479_v21  ;;  %v384_v49 = vrot.slane %v4479_v21, 7 }
 0x100   :  { %v204_v59 = vpop.f32.mrb[4].mxu1  ;;  %5734 = vst [vmem:[#allocation12_spill] sm:$0xff] %v4481_v22 }
 0x101   :  { %v206_v62 = vpop.f32.mrb[5].mxu1  ;;  %v4483_v27 = vadd.f32 %v204_v59, %v109_v16  ;;  %v405_v59 = vrot.slane %v4481_v22, 7 }
 0x102   :  { %v4473_v13 = vpop.f32.mrb[0].mxu0  ;;  %v4485_v28 = vadd.f32 %v206_v62, %v113_v60  ;;  %v4502_v62 = vadd.f32 %v192_v33, %v109_v16 }
 0x103   :  { %v4475_v46 = vpop.f32.mrb[1].mxu0  ;;  %5735 = vst [vmem:[#allocation13_spill] sm:$0xff] %v4483_v27  ;;  %v387_v53 = vrot.slane %v4483_v27, 6 }
 0x104   :  { %v210_v63 = vpop.f32.mrb[6].mxu1  ;;  %5736 = vst [vmem:[#allocation14_spill] sm:$0xff] %v4485_v28  ;;  %5743 = vst [vmem:[#allocation21_spill] sm:$0xff] %v4502_v62  ;;  %v407_v9 = vrot.slane %v4485_v28, 6  ;;  %v386_v3 = vsel %vm385_vm0, %v384_v49, %v4502_v62 }
 0x105   :  { %v212_v30 = vpop.f32.mrb[7].mxu1  ;;  %v4487_v29 = vadd.f32 %v210_v63, %v109_v16  ;;  %v389_v21 = vsel %vm388_vm1, %v387_v53, %v386_v3 }
 0x106   :  { %v4489_v36 = vadd.f32 %v212_v30, %v113_v60 }
 0x107   :  { %5737 = vst [vmem:[#allocation15_spill] sm:$0xff] %v4487_v29  ;;  %v390_v30 = vrot.slane %v4487_v29, 5 }
 0x108   :  { %v216_v14 = vpop.f32.mrb[8].mxu1  ;;  %5738 = vst [vmem:[#allocation16_spill] sm:$0xff] %v4489_v36 }
 0x109   :  { %v218_v20 = vpop.f32.mrb[9].mxu1  ;;  %v4491_v15 = vadd.f32 %v216_v14, %v109_v16  ;;  %v4508_v14 = vadd.f32 %v194_v44, %v113_v60  ;;  %v392_v49 = vsel %vm391_vm2, %v390_v30, %v389_v21 }
 0x10a   :  { %v4493_v39 = vadd.f32 %v218_v20, %v113_v60 }
 0x10b   :  { %5739 = vst [vmem:[#allocation17_spill] sm:$0xff] %v4491_v15  ;;  %5745 = vst [vmem:[#allocation23_spill] sm:$0xff] %v4508_v14 }
 0x10c   :  { %v222_v7 = vpop.f32.mrb[10].mxu1  ;;  %5740 = vst [vmem:[#allocation18_spill] sm:$0xff] %v4493_v39 }
 0x10d   :  { %v224_v35 = vpop.f32.mrb[11].mxu1  ;;  %v4495_v45 = vadd.f32 %v222_v7, %v109_v16  ;;  %v393_v7 = vrot.slane %v4491_v15, 4 }
 0x10e   :  { %v4498_v50 = vadd.f32 %v224_v35, %v113_v60  ;;  %v409_v35 = vrot.slane %v4489_v36, 5 }
 0x10f   :  { %5741 = vst [vmem:[#allocation19_spill] sm:$0xff] %v4495_v45  ;;  %v396_v33 = vrot.slane %v4495_v45, 3  ;;  %v395_v3 = vsel %vm394_vm3, %v393_v7, %v392_v49 }
 0x110   :  { %5742 = vst [vmem:[#allocation20_spill] sm:$0xff] %v4498_v50  ;;  %v228_v51 = vpop.f32.mrb[12].mxu1  ;;  %v413_v15 = vrot.slane %v4498_v50, 3 }
 0x111   :  { %v4504_v63 = vadd.f32 %v228_v51, %v109_v16  ;;  %v230_v5 = vpop.f32.mrb[13].mxu1  ;;  %v411_v51 = vrot.slane %v4493_v39, 4 }
 0x112   :  { %v4510_v20 = vadd.f32 %v230_v5, %v113_v60  ;;  %v406_v5 = vsel %vm385_vm0, %v405_v59, %v4508_v14  ;;  %v398_v59 = vsel %vm397_vm4, %v396_v33, %v395_v3  ;;  %v116_v33 = vsub.s32 2, %v4464_v61 }
 0x113   :  { %5744 = vst [vmem:[#allocation22_spill] sm:$0xff] %v4504_v63  ;;  %v399_v44 = vrot.slane %v4504_v63, 2  ;;  %v408_v29 = vsel %vm388_vm1, %v407_v9, %v406_v5 }
 0x114   :  { %5746 = vst [vmem:[#allocation24_spill] sm:$0xff] %v4510_v20  ;;  %v234_v22 = vpop.f32.mrb[14].mxu1  ;;  %v415_v45 = vrot.slane %v4510_v20, 2  ;;  %v410_v53 = vsel %vm391_vm2, %v409_v35, %v408_v29 }
 0x115   :  { %v4523_v28 = vadd.f32 %v234_v22, %v109_v16  ;;  %v236_v36 = vpop.f32.mrb[15].mxu1  ;;  %v412_v22 = vsel %vm394_vm3, %v411_v51, %v410_v53  ;;  %v401_v21 = vsel %vm400_vm5, %v399_v44, %v398_v59  ;;  %v120_v44 = vsub.s32 3, %v4464_v61 }
 0x116   :  { %v4528_v39 = vadd.f32 %v236_v36, %v113_v60  ;;  %v414_v30 = vsel %vm397_vm4, %v413_v15, %v412_v22  ;;  %v4546_v15 = vrot.slane %v4470_v8, %v116_v33 }
 0x117   :  { %5747 = vst [vmem:[#allocation25_spill] sm:$0xff] %v4523_v28  ;;  %v402_v16 = vrot.slane %v4523_v28, 1  ;;  %v416_v29 = vsel %vm400_vm5, %v415_v45, %v414_v30  ;;  %v4549_v53 = vrot.slane %v4470_v8, %v120_v44 }
 0x118   :  { %5748 = vst [vmem:[#allocation26_spill] sm:$0xff] %v4528_v39  ;;  %v305_v50 = vpop.f32.mrb[16].mxu1  ;;  %v417_v60 = vrot.slane %v4528_v39, 1 }
 0x119   :  { %v307_v36 = vpop.f32.mrb[17].mxu1  ;;  %v404_v9 = vsel %vm403_vm6, %v402_v16, %v401_v21  ;;  %v4555_v59 = vadd.f32 %v305_v50, %v4546_v15 }
 0x11a   :  { %v1122_v7 = vadd.f32 %v4473_v13, %v404_v9  ;;  %v418_v35 = vsel %vm403_vm6, %v417_v60, %v416_v29  ;;  %v4565_v9 = vadd.f32 %v307_v36, %v4549_v53 }
 0x11b   :  { %v1123_v51 = vadd.f32 %v4475_v46, %v418_v35  ;;  %v548_v33 = vrot.slane %v4555_v59, 2  ;;  %v483_v44 = vrot.slane %v4555_v59, 1 }
 0x11c   :  { %v311_v5 = vpop.f32.mrb[18].mxu1  ;;  %v1126_v16 = vmul.f32 0.5, %v1122_v7  ;;  %5750 = vst [vmem:[#allocation28_spill] sm:$0xff] %v4565_v9 }
 0x11d   :  { %v313_v49 = vpop.f32.mrb[19].mxu1  ;;  %v4552_v45 = vadd.f32 %v311_v5, %v4546_v15  ;;  %v1130_v30 = vmul.f32 0.5, %v1123_v51 }
 0x11e   :  { %v4558_v46 = vadd.f32 %v313_v49, %v4549_v53  ;;  %3745 = vtanh.f32 %v1126_v16 }
 0x11f   :  { %v549_v8 = vrot.slane %v4552_v45, 1  ;;  %v419_v29 = vrot.slane %v4552_v45, 7  ;;  %v614_v36 = vrot.slane %v4552_v45, 2  ;;  %3747 = vtanh.f32 %v1130_v30 }
 0x120   :  { %v317_v3 = vpop.f32.mrb[20].mxu1  ;;  %5749 = vst [vmem:[#allocation27_spill] sm:$0xff] %v4558_v46  ;;  %v433_v7 = vrot.slane %v4558_v46, 7  ;;  %v484_v46 = vsel %vm385_vm0, %v4552_v45, %v483_v44 }
 0x121   :  { %v319_v13 = vpop.f32.mrb[21].mxu1  ;;  %v4561_v22 = vadd.f32 %v317_v3, %v4546_v15  ;;  %v420_v16 = vsel %vm385_vm0, %v419_v29, %v4555_v59 }
 0x122   :  { %v4569_v50 = vadd.f32 %v319_v13, %v4549_v53  ;;  %v550_v13 = vsel %vm385_vm0, %v549_v8, %v548_v33 }
 0x123   :  { %v421_v5 = vrot.slane %v4561_v22, 6  ;;  %v485_v39 = vrot.slane %v4561_v22, 7  ;;  %v616_v33 = vrot.slane %v4561_v22, 1  ;;  %v551_v29 = vsel %vm388_vm1, %v4561_v22, %v550_v13 }
 0x124   :  { %v323_v21 = vpop.f32.mrb[22].mxu1  ;;  %5751 = vst [vmem:[#allocation29_spill] sm:$0xff] %v4569_v50  ;;  %v435_v8 = vrot.slane %v4569_v50, 6 }
 0x125   :  { %v325_v60 = vpop.f32.mrb[23].mxu1  ;;  %v4572_v35 = vadd.f32 %v323_v21, %v4546_v15  ;;  %v613_v21 = vrot.slane %v4555_v59, 3 }
 0x126   :  { %v4580_v49 = vadd.f32 %v325_v60, %v4549_v53  ;;  %v434_v60 = vsel %vm385_vm0, %v433_v7, %v4565_v9 }
 0x127   :  { %v423_v30 = vrot.slane %v4572_v35, 5  ;;  %v487_v28 = vrot.slane %v4572_v35, 6  ;;  %v615_v44 = vsel %vm385_vm0, %v614_v36, %v613_v21  ;;  %v552_v50 = vrot.slane %v4572_v35, 7 }
 0x128   :  { %v329_v51 = vpop.f32.mrb[24].mxu1  ;;  %5752 = vst [vmem:[#allocation30_spill] sm:$0xff] %v4580_v49  ;;  %v437_v9 = vrot.slane %v4580_v49, 5  ;;  %v617_v21 = vsel %vm388_vm1, %v616_v33, %v615_v44 }
 0x129   :  { %v331_v3 = vpop.f32.mrb[25].mxu1  ;;  %v4585_v61 = vadd.f32 %v329_v51, %v4546_v15  ;;  %v422_v51 = vsel %vm388_vm1, %v421_v5, %v420_v16  ;;  %v486_v16 = vsel %vm388_vm1, %v485_v39, %v484_v46 }
 0x12a   :  { %v4603_v63 = vadd.f32 %v331_v3, %v4549_v53  ;;  %v424_v3 = vsel %vm391_vm2, %v423_v30, %v422_v51  ;;  %v488_v47 = vsel %vm391_vm2, %v487_v28, %v486_v16 }
 0x12b   :  { %v425_v5 = vrot.slane %v4585_v61, 4  ;;  %v489_v62 = vrot.slane %v4585_v61, 5  ;;  %v554_v13 = vrot.slane %v4585_v61, 6 }
 0x12c   :  { %v335_v20 = vpop.f32.mrb[26].mxu1  ;;  %5753 = vst [vmem:[#allocation31_spill] sm:$0xff] %v4603_v63  ;;  %v439_v30 = vrot.slane %v4603_v63, 4 }
 0x12d   :  { %v4606_v14 = vadd.f32 %v335_v20, %v4546_v15  ;;  %v337_v7 = vpop.f32.mrb[27].mxu1  ;;  %v436_v20 = vsel %vm388_vm1, %v435_v8, %v434_v60  ;;  %v553_v60 = vsel %vm391_vm2, %v552_v50, %v551_v29  ;;  %v3746_v8 = vpop.eup %3745  ;;  %v426_v28 = vsel %vm394_vm3, %v425_v5, %v424_v3 }
 0x12e   :  { %v4615_v36 = vadd.f32 %v337_v7, %v4549_v53  ;;  %v438_v23 = vsel %vm391_vm2, %v437_v9, %v436_v20  ;;  %v490_v51 = vsel %vm394_vm3, %v489_v62, %v488_v47  ;;  %v555_v44 = vsel %vm394_vm3, %v554_v13, %v553_v60  ;;  %v3748_v16 = vpop.eup %3747 }
 0x12f   :  { %v427_v27 = vrot.slane %v4606_v14, 3  ;;  %v491_v39 = vrot.slane %v4606_v14, 4  ;;  %v556_v46 = vrot.slane %v4606_v14, 5 }
 0x130   :  { %5754 = vst [vmem:[#allocation32_spill] sm:$0xff] %v4615_v36  ;;  %v341_v49 = vpop.f32.mrb[28].mxu1  ;;  %v441_v2 = vrot.slane %v4615_v36, 3 }
 0x131   :  { %v4625_v32 = vadd.f32 %v341_v49, %v4546_v15  ;;  %v343_v7 = vpop.f32.mrb[29].mxu1  ;;  %v428_v29 = vsel %vm397_vm4, %v427_v27, %v426_v28  ;;  %v492_v5 = vsel %vm397_vm4, %v491_v39, %v490_v51  ;;  %v557_v47 = vsel %vm397_vm4, %v556_v46, %v555_v44 }
 0x132   :  { %v4631_v33 = vadd.f32 %v343_v7, %v4549_v53  ;;  %v440_v27 = vsel %vm394_vm3, %v439_v30, %v438_v23  ;;  %v619_v28 = vrot.slane %v4585_v61, 7  ;;  %v621_v23 = vrot.slane %v4606_v14, 6 }
 0x133   :  { %v429_v49 = vrot.slane %v4625_v32, 2  ;;  %v493_v9 = vrot.slane %v4625_v32, 3  ;;  %v558_v20 = vrot.slane %v4625_v32, 4  ;;  %v442_v46 = vsel %vm397_vm4, %v441_v2, %v440_v27 }
 0x134   :  { %v347_v50 = vpop.f32.mrb[30].mxu1  ;;  %v443_v7 = vrot.slane %v4631_v33, 2 }
 0x135   :  { %v4645_v62 = vadd.f32 %v347_v50, %v4546_v15  ;;  %v349_v13 = vpop.f32.mrb[31].mxu1  ;;  %v430_v3 = vsel %vm400_vm5, %v429_v49, %v428_v29  ;;  %v494_v60 = vsel %vm400_vm5, %v493_v9, %v492_v5  ;;  %v559_v36 = vsel %vm400_vm5, %v558_v20, %v557_v47 }
 0x136   :  { %v4651_v63 = vadd.f32 %v349_v13, %v4549_v53  ;;  %v444_v49 = vsel %vm400_vm5, %v443_v7, %v442_v46  ;;  %v618_v53 = vsel %vm391_vm2, %v4572_v35, %v617_v21  ;;  %v623_v29 = vrot.slane %v4625_v32, 5 }
 0x137   :  { %v431_v39 = vrot.slane %v4645_v62, 1  ;;  %v495_v15 = vrot.slane %v4645_v62, 2  ;;  %v560_v51 = vrot.slane %v4645_v62, 3  ;;  %v620_v47 = vsel %vm394_vm3, %v619_v28, %v618_v53 }
 0x138   :  { %5755 = vst [vmem:[#allocation33_spill] sm:$0xff] %v4651_v63  ;;  %v1117_v44 = vpop.f32.mrb[32].mxu1  ;;  %v445_v9 = vrot.slane %v4651_v63, 1  ;;  %v622_v21 = vsel %vm397_vm4, %v621_v23, %v620_v47  ;;  %v625_v27 = vrot.slane %v4645_v62, 4  ;;  %v1128_v46 = vmul.f32 0.5, %v3746_v8 }
 0x139   :  { %v432_v30 = vsel %vm403_vm6, %v431_v39, %v430_v3  ;;  %v1119_v20 = vpop.f32.mrb[33].mxu1  ;;  %v4666_v50 = vsel %vm403_vm6, %v495_v15, %v494_v60  ;;  %v4669_v2 = vsel %vm403_vm6, %v560_v51, %v559_v36  ;;  %v624_v3 = vsel %vm400_vm5, %v623_v29, %v622_v21 }
 0x13a   :  { %5756 = vst [vmem:[#allocation34_spill] sm:$0xff] %v4669_v2  ;;  %v1124_v5 = vadd.f32 %v1117_v44, %v432_v30  ;;  %v446_v7 = vsel %vm403_vm6, %v445_v9, %v444_v49  ;;  %v4678_v60 = vsel %vm403_vm6, %v625_v27, %v624_v3  ;;  %v1132_v36 = vmul.f32 0.5, %v3748_v16 }
 0x13b   :  { %v1125_v13 = vadd.f32 %v1119_v20, %v446_v7  ;;  %5757 = vst [vmem:[#allocation35_spill] sm:$0xff] %v4678_v60  ;;  %v678_v15 = vrot.slane %v4555_v59, 4  ;;  %v679_v51 = vrot.slane %v4552_v45, 3  ;;  %v681_v28 = vrot.slane %v4561_v22, 2  ;;  %v5780_v60 = vld [vmem:[#allocation20_spill] sm:$0xff] }
 0x13c   :  { %3749 = vtanh.f32 %v1124_v5  ;;  %v1133_v44 = vadd.f32 0.5, %v1132_v36  ;;  %v683_v49 = vrot.slane %v4572_v35, 1  ;;  %v686_v53 = vrot.slane %v4606_v14, 7 }
 0x13d   :  { %v1135_v39 = vmul.f32 0.5, %v1125_v13  ;;  %v680_v9 = vsel %vm385_vm0, %v679_v51, %v678_v15  ;;  %v1129_v23 = vadd.f32 0.5, %v1128_v46  ;;  %v688_v16 = vrot.slane %v4625_v32, 6 }
 0x13e   :  { %v682_v30 = vsel %vm388_vm1, %v681_v28, %v680_v9  ;;  %v690_v29 = vrot.slane %v4645_v62, 5  ;;  %v1139_v5 = vmul.f32 0.0, %v1133_v44  ;;  %v743_v46 = vrot.slane %v4555_v59, 5 }
 0x13f   :  { %3751 = vtanh.f32 %v1135_v39  ;;  %v684_v20 = vsel %vm391_vm2, %v683_v49, %v682_v30  ;;  %v744_v15 = vrot.slane %v4552_v45, 4  ;;  %v746_v51 = vrot.slane %v4561_v22, 3 }
 0x140   :  { %v685_v47 = vsel %vm394_vm3, %v4585_v61, %v684_v20  ;;  %v748_v28 = vrot.slane %v4572_v35, 2  ;;  %v750_v49 = vrot.slane %v4585_v61, 1  ;;  %v477_v2 = vrot.slane %v5780_v60, 4 }
 0x141   :  { %v687_v13 = vsel %vm397_vm4, %v686_v53, %v685_v47  ;;  %v745_v44 = vsel %vm385_vm0, %v744_v15, %v743_v46  ;;  %v753_v53 = vrot.slane %v4625_v32, 7  ;;  %v813_v46 = vrot.slane %v4572_v35, 3 }
 0x142   :  { %v689_v27 = vsel %vm400_vm5, %v688_v16, %v687_v13  ;;  %v747_v9 = vsel %vm388_vm1, %v746_v51, %v745_v44  ;;  %v755_v16 = vrot.slane %v4645_v62, 6  ;;  %v5761_v13 = vmov 0.0  }
 0x143   :  { %v4697_v3 = vsel %vm403_vm6, %v690_v29, %v689_v27  ;;  %v749_v30 = vsel %vm391_vm2, %v748_v28, %v747_v9  ;;  %v808_v27 = vrot.slane %v4555_v59, 6  ;;  %v815_v51 = vrot.slane %v4585_v61, 2 }
 0x144   :  { %5758 = vst [vmem:[#allocation36_spill] sm:$0xff] %v4697_v3  ;;  %v751_v20 = vsel %vm394_vm3, %v750_v49, %v749_v30  ;;  %v817_v44 = vrot.slane %v4606_v14, 1  ;;  %v820_v9 = vrot.slane %v4645_v62, 7 }
 0x146   :  { %v3750_v8 = vpop.eup %3749 }
 0x147   :  { %v1140_v7 = vmul.f32 %v3750_v8, %v1129_v23 }
 0x149   :  { %v4693_v21 = vadd.f32 %v1140_v7, %v1139_v5  ;;  %v3752_v36 = vpop.eup %3751  ;;  %v752_v5 = vsel %vm397_vm4, %v4606_v14, %v751_v20  ;;  %v874_v20 = vrot.slane %v4552_v45, 6 }
 0x14a   :  { %v1137_v39 = vmul.f32 0.5, %v3752_v36  ;;  %v754_v7 = vsel %vm400_vm5, %v753_v53, %v752_v5  ;;  %v809_v36 = vrot.slane %v4552_v45, 5  ;;  %v876_v5 = vrot.slane %v4561_v22, 5 }
 0x14b   :  { %3753 = vtanh.f32 %v4693_v21  ;;  %v4719_v47 = vsel %vm403_vm6, %v755_v16, %v754_v7  ;;  %v878_v7 = vrot.slane %v4572_v35, 4 }
 0x14c   :  { %v1138_v23 = vadd.f32 0.5, %v1137_v39  ;;  %5760 = vst [vmem:[#allocation38_spill] sm:$0xff] %v4719_v47  ;;  %v811_v39 = vrot.slane %v4561_v22, 4  ;;  %v810_v15 = vsel %vm385_vm0, %v809_v36, %v808_v27  ;;  %v880_v36 = vrot.slane %v4585_v61, 3  ;;  %v5779_v47 = vld [vmem:[#allocation12_spill] sm:$0xff] }
 0x14e   :  { %v812_v28 = vsel %vm388_vm1, %v811_v39, %v810_v15  ;;  %v884_v39 = vrot.slane %v4625_v32, 1  ;;  %v5765_v15 = vld [vmem:[#allocation9_spill] sm:$0xff] }
 0x14f   :  { %v814_v49 = vsel %vm391_vm2, %v813_v46, %v812_v28  ;;  %v5767_v28 = vld [vmem:[#allocation8_spill] sm:$0xff] }
 0x150   :  { %v816_v53 = vsel %vm394_vm3, %v815_v51, %v814_v49  ;;  %v5766_v51 = vld [vmem:[#allocation6_spill] sm:$0xff] }
 0x155   :  { %v3754_v8 = vpop.eup %3753 }
 0x156   :  { %v4711_v29 = vmul.f32 %v3754_v8, %v1138_v23  ;;  %v818_v23 = vsel %vm397_vm4, %v817_v44, %v816_v53  ;;  %v873_v8 = vrot.slane %v4555_v59, 7  ;;  %v882_v59 = vrot.slane %v4606_v14, 2  ;;  %v5768_v44 = vld [vmem:[#allocation13_spill] sm:$0xff] }
 0x157   :  { %v819_v30 = vsel %vm400_vm5, %v4625_v32, %v818_v23  ;;  %v5764_v32 = vld [vmem:[#allocation7_spill] sm:$0xff]  ;;  %v457_v49 = vrot.slane %v5768_v44, 7  ;;  %v5781_v44 = vld [vmem:[#allocation25_spill] sm:$0xff] }
 0x158   :  { %5759 = vst [vmem:[#allocation37_spill] sm:$0xff] %v4711_v29  ;;  %1214 = vmatmul.mubr.f32.vlgmr.msra.gmra.mrb[2].mxu0 %v4711_v29  ;;  %1285 = vmatmul.mubr.f32.vlgmr.msra.gmra.mrb[34].mxu1 %v4711_v29  ;;  %v4754_v16 = vsel %vm403_vm6, %v820_v9, %v819_v30  ;;  %v875_v27 = vsel %vm385_vm0, %v874_v20, %v873_v8  ;;  %v5769_v9 = vld [vmem:[#allocation21_spill] sm:$0xff]  ;;  %v5770_v23 = vld [vmem:[#allocation15_spill] sm:$0xff]  ;;  %v5771_v8 = vld [vmem:[#allocation14_spill] sm:$0xff] }
 0x159   :  { %3330 = vmatpush1.bf16.msra.mxu0 %v3954_v37  ;;  %3362 = vmatpush1.bf16.msra.mxu1 %v4297_v55  ;;  %5762 = vst [vmem:[#allocation39_spill] sm:$0xff] %v4754_v16  ;;  %v877_v45 = vsel %vm388_vm1, %v876_v5, %v875_v27  ;;  %v455_v53 = vrot.slane %v5769_v9, 1  ;;  %v459_v30 = vrot.slane %v5770_v23, 6  ;;  %v471_v20 = vrot.slane %v5771_v8, 7  ;;  %v5772_v5 = vld [vmem:[#allocation17_spill] sm:$0xff]  ;;  %v5778_v29 = vld [vmem:[#allocation22_spill] sm:$0xff] }
 0x15a   :  { %3332 = vmatprep.subr.bf16.mxu0 %v3964_v41  ;;  %3364 = vmatprep.subr.bf16.mxu1 %v4300_v57  ;;  %v879_v46 = vsel %vm391_vm2, %v878_v7, %v877_v45  ;;  %v461_v7 = vrot.slane %v5772_v5, 5  ;;  %v5775_v45 = vld [vmem:[#allocation11_spill] sm:$0xff]  ;;  %v465_v16 = vrot.slane %v5778_v29, 3 }
 0x15b   :  { %1383 = vmatprep.mubr.f32.mxu0 %v5761_v13  ;;  %1454 = vmatprep.mubr.f32.mxu1 %v5761_v13  ;;  %v881_v22 = vsel %vm394_vm3, %v880_v36, %v879_v46  ;;  %v5774_v36 = vld [vmem:[#allocation16_spill] sm:$0xff]  ;;  %v5776_v46 = vld [vmem:[#allocation19_spill] sm:$0xff] }
 0x15c   :  { %v883_v61 = vsel %vm397_vm4, %v882_v59, %v881_v22  ;;  %v473_v59 = vrot.slane %v5774_v36, 6  ;;  %v463_v22 = vrot.slane %v5776_v46, 4  ;;  %v467_v36 = vrot.slane %v5781_v44, 2 }
 0x15d   :  { %3334 = vmatpush1.bf16.msra.mxu0 %v3981_v48  ;;  %3366 = vmatpush1.bf16.msra.mxu1 %v4319_v1  ;;  %v885_v14 = vsel %vm400_vm5, %v884_v39, %v883_v61  ;;  %v456_v39 = vsel %vm385_vm0, %v5775_v45, %v455_v53  ;;  %v5777_v61 = vld [vmem:[#allocation18_spill] sm:$0xff]  ;;  %v5782_v53 = vld [vmem:[#allocation24_spill] sm:$0xff] }
 0x15e   :  { %3336 = vmatprep.subr.bf16.mxu0 %v3993_v52  ;;  %3368 = vmatprep.subr.bf16.mxu1 %v4322_v4  ;;  %v4783_v35 = vsel %vm403_vm6, %v4645_v62, %v885_v14  ;;  %v5773_v62 = vld [vmem:[#allocation23_spill] sm:$0xff]  ;;  %v475_v14 = vrot.slane %v5777_v61, 5  ;;  %v479_v23 = vrot.slane %v5782_v53, 3 }
 0x15f   :  { %5763 = vst [vmem:[#allocation40_spill] sm:$0xff] %v4783_v35  ;;  %v469_v27 = vrot.slane %v5773_v62, 1  ;;  %v458_v35 = vsel %vm388_vm1, %v457_v49, %v456_v39  ;;  %v5783_v49 = vld [vmem:[#allocation26_spill] sm:$0xff] }
 0x160   :  { %v460_v8 = vsel %vm391_vm2, %v459_v30, %v458_v35  ;;  %v481_v39 = vrot.slane %v5783_v49, 2  ;;  %v5784_v30 = vld [vmem:[#allocation29_spill] sm:$0xff] }
 0x161   :  { %3338 = vmatpush1.bf16.msra.mxu0 %v4008_v58  ;;  %3370 = vmatpush1.bf16.msra.mxu1 %v4341_v10  ;;  %v470_v3 = vsel %vm385_vm0, %v5779_v47, %v469_v27  ;;  %v462_v46 = vsel %vm394_vm3, %v461_v7, %v460_v8  ;;  %v499_v44 = vrot.slane %v5784_v30, 7  ;;  %v5785_v7 = vld [vmem:[#allocation28_spill] sm:$0xff] }
 0x162   :  { %3340 = vmatprep.subr.bf16.mxu0 %v4023_v0  ;;  %3372 = vmatprep.subr.bf16.mxu1 %v4344_v12  ;;  %v472_v5 = vsel %vm388_vm1, %v471_v20, %v470_v3  ;;  %v464_v29 = vsel %vm397_vm4, %v463_v22, %v462_v46 }
 0x163   :  { %v474_v61 = vsel %vm391_vm2, %v473_v59, %v472_v5  ;;  %v466_v60 = vsel %vm400_vm5, %v465_v16, %v464_v29  ;;  %v497_v5 = vrot.slane %v5785_v7, 1  ;;  %v5786_v59 = vld [vmem:[#allocation30_spill] sm:$0xff]  ;;  %v5787_v16 = vld [vmem:[#allocation31_spill] sm:$0xff] }
 0x164   :  { %v476_v27 = vsel %vm394_vm3, %v475_v14, %v474_v61  ;;  %v468_v3 = vsel %vm403_vm6, %v467_v36, %v466_v60  ;;  %v501_v49 = vrot.slane %v5786_v59, 6  ;;  %v5789_v36 = vld [vmem:[#allocation32_spill] sm:$0xff]  ;;  %v507_v59 = vrot.slane %v4631_v33, 3 }
 0x165   :  { %3342 = vmatpush1.bf16.msra.mxu0 %v4035_v6  ;;  %3374 = vmatpush1.bf16.msra.mxu1 %v4363_v17  ;;  %v478_v35 = vsel %vm397_vm4, %v477_v2, %v476_v27  ;;  %v503_v2 = vrot.slane %v5787_v16, 5  ;;  %v5788_v27 = vld [vmem:[#allocation27_spill] sm:$0xff]  ;;  %v505_v30 = vrot.slane %v5789_v36, 4 }
 0x166   :  { %3344 = vmatprep.subr.bf16.mxu0 %v4047_v11  ;;  %3376 = vmatprep.subr.bf16.mxu1 %v4366_v18  ;;  %v480_v8 = vsel %vm400_vm5, %v479_v23, %v478_v35  ;;  %v498_v60 = vsel %vm385_vm0, %v5788_v27, %v497_v5 }
 0x167   :  { %v482_v22 = vsel %vm403_vm6, %v481_v39, %v480_v8  ;;  %v500_v35 = vsel %vm388_vm1, %v499_v44, %v498_v60 }
 0x169   :  { %3346 = vmatpush1.bf16.msra.mxu0 %v4068_v19  ;;  %3378 = vmatpush1.bf16.msra.mxu1 %v4385_v25 }
 0x16a   :  { %3348 = vmatprep.subr.bf16.mxu0 %v4080_v24  ;;  %3380 = vmatprep.subr.bf16.mxu1 %v4388_v26 }
 0x16d   :  { %3350 = vmatpush1.bf16.msra.mxu0 %v4113_v38  ;;  %3382 = vmatpush1.bf16.msra.mxu1 %v4405_v31 }
 0x16e   :  { %3352 = vmatprep.subr.bf16.mxu0 %v4118_v40  ;;  %3384 = vmatprep.subr.bf16.mxu1 %v4408_v34 }
 0x171   :  { %3354 = vmatpush1.bf16.msra.mxu0 %v4149_v54  ;;  %3386 = vmatpush1.bf16.msra.mxu1 %v4425_v42 }
 0x172   :  { %3356 = vmatprep.subr.bf16.mxu0 %v4155_v56  ;;  %3388 = vmatprep.subr.bf16.mxu1 %v4428_v43 }
 0x175   :  { %3358 = vmatpush1.bf16.msra.mxu0 %v5764_v32  ;;  %3390 = vmatpush1.bf16.msra.mxu1 %v5765_v15 }
 0x176   :  { %3392 = vmatprep.subr.bf16.mxu0 %v5766_v51  ;;  %3424 = vmatprep.subr.bf16.mxu1 %v5767_v28 }
 0x22b   :  { %v1215_v20 = vpop.f32.mrb[2].mxu0  ;;  %v1286_v53 = vpop.f32.mrb[34].mxu1 }
 0x22c   :  { %v1291_v62 = vadd.f32 %v1215_v20, %v468_v3  ;;  %v1293_v46 = vadd.f32 %v1286_v53, %v4666_v50  ;;  %v1217_v29 = vpop.f32.mrb[3].mxu0  ;;  %v1288_v61 = vpop.f32.mrb[35].mxu1  ;;  %v502_v50 = vsel %vm391_vm2, %v501_v49, %v500_v35  ;;  %v509_v53 = vrot.slane %v4651_v63, 2 }
 0x22d   :  { %v1292_v14 = vadd.f32 %v1217_v29, %v482_v22  ;;  %v504_v39 = vsel %vm394_vm3, %v503_v2, %v502_v50 }
 0x22e   :  { %v1295_v23 = vmul.f32 0.5, %v1291_v62  ;;  %v506_v20 = vsel %vm397_vm4, %v505_v30, %v504_v39  ;;  %v5791_v39 = vld [vmem:[#allocation23_spill] sm:$0xff] }
 0x22f   :  { %v1299_v3 = vmul.f32 0.5, %v1292_v14  ;;  %v508_v8 = vsel %vm400_vm5, %v507_v59, %v506_v20  ;;  %v534_v20 = vrot.slane %v5791_v39, 2  ;;  %v5802_v39 = vld [vmem:[#allocation24_spill] sm:$0xff] }
 0x230   :  { %3755 = vtanh.f32 %v1295_v23  ;;  %v510_v5 = vsel %vm403_vm6, %v509_v53, %v508_v8  ;;  %v520_v53 = vrot.slane %v5769_v9, 2 }
 0x231   :  { %3757 = vtanh.f32 %v1299_v3  ;;  %v1294_v62 = vadd.f32 %v1288_v61, %v510_v5  ;;  %v5792_v5 = vld [vmem:[#allocation15_spill] sm:$0xff] }
 0x232   :  { %3759 = vtanh.f32 %v1293_v46 }
 0x233   :  { %v1304_v44 = vmul.f32 0.5, %v1294_v62  ;;  %v524_v62 = vrot.slane %v5792_v5, 7 }
 0x235   :  { %3761 = vtanh.f32 %v1304_v44 }
 0x23a   :  { %v3756_v22 = vpop.eup %3755 }
 0x23b   :  { %v3758_v29 = vpop.eup %3757  ;;  %v1297_v14 = vmul.f32 0.5, %v3756_v22  ;;  %v5793_v22 = vld [vmem:[#allocation17_spill] sm:$0xff] }
 0x23c   :  { %v1301_v60 = vmul.f32 0.5, %v3758_v29  ;;  %v3760_v35 = vpop.eup %3759  ;;  %v526_v29 = vrot.slane %v5793_v22, 6 }
 0x23d   :  { %v1298_v49 = vadd.f32 0.5, %v1297_v14  ;;  %v5794_v14 = vld [vmem:[#allocation16_spill] sm:$0xff] }
 0x23e   :  { %v1302_v23 = vadd.f32 0.5, %v1301_v60  ;;  %v538_v60 = vrot.slane %v5794_v14, 7  ;;  %v544_v14 = vrot.slane %v5802_v39, 4 }
 0x23f   :  { %v1309_v63 = vmul.f32 %v3760_v35, %v1298_v49  ;;  %v3762_v30 = vpop.eup %3761  ;;  %v5795_v49 = vld [vmem:[#allocation19_spill] sm:$0xff] }
 0x240   :  { %v1308_v2 = vmul.f32 %v1302_v23, %v4693_v21  ;;  %v1306_v59 = vmul.f32 0.5, %v3762_v30  ;;  %v535_v21 = vrot.slane %v5779_v47, 1  ;;  %v528_v35 = vrot.slane %v5795_v49, 5  ;;  %v5796_v23 = vld [vmem:[#allocation18_spill] sm:$0xff]  ;;  %v5797_v30 = vld [vmem:[#allocation13_spill] sm:$0xff] }
 0x241   :  { %v563_v49 = vrot.slane %v5788_v27, 1 }
 0x242   :  { %v4836_v3 = vadd.f32 %v1309_v63, %v1308_v2  ;;  %v1307_v46 = vadd.f32 0.5, %v1306_v59  ;;  %v521_v63 = vrot.slane %v5775_v45, 1  ;;  %v536_v44 = vsel %vm385_vm0, %v535_v21, %v534_v20  ;;  %v5801_v20 = vld [vmem:[#allocation25_spill] sm:$0xff] }
 0x243   :  { %v540_v2 = vrot.slane %v5796_v23, 6  ;;  %v532_v22 = vrot.slane %v5801_v20, 3 }
 0x244   :  { %3763 = vtanh.f32 %v4836_v3  ;;  %v522_v8 = vsel %vm385_vm0, %v521_v63, %v520_v53  ;;  %v5800_v53 = vld [vmem:[#allocation20_spill] sm:$0xff] }
 0x245   :  { %v523_v59 = vsel %vm388_vm1, %v5797_v30, %v522_v8  ;;  %v542_v5 = vrot.slane %v5800_v53, 5  ;;  %v5803_v8 = vld [vmem:[#allocation26_spill] sm:$0xff]  ;;  %v562_v53 = vrot.slane %v5785_v7, 2 }
 0x246   :  { %v525_v21 = vsel %vm391_vm2, %v524_v62, %v523_v59  ;;  %v546_v47 = vrot.slane %v5803_v8, 3 }
 0x247   :  { %v527_v23 = vsel %vm394_vm3, %v526_v29, %v525_v21 }
 0x24e   :  { %v3764_v61 = vpop.eup %3763 }
 0x24f   :  { %v4839_v50 = vmul.f32 %v3764_v61, %v1307_v46  ;;  %v5798_v46 = vld [vmem:[#allocation22_spill] sm:$0xff] }
 0x250   :  { %v530_v61 = vrot.slane %v5798_v46, 4  ;;  %v529_v46 = vsel %vm397_vm4, %v528_v35, %v527_v23  ;;  %v5805_v35 = vld [vmem:[#allocation34_spill] sm:$0xff] }
 0x251   :  { %5790 = vst [vmem:[#allocation7_spill] sm:$0xff] %v4839_v50  ;;  %1384 = vmatmul.mubr.f32.vlgmr.msra.gmra.mrb[4].mxu0 %v4839_v50  ;;  %1455 = vmatmul.mubr.f32.vlgmr.msra.gmra.mrb[36].mxu1 %v4839_v50  ;;  %v5799_v50 = vld [vmem:[#allocation14_spill] sm:$0xff] }
 0x252   :  { %3394 = vmatpush1.bf16.msra.mxu0 %v3954_v37  ;;  %3426 = vmatpush1.bf16.msra.mxu1 %v4297_v55  ;;  %v537_v63 = vsel %vm388_vm1, %v5799_v50, %v536_v44  ;;  %v531_v62 = vsel %vm400_vm5, %v530_v61, %v529_v46  ;;  %v568_v46 = vrot.slane %v5787_v16, 6 }
 0x253   :  { %3396 = vmatprep.subr.bf16.mxu0 %v3964_v41  ;;  %3428 = vmatprep.subr.bf16.mxu1 %v4300_v57  ;;  %v539_v9 = vsel %vm391_vm2, %v538_v60, %v537_v63  ;;  %v533_v20 = vsel %vm403_vm6, %v532_v22, %v531_v62  ;;  %v564_v60 = vsel %vm385_vm0, %v563_v49, %v562_v53  ;;  %v5804_v63 = vld [vmem:[#allocation30_spill] sm:$0xff]  ;;  %v570_v22 = vrot.slane %v5789_v36, 5  ;;  %v5806_v62 = vld [vmem:[#allocation29_spill] sm:$0xff] }
 0x254   :  { %1553 = vmatprep.mubr.f32.mxu0 %v5761_v13  ;;  %1624 = vmatprep.mubr.f32.mxu1 %v5761_v13  ;;  %v541_v44 = vsel %vm394_vm3, %v540_v2, %v539_v9  ;;  %v566_v21 = vrot.slane %v5804_v63, 7  ;;  %v572_v49 = vrot.slane %v4631_v33, 4 }
 0x255   :  { %v543_v59 = vsel %vm397_vm4, %v542_v5, %v541_v44 }
 0x256   :  { %3398 = vmatpush1.bf16.msra.mxu0 %v3981_v48  ;;  %3430 = vmatpush1.bf16.msra.mxu1 %v4319_v1  ;;  %v545_v29 = vsel %vm400_vm5, %v544_v14, %v543_v59  ;;  %v565_v14 = vsel %vm388_vm1, %v5806_v62, %v564_v60 }
 0x257   :  { %3400 = vmatprep.subr.bf16.mxu0 %v3993_v52  ;;  %3432 = vmatprep.subr.bf16.mxu1 %v4322_v4  ;;  %v547_v9 = vsel %vm403_vm6, %v546_v47, %v545_v29 }
 0x25a   :  { %3402 = vmatpush1.bf16.msra.mxu0 %v4008_v58  ;;  %3434 = vmatpush1.bf16.msra.mxu1 %v4341_v10 }
 0x25b   :  { %3404 = vmatprep.subr.bf16.mxu0 %v4023_v0  ;;  %3436 = vmatprep.subr.bf16.mxu1 %v4344_v12 }
 0x25e   :  { %3406 = vmatpush1.bf16.msra.mxu0 %v4035_v6  ;;  %3438 = vmatpush1.bf16.msra.mxu1 %v4363_v17 }
 0x25f   :  { %3408 = vmatprep.subr.bf16.mxu0 %v4047_v11  ;;  %3440 = vmatprep.subr.bf16.mxu1 %v4366_v18 }
 0x262   :  { %3410 = vmatpush1.bf16.msra.mxu0 %v4068_v19  ;;  %3442 = vmatpush1.bf16.msra.mxu1 %v4385_v25 }
 0x263   :  { %3412 = vmatprep.subr.bf16.mxu0 %v4080_v24  ;;  %3444 = vmatprep.subr.bf16.mxu1 %v4388_v26 }
 0x266   :  { %3414 = vmatpush1.bf16.msra.mxu0 %v4113_v38  ;;  %3446 = vmatpush1.bf16.msra.mxu1 %v4405_v31 }
 0x267   :  { %3416 = vmatprep.subr.bf16.mxu0 %v4118_v40  ;;  %3448 = vmatprep.subr.bf16.mxu1 %v4408_v34 }
 0x26a   :  { %3418 = vmatpush1.bf16.msra.mxu0 %v4149_v54  ;;  %3450 = vmatpush1.bf16.msra.mxu1 %v4425_v42 }
 0x26b   :  { %3420 = vmatprep.subr.bf16.mxu0 %v4155_v56  ;;  %3452 = vmatprep.subr.bf16.mxu1 %v4428_v43 }
 0x26e   :  { %3422 = vmatpush1.bf16.msra.mxu0 %v5764_v32  ;;  %3454 = vmatpush1.bf16.msra.mxu1 %v5765_v15 }
 0x26f   :  { %3456 = vmatprep.subr.bf16.mxu0 %v5766_v51  ;;  %3488 = vmatprep.subr.bf16.mxu1 %v5767_v28 }
 0x324   :  { %v1385_v39 = vpop.f32.mrb[4].mxu0  ;;  %v1456_v27 = vpop.f32.mrb[36].mxu1 }
 0x325   :  { %v1461_v8 = vadd.f32 %v1385_v39, %v533_v20  ;;  %v1463_v23 = vadd.f32 %v1456_v27, %v5805_v35  ;;  %v1387_v2 = vpop.f32.mrb[5].mxu0  ;;  %v1458_v61 = vpop.f32.mrb[37].mxu1  ;;  %v567_v39 = vsel %vm391_vm2, %v566_v21, %v565_v14  ;;  %v5807_v20 = vld [vmem:[#allocation33_spill] sm:$0xff] }
 0x326   :  { %v1462_v5 = vadd.f32 %v1387_v2, %v547_v9  ;;  %v574_v27 = vrot.slane %v5807_v20, 3  ;;  %v569_v47 = vsel %vm394_vm3, %v568_v46, %v567_v39 }
 0x327   :  { %v1465_v44 = vmul.f32 0.5, %v1461_v8  ;;  %v571_v59 = vsel %vm397_vm4, %v570_v22, %v569_v47  ;;  %v5810_v47 = vld [vmem:[#allocation21_spill] sm:$0xff] }
 0x328   :  { %v1469_v53 = vmul.f32 0.5, %v1462_v5  ;;  %v573_v29 = vsel %vm400_vm5, %v572_v49, %v571_v59  ;;  %v585_v59 = vrot.slane %v5810_v47, 3 }
 0x329   :  { %3765 = vtanh.f32 %v1465_v44  ;;  %v575_v8 = vsel %vm403_vm6, %v574_v27, %v573_v29  ;;  %v602_v29 = vrot.slane %v5799_v50, 1 }
 0x32a   :  { %3767 = vtanh.f32 %v1469_v53  ;;  %v1464_v35 = vadd.f32 %v1458_v61, %v575_v8  ;;  %v5811_v8 = vld [vmem:[#allocation23_spill] sm:$0xff] }
 0x32b   :  { %3769 = vtanh.f32 %v1463_v23 }
 0x32c   :  { %v1474_v60 = vmul.f32 0.5, %v1464_v35  ;;  %v599_v35 = vrot.slane %v5811_v8, 3  ;;  %v5817_v8 = vld [vmem:[#allocation22_spill] sm:$0xff] }
 0x32d   :  { %v595_v47 = vrot.slane %v5817_v8, 5 }
 0x32e   :  { %3771 = vtanh.f32 %v1474_v60 }
 0x333   :  { %v3766_v9 = vpop.eup %3765 }
 0x334   :  { %v3768_v2 = vpop.eup %3767  ;;  %v1467_v5 = vmul.f32 0.5, %v3766_v9 }
 0x335   :  { %v1471_v63 = vmul.f32 0.5, %v3768_v2  ;;  %v3770_v14 = vpop.eup %3769 }
 0x336   :  { %v1468_v21 = vadd.f32 0.5, %v1467_v5  ;;  %v5812_v5 = vld [vmem:[#allocation17_spill] sm:$0xff] }
 0x337   :  { %v1472_v44 = vadd.f32 0.5, %v1471_v63  ;;  %v588_v63 = vrot.slane %v5797_v30, 1 }
 0x338   :  { %v1479_v20 = vmul.f32 %v3770_v14, %v1468_v21  ;;  %v3772_v22 = vpop.eup %3771  ;;  %v591_v21 = vrot.slane %v5812_v5, 7  ;;  %v5821_v5 = vld [vmem:[#allocation26_spill] sm:$0xff] }
 0x339   :  { %v1478_v46 = vmul.f32 %v1472_v44, %v4836_v3  ;;  %v1476_v49 = vmul.f32 0.5, %v3772_v22  ;;  %v586_v3 = vrot.slane %v5775_v45, 2  ;;  %v5813_v44 = vld [vmem:[#allocation18_spill] sm:$0xff]  ;;  %v5814_v22 = vld [vmem:[#allocation19_spill] sm:$0xff] }
 0x33b   :  { %v4924_v53 = vadd.f32 %v1479_v20, %v1478_v46  ;;  %v1477_v23 = vadd.f32 0.5, %v1476_v49  ;;  %v5809_v20 = vld [vmem:[#allocation12_spill] sm:$0xff]  ;;  %v587_v60 = vsel %vm385_vm0, %v586_v3, %v585_v59  ;;  %v605_v46 = vrot.slane %v5813_v44, 7 }
 0x33c   :  { %v600_v27 = vrot.slane %v5809_v20, 2  ;;  %v589_v9 = vsel %vm388_vm1, %v588_v63, %v587_v60  ;;  %v593_v49 = vrot.slane %v5814_v22, 6  ;;  %v5818_v3 = vld [vmem:[#allocation24_spill] sm:$0xff]  ;;  %v5819_v63 = vld [vmem:[#allocation25_spill] sm:$0xff]  ;;  %v630_v20 = vrot.slane %v5806_v62, 1 }
 0x33d   :  { %3773 = vtanh.f32 %v4924_v53  ;;  %v609_v59 = vrot.slane %v5818_v3, 5  ;;  %v597_v60 = vrot.slane %v5819_v63, 4  ;;  %v627_v3 = vrot.slane %v5785_v7, 3 }
 0x33e   :  { %v601_v2 = vsel %vm385_vm0, %v600_v27, %v599_v35  ;;  %v5820_v27 = vld [vmem:[#allocation16_spill] sm:$0xff] }
 0x33f   :  { %v603_v14 = vsel %vm388_vm1, %v602_v29, %v601_v2  ;;  %v611_v29 = vrot.slane %v5821_v5, 4  ;;  %v5822_v2 = vld [vmem:[#allocation27_spill] sm:$0xff] }
 0x340   :  { %v604_v35 = vsel %vm391_vm2, %v5820_v27, %v603_v14  ;;  %v628_v44 = vrot.slane %v5822_v2, 2 }
 0x347   :  { %v3774_v61 = vpop.eup %3773 }
 0x348   :  { %v4927_v39 = vmul.f32 %v3774_v61, %v1477_v23  ;;  %v5815_v23 = vld [vmem:[#allocation20_spill] sm:$0xff] }
 0x349   :  { %v607_v61 = vrot.slane %v5815_v23, 6  ;;  %v606_v23 = vsel %vm394_vm3, %v605_v46, %v604_v35  ;;  %v5823_v35 = vld [vmem:[#allocation35_spill] sm:$0xff] }
 0x34a   :  { %5808 = vst [vmem:[#allocation9_spill] sm:$0xff] %v4927_v39  ;;  %1554 = vmatmul.mubr.f32.vlgmr.msra.gmra.mrb[6].mxu0 %v4927_v39  ;;  %1625 = vmatmul.mubr.f32.vlgmr.msra.gmra.mrb[38].mxu1 %v4927_v39  ;;  %v5816_v39 = vld [vmem:[#allocation15_spill] sm:$0xff] }
 0x34b   :  { %3458 = vmatpush1.bf16.msra.mxu0 %v3954_v37  ;;  %3490 = vmatpush1.bf16.msra.mxu1 %v4297_v55  ;;  %v590_v50 = vsel %vm391_vm2, %v5816_v39, %v589_v9  ;;  %v608_v8 = vsel %vm397_vm4, %v607_v61, %v606_v23  ;;  %v633_v23 = vrot.slane %v5787_v16, 7 }
 0x34c   :  { %3460 = vmatprep.subr.bf16.mxu0 %v3964_v41  ;;  %3492 = vmatprep.subr.bf16.mxu1 %v4300_v57  ;;  %v592_v22 = vsel %vm394_vm3, %v591_v21, %v590_v50  ;;  %v610_v14 = vsel %vm400_vm5, %v609_v59, %v608_v8  ;;  %v629_v21 = vsel %vm385_vm0, %v628_v44, %v627_v3  ;;  %v635_v8 = vrot.slane %v5789_v36, 6  ;;  %v5825_v44 = vld [vmem:[#allocation33_spill] sm:$0xff] }
 0x34d   :  { %1723 = vmatprep.mubr.f32.mxu0 %v5761_v13  ;;  %1794 = vmatprep.mubr.f32.mxu1 %v5761_v13  ;;  %v594_v9 = vsel %vm397_vm4, %v593_v49, %v592_v22  ;;  %v612_v50 = vsel %vm403_vm6, %v611_v29, %v610_v14  ;;  %v631_v49 = vsel %vm388_vm1, %v630_v20, %v629_v21 }
 0x34e   :  { %v596_v63 = vsel %vm400_vm5, %v595_v47, %v594_v9  ;;  %v5824_v9 = vld [vmem:[#allocation30_spill] sm:$0xff] }
 0x34f   :  { %3462 = vmatpush1.bf16.msra.mxu0 %v3981_v48  ;;  %3494 = vmatpush1.bf16.msra.mxu1 %v4319_v1  ;;  %v598_v5 = vsel %vm403_vm6, %v597_v60, %v596_v63  ;;  %v637_v63 = vrot.slane %v4631_v33, 5  ;;  %v632_v29 = vsel %vm391_vm2, %v5824_v9, %v631_v49 }
 0x350   :  { %3464 = vmatprep.subr.bf16.mxu0 %v3993_v52  ;;  %3496 = vmatprep.subr.bf16.mxu1 %v4322_v4  ;;  %v634_v3 = vsel %vm394_vm3, %v633_v23, %v632_v29 }
 0x351   :  { %v636_v20 = vsel %vm397_vm4, %v635_v8, %v634_v3 }
 0x353   :  { %3466 = vmatpush1.bf16.msra.mxu0 %v4008_v58  ;;  %3498 = vmatpush1.bf16.msra.mxu1 %v4341_v10 }
 0x354   :  { %3468 = vmatprep.subr.bf16.mxu0 %v4023_v0  ;;  %3500 = vmatprep.subr.bf16.mxu1 %v4344_v12 }
 0x357   :  { %3470 = vmatpush1.bf16.msra.mxu0 %v4035_v6  ;;  %3502 = vmatpush1.bf16.msra.mxu1 %v4363_v17 }
 0x358   :  { %3472 = vmatprep.subr.bf16.mxu0 %v4047_v11  ;;  %3504 = vmatprep.subr.bf16.mxu1 %v4366_v18 }
 0x35b   :  { %3474 = vmatpush1.bf16.msra.mxu0 %v4068_v19  ;;  %3506 = vmatpush1.bf16.msra.mxu1 %v4385_v25 }
 0x35c   :  { %3476 = vmatprep.subr.bf16.mxu0 %v4080_v24  ;;  %3508 = vmatprep.subr.bf16.mxu1 %v4388_v26 }
 0x35f   :  { %3478 = vmatpush1.bf16.msra.mxu0 %v4113_v38  ;;  %3510 = vmatpush1.bf16.msra.mxu1 %v4405_v31 }
 0x360   :  { %3480 = vmatprep.subr.bf16.mxu0 %v4118_v40  ;;  %3512 = vmatprep.subr.bf16.mxu1 %v4408_v34 }
 0x363   :  { %3482 = vmatpush1.bf16.msra.mxu0 %v4149_v54  ;;  %3514 = vmatpush1.bf16.msra.mxu1 %v4425_v42 }
 0x364   :  { %3484 = vmatprep.subr.bf16.mxu0 %v4155_v56  ;;  %3516 = vmatprep.subr.bf16.mxu1 %v4428_v43 }
 0x367   :  { %3486 = vmatpush1.bf16.msra.mxu0 %v5764_v32  ;;  %3518 = vmatpush1.bf16.msra.mxu1 %v5765_v15 }
 0x368   :  { %3520 = vmatprep.subr.bf16.mxu0 %v5766_v51  ;;  %3552 = vmatprep.subr.bf16.mxu1 %v5767_v28 }
 0x41d   :  { %v1555_v27 = vpop.f32.mrb[6].mxu0  ;;  %v1626_v2 = vpop.f32.mrb[38].mxu1 }
 0x41e   :  { %v1631_v46 = vadd.f32 %v1555_v27, %v598_v5  ;;  %v1633_v62 = vadd.f32 %v1626_v2, %v5823_v35  ;;  %v1557_v22 = vpop.f32.mrb[7].mxu0  ;;  %v1628_v61 = vpop.f32.mrb[39].mxu1  ;;  %v639_v5 = vrot.slane %v5825_v44, 4  ;;  %v638_v27 = vsel %vm400_vm5, %v637_v63, %v636_v20  ;;  %v5828_v20 = vld [vmem:[#allocation21_spill] sm:$0xff] }
 0x41f   :  { %v1632_v47 = vadd.f32 %v1557_v22, %v612_v50 }
 0x420   :  { %v1635_v59 = vmul.f32 0.5, %v1631_v46  ;;  %v640_v2 = vsel %vm403_vm6, %v639_v5, %v638_v27  ;;  %v5827_v5 = vld [vmem:[#allocation12_spill] sm:$0xff]  ;;  %v650_v27 = vrot.slane %v5828_v20, 4  ;;  %v5835_v20 = vld [vmem:[#allocation25_spill] sm:$0xff] }
 0x421   :  { %v1639_v60 = vmul.f32 0.5, %v1632_v47  ;;  %v1634_v14 = vadd.f32 %v1628_v61, %v640_v2  ;;  %v665_v3 = vrot.slane %v5827_v5, 3  ;;  %v655_v2 = vrot.slane %v5816_v39, 1  ;;  %v5834_v39 = vld [vmem:[#allocation20_spill] sm:$0xff] }
 0x422   :  { %3775 = vtanh.f32 %v1635_v59  ;;  %v5836_v5 = vld [vmem:[#allocation24_spill] sm:$0xff] }
 0x423   :  { %3777 = vtanh.f32 %v1639_v60  ;;  %v1644_v50 = vmul.f32 0.5, %v1634_v14  ;;  %v5829_v14 = vld [vmem:[#allocation14_spill] sm:$0xff] }
 0x424   :  { %3779 = vtanh.f32 %v1633_v62 }
 0x425   :  { %3781 = vtanh.f32 %v1644_v50  ;;  %v667_v50 = vrot.slane %v5829_v14, 2 }
 0x42c   :  { %v3776_v21 = vpop.eup %3775 }
 0x42d   :  { %v3778_v46 = vpop.eup %3777  ;;  %v1637_v35 = vmul.f32 0.5, %v3776_v21  ;;  %v5830_v21 = vld [vmem:[#allocation23_spill] sm:$0xff] }
 0x42e   :  { %v1641_v22 = vmul.f32 0.5, %v3778_v46  ;;  %v3780_v47 = vpop.eup %3779  ;;  %v664_v46 = vrot.slane %v5830_v21, 4  ;;  %v672_v21 = vrot.slane %v5834_v39, 7  ;;  %v697_v39 = vrot.slane %v5824_v9, 1 }
 0x42f   :  { %v1638_v49 = vadd.f32 0.5, %v1637_v35  ;;  %v3782_v8 = vpop.eup %3781  ;;  %v5831_v35 = vld [vmem:[#allocation16_spill] sm:$0xff] }
 0x430   :  { %v1642_v59 = vadd.f32 0.5, %v1641_v22  ;;  %v1646_v63 = vmul.f32 0.5, %v3782_v8  ;;  %v669_v22 = vrot.slane %v5831_v35, 1  ;;  %v5832_v8 = vld [vmem:[#allocation19_spill] sm:$0xff]  ;;  %v662_v35 = vrot.slane %v5835_v20, 5 }
 0x431   :  { %v1649_v16 = vmul.f32 %v3780_v47, %v1638_v49 }
 0x432   :  { %v1648_v23 = vmul.f32 %v1642_v59, %v4924_v53  ;;  %v1647_v62 = vadd.f32 0.5, %v1646_v63  ;;  %v653_v53 = vrot.slane %v5797_v30, 2  ;;  %v666_v59 = vsel %vm385_vm0, %v665_v3, %v664_v46 }
 0x433   :  { %v658_v63 = vrot.slane %v5832_v8, 7 }
 0x434   :  { %v5012_v60 = vadd.f32 %v1649_v16, %v1648_v23  ;;  %v651_v16 = vrot.slane %v5775_v45, 3 }
 0x436   :  { %3783 = vtanh.f32 %v5012_v60  ;;  %v652_v49 = vsel %vm385_vm0, %v651_v16, %v650_v27  ;;  %v674_v16 = vrot.slane %v5836_v5, 6  ;;  %v5837_v27 = vld [vmem:[#allocation27_spill] sm:$0xff] }
 0x437   :  { %v654_v47 = vsel %vm388_vm1, %v653_v53, %v652_v49  ;;  %v693_v53 = vrot.slane %v5837_v27, 3  ;;  %v5838_v49 = vld [vmem:[#allocation17_spill] sm:$0xff] }
 0x438   :  { %v656_v23 = vsel %vm391_vm2, %v655_v2, %v654_v47  ;;  %v5839_v2 = vld [vmem:[#allocation26_spill] sm:$0xff]  ;;  %v5840_v47 = vld [vmem:[#allocation29_spill] sm:$0xff] }
 0x439   :  { %v657_v3 = vsel %vm394_vm3, %v5838_v49, %v656_v23  ;;  %v676_v46 = vrot.slane %v5839_v2, 5  ;;  %v695_v8 = vrot.slane %v5840_v47, 2 }
 0x440   :  { %v3784_v61 = vpop.eup %3783 }
 0x441   :  { %v5015_v29 = vmul.f32 %v3784_v61, %v1647_v62  ;;  %v668_v62 = vsel %vm388_vm1, %v667_v50, %v666_v59  ;;  %v5833_v61 = vld [vmem:[#allocation22_spill] sm:$0xff]  ;;  %v659_v50 = vsel %vm397_vm4, %v658_v63, %v657_v3  ;;  %v5842_v3 = vld [vmem:[#allocation36_spill] sm:$0xff] }
 0x442   :  { %v670_v14 = vsel %vm391_vm2, %v669_v22, %v668_v62  ;;  %v5841_v59 = vld [vmem:[#allocation18_spill] sm:$0xff]  ;;  %v692_v62 = vrot.slane %v5785_v7, 4 }
 0x443   :  { %5826 = vst [vmem:[#allocation6_spill] sm:$0xff] %v5015_v29  ;;  %1724 = vmatmul.mubr.f32.vlgmr.msra.gmra.mrb[8].mxu0 %v5015_v29  ;;  %1795 = vmatmul.mubr.f32.vlgmr.msra.gmra.mrb[40].mxu1 %v5015_v29  ;;  %v660_v29 = vrot.slane %v5833_v61, 6  ;;  %v671_v22 = vsel %vm394_vm3, %v5841_v59, %v670_v14 }
 0x444   :  { %3522 = vmatpush1.bf16.msra.mxu0 %v3954_v37  ;;  %3554 = vmatpush1.bf16.msra.mxu1 %v4297_v55  ;;  %v673_v27 = vsel %vm397_vm4, %v672_v21, %v671_v22  ;;  %v694_v47 = vsel %vm385_vm0, %v693_v53, %v692_v62 }
 0x445   :  { %3524 = vmatprep.subr.bf16.mxu0 %v3964_v41  ;;  %3556 = vmatprep.subr.bf16.mxu1 %v4300_v57  ;;  %v661_v5 = vsel %vm400_vm5, %v660_v29, %v659_v50  ;;  %v675_v2 = vsel %vm400_vm5, %v674_v16, %v673_v27  ;;  %v696_v9 = vsel %vm388_vm1, %v695_v8, %v694_v47  ;;  %v702_v50 = vrot.slane %v4631_v33, 6 }
 0x446   :  { %1893 = vmatprep.mubr.f32.mxu0 %v5761_v13  ;;  %1964 = vmatprep.mubr.f32.mxu1 %v5761_v13  ;;  %v663_v20 = vsel %vm403_vm6, %v662_v35, %v661_v5  ;;  %v677_v14 = vsel %vm403_vm6, %v676_v46, %v675_v2  ;;  %v698_v21 = vsel %vm391_vm2, %v697_v39, %v696_v9  ;;  %v700_v5 = vrot.slane %v5789_v36, 7 }
 0x447   :  { %v704_v27 = vrot.slane %v5825_v44, 5 }
 0x448   :  { %3526 = vmatpush1.bf16.msra.mxu0 %v3981_v48  ;;  %3558 = vmatpush1.bf16.msra.mxu1 %v4319_v1 }
 0x449   :  { %3528 = vmatprep.subr.bf16.mxu0 %v3993_v52  ;;  %3560 = vmatprep.subr.bf16.mxu1 %v4322_v4 }
 0x44c   :  { %3530 = vmatpush1.bf16.msra.mxu0 %v4008_v58  ;;  %3562 = vmatpush1.bf16.msra.mxu1 %v4341_v10 }
 0x44d   :  { %3532 = vmatprep.subr.bf16.mxu0 %v4023_v0  ;;  %3564 = vmatprep.subr.bf16.mxu1 %v4344_v12 }
 0x450   :  { %3534 = vmatpush1.bf16.msra.mxu0 %v4035_v6  ;;  %3566 = vmatpush1.bf16.msra.mxu1 %v4363_v17 }
 0x451   :  { %3536 = vmatprep.subr.bf16.mxu0 %v4047_v11  ;;  %3568 = vmatprep.subr.bf16.mxu1 %v4366_v18 }
 0x454   :  { %3538 = vmatpush1.bf16.msra.mxu0 %v4068_v19  ;;  %3570 = vmatpush1.bf16.msra.mxu1 %v4385_v25 }
 0x455   :  { %3540 = vmatprep.subr.bf16.mxu0 %v4080_v24  ;;  %3572 = vmatprep.subr.bf16.mxu1 %v4388_v26 }
 0x458   :  { %3542 = vmatpush1.bf16.msra.mxu0 %v4113_v38  ;;  %3574 = vmatpush1.bf16.msra.mxu1 %v4405_v31 }
 0x459   :  { %3544 = vmatprep.subr.bf16.mxu0 %v4118_v40  ;;  %3576 = vmatprep.subr.bf16.mxu1 %v4408_v34 }
 0x45c   :  { %3546 = vmatpush1.bf16.msra.mxu0 %v4149_v54  ;;  %3578 = vmatpush1.bf16.msra.mxu1 %v4425_v42 }
 0x45d   :  { %3548 = vmatprep.subr.bf16.mxu0 %v4155_v56  ;;  %3580 = vmatprep.subr.bf16.mxu1 %v4428_v43 }
 0x460   :  { %3550 = vmatpush1.bf16.msra.mxu0 %v5764_v32  ;;  %3582 = vmatpush1.bf16.msra.mxu1 %v5765_v15 }
 0x461   :  { %3584 = vmatprep.subr.bf16.mxu0 %v5766_v51  ;;  %3616 = vmatprep.subr.bf16.mxu1 %v5767_v28 }
 0x516   :  { %v1725_v23 = vpop.f32.mrb[8].mxu0  ;;  %v1796_v61 = vpop.f32.mrb[40].mxu1 }
 0x517   :  { %v1801_v63 = vadd.f32 %v1725_v23, %v663_v20  ;;  %v1803_v49 = vadd.f32 %v1796_v61, %v5842_v3  ;;  %v1727_v7 = vpop.f32.mrb[9].mxu0  ;;  %v1798_v59 = vpop.f32.mrb[41].mxu1  ;;  %v5843_v20 = vld [vmem:[#allocation31_spill] sm:$0xff] }
 0x518   :  { %v1802_v29 = vadd.f32 %v1727_v7, %v677_v14  ;;  %v699_v61 = vsel %vm394_vm3, %v5843_v20, %v698_v21 }
 0x519   :  { %v1805_v35 = vmul.f32 0.5, %v1801_v63  ;;  %v701_v53 = vsel %vm397_vm4, %v700_v5, %v699_v61  ;;  %v5846_v61 = vld [vmem:[#allocation21_spill] sm:$0xff] }
 0x51a   :  { %v1809_v16 = vmul.f32 0.5, %v1802_v29  ;;  %v703_v8 = vsel %vm400_vm5, %v702_v50, %v701_v53  ;;  %v718_v50 = vrot.slane %v5797_v30, 3  ;;  %v715_v53 = vrot.slane %v5846_v61, 5 }
 0x51b   :  { %3785 = vtanh.f32 %v1805_v35  ;;  %v705_v7 = vsel %vm403_vm6, %v704_v27, %v703_v8  ;;  %v5847_v8 = vld [vmem:[#allocation15_spill] sm:$0xff] }
 0x51c   :  { %3787 = vtanh.f32 %v1809_v16  ;;  %v1804_v39 = vadd.f32 %v1798_v59, %v705_v7  ;;  %v5845_v16 = vld [vmem:[#allocation12_spill] sm:$0xff]  ;;  %v720_v7 = vrot.slane %v5847_v8, 2 }
 0x51d   :  { %3789 = vtanh.f32 %v1803_v49  ;;  %v730_v27 = vrot.slane %v5845_v16, 4 }
 0x51e   :  { %v1814_v9 = vmul.f32 0.5, %v1804_v39  ;;  %v5848_v39 = vld [vmem:[#allocation14_spill] sm:$0xff] }
 0x520   :  { %3791 = vtanh.f32 %v1814_v9  ;;  %v732_v9 = vrot.slane %v5848_v39, 3  ;;  %v5856_v39 = vld [vmem:[#allocation27_spill] sm:$0xff] }
 0x525   :  { %v3786_v2 = vpop.eup %3785 }
 0x526   :  { %v3788_v46 = vpop.eup %3787  ;;  %v1807_v47 = vmul.f32 0.5, %v3786_v2  ;;  %v5849_v2 = vld [vmem:[#allocation17_spill] sm:$0xff] }
 0x527   :  { %v1811_v22 = vmul.f32 0.5, %v3788_v46  ;;  %v3790_v23 = vpop.eup %3789  ;;  %v722_v46 = vrot.slane %v5849_v2, 1  ;;  %v5854_v2 = vld [vmem:[#allocation25_spill] sm:$0xff] }
 0x528   :  { %v1808_v62 = vadd.f32 0.5, %v1807_v47  ;;  %v5850_v47 = vld [vmem:[#allocation23_spill] sm:$0xff] }
 0x529   :  { %v1812_v63 = vadd.f32 0.5, %v1811_v22  ;;  %v729_v22 = vrot.slane %v5850_v47, 5 }
 0x52a   :  { %v1819_v3 = vmul.f32 %v3790_v23, %v1808_v62  ;;  %v3792_v21 = vpop.eup %3791  ;;  %v5851_v62 = vld [vmem:[#allocation16_spill] sm:$0xff]  ;;  %v5852_v23 = vld [vmem:[#allocation18_spill] sm:$0xff] }
 0x52b   :  { %v1818_v14 = vmul.f32 %v1812_v63, %v5012_v60  ;;  %v1816_v5 = vmul.f32 0.5, %v3792_v21  ;;  %v716_v60 = vrot.slane %v5775_v45, 4  ;;  %v736_v63 = vrot.slane %v5852_v23, 1 }
 0x52d   :  { %v5100_v29 = vadd.f32 %v1819_v3, %v1818_v14  ;;  %v1817_v49 = vadd.f32 0.5, %v1816_v5  ;;  %v731_v14 = vsel %vm385_vm0, %v730_v27, %v729_v22  ;;  %v5858_v22 = vld [vmem:[#allocation29_spill] sm:$0xff] }
 0x52e   :  { %v733_v5 = vsel %vm388_vm1, %v732_v9, %v731_v14 }
 0x52f   :  { %3793 = vtanh.f32 %v5100_v29 }
 0x539   :  { %v3794_v59 = vpop.eup %3793 }
 0x53a   :  { %v5103_v35 = vmul.f32 %v3794_v59, %v1817_v49  ;;  %v5853_v59 = vld [vmem:[#allocation22_spill] sm:$0xff] }
 0x53c   :  { %5844 = vst [vmem:[#allocation8_spill] sm:$0xff] %v5103_v35  ;;  %1894 = vmatmul.mubr.f32.vlgmr.msra.gmra.mrb[10].mxu0 %v5103_v35  ;;  %1965 = vmatmul.mubr.f32.vlgmr.msra.gmra.mrb[42].mxu1 %v5103_v35  ;;  %v725_v35 = vrot.slane %v5853_v59, 7 }
 0x53d   :  { %3586 = vmatpush1.bf16.msra.mxu0 %v3954_v37  ;;  %3618 = vmatpush1.bf16.msra.mxu1 %v4297_v55 }
 0x53e   :  { %3588 = vmatprep.subr.bf16.mxu0 %v3964_v41  ;;  %3620 = vmatprep.subr.bf16.mxu1 %v4300_v57 }
 0x53f   :  { %2063 = vmatprep.mubr.f32.mxu0 %v5761_v13  ;;  %2134 = vmatprep.mubr.f32.mxu1 %v5761_v13 }
 0x541   :  { %3590 = vmatpush1.bf16.msra.mxu0 %v3981_v48  ;;  %3622 = vmatpush1.bf16.msra.mxu1 %v4319_v1 }
 0x542   :  { %3592 = vmatprep.subr.bf16.mxu0 %v3993_v52  ;;  %3624 = vmatprep.subr.bf16.mxu1 %v4322_v4 }
 0x545   :  { %3594 = vmatpush1.bf16.msra.mxu0 %v4008_v58  ;;  %3626 = vmatpush1.bf16.msra.mxu1 %v4341_v10 }
 0x546   :  { %3596 = vmatprep.subr.bf16.mxu0 %v4023_v0  ;;  %3628 = vmatprep.subr.bf16.mxu1 %v4344_v12 }
 0x549   :  { %3598 = vmatpush1.bf16.msra.mxu0 %v4035_v6  ;;  %3630 = vmatpush1.bf16.msra.mxu1 %v4363_v17 }
 0x54a   :  { %3600 = vmatprep.subr.bf16.mxu0 %v4047_v11  ;;  %3632 = vmatprep.subr.bf16.mxu1 %v4366_v18 }
 0x54d   :  { %3602 = vmatpush1.bf16.msra.mxu0 %v4068_v19  ;;  %3634 = vmatpush1.bf16.msra.mxu1 %v4385_v25 }
 0x54e   :  { %3604 = vmatprep.subr.bf16.mxu0 %v4080_v24  ;;  %3636 = vmatprep.subr.bf16.mxu1 %v4388_v26 }
 0x551   :  { %3606 = vmatpush1.bf16.msra.mxu0 %v4113_v38  ;;  %3638 = vmatpush1.bf16.msra.mxu1 %v4405_v31 }
 0x552   :  { %3608 = vmatprep.subr.bf16.mxu0 %v4118_v40  ;;  %3640 = vmatprep.subr.bf16.mxu1 %v4408_v34 }
 0x555   :  { %3610 = vmatpush1.bf16.msra.mxu0 %v4149_v54  ;;  %3642 = vmatpush1.bf16.msra.mxu1 %v4425_v42 }
 0x556   :  { %3612 = vmatprep.subr.bf16.mxu0 %v4155_v56  ;;  %3644 = vmatprep.subr.bf16.mxu1 %v4428_v43 }
 0x559   :  { %3614 = vmatpush1.bf16.msra.mxu0 %v5764_v32  ;;  %3646 = vmatpush1.bf16.msra.mxu1 %v5765_v15 }
 0x55a   :  { %3648 = vmatprep.subr.bf16.mxu0 %v5766_v51  ;;  %3680 = vmatprep.subr.bf16.mxu1 %v5767_v28  ;;  %v734_v51 = vrot.slane %v5851_v62, 2  ;;  %v717_v28 = vsel %vm385_vm0, %v716_v60, %v715_v53  ;;  %v727_v62 = vrot.slane %v5854_v2, 6  ;;  %v5855_v53 = vld [vmem:[#allocation24_spill] sm:$0xff] }
 0x55b   :  { %v719_v3 = vsel %vm388_vm1, %v718_v50, %v717_v28  ;;  %v739_v23 = vrot.slane %v5855_v53, 7  ;;  %v758_v50 = vrot.slane %v5856_v39, 4  ;;  %v5857_v28 = vld [vmem:[#allocation26_spill] sm:$0xff] }
 0x55c   :  { %v721_v21 = vsel %vm391_vm2, %v720_v7, %v719_v3  ;;  %v735_v47 = vsel %vm391_vm2, %v734_v51, %v733_v5  ;;  %v741_v27 = vrot.slane %v5857_v28, 6  ;;  %v760_v7 = vrot.slane %v5858_v22, 3  ;;  %v5859_v3 = vld [vmem:[#allocation19_spill] sm:$0xff]  ;;  %v5862_v5 = vld [vmem:[#allocation20_spill] sm:$0xff] }
 0x55d   :  { %v723_v49 = vsel %vm394_vm3, %v722_v46, %v721_v21  ;;  %v737_v60 = vsel %vm394_vm3, %v736_v63, %v735_v47  ;;  %v5860_v46 = vld [vmem:[#allocation28_spill] sm:$0xff]  ;;  %v5861_v21 = vld [vmem:[#allocation30_spill] sm:$0xff]  ;;  %v764_v63 = vrot.slane %v5843_v20, 1 }
 0x55e   :  { %v724_v9 = vsel %vm397_vm4, %v5859_v3, %v723_v49  ;;  %v757_v14 = vrot.slane %v5860_v46, 5  ;;  %v762_v59 = vrot.slane %v5861_v21, 2  ;;  %v738_v47 = vsel %vm397_vm4, %v5862_v5, %v737_v60  ;;  %v5863_v3 = vld [vmem:[#allocation38_spill] sm:$0xff] }
 0x55f   :  { %v726_v51 = vsel %vm400_vm5, %v725_v35, %v724_v9  ;;  %v740_v22 = vsel %vm400_vm5, %v739_v23, %v738_v47 }
 0x560   :  { %v728_v53 = vsel %vm403_vm6, %v727_v62, %v726_v51  ;;  %v759_v2 = vsel %vm385_vm0, %v758_v50, %v757_v14  ;;  %v742_v21 = vsel %vm403_vm6, %v741_v27, %v740_v22  ;;  %v767_v51 = vrot.slane %v4631_v33, 7 }
 0x561   :  { %v761_v35 = vsel %vm388_vm1, %v760_v7, %v759_v2  ;;  %v769_v50 = vrot.slane %v5825_v44, 6 }
 0x562   :  { %v763_v20 = vsel %vm391_vm2, %v762_v59, %v761_v35 }
 0x563   :  { %v765_v62 = vsel %vm394_vm3, %v764_v63, %v763_v20 }
 0x60f   :  { %v1895_v39 = vpop.f32.mrb[10].mxu0  ;;  %v1966_v28 = vpop.f32.mrb[42].mxu1 }
 0x610   :  { %v1971_v49 = vadd.f32 %v1895_v39, %v728_v53  ;;  %v1973_v46 = vadd.f32 %v1966_v28, %v5863_v3  ;;  %v1897_v8 = vpop.f32.mrb[11].mxu0  ;;  %v1968_v9 = vpop.f32.mrb[43].mxu1  ;;  %v766_v39 = vsel %vm397_vm4, %v5789_v36, %v765_v62 }
 0x611   :  { %v1972_v60 = vadd.f32 %v1897_v8, %v742_v21  ;;  %v768_v53 = vsel %vm400_vm5, %v767_v51, %v766_v39  ;;  %v5873_v51 = vld [vmem:[#allocation27_spill] sm:$0xff]  ;;  %v5874_v39 = vld [vmem:[#allocation26_spill] sm:$0xff] }
 0x612   :  { %v1975_v5 = vmul.f32 0.5, %v1971_v49  ;;  %v770_v2 = vsel %vm403_vm6, %v769_v50, %v768_v53  ;;  %v806_v53 = vrot.slane %v5874_v39, 7 }
 0x613   :  { %v1979_v23 = vmul.f32 0.5, %v1972_v60  ;;  %v1974_v8 = vadd.f32 %v1968_v9, %v770_v2  ;;  %v5875_v2 = vld [vmem:[#allocation29_spill] sm:$0xff] }
 0x614   :  { %3795 = vtanh.f32 %v1975_v5 }
 0x615   :  { %3797 = vtanh.f32 %v1979_v23  ;;  %v1984_v59 = vmul.f32 0.5, %v1974_v8  ;;  %v823_v23 = vrot.slane %v5873_v51, 5  ;;  %v825_v8 = vrot.slane %v5875_v2, 4 }
 0x616   :  { %3799 = vtanh.f32 %v1973_v46 }
 0x617   :  { %3801 = vtanh.f32 %v1984_v59  ;;  %v5876_v59 = vld [vmem:[#allocation28_spill] sm:$0xff] }
 0x61e   :  { %v3796_v28 = vpop.eup %3795 }
 0x61f   :  { %v3798_v27 = vpop.eup %3797  ;;  %v1977_v20 = vmul.f32 0.5, %v3796_v28  ;;  %v822_v28 = vrot.slane %v5876_v59, 6 }
 0x620   :  { %v1981_v22 = vmul.f32 0.5, %v3798_v27  ;;  %v3800_v3 = vpop.eup %3799  ;;  %v5877_v27 = vld [vmem:[#allocation30_spill] sm:$0xff] }
 0x621   :  { %v1978_v7 = vadd.f32 0.5, %v1977_v20  ;;  %v3802_v63 = vpop.eup %3801  ;;  %v827_v20 = vrot.slane %v5877_v27, 3 }
 0x622   :  { %v1982_v14 = vadd.f32 0.5, %v1981_v22  ;;  %v1986_v49 = vmul.f32 0.5, %v3802_v63  ;;  %v5878_v22 = vld [vmem:[#allocation22_spill] sm:$0xff] }
 0x623   :  { %v1989_v21 = vmul.f32 %v3800_v3, %v1978_v7  ;;  %v5879_v3 = vld [vmem:[#allocation31_spill] sm:$0xff] }
 0x624   :  { %v1988_v5 = vmul.f32 %v1982_v14, %v5100_v29  ;;  %v1987_v46 = vadd.f32 0.5, %v1986_v49  ;;  %v5872_v29 = vld [vmem:[#allocation25_spill] sm:$0xff]  ;;  %v829_v14 = vrot.slane %v5879_v3, 2  ;;  %v5880_v49 = vld [vmem:[#allocation24_spill] sm:$0xff] }
 0x625   :  { %v792_v60 = vrot.slane %v5872_v29, 7 }
 0x626   :  { %v5188_v47 = vadd.f32 %v1989_v21, %v1988_v5 }
 0x628   :  { %3803 = vtanh.f32 %v5188_v47 }
 0x632   :  { %v3804_v35 = vpop.eup %3803 }
 0x633   :  { %v5191_v9 = vmul.f32 %v3804_v35, %v1987_v46  ;;  %v824_v35 = vsel %vm385_vm0, %v823_v23, %v822_v28 }
 0x635   :  { %2064 = vmatmul.mubr.f32.vlgmr.msra.gmra.mrb[12].mxu0 %v5191_v9  ;;  %2135 = vmatmul.mubr.f32.vlgmr.msra.gmra.mrb[44].mxu1 %v5191_v9 }
 0x636   :  { %3650 = vmatpush1.bf16.msra.mxu0 %v3954_v37  ;;  %3682 = vmatpush1.bf16.msra.mxu1 %v4297_v55  ;;  %v2345_v37 = vld [vmem:[%s5651_s4] sm:$0xff] }
 0x637   :  { %3652 = vmatprep.subr.bf16.mxu0 %v3964_v41  ;;  %3684 = vmatprep.subr.bf16.mxu1 %v4300_v57  ;;  %v2346_v41 = vld [vmem:[%s5651_s4 + $0x8] sm:$0xff]  ;;  %v5868_v57 = vld [vmem:[#allocation16_spill] sm:$0xff] }
 0x638   :  { %2233 = vmatprep.mubr.f32.mxu0 %v5761_v13  ;;  %2304 = vmatprep.mubr.f32.mxu1 %v5761_v13 }
 0x63a   :  { %3654 = vmatpush1.bf16.msra.mxu0 %v3981_v48  ;;  %3686 = vmatpush1.bf16.msra.mxu1 %v4319_v1  ;;  %v5233_v48 = vpack.c.bf16 %v2346_v41, %v2345_v37  ;;  %v799_v1 = vrot.slane %v5868_v57, 3  ;;  %v831_v37 = vrot.slane %v5789_v36, 1 }
 0x63b   :  { %3656 = vmatprep.subr.bf16.mxu0 %v3993_v52  ;;  %3688 = vmatprep.subr.bf16.mxu1 %v4322_v4  ;;  %v781_v52 = vrot.slane %v5775_v45, 5 }
 0x63e   :  { %3658 = vmatpush1.bf16.msra.mxu0 %v4008_v58  ;;  %3690 = vmatpush1.bf16.msra.mxu1 %v4341_v10  ;;  %v783_v58 = vrot.slane %v5797_v30, 4  ;;  %v5869_v10 = vld [vmem:[#allocation19_spill] sm:$0xff] }
 0x63f   :  { %3660 = vmatprep.subr.bf16.mxu0 %v4023_v0  ;;  %3692 = vmatprep.subr.bf16.mxu1 %v4344_v12  ;;  %v795_v0 = vrot.slane %v5845_v16, 5  ;;  %v789_v12 = vrot.slane %v5869_v10, 1 }
 0x642   :  { %3662 = vmatpush1.bf16.msra.mxu0 %v4035_v6  ;;  %3694 = vmatpush1.bf16.msra.mxu1 %v4363_v17  ;;  %v780_v6 = vrot.slane %v5846_v61, 6  ;;  %v5870_v17 = vld [vmem:[#allocation18_spill] sm:$0xff] }
 0x643   :  { %3664 = vmatprep.subr.bf16.mxu0 %v4047_v11  ;;  %3696 = vmatprep.subr.bf16.mxu1 %v4366_v18  ;;  %v5864_v11 = vld [vmem:[#allocation15_spill] sm:$0xff]  ;;  %v801_v18 = vrot.slane %v5870_v17, 2 }
 0x644   :  { %v782_v4 = vsel %vm385_vm0, %v781_v52, %v780_v6  ;;  %v5881_v52 = vld [vmem:[#allocation39_spill] sm:$0xff] }
 0x646   :  { %3666 = vmatpush1.bf16.msra.mxu0 %v4068_v19  ;;  %3698 = vmatpush1.bf16.msra.mxu1 %v4385_v25  ;;  %v785_v19 = vrot.slane %v5864_v11, 3  ;;  %v784_v25 = vsel %vm388_vm1, %v783_v58, %v782_v4 }
 0x647   :  { %3668 = vmatprep.subr.bf16.mxu0 %v4080_v24  ;;  %3700 = vmatprep.subr.bf16.mxu1 %v4388_v26  ;;  %v5865_v24 = vld [vmem:[#allocation14_spill] sm:$0xff] }
 0x64a   :  { %3670 = vmatpush1.bf16.msra.mxu0 %v4113_v38  ;;  %3702 = vmatpush1.bf16.msra.mxu1 %v4405_v31  ;;  %v797_v38 = vrot.slane %v5865_v24, 4  ;;  %v5871_v31 = vld [vmem:[#allocation20_spill] sm:$0xff] }
 0x64b   :  { %3672 = vmatprep.subr.bf16.mxu0 %v4118_v40  ;;  %3704 = vmatprep.subr.bf16.mxu1 %v4408_v34  ;;  %v5866_v40 = vld [vmem:[#allocation17_spill] sm:$0xff]  ;;  %v803_v34 = vrot.slane %v5871_v31, 1 }
 0x64e   :  { %3674 = vmatpush1.bf16.msra.mxu0 %v4149_v54  ;;  %3706 = vmatpush1.bf16.msra.mxu1 %v4425_v42  ;;  %v787_v54 = vrot.slane %v5866_v40, 2  ;;  %v786_v42 = vsel %vm391_vm2, %v785_v19, %v784_v25  ;;  %v826_v19 = vsel %vm388_vm1, %v825_v8, %v824_v35  ;;  %v834_v25 = vrot.slane %v5825_v44, 7 }
 0x64f   :  { %3676 = vmatprep.subr.bf16.mxu0 %v4155_v56  ;;  %3708 = vmatprep.subr.bf16.mxu1 %v4428_v43  ;;  %v5867_v56 = vld [vmem:[#allocation23_spill] sm:$0xff] }
 0x650   :  { %v794_v55 = vrot.slane %v5867_v56, 6  ;;  %v788_v13 = vsel %vm394_vm3, %v787_v54, %v786_v42 }
 0x652   :  { %3678 = vmatpush1.bf16.msra.mxu0 %v5764_v32  ;;  %3710 = vmatpush1.bf16.msra.mxu1 %v5765_v15  ;;  %v796_v26 = vsel %vm385_vm0, %v795_v0, %v794_v55  ;;  %v790_v15 = vsel %vm397_vm4, %v789_v12, %v788_v13  ;;  %v828_v55 = vsel %vm391_vm2, %v827_v20, %v826_v19  ;;  %v2353_v19 = vld [vmem:[%s5651_s4 + $0x40] sm:$0xff] }
 0x653   :  { %3712 = vmatprep.subr.bf16.mxu0 %v5233_v48  ;;  %v798_v43 = vsel %vm388_vm1, %v797_v38, %v796_v26  ;;  %v791_v7 = vsel %vm400_vm5, %v5878_v22, %v790_v15  ;;  %v830_v4 = vsel %vm394_vm3, %v829_v14, %v828_v55  ;;  %v2347_v14 = vld [vmem:[%s5651_s4 + $0x10] sm:$0xff]  ;;  %v2356_v55 = vld [vmem:[%s5651_s4 + $0x58] sm:$0xff] }
 0x654   :  { %v800_v32 = vsel %vm391_vm2, %v799_v1, %v798_v43  ;;  %v793_v21 = vsel %vm403_vm6, %v792_v60, %v791_v7 }
 0x655   :  { %v802_v62 = vsel %vm394_vm3, %v801_v18, %v800_v32  ;;  %v832_v18 = vsel %vm397_vm4, %v831_v37, %v830_v4  ;;  %v2350_v37 = vld [vmem:[%s5651_s4 + $0x28] sm:$0xff]  ;;  %v2357_v4 = vld [vmem:[%s5651_s4 + $0x60] sm:$0xff] }
 0x656   :  { %v804_v50 = vsel %vm397_vm4, %v803_v34, %v802_v62  ;;  %v833_v26 = vsel %vm400_vm5, %v4631_v33, %v832_v18 }
 0x657   :  { %v805_v46 = vsel %vm400_vm5, %v5880_v49, %v804_v50  ;;  %v835_v34 = vsel %vm403_vm6, %v834_v25, %v833_v26  ;;  %v2359_v25 = vld [vmem:[%s5651_s4 + $0x70] sm:$0xff]  ;;  %v2360_v26 = vld [vmem:[%s5651_s4 + $0x78] sm:$0xff] }
 0x658   :  { %v807_v0 = vsel %vm403_vm6, %v806_v53, %v805_v46 }
 0x708   :  { %v2065_v5 = vpop.f32.mrb[12].mxu0  ;;  %v2136_v63 = vpop.f32.mrb[44].mxu1 }
 0x709   :  { %v2141_v41 = vadd.f32 %v2065_v5, %v793_v21  ;;  %v2143_v58 = vadd.f32 %v2136_v63, %v5881_v52  ;;  %v2067_v6 = vpop.f32.mrb[13].mxu0  ;;  %v2138_v38 = vpop.f32.mrb[45].mxu1  ;;  %v2348_v21 = vld [vmem:[%s5651_s4 + $0x18] sm:$0xff] }
 0x70a   :  { %v2142_v54 = vadd.f32 %v2067_v6, %v807_v0  ;;  %v2144_v42 = vadd.f32 %v2138_v38, %v835_v34  ;;  %v3715_v35 = vpack.c.bf16 %v2348_v21, %v2347_v14  ;;  %v2352_v0 = vld [vmem:[%s5651_s4 + $0x38] sm:$0xff]  ;;  %v3739_v34 = vpack.c.bf16 %v2360_v26, %v2359_v25 }
 0x70b   :  { %v2145_v1 = vmul.f32 0.5, %v2141_v41  ;;  %v5882_v41 = vld [vmem:[#allocation37_spill] sm:$0xff] }
 0x70c   :  { %v2149_v12 = vmul.f32 0.5, %v2142_v54  ;;  %v2154_v43 = vmul.f32 0.5, %v2144_v42  ;;  %v2355_v54 = vld [vmem:[%s5651_s4 + $0x50] sm:$0xff]  ;;  %v5883_v42 = vld [vmem:[#allocation7_spill] sm:$0xff] }
 0x70d   :  { %3805 = vtanh.f32 %v2145_v1  ;;  %v3731_v1 = vpack.c.bf16 %v2356_v55, %v2355_v54 }
 0x70e   :  { %3807 = vtanh.f32 %v2149_v12  ;;  %v2358_v12 = vld [vmem:[%s5651_s4 + $0x68] sm:$0xff] }
 0x70f   :  { %3809 = vtanh.f32 %v2143_v58  ;;  %v2351_v58 = vld [vmem:[%s5651_s4 + $0x30] sm:$0xff]  ;;  %v3735_v18 = vpack.c.bf16 %v2358_v12, %v2357_v4 }
 0x710   :  { %3811 = vtanh.f32 %v2154_v43  ;;  %v3723_v6 = vpack.c.bf16 %v2352_v0, %v2351_v58  ;;  %v5884_v43 = vld [vmem:[#allocation9_spill] sm:$0xff]  ;;  %v896_v58 = vrot.slane %v5789_v36, 2  ;;  %v898_v0 = vrot.slane %v4631_v33, 1 }
 0x717   :  { %v3806_v13 = vpop.eup %3805 }
 0x718   :  { %v3808_v32 = vpop.eup %3807  ;;  %v2147_v15 = vmul.f32 0.5, %v3806_v13  ;;  %v5885_v13 = vld [vmem:[#allocation6_spill] sm:$0xff] }
 0x719   :  { %v2151_v60 = vmul.f32 0.5, %v3808_v32  ;;  %v3810_v23 = vpop.eup %3809  ;;  %v5886_v32 = vld [vmem:[#allocation8_spill] sm:$0xff] }
 0x71a   :  { %v2148_v62 = vadd.f32 0.5, %v2147_v15  ;;  %v3812_v20 = vpop.eup %3811  ;;  %v846_v15 = vrot.slane %v5775_v45, 6  ;;  %v854_v45 = vrot.slane %v5869_v10, 2 }
 0x71b   :  { %v2152_v50 = vadd.f32 0.5, %v2151_v60  ;;  %v2156_v7 = vmul.f32 0.5, %v3812_v20  ;;  %v848_v60 = vrot.slane %v5797_v30, 5  ;;  %v859_v20 = vrot.slane %v5867_v56, 7 }
 0x71c   :  { %v2159_v53 = vmul.f32 %v3810_v23, %v2148_v62  ;;  %v860_v62 = vrot.slane %v5845_v16, 6  ;;  %v845_v23 = vrot.slane %v5846_v61, 7  ;;  %v866_v30 = vrot.slane %v5870_v17, 3 }
 0x71d   :  { %v2158_v8 = vmul.f32 %v2152_v50, %v5188_v47  ;;  %v2157_v5 = vadd.f32 0.5, %v2156_v7  ;;  %v2349_v47 = vld [vmem:[%s5651_s4 + $0x20] sm:$0xff]  ;;  %v850_v50 = vrot.slane %v5864_v11, 4  ;;  %v864_v7 = vrot.slane %v5868_v57, 4 }
 0x71e   :  { %v3719_v52 = vpack.c.bf16 %v2350_v37, %v2349_v47  ;;  %v856_v61 = vrot.slane %v5878_v22, 1  ;;  %v861_v11 = vsel %vm385_vm0, %v860_v62, %v859_v20  ;;  %v870_v57 = vrot.slane %v5880_v49, 1 }
 0x71f   :  { %v5283_v28 = vadd.f32 %v2159_v53, %v2158_v8  ;;  %v862_v53 = vrot.slane %v5865_v24, 5  ;;  %v852_v8 = vrot.slane %v5866_v40, 3  ;;  %v868_v24 = vrot.slane %v5871_v31, 2 }
 0x720   :  { %v888_v22 = vrot.slane %v5873_v51, 6  ;;  %v887_v49 = vrot.slane %v5876_v59, 7  ;;  %v894_v47 = vrot.slane %v5879_v3, 3  ;;  %v3826_v62 = vmov 1966171168  }
 0x721   :  { %3813 = vtanh.f32 %v5283_v28  ;;  %v863_v56 = vsel %vm388_vm1, %v862_v53, %v861_v11  ;;  %v5388_v53 = vld [vmem:[%s5653_s5] ss:$0 sm:$0xff] }
 0x722   :  { %v865_v10 = vsel %vm391_vm2, %v864_v7, %v863_v56  ;;  %v889_v51 = vsel %vm385_vm0, %v888_v22, %v887_v49 }
 0x723   :  { %v867_v21 = vsel %vm394_vm3, %v866_v30, %v865_v10 }
 0x724   :  { %v869_v31 = vsel %vm397_vm4, %v868_v24, %v867_v21 }
 0x72b   :  { %v3814_v63 = vpop.eup %3813 }
 0x72c   :  { %v2162_v46 = vmul.f32 %v3814_v63, %v2157_v5  ;;  %v890_v63 = vrot.slane %v5875_v2, 5 }
 0x72e   :  { %2234 = vmatmul.mubr.f32.vlgmr.msra.gmra.mrb[14].mxu0 %v2162_v46  ;;  %2305 = vmatmul.mubr.f32.vlgmr.msra.gmra.mrb[46].mxu1 %v2162_v46  ;;  %v891_v3 = vsel %vm388_vm1, %v890_v63, %v889_v51 }
 0x72f   :  { %3714 = vmatpush3.bf16.msra.mxu0 %v5233_v48  ;;  %3123 = vmatprep.mubr.f32.mxu0 %v5882_v41  ;;  %v2354_v48 = vld [vmem:[%s5651_s4 + $0x48] sm:$0xff] }
 0x730   :  { %3716 = vmatprep.subr.bf16.mxu0 %v3715_v35  ;;  %v3727_v38 = vpack.c.bf16 %v2354_v48, %v2353_v19 }
 0x733   :  { %3718 = vmatpush3.bf16.msra.mxu0 %v3715_v35  ;;  %v892_v35 = vrot.slane %v5877_v27, 4 }
 0x734   :  { %3720 = vmatprep.subr.bf16.mxu0 %v3719_v52 }
 0x737   :  { %3722 = vmatpush3.bf16.msra.mxu0 %v3719_v52 }
 0x738   :  { %3724 = vmatprep.subr.bf16.mxu0 %v3723_v6 }
 0x73b   :  { %3726 = vmatpush3.bf16.msra.mxu0 %v3723_v6  ;;  %v5887_v6 = vld [vmem:[#allocation40_spill] sm:$0xff] }
 0x73c   :  { %3728 = vmatprep.subr.bf16.mxu0 %v3727_v38 }
 0x73f   :  { %3730 = vmatpush3.bf16.msra.mxu0 %v3727_v38 }
 0x740   :  { %3732 = vmatprep.subr.bf16.mxu0 %v3731_v1 }
 0x743   :  { %3734 = vmatpush3.bf16.msra.mxu0 %v3731_v1 }
 0x744   :  { %3736 = vmatprep.subr.bf16.mxu0 %v3735_v18 }
 0x747   :  { %3738 = vmatpush3.bf16.msra.mxu0 %v3735_v18 }
 0x748   :  { %3740 = vmatprep.subr.bf16.mxu0 %v3739_v34 }
 0x74b   :  { %3742 = vmatpush3.bf16.msra.mxu0 %v3739_v34 }
 0x74e   :  { %3124 = vmatmul.mubr.f32.vlgmr.msra.gmra.mrb[16].mxu0 %v5883_v42 }
 0x74f   :  { %3126 = vmatprep.mubr.f32.mxu0 %v5884_v43 }
 0x752   :  { %3127 = vmatmul.mubr.f32.gmra.mrb[18].mxu0 %v5885_v13 }
 0x753   :  { %3129 = vmatprep.mubr.f32.mxu0 %v5886_v32 }
 0x756   :  { %3130 = vmatmul.mubr.f32.gmra.mrb[20].mxu0 %v5191_v9  ;;  %v847_v9 = vsel %vm385_vm0, %v846_v15, %v845_v23  ;;  %v2492_v23 = vunpack.c.l.s4 %v3826_v62 }
 0x757   :  { %3132 = vmatprep.mubr.f32.mxu0 %v2162_v46  ;;  %v849_v16 = vsel %vm388_vm1, %v848_v60, %v847_v9  ;;  %v871_v46 = vsel %vm400_vm5, %v870_v57, %v869_v31 }
 0x758   :  { %v851_v40 = vsel %vm391_vm2, %v850_v50, %v849_v16  ;;  %v872_v59 = vsel %vm403_vm6, %v5874_v39, %v871_v46 }
 0x759   :  { %v853_v14 = vsel %vm394_vm3, %v852_v8, %v851_v40  ;;  %v2493_v8 = vunpack.c.0.s8 %v2492_v23 }
 0x75a   :  { %v855_v17 = vsel %vm397_vm4, %v854_v45, %v853_v14 }
 0x75b   :  { %v857_v5 = vsel %vm400_vm5, %v856_v61, %v855_v17  ;;  %v5888_v61 = vld [vmem:[#allocation10_spill] sm:$0xff] }
 0x75c   :  { %v858_v37 = vsel %vm403_vm6, %v5872_v29, %v857_v5  ;;  %v893_v29 = vsel %vm391_vm2, %v892_v35, %v891_v3  ;;  %v5393_v11 = vsub.s32 %v2493_v8, %v5888_v61 }
 0x75d   :  { %v895_v55 = vsel %vm394_vm3, %v894_v47, %v893_v29 }
 0x75e   :  { %v897_v36 = vsel %vm397_vm4, %v896_v58, %v895_v55 }
 0x75f   :  { %v899_v33 = vsel %vm400_vm5, %v898_v0, %v897_v36 }
 0x760   :  { %v900_v39 = vsel %vm403_vm6, %v5825_v44, %v899_v33 }
 0x801   :  { %v2235_v41 = vpop.f32.mrb[14].mxu0  ;;  %v2306_v52 = vpop.f32.mrb[46].mxu1 }
 0x802   :  { %v2311_v2 = vadd.f32 %v2235_v41, %v858_v37  ;;  %v2313_v19 = vadd.f32 %v2306_v52, %v5887_v6  ;;  %v2237_v27 = vpop.f32.mrb[15].mxu0  ;;  %v2308_v48 = vpop.f32.mrb[47].mxu1 }
 0x803   :  { %v2312_v38 = vadd.f32 %v2237_v27, %v872_v59  ;;  %v2314_v4 = vadd.f32 %v2308_v48, %v900_v39 }
 0x804   :  { %v2315_v54 = vmul.f32 0.5, %v2311_v2 }
 0x805   :  { %v2319_v1 = vmul.f32 0.5, %v2312_v38  ;;  %v2324_v12 = vmul.f32 0.5, %v2314_v4 }
 0x806   :  { %3815 = vtanh.f32 %v2315_v54 }
 0x807   :  { %3817 = vtanh.f32 %v2319_v1 }
 0x808   :  { %3819 = vtanh.f32 %v2313_v19 }
 0x809   :  { %3821 = vtanh.f32 %v2324_v12 }
 0x810   :  { %v3816_v18 = vpop.eup %3815 }
 0x811   :  { %v3818_v25 = vpop.eup %3817  ;;  %v2317_v26 = vmul.f32 0.5, %v3816_v18 }
 0x812   :  { %v2321_v34 = vmul.f32 0.5, %v3818_v25  ;;  %v3820_v43 = vpop.eup %3819 }
 0x813   :  { %v2318_v42 = vadd.f32 0.5, %v2317_v26  ;;  %v3822_v44 = vpop.eup %3821 }
 0x814   :  { %v2322_v13 = vadd.f32 0.5, %v2321_v34  ;;  %v2326_v50 = vmul.f32 0.5, %v3822_v44 }
 0x815   :  { %v2329_v32 = vmul.f32 %v3820_v43, %v2318_v42 }
 0x816   :  { %v2328_v15 = vmul.f32 %v2322_v13, %v5283_v28  ;;  %v2327_v9 = vadd.f32 0.5, %v2326_v50 }
 0x818   :  { %v2330_v60 = vadd.f32 %v2329_v32, %v2328_v15 }
 0x81a   :  { %3823 = vtanh.f32 %v2330_v60  ;;  %3021 = vst [vmem:[%s5652_s8] sm:$0xff] %v2330_v60 }
 0x821   :  { %v3125_v20 = vpop.f32.mrb[16].mxu0 }
 0x822   :  { %v2440_v7 = vadd.f32 %v3125_v20, %v5388_v53  ;;  %v2434_v28 = vpop.f32.mrb[17].mxu0 }
 0x823   :  { %v2435_v45 = vadd.f32 %v5388_v53, %v2434_v28 }
 0x824   :  { %v3824_v30 = vpop.eup %3823  ;;  %v2474_v16 = vmax.f32 %v2440_v7, 0.0 }
 0x825   :  { %v2473_v24 = vmax.f32 %v2435_v45, 0.0  ;;  %v3128_v40 = vpop.f32.mrb[18].mxu0  ;;  %v2332_v56 = vmul.f32 %v3824_v30, %v2327_v9 }
 0x826   :  { %v2482_v57 = vmul.f32 -1.0, %v2474_v16  ;;  %v2450_v14 = vadd.f32 %v3128_v40, %v5388_v53  ;;  %v2444_v10 = vpop.f32.mrb[19].mxu0 }
 0x827   :  { %v2481_v17 = vmul.f32 -1.0, %v2473_v24  ;;  %v2445_v21 = vadd.f32 %v5388_v53, %v2444_v10  ;;  %3133 = vmatmul.mubr.f32.gmra.mrb[22].mxu0 %v2332_v56  ;;  %3020 = vst [vmem:[%s5654_s7] sm:$0xff] %v2332_v56 }
 0x828   :  { %v2556_v22 = vcombine.high %v2482_v57, %v2482_v57  ;;  %v2563_v5 = vrot.slane %v2482_v57, %v5393_v11  ;;  %v2476_v31 = vmax.f32 %v2450_v14, 0.0 }
 0x829   :  { %v2490_v63 = vcombine.high %v2481_v17, %v2481_v17  ;;  %v2497_v46 = vrot.slane %v2481_v17, %v5393_v11  ;;  %v2475_v49 = vmax.f32 %v2445_v21, 0.0  ;;  %v3131_v35 = vpop.f32.mrb[20].mxu0 }
 0x82a   :  { %v2570_v47 = vrot.slane %v2556_v22, %v5393_v11  ;;  %v2571_v37 = vcombine.high %v2563_v5, %v2563_v5  ;;  %v2579_v41 = vrot.slane %v2563_v5, %v5393_v11  ;;  %3039 = vst.sshfl [vmem:[%s5655_s6 + $0x1] sm:$0x1 pattern:$0x73625140] %v2563_v5  ;;  %v2484_v52 = vmul.f32 -1.0, %v2476_v31  ;;  %v5407_v51 = vpop.f32.mrb[21].mxu0 }
 0x82b   :  { %v2504_v58 = vrot.slane %v2490_v63, %v5393_v11  ;;  %v2505_v0 = vcombine.high %v2497_v46, %v2497_v46  ;;  %v2513_v2 = vrot.slane %v2497_v46, %v5393_v11  ;;  %3035 = vst.sshfl [vmem:[%s5655_s6] sm:$0x1 pattern:$0x73625140] %v2497_v46  ;;  %v2483_v6 = vmul.f32 -1.0, %v2475_v49 }
 0x82c   :  { %v2572_v19 = vcombine.high %v2570_v47, %v2570_v47  ;;  %v2586_v59 = vrot.slane %v2570_v47, %v5393_v11  ;;  %v2593_v27 = vrot.slane %v2571_v37, %v5393_v11  ;;  %v2601_v3 = vcombine.high %v2579_v41, %v2579_v41  ;;  %3040 = vst.sshfl [vmem:[%s5655_s6 + $0x9] sm:$0x1 pattern:$0x73625140] %v2571_v37 }
 0x82d   :  { %3041 = vst.sshfl [vmem:[%s5655_s6 + $0x21] sm:$0x1 pattern:$0x73625140] %v2570_v47  ;;  %v2506_v48 = vcombine.high %v2504_v58, %v2504_v58  ;;  %v2520_v38 = vrot.slane %v2504_v58, %v5393_v11  ;;  %v2527_v29 = vrot.slane %v2505_v0, %v5393_v11  ;;  %v2535_v54 = vcombine.high %v2513_v2, %v2513_v2 }
 0x82e   :  { %3036 = vst.sshfl [vmem:[%s5655_s6 + $0x8] sm:$0x1 pattern:$0x73625140] %v2505_v0  ;;  %v2600_v55 = vrot.slane %v2572_v19, %v5393_v11  ;;  %v2602_v1 = vcombine.high %v2586_v59, %v2586_v59  ;;  %v2603_v36 = vcombine.high %v2593_v27, %v2593_v27  ;;  %2615 = vst [vmem:[%s5655_s6 + $0x11] sm:$0x1] %v2601_v3 }
 0x82f   :  { %3037 = vst.sshfl [vmem:[%s5655_s6 + $0x20] sm:$0x1 pattern:$0x73625140] %v2504_v58  ;;  %v2688_v33 = vcombine.high %v2484_v52, %v2484_v52  ;;  %v2534_v39 = vrot.slane %v2506_v48, %v5393_v11  ;;  %v2536_v4 = vcombine.high %v2520_v38, %v2520_v38  ;;  %v2537_v12 = vcombine.high %v2527_v29, %v2527_v29 }
 0x830   :  { %3042 = vst.sshfl [vmem:[%s5655_s6 + $0x29] sm:$0x1 pattern:$0x73625140] %v2572_v19  ;;  %2549 = vst [vmem:[%s5655_s6 + $0x10] sm:$0x1] %v2535_v54  ;;  %v2695_v18 = vrot.slane %v2484_v52, %v5393_v11  ;;  %v2604_v25 = vcombine.high %v2600_v55, %v2600_v55  ;;  %v2622_v34 = vcombine.high %v2483_v6, %v2483_v6 }
 0x831   :  { %3038 = vst.sshfl [vmem:[%s5655_s6 + $0x28] sm:$0x1 pattern:$0x73625140] %v2506_v48  ;;  %2616 = vst [vmem:[%s5655_s6 + $0x19] sm:$0x1] %v2603_v36  ;;  %v2702_v26 = vrot.slane %v2688_v33, %v5393_v11  ;;  %v2629_v42 = vrot.slane %v2483_v6, %v5393_v11  ;;  %v2538_v43 = vcombine.high %v2534_v39, %v2534_v39 }
 0x832   :  { %2619 = vst [vmem:[%s5655_s6 + $0x31] sm:$0x1] %v2602_v1  ;;  %2550 = vst [vmem:[%s5655_s6 + $0x18] sm:$0x1] %v2537_v12  ;;  %v2703_v13 = vcombine.high %v2695_v18, %v2695_v18  ;;  %v2711_v32 = vrot.slane %v2695_v18, %v5393_v11  ;;  %v2460_v15 = vadd.f32 %v3131_v35, %v5388_v53 }
 0x833   :  { %2553 = vst [vmem:[%s5655_s6 + $0x30] sm:$0x1] %v2536_v4  ;;  %3047 = vst.sshfl [vmem:[%s5655_s6 + $0x3] sm:$0x1 pattern:$0x73625140] %v2695_v18  ;;  %v2704_v60 = vcombine.high %v2702_v26, %v2702_v26  ;;  %v2718_v44 = vrot.slane %v2702_v26, %v5393_v11  ;;  %v2636_v62 = vrot.slane %v2622_v34, %v5393_v11 }
 0x834   :  { %2620 = vst [vmem:[%s5655_s6 + $0x39] sm:$0x1] %v2604_v25  ;;  %3049 = vst.sshfl [vmem:[%s5655_s6 + $0x23] sm:$0x1 pattern:$0x73625140] %v2702_v26  ;;  %v2637_v23 = vcombine.high %v2629_v42, %v2629_v42  ;;  %v2725_v50 = vrot.slane %v2703_v13, %v5393_v11  ;;  %v2733_v8 = vcombine.high %v2711_v32, %v2711_v32 }
 0x835   :  { %3043 = vst.sshfl [vmem:[%s5655_s6 + $0x2] sm:$0x1 pattern:$0x73625140] %v2629_v42  ;;  %2554 = vst [vmem:[%s5655_s6 + $0x38] sm:$0x1] %v2538_v43  ;;  %v2645_v20 = vrot.slane %v2629_v42, %v5393_v11  ;;  %v2732_v28 = vrot.slane %v2704_v60, %v5393_v11  ;;  %v2734_v9 = vcombine.high %v2718_v44, %v2718_v44 }
 0x836   :  { %3048 = vst.sshfl [vmem:[%s5655_s6 + $0xb] sm:$0x1 pattern:$0x73625140] %v2703_v13  ;;  %v2478_v7 = vmax.f32 %v2460_v15, 0.0  ;;  %v2638_v45 = vcombine.high %v2636_v62, %v2636_v62  ;;  %v2652_v30 = vrot.slane %v2636_v62, %v5393_v11  ;;  %v2735_v16 = vcombine.high %v2725_v50, %v2725_v50 }
 0x837   :  { %3050 = vst.sshfl [vmem:[%s5655_s6 + $0x2b] sm:$0x1 pattern:$0x73625140] %v2704_v60  ;;  %2747 = vst [vmem:[%s5655_s6 + $0x13] sm:$0x1] %v2733_v8  ;;  %v2659_v61 = vrot.slane %v2637_v23, %v5393_v11  ;;  %v2667_v24 = vcombine.high %v2645_v20, %v2645_v20  ;;  %v2736_v56 = vcombine.high %v2732_v28, %v2732_v28 }
 0x838   :  { %3044 = vst.sshfl [vmem:[%s5655_s6 + $0xa] sm:$0x1 pattern:$0x73625140] %v2637_v23  ;;  %v2486_v40 = vmul.f32 -1.0, %v2478_v7  ;;  %v2666_v57 = vrot.slane %v2638_v45, %v5393_v11  ;;  %v2668_v14 = vcombine.high %v2652_v30, %v2652_v30  ;;  %v2455_v10 = vadd.f32 %v5388_v53, %v5407_v51 }
 0x839   :  { %3045 = vst.sshfl [vmem:[%s5655_s6 + $0x22] sm:$0x1 pattern:$0x73625140] %v2636_v62  ;;  %2751 = vst [vmem:[%s5655_s6 + $0x33] sm:$0x1] %v2734_v9  ;;  %v2669_v17 = vcombine.high %v2659_v61, %v2659_v61 }
 0x83a   :  { %3046 = vst.sshfl [vmem:[%s5655_s6 + $0x2a] sm:$0x1 pattern:$0x73625140] %v2638_v45  ;;  %2748 = vst [vmem:[%s5655_s6 + $0x1b] sm:$0x1] %v2735_v16  ;;  %v2820_v21 = vcombine.high %v2486_v40, %v2486_v40  ;;  %v2827_v22 = vrot.slane %v2486_v40, %v5393_v11  ;;  %v2670_v5 = vcombine.high %v2666_v57, %v2666_v57 }
 0x83b   :  { %2681 = vst [vmem:[%s5655_s6 + $0x12] sm:$0x1] %v2667_v24  ;;  %2752 = vst [vmem:[%s5655_s6 + $0x3b] sm:$0x1] %v2736_v56  ;;  %v2477_v31 = vmax.f32 %v2455_v10, 0.0 }
 0x83c   :  { %2685 = vst [vmem:[%s5655_s6 + $0x32] sm:$0x1] %v2668_v14  ;;  %2682 = vst [vmem:[%s5655_s6 + $0x1a] sm:$0x1] %v2669_v17  ;;  %v2834_v63 = vrot.slane %v2820_v21, %v5393_v11  ;;  %v2835_v46 = vcombine.high %v2827_v22, %v2827_v22  ;;  %v2843_v49 = vrot.slane %v2827_v22, %v5393_v11 }
 0x83d   :  { %3055 = vst.sshfl [vmem:[%s5655_s6 + $0x5] sm:$0x1 pattern:$0x73625140] %v2827_v22  ;;  %2686 = vst [vmem:[%s5655_s6 + $0x3a] sm:$0x1] %v2670_v5 }
 0x83e   :  { %v2485_v35 = vmul.f32 -1.0, %v2477_v31  ;;  %v2836_v47 = vcombine.high %v2834_v63, %v2834_v63  ;;  %v2850_v37 = vrot.slane %v2834_v63, %v5393_v11  ;;  %v2857_v41 = vrot.slane %v2835_v46, %v5393_v11  ;;  %3056 = vst.sshfl [vmem:[%s5655_s6 + $0xd] sm:$0x1 pattern:$0x73625140] %v2835_v46 }
 0x83f   :  { %v2865_v52 = vcombine.high %v2843_v49, %v2843_v49  ;;  %3057 = vst.sshfl [vmem:[%s5655_s6 + $0x25] sm:$0x1 pattern:$0x73625140] %v2834_v63 }
 0x840   :  { %v2754_v51 = vcombine.high %v2485_v35, %v2485_v35  ;;  %v2761_v58 = vrot.slane %v2485_v35, %v5393_v11  ;;  %v2864_v0 = vrot.slane %v2836_v47, %v5393_v11  ;;  %v2866_v2 = vcombine.high %v2850_v37, %v2850_v37  ;;  %3058 = vst.sshfl [vmem:[%s5655_s6 + $0x2d] sm:$0x1 pattern:$0x73625140] %v2836_v47 }
 0x841   :  { %v2867_v6 = vcombine.high %v2857_v41, %v2857_v41  ;;  %2879 = vst [vmem:[%s5655_s6 + $0x15] sm:$0x1] %v2865_v52 }
 0x842   :  { %v2768_v19 = vrot.slane %v2754_v51, %v5393_v11  ;;  %v2769_v59 = vcombine.high %v2761_v58, %v2761_v58  ;;  %v2777_v27 = vrot.slane %v2761_v58, %v5393_v11  ;;  %3051 = vst.sshfl [vmem:[%s5655_s6 + $0x4] sm:$0x1 pattern:$0x73625140] %v2761_v58  ;;  %v2868_v3 = vcombine.high %v2864_v0, %v2864_v0 }
 0x843   :  { %2880 = vst [vmem:[%s5655_s6 + $0x1d] sm:$0x1] %v2867_v6  ;;  %2883 = vst [vmem:[%s5655_s6 + $0x35] sm:$0x1] %v2866_v2 }
 0x844   :  { %v2770_v48 = vcombine.high %v2768_v19, %v2768_v19  ;;  %v2784_v38 = vrot.slane %v2768_v19, %v5393_v11  ;;  %v2791_v29 = vrot.slane %v2769_v59, %v5393_v11  ;;  %v2799_v54 = vcombine.high %v2777_v27, %v2777_v27  ;;  %3052 = vst.sshfl [vmem:[%s5655_s6 + $0xc] sm:$0x1 pattern:$0x73625140] %v2769_v59 }
 0x845   :  { %3053 = vst.sshfl [vmem:[%s5655_s6 + $0x24] sm:$0x1 pattern:$0x73625140] %v2768_v19  ;;  %2884 = vst [vmem:[%s5655_s6 + $0x3d] sm:$0x1] %v2868_v3 }
 0x846   :  { %v2798_v55 = vrot.slane %v2770_v48, %v5393_v11  ;;  %v2800_v1 = vcombine.high %v2784_v38, %v2784_v38  ;;  %v2801_v36 = vcombine.high %v2791_v29, %v2791_v29  ;;  %2813 = vst [vmem:[%s5655_s6 + $0x14] sm:$0x1] %v2799_v54  ;;  %3054 = vst.sshfl [vmem:[%s5655_s6 + $0x2c] sm:$0x1 pattern:$0x73625140] %v2770_v48 }
 0x848   :  { %v2802_v33 = vcombine.high %v2798_v55, %v2798_v55  ;;  %2814 = vst [vmem:[%s5655_s6 + $0x1c] sm:$0x1] %v2801_v36  ;;  %2817 = vst [vmem:[%s5655_s6 + $0x34] sm:$0x1] %v2800_v1 }
 0x84a   :  { %2818 = vst [vmem:[%s5655_s6 + $0x3c] sm:$0x1] %v2802_v33 }
 0x8fa   :  { %v3134_v39 = vpop.f32.mrb[22].mxu0 }
 0x8fb   :  { %v2470_v4 = vadd.f32 %v3134_v39, %v5388_v53  ;;  %v2464_v12 = vpop.f32.mrb[23].mxu0 }
 0x8fc   :  { %v2465_v18 = vadd.f32 %v5388_v53, %v2464_v12 }
 0x8fd   :  { %v2480_v25 = vmax.f32 %v2470_v4, 0.0 }
 0x8fe   :  { %v2479_v26 = vmax.f32 %v2465_v18, 0.0 }
 0x8ff   :  { %v2488_v34 = vmul.f32 -1.0, %v2480_v25 }
 0x900   :  { %v2487_v42 = vmul.f32 -1.0, %v2479_v26 }
 0x901   :  { %v2952_v43 = vcombine.high %v2488_v34, %v2488_v34  ;;  %v2959_v13 = vrot.slane %v2488_v34, %v5393_v11 }
 0x902   :  { %v2886_v32 = vcombine.high %v2487_v42, %v2487_v42  ;;  %v2893_v15 = vrot.slane %v2487_v42, %v5393_v11 }
 0x903   :  { %v2966_v60 = vrot.slane %v2952_v43, %v5393_v11  ;;  %v2967_v44 = vcombine.high %v2959_v13, %v2959_v13  ;;  %v2975_v62 = vrot.slane %v2959_v13, %v5393_v11  ;;  %3063 = vst.sshfl [vmem:[%s5655_s6 + $0x7] sm:$0x1 pattern:$0x73625140] %v2959_v13 }
 0x904   :  { %v2900_v53 = vrot.slane %v2886_v32, %v5393_v11  ;;  %v2901_v23 = vcombine.high %v2893_v15, %v2893_v15  ;;  %v2909_v50 = vrot.slane %v2893_v15, %v5393_v11  ;;  %3059 = vst.sshfl [vmem:[%s5655_s6 + $0x6] sm:$0x1 pattern:$0x73625140] %v2893_v15 }
 0x905   :  { %v2968_v8 = vcombine.high %v2966_v60, %v2966_v60  ;;  %v2982_v20 = vrot.slane %v2966_v60, %v5393_v11  ;;  %v2989_v7 = vrot.slane %v2967_v44, %v5393_v11  ;;  %v2997_v28 = vcombine.high %v2975_v62, %v2975_v62  ;;  %3064 = vst.sshfl [vmem:[%s5655_s6 + $0xf] sm:$0x1 pattern:$0x73625140] %v2967_v44 }
 0x906   :  { %3065 = vst.sshfl [vmem:[%s5655_s6 + $0x27] sm:$0x1 pattern:$0x73625140] %v2966_v60  ;;  %v2902_v9 = vcombine.high %v2900_v53, %v2900_v53  ;;  %v2916_v45 = vrot.slane %v2900_v53, %v5393_v11  ;;  %v2923_v30 = vrot.slane %v2901_v23, %v5393_v11  ;;  %v2931_v16 = vcombine.high %v2909_v50, %v2909_v50 }
 0x907   :  { %3060 = vst.sshfl [vmem:[%s5655_s6 + $0xe] sm:$0x1 pattern:$0x73625140] %v2901_v23  ;;  %v2996_v61 = vrot.slane %v2968_v8, %v5393_v11  ;;  %v2998_v24 = vcombine.high %v2982_v20, %v2982_v20  ;;  %v2999_v40 = vcombine.high %v2989_v7, %v2989_v7  ;;  %3011 = vst [vmem:[%s5655_s6 + $0x17] sm:$0x1] %v2997_v28 }
 0x908   :  { %3061 = vst.sshfl [vmem:[%s5655_s6 + $0x26] sm:$0x1 pattern:$0x73625140] %v2900_v53  ;;  %v2930_v56 = vrot.slane %v2902_v9, %v5393_v11  ;;  %v2932_v57 = vcombine.high %v2916_v45, %v2916_v45  ;;  %v2933_v14 = vcombine.high %v2923_v30, %v2923_v30  ;;  %2945 = vst [vmem:[%s5655_s6 + $0x16] sm:$0x1] %v2931_v16 }
 0x909   :  { %3066 = vst.sshfl [vmem:[%s5655_s6 + $0x2f] sm:$0x1 pattern:$0x73625140] %v2968_v8  ;;  %v3000_v10 = vcombine.high %v2996_v61, %v2996_v61  ;;  %3012 = vst [vmem:[%s5655_s6 + $0x1f] sm:$0x1] %v2999_v40 }
 0x90a   :  { %3062 = vst.sshfl [vmem:[%s5655_s6 + $0x2e] sm:$0x1 pattern:$0x73625140] %v2902_v9  ;;  %3015 = vst [vmem:[%s5655_s6 + $0x37] sm:$0x1] %v2998_v24  ;;  %v2934_v11 = vcombine.high %v2930_v56, %v2930_v56 }
 0x90b   :  { %2946 = vst [vmem:[%s5655_s6 + $0x1e] sm:$0x1] %v2933_v14  ;;  %2949 = vst [vmem:[%s5655_s6 + $0x36] sm:$0x1] %v2932_v57 }
 0x90c   :  { %3016 = vst [vmem:[%s5655_s6 + $0x3f] sm:$0x1] %v3000_v10  ;;  %2950 = vst [vmem:[%s5655_s6 + $0x3e] sm:$0x1] %v2934_v11 }

</bundles_post_ra>
